<compile_context>
chip_gen: v5e
topology: v5e:2x2
jax: 0.10.0
libtpu: 0.0.40
codegen_flags: <defaults>
</compile_context>

<pallas_src>
import functools

import jax
import jax.numpy as jnp
from jax.experimental import pallas as pl
from jax.experimental.pallas import tpu as pltpu

MAX_LANE_TILE = 512              # lane (N) tile for all kernels; multiple of 128
VMEM_LIMIT = 32 * 1024 * 1024    # explicit scoped-VMEM budget, safe on v5e/v6e/v7x


def _round_up(n, m):
    return ((n + m - 1) // m) * m


def _pick_tile(n, max_tile=MAX_LANE_TILE):
    """Pick a lane tile (multiple of 128) and padded extent for a length-n lane axis."""
    npad = _round_up(n, 128)
    tile = min(max_tile, npad)
    # Keep >= 2 grid steps when possible so both v7x TensorCores get sharded work.
    if tile == npad and npad % 256 == 0:
        tile = npad // 2
    npad = _round_up(npad, tile)
    return tile, npad


def _pad_lanes(x, npad):
    n = x.shape[-1]
    if n == npad:
        return x
    widths = [(0, 0)] * (x.ndim - 1) + [(0, npad - n)]
    return jnp.pad(x, widths)


def _compiler_params():
    return pltpu.CompilerParams(dimension_semantics=("parallel",),
                                vmem_limit_bytes=VMEM_LIMIT)


# ----------------------------------------------------------------------------
# Pallas kernel 1: channels-first GEMM (+bias) — hot path of every convolution.
#   w (Cout, K) @ x (K, TN) + b -> (Cout, TN), N on lanes (lane-dense stores).
# ----------------------------------------------------------------------------
def _matmul_bias_kernel(w_ref, x_ref, b_ref, o_ref):
    acc = jnp.dot(w_ref[...], x_ref[...], preferred_element_type=jnp.float32)
    o_ref[...] = acc + b_ref[...]


def pallas_matmul_bias_cf(w, x, b):
    """w: (Cout, K), x: (K, N), b: (Cout,) -> (Cout, N) f32. bf16 MXU, f32 accumulate."""
    Cout, K = w.shape
    N = x.shape[1]
    tn, npad = _pick_tile(N)
    xb = _pad_lanes(x.astype(jnp.bfloat16), npad)
    wb = w.astype(jnp.bfloat16)
    bb = b.astype(jnp.float32).reshape(Cout, 1)
    out = pl.pallas_call(
        _matmul_bias_kernel,
        out_shape=jax.ShapeDtypeStruct((Cout, npad), jnp.float32),
        grid_spec=pltpu.PrefetchScalarGridSpec(
            num_scalar_prefetch=0,
            grid=(npad // tn,),
            in_specs=[
                pl.BlockSpec((Cout, K), lambda i: (0, 0)),
                pl.BlockSpec((K, tn), lambda i: (0, i)),
                pl.BlockSpec((Cout, 1), lambda i: (0, 0)),
            ],
            out_specs=pl.BlockSpec((Cout, tn), lambda i: (0, i)),
        ),
        compiler_params=_compiler_params(),
    )(wb, xb, bb)
    return out[:, :N]


# ----------------------------------------------------------------------------
# Pallas kernel 2: high-res dynamic filtering.
#   softmax over 27 taps + per-tap weighted accumulation + residual.
# ----------------------------------------------------------------------------
def _filter_high_kernel(dyf_ref, unf_ref, hr_ref, o_ref, *, k3):
    # dyf_ref (K3, TN) f32 logits; unf_ref (K3, C, TN) bf16 taps; hr_ref (C, TN) f32.
    logits = dyf_ref[...]
    m = jnp.max(logits, axis=0, keepdims=True)
    e = jnp.exp(logits - m)
    p = e * pl.reciprocal(jnp.sum(e, axis=0, keepdims=True), approx=True)
    acc = hr_ref[...]                                  # residual
    for k in range(k3):                                # per-tap accumulation, low vreg use
        acc = acc + unf_ref[k].astype(jnp.float32) * p[k:k + 1, :]
    o_ref[...] = acc


# ----------------------------------------------------------------------------
# Pallas kernel 3: low-res dynamic filtering — 8 sub-voxel filters per coarse voxel.
# ----------------------------------------------------------------------------
def _filter_low_kernel(alpf_ref, unf_ref, o_ref, *, k3):
    # alpf_ref (8, K3, TN) f32; unf_ref (K3, C, TN) bf16; o_ref (8, C, TN) f32.
    for i in range(8):                                 # 8 sub-voxel filters (static unroll)
        logits = alpf_ref[i]
        m = jnp.max(logits, axis=0, keepdims=True)
        e = jnp.exp(logits - m)
        p = e * pl.reciprocal(jnp.sum(e, axis=0, keepdims=True), approx=True)
        acc = jnp.zeros(o_ref.shape[1:], jnp.float32)
        for k in range(k3):
            acc = acc + unf_ref[k].astype(jnp.float32) * p[k:k + 1, :]
        o_ref[i] = acc


# ----------------------------------------------------------------------------
# Glue: unfold / im2col built DIRECTLY in the target layouts (no 27x-tensor transpose),
# stored in bf16 to halve HBM bytes on the dominant path.
# ----------------------------------------------------------------------------
def _unfold_taps_cf(x_cf, dtype=jnp.bfloat16):
    """x_cf (C, B, D, H, W) -> (27, C, B*D*H*W), tap-major (kd, kh, kw)."""
    C, B, D, H, W = x_cf.shape
    xp = jnp.pad(x_cf, ((0, 0), (0, 0), (1, 1), (1, 1), (1, 1))).astype(dtype)
    taps = []
    for kd in range(3):
        for kh in range(3):
            for kw in range(3):
                taps.append(xp[:, :, kd:kd + D, kh:kh + H, kw:kw + W]
                            .reshape(1, C, B * D * H * W))
    return jnp.concatenate(taps, axis=0)


def _im2col_cf(x_cf, dtype=jnp.bfloat16):
    """x_cf (C, B, D, H, W) -> (C*27, B*D*H*W), rows ordered (c, kd, kh, kw)."""
    C, B, D, H, W = x_cf.shape
    xp = jnp.pad(x_cf, ((0, 0), (0, 0), (1, 1), (1, 1), (1, 1))).astype(dtype)
    taps = []
    for kd in range(3):
        for kh in range(3):
            for kw in range(3):
                taps.append(xp[:, :, kd:kd + D, kh:kh + H, kw:kw + W]
                            .reshape(C, 1, B * D * H * W))
    return jnp.concatenate(taps, axis=1).reshape(C * 27, B * D * H * W)


# ----------------------------------------------------------------------------
# Convolutions routed through the channels-first Pallas GEMM.
# Internal layout is "cf": (C, B, D, H, W).
# ----------------------------------------------------------------------------
def conv3d_3x3_cf(x_cf, w, b):
    """3x3x3 conv, pad=1, stride=1. w: (Cout, Cin, 3, 3, 3), b: (Cout,)."""
    Cin, B, D, H, W = x_cf.shape
    Cout = w.shape[0]
    cols = _im2col_cf(x_cf)                                 # (Cin*27, N) bf16
    wmat = w.reshape(Cout, Cin * 27)
    out = pallas_matmul_bias_cf(wmat, cols, b)              # (Cout, N) f32
    return out.reshape(Cout, B, D, H, W)


def conv_transpose3d_2x2_s2_cf(x_cf, w, b):
    """ConvTranspose3d, kernel=stride=2 (no overlap). w: (Cin, Cout, 2, 2, 2)."""
    Cin, B, D, H, W = x_cf.shape
    Cout = w.shape[1]
    xflat = x_cf.reshape(Cin, B * D * H * W)
    wmat = jnp.transpose(w, (1, 2, 3, 4, 0)).reshape(Cout * 8, Cin)
    bvec = jnp.repeat(b, 8)
    out = pallas_matmul_bias_cf(wmat, xflat, bvec)          # (Cout*8, N) f32
    out = out.reshape(Cout, 2, 2, 2, B, D, H, W)
    out = jnp.transpose(out, (0, 4, 5, 1, 6, 2, 7, 3))      # (Cout, B, D, rd, H, rh, W, rw)
    return out.reshape(Cout, B, 2 * D, 2 * H, 2 * W)


# ----------------------------------------------------------------------------
# Dynamic filter application (Pallas hot path; glue reshapes around it).
# ----------------------------------------------------------------------------
def apply_filter_high_res_cf(hr_cf, dy_filter_cf, dy_kernel_size=3):
    C, B, D, H, W = hr_cf.shape
    K3 = dy_kernel_size ** 3
    N = B * D * H * W
    tn, npad = _pick_tile(N)
    unf = _pad_lanes(_unfold_taps_cf(hr_cf), npad)                           # (27, C, Np) bf16
    dyf = _pad_lanes(dy_filter_cf.reshape(K3, N).astype(jnp.float32), npad)  # (27, Np)
    hrf = _pad_lanes(hr_cf.reshape(C, N).astype(jnp.float32), npad)          # (C, Np)
    out = pl.pallas_call(
        functools.partial(_filter_high_kernel, k3=K3),
        out_shape=jax.ShapeDtypeStruct((C, npad), jnp.float32),
        grid_spec=pltpu.PrefetchScalarGridSpec(
            num_scalar_prefetch=0,
            grid=(npad // tn,),
            in_specs=[
                pl.BlockSpec((K3, tn), lambda i: (0, i)),
                pl.BlockSpec((K3, C, tn), lambda i: (0, 0, i)),
                pl.BlockSpec((C, tn), lambda i: (0, i)),
            ],
            out_specs=pl.BlockSpec((C, tn), lambda i: (0, i)),
        ),
        compiler_params=_compiler_params(),
    )(dyf, unf, hrf)
    return out[:, :N].reshape(C, B, D, H, W)


def apply_filter_low_res_cf(lr_cf, dy_filter_cf, dy_kernel_size=3):
    C, B, D, H, W = lr_cf.shape
    K3 = dy_kernel_size ** 3
    N = B * D * H * W
    tn, npad = _pick_tile(N)
    # pixel-unshuffle dy_filter (K3, B, 2D, 2H, 2W) -> (8, K3, N), i = rd*4 + rh*2 + rw
    fl = dy_filter_cf.reshape(K3, B, D, 2, H, 2, W, 2)
    alpfs = jnp.transpose(fl, (3, 5, 7, 0, 1, 2, 4, 6)).reshape(8, K3, N)
    alpfs = _pad_lanes(alpfs.astype(jnp.float32), npad)
    unf = _pad_lanes(_unfold_taps_cf(lr_cf), npad)                           # (27, C, Np) bf16
    filt = pl.pallas_call(
        functools.partial(_filter_low_kernel, k3=K3),
        out_shape=jax.ShapeDtypeStruct((8, C, npad), jnp.float32),
        grid_spec=pltpu.PrefetchScalarGridSpec(
            num_scalar_prefetch=0,
            grid=(npad // tn,),
            in_specs=[
                pl.BlockSpec((8, K3, tn), lambda i: (0, 0, i)),
                pl.BlockSpec((K3, C, tn), lambda i: (0, 0, i)),
            ],
            out_specs=pl.BlockSpec((8, C, tn), lambda i: (0, 0, i)),
        ),
        compiler_params=_compiler_params(),
    )(alpfs, unf)
    # pixel-shuffle: out[c, b, 2d+rd, 2h+rh, 2w+rw] = filt[(rd,rh,rw), c, (b,d,h,w)]
    filt = filt[:, :, :N].reshape(2, 2, 2, C, B, D, H, W)
    out = jnp.transpose(filt, (3, 4, 5, 0, 6, 1, 7, 2))
    return out.reshape(C, B, 2 * D, 2 * H, 2 * W)


# ----------------------------------------------------------------------------
# Small JAX glue: instance norm (no affine) + leaky relu (MONAI defaults).
# ----------------------------------------------------------------------------
def instance_norm_cf(x, eps=1e-5):
    # x: (C, B, D, H, W); normalize per (c, b) over spatial dims.
    mean = jnp.mean(x, axis=(2, 3, 4), keepdims=True)
    var = jnp.var(x, axis=(2, 3, 4), keepdims=True)
    return (x - mean) * jax.lax.rsqrt(var + eps)


def leaky_relu(x, a=0.01):
    return jnp.where(x >= 0, x, a * x)


# ----------------------------------------------------------------------------
# FilteringBlock forward
# ----------------------------------------------------------------------------
def filtering_block_forward(params, hr_feat, lr_feat):
    # Internal layout: channels-first, batch second ("cf"): (C, B, D, H, W).
    hr_cf = jnp.transpose(hr_feat, (1, 0, 2, 3, 4))
    lr_cf = jnp.transpose(lr_feat, (1, 0, 2, 3, 4))

    # init_up = UnetrUpBlock(3, lr_c, hr_c, k=3, up=2, norm='instance'):
    #   transp_conv(lr) -> cat(up, hr) -> conv3x3 -> IN -> lrelu -> conv3x3 -> IN -> lrelu
    up = conv_transpose3d_2x2_s2_cf(lr_cf, params["up_w"], params["up_b"])
    x = jnp.concatenate([up, hr_cf], axis=0)
    x = conv3d_3x3_cf(x, params["conv1_w"], params["conv1_b"])
    x = leaky_relu(instance_norm_cf(x))
    x = conv3d_3x3_cf(x, params["conv2_w"], params["conv2_b"])
    feat_fused = leaky_relu(instance_norm_cf(x))

    # filter_low_mapping + filter_high_mapping fused: shared im2col, one GEMM, split after.
    w_cat = jnp.concatenate([params["flow_w"], params["fhigh_w"]], axis=0)
    b_cat = jnp.concatenate([params["flow_b"], params["fhigh_b"]], axis=0)
    filters = conv3d_3x3_cf(feat_fused, w_cat, b_cat)       # (54, B, 2D, 2H, 2W)
    k3 = params["flow_w"].shape[0]
    filter_low, filter_high = filters[:k3], filters[k3:]

    lr_refined = apply_filter_low_res_cf(lr_cf, filter_low, 3)
    hr_refined = apply_filter_high_res_cf(hr_cf, filter_high, 3)
    return (jnp.transpose(lr_refined, (1, 0, 2, 3, 4)),
            jnp.transpose(hr_refined, (1, 0, 2, 3, 4)))


# ----------------------------------------------------------------------------
# Deterministic synthetic parameter init (he_leaky / kaiming fan_out, bias = 0)
# ----------------------------------------------------------------------------
def kaiming_fan_out(key, shape, fan_out, a=0.01):
    gain = (2.0 / (1.0 + a * a)) ** 0.5
    std = gain / (fan_out ** 0.5)
    return std * jax.random.normal(key, shape, dtype=jnp.float32)


if __name__ == "__main__":
    B = 1
    hr_c, lr_c = 8, 8
    D = H = W = 4                      # lr spatial; hr is 2x

    key = jax.random.PRNGKey(0)
    keys = jax.random.split(key, 8)
    hr_feat = jax.random.normal(keys[0], (B, hr_c, 2 * D, 2 * H, 2 * W), jnp.float32)
    lr_feat = jax.random.normal(keys[1], (B, lr_c, D, H, W), jnp.float32)

    params = {
        # UnetrUpBlock transposed conv (Cin, Cout, 2, 2, 2), bias=False in MONAI -> zeros
        "up_w": kaiming_fan_out(keys[2], (lr_c, hr_c, 2, 2, 2), hr_c * 8),
        "up_b": jnp.zeros((hr_c,), jnp.float32),
        # UnetBasicBlock convs (bias=False in MONAI -> zeros)
        "conv1_w": kaiming_fan_out(keys[3], (hr_c, 2 * hr_c, 3, 3, 3), hr_c * 27),
        "conv1_b": jnp.zeros((hr_c,), jnp.float32),
        "conv2_w": kaiming_fan_out(keys[4], (hr_c, hr_c, 3, 3, 3), hr_c * 27),
        "conv2_b": jnp.zeros((hr_c,), jnp.float32),
        # filter_low_mapping / filter_high_mapping: Conv3d(hr_c -> 27, k=3), bias init 0
        "flow_w": kaiming_fan_out(keys[5], (27, hr_c, 3, 3, 3), 27 * 27),
        "flow_b": jnp.zeros((27,), jnp.float32),
        "fhigh_w": kaiming_fan_out(keys[6], (27, hr_c, 3, 3, 3), 27 * 27),
        "fhigh_b": jnp.zeros((27,), jnp.float32),
    }

    fwd = jax.jit(filtering_block_forward)
    lr_refined, hr_refined = fwd(params, hr_feat, lr_feat)
    jax.block_until_ready((lr_refined, hr_refined))

    assert lr_refined.shape == (B, lr_c, 2 * D, 2 * H, 2 * W), lr_refined.shape
    assert hr_refined.shape == (B, hr_c, 2 * D, 2 * H, 2 * W), hr_refined.shape
    assert lr_refined.dtype == jnp.float32 and hr_refined.dtype == jnp.float32
    assert bool(jnp.all(jnp.isfinite(lr_refined))) and bool(jnp.all(jnp.isfinite(hr_refined)))

    print("KERNEL_OK")
</pallas_src>

<mosaic_0001>
module attributes {stable_mosaic.version = 11 : i64} {
  func.func @_matmul_bias_kernel(%arg0: i32, %arg1: memref<64x8xbf16, #tpu.memory_space<vmem>>, %arg2: memref<8x128xbf16, #tpu.memory_space<vmem>>, %arg3: memref<64x1xf32, #tpu.memory_space<vmem>>, %arg4: memref<64x128xf32, #tpu.memory_space<vmem>>) attributes {dimension_semantics = [#tpu.dimension_semantics<parallel>], iteration_bounds = array<i64: 1>, scalar_prefetch = 0 : i64, scratch_operands = 0 : i64, tpu.core_type = #tpu.core_type<tc>, window_params = [{pipeline_mode = #tpu.pipeline_mode<synchronous>, transform_indices = @transform_0, window_bounds = array<i64: 64, 8>}, {transform_indices = @transform_1, window_bounds = array<i64: 8, 128>}, {pipeline_mode = #tpu.pipeline_mode<synchronous>, transform_indices = @transform_2, window_bounds = array<i64: 64, 1>}, {transform_indices = @transform_3, window_bounds = array<i64: 64, 128>}]} {
    %c0 = arith.constant 0 : index
    %c0_0 = arith.constant 0 : index
    %0 = vector.load %arg1[%c0, %c0_0] : memref<64x8xbf16, #tpu.memory_space<vmem>>, vector<64x8xbf16>
    %c0_1 = arith.constant 0 : index
    %c0_2 = arith.constant 0 : index
    %1 = vector.load %arg2[%c0_1, %c0_2] : memref<8x128xbf16, #tpu.memory_space<vmem>>, vector<8x128xbf16>
    %cst = arith.constant dense<0.000000e+00> : vector<64x128xf32>
    %2 = tpu.matmul %0, %1, %cst {dimension_numbers = #tpu.dot_dimension_numbers<[1], [0], [0], [1], [0, 0, 1, 1], [], []>} : vector<64x8xbf16>, vector<8x128xbf16>, vector<64x128xf32> -> vector<64x128xf32>
    %c0_3 = arith.constant 0 : index
    %c0_4 = arith.constant 0 : index
    %3 = vector.load %arg3[%c0_3, %c0_4] : memref<64x1xf32, #tpu.memory_space<vmem>>, vector<64x1xf32>
    %4 = vector.broadcast %3 : vector<64x1xf32> to vector<64x128xf32>
    %5 = arith.addf %2, %4 : vector<64x128xf32>
    %c0_5 = arith.constant 0 : index
    %c0_6 = arith.constant 0 : index
    %6 = vector.load %arg4[%c0_5, %c0_6] : memref<64x128xf32, #tpu.memory_space<vmem>>, vector<64x128xf32>
    tpu.vector_store %arg4[%c0_5, %c0_6], %5 {strides = array<i32>} : memref<64x128xf32, #tpu.memory_space<vmem>>, vector<64x128xf32>,
    return
  }
  func.func @transform_0(%arg0: i32) -> (i32, i32) {
    %c0_i32 = arith.constant 0 : i32
    %c0_i32_0 = arith.constant 0 : i32
    %c0_i32_1 = arith.constant 0 : i32
    return %c0_i32, %c0_i32_0 : i32, i32
  }
  func.func @transform_1(%arg0: i32) -> (i32, i32) {
    %c0_i32 = arith.constant 0 : i32
    %c0_i32_0 = arith.constant 0 : i32
    return %c0_i32, %arg0 : i32, i32
  }
  func.func @transform_2(%arg0: i32) -> (i32, i32) {
    %c0_i32 = arith.constant 0 : i32
    %c0_i32_0 = arith.constant 0 : i32
    %c0_i32_1 = arith.constant 0 : i32
    return %c0_i32, %c0_i32_0 : i32, i32
  }
  func.func @transform_3(%arg0: i32) -> (i32, i32) {
    %c0_i32 = arith.constant 0 : i32
    %c0_i32_0 = arith.constant 0 : i32
    return %c0_i32, %arg0 : i32, i32
  }
}

module attributes {stable_mosaic.version = 11 : i64} {
  func.func @_matmul_bias_kernel(%arg0: i32, %arg1: memref<8x432xbf16, #tpu.memory_space<vmem>>, %arg2: memref<432x256xbf16, #tpu.memory_space<vmem>>, %arg3: memref<8x1xf32, #tpu.memory_space<vmem>>, %arg4: memref<8x256xf32, #tpu.memory_space<vmem>>) attributes {dimension_semantics = [#tpu.dimension_semantics<parallel>], iteration_bounds = array<i64: 2>, scalar_prefetch = 0 : i64, scratch_operands = 0 : i64, tpu.core_type = #tpu.core_type<tc>, window_params = [{pipeline_mode = #tpu.pipeline_mode<synchronous>, transform_indices = @transform_0, window_bounds = array<i64: 8, 432>}, {transform_indices = @transform_1, window_bounds = array<i64: 432, 256>}, {pipeline_mode = #tpu.pipeline_mode<synchronous>, transform_indices = @transform_2, window_bounds = array<i64: 8, 1>}, {transform_indices = @transform_3, window_bounds = array<i64: 8, 256>}]} {
    %c0 = arith.constant 0 : index
    %c0_0 = arith.constant 0 : index
    %0 = vector.load %arg1[%c0, %c0_0] : memref<8x432xbf16, #tpu.memory_space<vmem>>, vector<8x432xbf16>
    %c0_1 = arith.constant 0 : index
    %c0_2 = arith.constant 0 : index
    %1 = vector.load %arg2[%c0_1, %c0_2] : memref<432x256xbf16, #tpu.memory_space<vmem>>, vector<432x256xbf16>
    %cst = arith.constant dense<0.000000e+00> : vector<8x256xf32>
    %2 = tpu.matmul %0, %1, %cst {dimension_numbers = #tpu.dot_dimension_numbers<[1], [0], [0], [1], [0, 0, 1, 1], [], []>} : vector<8x432xbf16>, vector<432x256xbf16>, vector<8x256xf32> -> vector<8x256xf32>
    %c0_3 = arith.constant 0 : index
    %c0_4 = arith.constant 0 : index
    %3 = vector.load %arg3[%c0_3, %c0_4] : memref<8x1xf32, #tpu.memory_space<vmem>>, vector<8x1xf32>
    %4 = vector.broadcast %3 : vector<8x1xf32> to vector<8x256xf32>
    %5 = arith.addf %2, %4 : vector<8x256xf32>
    %c0_5 = arith.constant 0 : index
    %c0_6 = arith.constant 0 : index
    %6 = vector.load %arg4[%c0_5, %c0_6] : memref<8x256xf32, #tpu.memory_space<vmem>>, vector<8x256xf32>
    tpu.vector_store %arg4[%c0_5, %c0_6], %5 {strides = array<i32>} : memref<8x256xf32, #tpu.memory_space<vmem>>, vector<8x256xf32>,
    return
  }
  func.func @transform_0(%arg0: i32) -> (i32, i32) {
    %c0_i32 = arith.constant 0 : i32
    %c0_i32_0 = arith.constant 0 : i32
    %c0_i32_1 = arith.constant 0 : i32
    return %c0_i32, %c0_i32_0 : i32, i32
  }
  func.func @transform_1(%arg0: i32) -> (i32, i32) {
    %c0_i32 = arith.constant 0 : i32
    %c0_i32_0 = arith.constant 0 : i32
    return %c0_i32, %arg0 : i32, i32
  }
  func.func @transform_2(%arg0: i32) -> (i32, i32) {
    %c0_i32 = arith.constant 0 : i32
    %c0_i32_0 = arith.constant 0 : i32
    %c0_i32_1 = arith.constant 0 : i32
    return %c0_i32, %c0_i32_0 : i32, i32
  }
  func.func @transform_3(%arg0: i32) -> (i32, i32) {
    %c0_i32 = arith.constant 0 : i32
    %c0_i32_0 = arith.constant 0 : i32
    return %c0_i32, %arg0 : i32, i32
  }
}

module attributes {stable_mosaic.version = 11 : i64} {
  func.func @_matmul_bias_kernel(%arg0: i32, %arg1: memref<8x216xbf16, #tpu.memory_space<vmem>>, %arg2: memref<216x256xbf16, #tpu.memory_space<vmem>>, %arg3: memref<8x1xf32, #tpu.memory_space<vmem>>, %arg4: memref<8x256xf32, #tpu.memory_space<vmem>>) attributes {dimension_semantics = [#tpu.dimension_semantics<parallel>], iteration_bounds = array<i64: 2>, scalar_prefetch = 0 : i64, scratch_operands = 0 : i64, tpu.core_type = #tpu.core_type<tc>, window_params = [{pipeline_mode = #tpu.pipeline_mode<synchronous>, transform_indices = @transform_0, window_bounds = array<i64: 8, 216>}, {transform_indices = @transform_1, window_bounds = array<i64: 216, 256>}, {pipeline_mode = #tpu.pipeline_mode<synchronous>, transform_indices = @transform_2, window_bounds = array<i64: 8, 1>}, {transform_indices = @transform_3, window_bounds = array<i64: 8, 256>}]} {
    %c0 = arith.constant 0 : index
    %c0_0 = arith.constant 0 : index
    %0 = vector.load %arg1[%c0, %c0_0] : memref<8x216xbf16, #tpu.memory_space<vmem>>, vector<8x216xbf16>
    %c0_1 = arith.constant 0 : index
    %c0_2 = arith.constant 0 : index
    %1 = vector.load %arg2[%c0_1, %c0_2] : memref<216x256xbf16, #tpu.memory_space<vmem>>, vector<216x256xbf16>
    %cst = arith.constant dense<0.000000e+00> : vector<8x256xf32>
    %2 = tpu.matmul %0, %1, %cst {dimension_numbers = #tpu.dot_dimension_numbers<[1], [0], [0], [1], [0, 0, 1, 1], [], []>} : vector<8x216xbf16>, vector<216x256xbf16>, vector<8x256xf32> -> vector<8x256xf32>
    %c0_3 = arith.constant 0 : index
    %c0_4 = arith.constant 0 : index
    %3 = vector.load %arg3[%c0_3, %c0_4] : memref<8x1xf32, #tpu.memory_space<vmem>>, vector<8x1xf32>
    %4 = vector.broadcast %3 : vector<8x1xf32> to vector<8x256xf32>
    %5 = arith.addf %2, %4 : vector<8x256xf32>
    %c0_5 = arith.constant 0 : index
    %c0_6 = arith.constant 0 : index
    %6 = vector.load %arg4[%c0_5, %c0_6] : memref<8x256xf32, #tpu.memory_space<vmem>>, vector<8x256xf32>
    tpu.vector_store %arg4[%c0_5, %c0_6], %5 {strides = array<i32>} : memref<8x256xf32, #tpu.memory_space<vmem>>, vector<8x256xf32>,
    return
  }
  func.func @transform_0(%arg0: i32) -> (i32, i32) {
    %c0_i32 = arith.constant 0 : i32
    %c0_i32_0 = arith.constant 0 : i32
    %c0_i32_1 = arith.constant 0 : i32
    return %c0_i32, %c0_i32_0 : i32, i32
  }
  func.func @transform_1(%arg0: i32) -> (i32, i32) {
    %c0_i32 = arith.constant 0 : i32
    %c0_i32_0 = arith.constant 0 : i32
    return %c0_i32, %arg0 : i32, i32
  }
  func.func @transform_2(%arg0: i32) -> (i32, i32) {
    %c0_i32 = arith.constant 0 : i32
    %c0_i32_0 = arith.constant 0 : i32
    %c0_i32_1 = arith.constant 0 : i32
    return %c0_i32, %c0_i32_0 : i32, i32
  }
  func.func @transform_3(%arg0: i32) -> (i32, i32) {
    %c0_i32 = arith.constant 0 : i32
    %c0_i32_0 = arith.constant 0 : i32
    return %c0_i32, %arg0 : i32, i32
  }
}

module attributes {stable_mosaic.version = 11 : i64} {
  func.func @_matmul_bias_kernel(%arg0: i32, %arg1: memref<54x216xbf16, #tpu.memory_space<vmem>>, %arg2: memref<216x256xbf16, #tpu.memory_space<vmem>>, %arg3: memref<54x1xf32, #tpu.memory_space<vmem>>, %arg4: memref<54x256xf32, #tpu.memory_space<vmem>>) attributes {dimension_semantics = [#tpu.dimension_semantics<parallel>], iteration_bounds = array<i64: 2>, scalar_prefetch = 0 : i64, scratch_operands = 0 : i64, tpu.core_type = #tpu.core_type<tc>, window_params = [{pipeline_mode = #tpu.pipeline_mode<synchronous>, transform_indices = @transform_0, window_bounds = array<i64: 54, 216>}, {transform_indices = @transform_1, window_bounds = array<i64: 216, 256>}, {pipeline_mode = #tpu.pipeline_mode<synchronous>, transform_indices = @transform_2, window_bounds = array<i64: 54, 1>}, {transform_indices = @transform_3, window_bounds = array<i64: 54, 256>}]} {
    %c0 = arith.constant 0 : index
    %c0_0 = arith.constant 0 : index
    %0 = vector.load %arg1[%c0, %c0_0] : memref<54x216xbf16, #tpu.memory_space<vmem>>, vector<54x216xbf16>
    %c0_1 = arith.constant 0 : index
    %c0_2 = arith.constant 0 : index
    %1 = vector.load %arg2[%c0_1, %c0_2] : memref<216x256xbf16, #tpu.memory_space<vmem>>, vector<216x256xbf16>
    %cst = arith.constant dense<0.000000e+00> : vector<54x256xf32>
    %2 = tpu.matmul %0, %1, %cst {dimension_numbers = #tpu.dot_dimension_numbers<[1], [0], [0], [1], [0, 0, 1, 1], [], []>} : vector<54x216xbf16>, vector<216x256xbf16>, vector<54x256xf32> -> vector<54x256xf32>
    %c0_3 = arith.constant 0 : index
    %c0_4 = arith.constant 0 : index
    %3 = vector.load %arg3[%c0_3, %c0_4] : memref<54x1xf32, #tpu.memory_space<vmem>>, vector<54x1xf32>
    %4 = vector.broadcast %3 : vector<54x1xf32> to vector<54x256xf32>
    %5 = arith.addf %2, %4 : vector<54x256xf32>
    %c0_5 = arith.constant 0 : index
    %c0_6 = arith.constant 0 : index
    %6 = vector.load %arg4[%c0_5, %c0_6] : memref<54x256xf32, #tpu.memory_space<vmem>>, vector<54x256xf32>
    tpu.vector_store %arg4[%c0_5, %c0_6], %5 {strides = array<i32>} : memref<54x256xf32, #tpu.memory_space<vmem>>, vector<54x256xf32>,
    return
  }
  func.func @transform_0(%arg0: i32) -> (i32, i32) {
    %c0_i32 = arith.constant 0 : i32
    %c0_i32_0 = arith.constant 0 : i32
    %c0_i32_1 = arith.constant 0 : i32
    return %c0_i32, %c0_i32_0 : i32, i32
  }
  func.func @transform_1(%arg0: i32) -> (i32, i32) {
    %c0_i32 = arith.constant 0 : i32
    %c0_i32_0 = arith.constant 0 : i32
    return %c0_i32, %arg0 : i32, i32
  }
  func.func @transform_2(%arg0: i32) -> (i32, i32) {
    %c0_i32 = arith.constant 0 : i32
    %c0_i32_0 = arith.constant 0 : i32
    %c0_i32_1 = arith.constant 0 : i32
    return %c0_i32, %c0_i32_0 : i32, i32
  }
  func.func @transform_3(%arg0: i32) -> (i32, i32) {
    %c0_i32 = arith.constant 0 : i32
    %c0_i32_0 = arith.constant 0 : i32
    return %c0_i32, %arg0 : i32, i32
  }
}

module attributes {stable_mosaic.version = 11 : i64} {
  func.func @_filter_high_kernel(%arg0: i32, %arg1: memref<27x256xf32, #tpu.memory_space<vmem>>, %arg2: memref<27x8x256xbf16, #tpu.memory_space<vmem>>, %arg3: memref<8x256xf32, #tpu.memory_space<vmem>>, %arg4: memref<8x256xf32, #tpu.memory_space<vmem>>) attributes {dimension_semantics = [#tpu.dimension_semantics<parallel>], iteration_bounds = array<i64: 2>, scalar_prefetch = 0 : i64, scratch_operands = 0 : i64, tpu.core_type = #tpu.core_type<tc>, window_params = [{transform_indices = @transform_0, window_bounds = array<i64: 27, 256>}, {transform_indices = @transform_1, window_bounds = array<i64: 27, 8, 256>}, {transform_indices = @transform_2, window_bounds = array<i64: 8, 256>}, {transform_indices = @transform_3, window_bounds = array<i64: 8, 256>}]} {
    %c0 = arith.constant 0 : index
    %c0_0 = arith.constant 0 : index
    %0 = vector.load %arg1[%c0, %c0_0] : memref<27x256xf32, #tpu.memory_space<vmem>>, vector<27x256xf32>
    %cst = arith.constant dense<0xFF800000> : vector<256xf32>
    %1 = vector.multi_reduction <maximumf>, %0, %cst [0] : vector<27x256xf32> to vector<256xf32>
    %2 = vector.shape_cast %1 : vector<256xf32> to vector<1x256xf32>
    %3 = vector.broadcast %2 : vector<1x256xf32> to vector<27x256xf32>
    %4 = arith.subf %0, %3 : vector<27x256xf32>
    %5 = math.exp %4 : vector<27x256xf32>
    %cst_1 = arith.constant dense<0.000000e+00> : vector<256xf32>
    %6 = vector.multi_reduction <add>, %5, %cst_1 [0] : vector<27x256xf32> to vector<256xf32>
    %7 = vector.shape_cast %6 : vector<256xf32> to vector<1x256xf32>
    %8 = tpu.reciprocal %7 {approx = true} : vector<1x256xf32> -> vector<1x256xf32>
    %9 = vector.broadcast %8 : vector<1x256xf32> to vector<27x256xf32>
    %10 = arith.mulf %5, %9 : vector<27x256xf32>
    %c0_2 = arith.constant 0 : index
    %c0_3 = arith.constant 0 : index
    %11 = vector.load %arg3[%c0_2, %c0_3] : memref<8x256xf32, #tpu.memory_space<vmem>>, vector<8x256xf32>
    %c0_4 = arith.constant 0 : index
    %c0_5 = arith.constant 0 : index
    %c0_6 = arith.constant 0 : index
    %12 = vector.load %arg2[%c0_4, %c0_5, %c0_6] : memref<27x8x256xbf16, #tpu.memory_space<vmem>>, vector<1x8x256xbf16>
    %13 = vector.shape_cast %12 : vector<1x8x256xbf16> to vector<8x256xbf16>
    %14 = arith.extf %13 : vector<8x256xbf16> to vector<8x256xf32>
    %15 = vector.extract_strided_slice %10 {offsets = [0, 0], sizes = [1, 256], strides = [1, 1]} : vector<27x256xf32> to vector<1x256xf32>
    %16 = vector.broadcast %15 : vector<1x256xf32> to vector<8x256xf32>
    %17 = arith.mulf %14, %16 : vector<8x256xf32>
    %18 = arith.addf %11, %17 : vector<8x256xf32>
    %c1 = arith.constant 1 : index
    %c0_7 = arith.constant 0 : index
    %c0_8 = arith.constant 0 : index
    %19 = vector.load %arg2[%c1, %c0_7, %c0_8] : memref<27x8x256xbf16, #tpu.memory_space<vmem>>, vector<1x8x256xbf16>
    %20 = vector.shape_cast %19 : vector<1x8x256xbf16> to vector<8x256xbf16>
    %21 = arith.extf %20 : vector<8x256xbf16> to vector<8x256xf32>
    %22 = vector.extract_strided_slice %10 {offsets = [1, 0], sizes = [1, 256], strides = [1, 1]} : vector<27x256xf32> to vector<1x256xf32>
    %23 = vector.broadcast %22 : vector<1x256xf32> to vector<8x256xf32>
    %24 = arith.mulf %21, %23 : vector<8x256xf32>
    %25 = arith.addf %18, %24 : vector<8x256xf32>
    %c2 = arith.constant 2 : index
    %c0_9 = arith.constant 0 : index
    %c0_10 = arith.constant 0 : index
    %26 = vector.load %arg2[%c2, %c0_9, %c0_10] : memref<27x8x256xbf16, #tpu.memory_space<vmem>>, vector<1x8x256xbf16>
    %27 = vector.shape_cast %26 : vector<1x8x256xbf16> to vector<8x256xbf16>
    %28 = arith.extf %27 : vector<8x256xbf16> to vector<8x256xf32>
    %29 = vector.extract_strided_slice %10 {offsets = [2, 0], sizes = [1, 256], strides = [1, 1]} : vector<27x256xf32> to vector<1x256xf32>
    %30 = vector.broadcast %29 : vector<1x256xf32> to vector<8x256xf32>
    %31 = arith.mulf %28, %30 : vector<8x256xf32>
    %32 = arith.addf %25, %31 : vector<8x256xf32>
    %c3 = arith.constant 3 : index
    %c0_11 = arith.constant 0 : index
    %c0_12 = arith.constant 0 : index
    %33 = vector.load %arg2[%c3, %c0_11, %c0_12] : memref<27x8x256xbf16, #tpu.memory_space<vmem>>, vector<1x8x256xbf16>
    %34 = vector.shape_cast %33 : vector<1x8x256xbf16> to vector<8x256xbf16>
    %35 = arith.extf %34 : vector<8x256xbf16> to vector<8x256xf32>
    %36 = vector.extract_strided_slice %10 {offsets = [3, 0], sizes = [1, 256], strides = [1, 1]} : vector<27x256xf32> to vector<1x256xf32>
    %37 = vector.broadcast %36 : vector<1x256xf32> to vector<8x256xf32>
    %38 = arith.mulf %35, %37 : vector<8x256xf32>
    %39 = arith.addf %32, %38 : vector<8x256xf32>
    %c4 = arith.constant 4 : index
    %c0_13 = arith.constant 0 : index
    %c0_14 = arith.constant 0 : index
    %40 = vector.load %arg2[%c4, %c0_13, %c0_14] : memref<27x8x256xbf16, #tpu.memory_space<vmem>>, vector<1x8x256xbf16>
    %41 = vector.shape_cast %40 : vector<1x8x256xbf16> to vector<8x256xbf16>
    %42 = arith.extf %41 : vector<8x256xbf16> to vector<8x256xf32>
    %43 = vector.extract_strided_slice %10 {offsets = [4, 0], sizes = [1, 256], strides = [1, 1]} : vector<27x256xf32> to vector<1x256xf32>
    %44 = vector.broadcast %43 : vector<1x256xf32> to vector<8x256xf32>
    %45 = arith.mulf %42, %44 : vector<8x256xf32>
    %46 = arith.addf %39, %45 : vector<8x256xf32>
    %c5 = arith.constant 5 : index
    %c0_15 = arith.constant 0 : index
    %c0_16 = arith.constant 0 : index
    %47 = vector.load %arg2[%c5, %c0_15, %c0_16] : memref<27x8x256xbf16, #tpu.memory_space<vmem>>, vector<1x8x256xbf16>
    %48 = vector.shape_cast %47 : vector<1x8x256xbf16> to vector<8x256xbf16>
    %49 = arith.extf %48 : vector<8x256xbf16> to vector<8x256xf32>
    %50 = vector.extract_strided_slice %10 {offsets = [5, 0], sizes = [1, 256], strides = [1, 1]} : vector<27x256xf32> to vector<1x256xf32>
    %51 = vector.broadcast %50 : vector<1x256xf32> to vector<8x256xf32>
    %52 = arith.mulf %49, %51 : vector<8x256xf32>
    %53 = arith.addf %46, %52 : vector<8x256xf32>
    %c6 = arith.constant 6 : index
    %c0_17 = arith.constant 0 : index
    %c0_18 = arith.constant 0 : index
    %54 = vector.load %arg2[%c6, %c0_17, %c0_18] : memref<27x8x256xbf16, #tpu.memory_space<vmem>>, vector<1x8x256xbf16>
    %55 = vector.shape_cast %54 : vector<1x8x256xbf16> to vector<8x256xbf16>
    %56 = arith.extf %55 : vector<8x256xbf16> to vector<8x256xf32>
    %57 = vector.extract_strided_slice %10 {offsets = [6, 0], sizes = [1, 256], strides = [1, 1]} : vector<27x256xf32> to vector<1x256xf32>
    %58 = vector.broadcast %57 : vector<1x256xf32> to vector<8x256xf32>
    %59 = arith.mulf %56, %58 : vector<8x256xf32>
    %60 = arith.addf %53, %59 : vector<8x256xf32>
    %c7 = arith.constant 7 : index
    %c0_19 = arith.constant 0 : index
    %c0_20 = arith.constant 0 : index
    %61 = vector.load %arg2[%c7, %c0_19, %c0_20] : memref<27x8x256xbf16, #tpu.memory_space<vmem>>, vector<1x8x256xbf16>
    %62 = vector.shape_cast %61 : vector<1x8x256xbf16> to vector<8x256xbf16>
    %63 = arith.extf %62 : vector<8x256xbf16> to vector<8x256xf32>
    %64 = vector.extract_strided_slice %10 {offsets = [7, 0], sizes = [1, 256], strides = [1, 1]} : vector<27x256xf32> to vector<1x256xf32>
    %65 = vector.broadcast %64 : vector<1x256xf32> to vector<8x256xf32>
    %66 = arith.mulf %63, %65 : vector<8x256xf32>
    %67 = arith.addf %60, %66 : vector<8x256xf32>
    %c8 = arith.constant 8 : index
    %c0_21 = arith.constant 0 : index
    %c0_22 = arith.constant 0 : index
    %68 = vector.load %arg2[%c8, %c0_21, %c0_22] : memref<27x8x256xbf16, #tpu.memory_space<vmem>>, vector<1x8x256xbf16>
    %69 = vector.shape_cast %68 : vector<1x8x256xbf16> to vector<8x256xbf16>
    %70 = arith.extf %69 : vector<8x256xbf16> to vector<8x256xf32>
    %71 = vector.extract_strided_slice %10 {offsets = [8, 0], sizes = [1, 256], strides = [1, 1]} : vector<27x256xf32> to vector<1x256xf32>
    %72 = vector.broadcast %71 : vector<1x256xf32> to vector<8x256xf32>
    %73 = arith.mulf %70, %72 : vector<8x256xf32>
    %74 = arith.addf %67, %73 : vector<8x256xf32>
    %c9 = arith.constant 9 : index
    %c0_23 = arith.constant 0 : index
    %c0_24 = arith.constant 0 : index
    %75 = vector.load %arg2[%c9, %c0_23, %c0_24] : memref<27x8x256xbf16, #tpu.memory_space<vmem>>, vector<1x8x256xbf16>
    %76 = vector.shape_cast %75 : vector<1x8x256xbf16> to vector<8x256xbf16>
    %77 = arith.extf %76 : vector<8x256xbf16> to vector<8x256xf32>
    %78 = vector.extract_strided_slice %10 {offsets = [9, 0], sizes = [1, 256], strides = [1, 1]} : vector<27x256xf32> to vector<1x256xf32>
    %79 = vector.broadcast %78 : vector<1x256xf32> to vector<8x256xf32>
    %80 = arith.mulf %77, %79 : vector<8x256xf32>
    %81 = arith.addf %74, %80 : vector<8x256xf32>
    %c10 = arith.constant 10 : index
    %c0_25 = arith.constant 0 : index
    %c0_26 = arith.constant 0 : index
    %82 = vector.load %arg2[%c10, %c0_25, %c0_26] : memref<27x8x256xbf16, #tpu.memory_space<vmem>>, vector<1x8x256xbf16>
    %83 = vector.shape_cast %82 : vector<1x8x256xbf16> to vector<8x256xbf16>
    %84 = arith.extf %83 : vector<8x256xbf16> to vector<8x256xf32>
    %85 = vector.extract_strided_slice %10 {offsets = [10, 0], sizes = [1, 256], strides = [1, 1]} : vector<27x256xf32> to vector<1x256xf32>
    %86 = vector.broadcast %85 : vector<1x256xf32> to vector<8x256xf32>
    %87 = arith.mulf %84, %86 : vector<8x256xf32>
    %88 = arith.addf %81, %87 : vector<8x256xf32>
    %c11 = arith.constant 11 : index
    %c0_27 = arith.constant 0 : index
    %c0_28 = arith.constant 0 : index
    %89 = vector.load %arg2[%c11, %c0_27, %c0_28] : memref<27x8x256xbf16, #tpu.memory_space<vmem>>, vector<1x8x256xbf16>
    %90 = vector.shape_cast %89 : vector<1x8x256xbf16> to vector<8x256xbf16>
    %91 = arith.extf %90 : vector<8x256xbf16> to vector<8x256xf32>
    %92 = vector.extract_strided_slice %10 {offsets = [11, 0], sizes = [1, 256], strides = [1, 1]} : vector<27x256xf32> to vector<1x256xf32>
    %93 = vector.broadcast %92 : vector<1x256xf32> to vector<8x256xf32>
    %94 = arith.mulf %91, %93 : vector<8x256xf32>
    %95 = arith.addf %88, %94 : vector<8x256xf32>
    %c12 = arith.constant 12 : index
    %c0_29 = arith.constant 0 : index
    %c0_30 = arith.constant 0 : index
    %96 = vector.load %arg2[%c12, %c0_29, %c0_30] : memref<27x8x256xbf16, #tpu.memory_space<vmem>>, vector<1x8x256xbf16>
    %97 = vector.shape_cast %96 : vector<1x8x256xbf16> to vector<8x256xbf16>
    %98 = arith.extf %97 : vector<8x256xbf16> to vector<8x256xf32>
    %99 = vector.extract_strided_slice %10 {offsets = [12, 0], sizes = [1, 256], strides = [1, 1]} : vector<27x256xf32> to vector<1x256xf32>
    %100 = vector.broadcast %99 : vector<1x256xf32> to vector<8x256xf32>
    %101 = arith.mulf %98, %100 : vector<8x256xf32>
    %102 = arith.addf %95, %101 : vector<8x256xf32>
    %c13 = arith.constant 13 : index
    %c0_31 = arith.constant 0 : index
    %c0_32 = arith.constant 0 : index
    %103 = vector.load %arg2[%c13, %c0_31, %c0_32] : memref<27x8x256xbf16, #tpu.memory_space<vmem>>, vector<1x8x256xbf16>
    %104 = vector.shape_cast %103 : vector<1x8x256xbf16> to vector<8x256xbf16>
    %105 = arith.extf %104 : vector<8x256xbf16> to vector<8x256xf32>
    %106 = vector.extract_strided_slice %10 {offsets = [13, 0], sizes = [1, 256], strides = [1, 1]} : vector<27x256xf32> to vector<1x256xf32>
    %107 = vector.broadcast %106 : vector<1x256xf32> to vector<8x256xf32>
    %108 = arith.mulf %105, %107 : vector<8x256xf32>
    %109 = arith.addf %102, %108 : vector<8x256xf32>
    %c14 = arith.constant 14 : index
    %c0_33 = arith.constant 0 : index
    %c0_34 = arith.constant 0 : index
    %110 = vector.load %arg2[%c14, %c0_33, %c0_34] : memref<27x8x256xbf16, #tpu.memory_space<vmem>>, vector<1x8x256xbf16>
    %111 = vector.shape_cast %110 : vector<1x8x256xbf16> to vector<8x256xbf16>
    %112 = arith.extf %111 : vector<8x256xbf16> to vector<8x256xf32>
    %113 = vector.extract_strided_slice %10 {offsets = [14, 0], sizes = [1, 256], strides = [1, 1]} : vector<27x256xf32> to vector<1x256xf32>
    %114 = vector.broadcast %113 : vector<1x256xf32> to vector<8x256xf32>
    %115 = arith.mulf %112, %114 : vector<8x256xf32>
    %116 = arith.addf %109, %115 : vector<8x256xf32>
    %c15 = arith.constant 15 : index
    %c0_35 = arith.constant 0 : index
    %c0_36 = arith.constant 0 : index
    %117 = vector.load %arg2[%c15, %c0_35, %c0_36] : memref<27x8x256xbf16, #tpu.memory_space<vmem>>, vector<1x8x256xbf16>
    %118 = vector.shape_cast %117 : vector<1x8x256xbf16> to vector<8x256xbf16>
    %119 = arith.extf %118 : vector<8x256xbf16> to vector<8x256xf32>
    %120 = vector.extract_strided_slice %10 {offsets = [15, 0], sizes = [1, 256], strides = [1, 1]} : vector<27x256xf32> to vector<1x256xf32>
    %121 = vector.broadcast %120 : vector<1x256xf32> to vector<8x256xf32>
    %122 = arith.mulf %119, %121 : vector<8x256xf32>
    %123 = arith.addf %116, %122 : vector<8x256xf32>
    %c16 = arith.constant 16 : index
    %c0_37 = arith.constant 0 : index
    %c0_38 = arith.constant 0 : index
    %124 = vector.load %arg2[%c16, %c0_37, %c0_38] : memref<27x8x256xbf16, #tpu.memory_space<vmem>>, vector<1x8x256xbf16>
    %125 = vector.shape_cast %124 : vector<1x8x256xbf16> to vector<8x256xbf16>
    %126 = arith.extf %125 : vector<8x256xbf16> to vector<8x256xf32>
    %127 = vector.extract_strided_slice %10 {offsets = [16, 0], sizes = [1, 256], strides = [1, 1]} : vector<27x256xf32> to vector<1x256xf32>
    %128 = vector.broadcast %127 : vector<1x256xf32> to vector<8x256xf32>
    %129 = arith.mulf %126, %128 : vector<8x256xf32>
    %130 = arith.addf %123, %129 : vector<8x256xf32>
    %c17 = arith.constant 17 : index
    %c0_39 = arith.constant 0 : index
    %c0_40 = arith.constant 0 : index
    %131 = vector.load %arg2[%c17, %c0_39, %c0_40] : memref<27x8x256xbf16, #tpu.memory_space<vmem>>, vector<1x8x256xbf16>
    %132 = vector.shape_cast %131 : vector<1x8x256xbf16> to vector<8x256xbf16>
    %133 = arith.extf %132 : vector<8x256xbf16> to vector<8x256xf32>
    %134 = vector.extract_strided_slice %10 {offsets = [17, 0], sizes = [1, 256], strides = [1, 1]} : vector<27x256xf32> to vector<1x256xf32>
    %135 = vector.broadcast %134 : vector<1x256xf32> to vector<8x256xf32>
    %136 = arith.mulf %133, %135 : vector<8x256xf32>
    %137 = arith.addf %130, %136 : vector<8x256xf32>
    %c18 = arith.constant 18 : index
    %c0_41 = arith.constant 0 : index
    %c0_42 = arith.constant 0 : index
    %138 = vector.load %arg2[%c18, %c0_41, %c0_42] : memref<27x8x256xbf16, #tpu.memory_space<vmem>>, vector<1x8x256xbf16>
    %139 = vector.shape_cast %138 : vector<1x8x256xbf16> to vector<8x256xbf16>
    %140 = arith.extf %139 : vector<8x256xbf16> to vector<8x256xf32>
    %141 = vector.extract_strided_slice %10 {offsets = [18, 0], sizes = [1, 256], strides = [1, 1]} : vector<27x256xf32> to vector<1x256xf32>
    %142 = vector.broadcast %141 : vector<1x256xf32> to vector<8x256xf32>
    %143 = arith.mulf %140, %142 : vector<8x256xf32>
    %144 = arith.addf %137, %143 : vector<8x256xf32>
    %c19 = arith.constant 19 : index
    %c0_43 = arith.constant 0 : index
    %c0_44 = arith.constant 0 : index
    %145 = vector.load %arg2[%c19, %c0_43, %c0_44] : memref<27x8x256xbf16, #tpu.memory_space<vmem>>, vector<1x8x256xbf16>
    %146 = vector.shape_cast %145 : vector<1x8x256xbf16> to vector<8x256xbf16>
    %147 = arith.extf %146 : vector<8x256xbf16> to vector<8x256xf32>
    %148 = vector.extract_strided_slice %10 {offsets = [19, 0], sizes = [1, 256], strides = [1, 1]} : vector<27x256xf32> to vector<1x256xf32>
    %149 = vector.broadcast %148 : vector<1x256xf32> to vector<8x256xf32>
    %150 = arith.mulf %147, %149 : vector<8x256xf32>
    %151 = arith.addf %144, %150 : vector<8x256xf32>
    %c20 = arith.constant 20 : index
    %c0_45 = arith.constant 0 : index
    %c0_46 = arith.constant 0 : index
    %152 = vector.load %arg2[%c20, %c0_45, %c0_46] : memref<27x8x256xbf16, #tpu.memory_space<vmem>>, vector<1x8x256xbf16>
    %153 = vector.shape_cast %152 : vector<1x8x256xbf16> to vector<8x256xbf16>
    %154 = arith.extf %153 : vector<8x256xbf16> to vector<8x256xf32>
    %155 = vector.extract_strided_slice %10 {offsets = [20, 0], sizes = [1, 256], strides = [1, 1]} : vector<27x256xf32> to vector<1x256xf32>
    %156 = vector.broadcast %155 : vector<1x256xf32> to vector<8x256xf32>
    %157 = arith.mulf %154, %156 : vector<8x256xf32>
    %158 = arith.addf %151, %157 : vector<8x256xf32>
    %c21 = arith.constant 21 : index
    %c0_47 = arith.constant 0 : index
    %c0_48 = arith.constant 0 : index
    %159 = vector.load %arg2[%c21, %c0_47, %c0_48] : memref<27x8x256xbf16, #tpu.memory_space<vmem>>, vector<1x8x256xbf16>
    %160 = vector.shape_cast %159 : vector<1x8x256xbf16> to vector<8x256xbf16>
    %161 = arith.extf %160 : vector<8x256xbf16> to vector<8x256xf32>
    %162 = vector.extract_strided_slice %10 {offsets = [21, 0], sizes = [1, 256], strides = [1, 1]} : vector<27x256xf32> to vector<1x256xf32>
    %163 = vector.broadcast %162 : vector<1x256xf32> to vector<8x256xf32>
    %164 = arith.mulf %161, %163 : vector<8x256xf32>
    %165 = arith.addf %158, %164 : vector<8x256xf32>
    %c22 = arith.constant 22 : index
    %c0_49 = arith.constant 0 : index
    %c0_50 = arith.constant 0 : index
    %166 = vector.load %arg2[%c22, %c0_49, %c0_50] : memref<27x8x256xbf16, #tpu.memory_space<vmem>>, vector<1x8x256xbf16>
    %167 = vector.shape_cast %166 : vector<1x8x256xbf16> to vector<8x256xbf16>
    %168 = arith.extf %167 : vector<8x256xbf16> to vector<8x256xf32>
    %169 = vector.extract_strided_slice %10 {offsets = [22, 0], sizes = [1, 256], strides = [1, 1]} : vector<27x256xf32> to vector<1x256xf32>
    %170 = vector.broadcast %169 : vector<1x256xf32> to vector<8x256xf32>
    %171 = arith.mulf %168, %170 : vector<8x256xf32>
    %172 = arith.addf %165, %171 : vector<8x256xf32>
    %c23 = arith.constant 23 : index
    %c0_51 = arith.constant 0 : index
    %c0_52 = arith.constant 0 : index
    %173 = vector.load %arg2[%c23, %c0_51, %c0_52] : memref<27x8x256xbf16, #tpu.memory_space<vmem>>, vector<1x8x256xbf16>
    %174 = vector.shape_cast %173 : vector<1x8x256xbf16> to vector<8x256xbf16>
    %175 = arith.extf %174 : vector<8x256xbf16> to vector<8x256xf32>
    %176 = vector.extract_strided_slice %10 {offsets = [23, 0], sizes = [1, 256], strides = [1, 1]} : vector<27x256xf32> to vector<1x256xf32>
    %177 = vector.broadcast %176 : vector<1x256xf32> to vector<8x256xf32>
    %178 = arith.mulf %175, %177 : vector<8x256xf32>
    %179 = arith.addf %172, %178 : vector<8x256xf32>
    %c24 = arith.constant 24 : index
    %c0_53 = arith.constant 0 : index
    %c0_54 = arith.constant 0 : index
    %180 = vector.load %arg2[%c24, %c0_53, %c0_54] : memref<27x8x256xbf16, #tpu.memory_space<vmem>>, vector<1x8x256xbf16>
    %181 = vector.shape_cast %180 : vector<1x8x256xbf16> to vector<8x256xbf16>
    %182 = arith.extf %181 : vector<8x256xbf16> to vector<8x256xf32>
    %183 = vector.extract_strided_slice %10 {offsets = [24, 0], sizes = [1, 256], strides = [1, 1]} : vector<27x256xf32> to vector<1x256xf32>
    %184 = vector.broadcast %183 : vector<1x256xf32> to vector<8x256xf32>
    %185 = arith.mulf %182, %184 : vector<8x256xf32>
    %186 = arith.addf %179, %185 : vector<8x256xf32>
    %c25 = arith.constant 25 : index
    %c0_55 = arith.constant 0 : index
    %c0_56 = arith.constant 0 : index
    %187 = vector.load %arg2[%c25, %c0_55, %c0_56] : memref<27x8x256xbf16, #tpu.memory_space<vmem>>, vector<1x8x256xbf16>
    %188 = vector.shape_cast %187 : vector<1x8x256xbf16> to vector<8x256xbf16>
    %189 = arith.extf %188 : vector<8x256xbf16> to vector<8x256xf32>
    %190 = vector.extract_strided_slice %10 {offsets = [25, 0], sizes = [1, 256], strides = [1, 1]} : vector<27x256xf32> to vector<1x256xf32>
    %191 = vector.broadcast %190 : vector<1x256xf32> to vector<8x256xf32>
    %192 = arith.mulf %189, %191 : vector<8x256xf32>
    %193 = arith.addf %186, %192 : vector<8x256xf32>
    %c26 = arith.constant 26 : index
    %c0_57 = arith.constant 0 : index
    %c0_58 = arith.constant 0 : index
    %194 = vector.load %arg2[%c26, %c0_57, %c0_58] : memref<27x8x256xbf16, #tpu.memory_space<vmem>>, vector<1x8x256xbf16>
    %195 = vector.shape_cast %194 : vector<1x8x256xbf16> to vector<8x256xbf16>
    %196 = arith.extf %195 : vector<8x256xbf16> to vector<8x256xf32>
    %197 = vector.extract_strided_slice %10 {offsets = [26, 0], sizes = [1, 256], strides = [1, 1]} : vector<27x256xf32> to vector<1x256xf32>
    %198 = vector.broadcast %197 : vector<1x256xf32> to vector<8x256xf32>
    %199 = arith.mulf %196, %198 : vector<8x256xf32>
    %200 = arith.addf %193, %199 : vector<8x256xf32>
    %c0_59 = arith.constant 0 : index
    %c0_60 = arith.constant 0 : index
    %201 = vector.load %arg4[%c0_59, %c0_60] : memref<8x256xf32, #tpu.memory_space<vmem>>, vector<8x256xf32>
    tpu.vector_store %arg4[%c0_59, %c0_60], %200 {strides = array<i32>} : memref<8x256xf32, #tpu.memory_space<vmem>>, vector<8x256xf32>,
    return
  }
  func.func @transform_0(%arg0: i32) -> (i32, i32) {
    %c0_i32 = arith.constant 0 : i32
    %c0_i32_0 = arith.constant 0 : i32
    return %c0_i32, %arg0 : i32, i32
  }
  func.func @transform_1(%arg0: i32) -> (i32, i32, i32) {
    %c0_i32 = arith.constant 0 : i32
    %c0_i32_0 = arith.constant 0 : i32
    %c0_i32_1 = arith.constant 0 : i32
    return %c0_i32, %c0_i32_0, %arg0 : i32, i32, i32
  }
  func.func @transform_2(%arg0: i32) -> (i32, i32) {
    %c0_i32 = arith.constant 0 : i32
    %c0_i32_0 = arith.constant 0 : i32
    return %c0_i32, %arg0 : i32, i32
  }
  func.func @transform_3(%arg0: i32) -> (i32, i32) {
    %c0_i32 = arith.constant 0 : i32
    %c0_i32_0 = arith.constant 0 : i32
    return %c0_i32, %arg0 : i32, i32
  }
}

module attributes {stable_mosaic.version = 11 : i64} {
  func.func @_filter_low_kernel(%arg0: i32, %arg1: memref<8x27x128xf32, #tpu.memory_space<vmem>>, %arg2: memref<27x8x128xbf16, #tpu.memory_space<vmem>>, %arg3: memref<8x8x128xf32, #tpu.memory_space<vmem>>) attributes {dimension_semantics = [#tpu.dimension_semantics<parallel>], iteration_bounds = array<i64: 1>, scalar_prefetch = 0 : i64, scratch_operands = 0 : i64, tpu.core_type = #tpu.core_type<tc>, window_params = [{transform_indices = @transform_0, window_bounds = array<i64: 8, 27, 128>}, {transform_indices = @transform_1, window_bounds = array<i64: 27, 8, 128>}, {transform_indices = @transform_2, window_bounds = array<i64: 8, 8, 128>}]} {
    %c0 = arith.constant 0 : index
    %c0_0 = arith.constant 0 : index
    %c0_1 = arith.constant 0 : index
    %0 = vector.load %arg1[%c0, %c0_0, %c0_1] : memref<8x27x128xf32, #tpu.memory_space<vmem>>, vector<1x27x128xf32>
    %1 = vector.shape_cast %0 : vector<1x27x128xf32> to vector<27x128xf32>
    %cst = arith.constant dense<0xFF800000> : vector<128xf32>
    %2 = vector.multi_reduction <maximumf>, %1, %cst [0] : vector<27x128xf32> to vector<128xf32>
    %3 = vector.shape_cast %2 : vector<128xf32> to vector<1x128xf32>
    %4 = vector.broadcast %3 : vector<1x128xf32> to vector<27x128xf32>
    %5 = arith.subf %1, %4 : vector<27x128xf32>
    %6 = math.exp %5 : vector<27x128xf32>
    %cst_2 = arith.constant dense<0.000000e+00> : vector<128xf32>
    %7 = vector.multi_reduction <add>, %6, %cst_2 [0] : vector<27x128xf32> to vector<128xf32>
    %8 = vector.shape_cast %7 : vector<128xf32> to vector<1x128xf32>
    %9 = tpu.reciprocal %8 {approx = true} : vector<1x128xf32> -> vector<1x128xf32>
    %10 = vector.broadcast %9 : vector<1x128xf32> to vector<27x128xf32>
    %11 = arith.mulf %6, %10 : vector<27x128xf32>
    %cst_3 = arith.constant 0.000000e+00 : f32
    %12 = vector.broadcast %cst_3 : f32 to vector<8x128xf32>
    %c0_4 = arith.constant 0 : index
    %c0_5 = arith.constant 0 : index
    %c0_6 = arith.constant 0 : index
    %13 = vector.load %arg2[%c0_4, %c0_5, %c0_6] : memref<27x8x128xbf16, #tpu.memory_space<vmem>>, vector<1x8x128xbf16>
    %14 = vector.shape_cast %13 : vector<1x8x128xbf16> to vector<8x128xbf16>
    %15 = arith.extf %14 : vector<8x128xbf16> to vector<8x128xf32>
    %16 = vector.extract_strided_slice %11 {offsets = [0, 0], sizes = [1, 128], strides = [1, 1]} : vector<27x128xf32> to vector<1x128xf32>
    %17 = vector.broadcast %16 : vector<1x128xf32> to vector<8x128xf32>
    %18 = arith.mulf %15, %17 : vector<8x128xf32>
    %19 = arith.addf %12, %18 : vector<8x128xf32>
    %c1 = arith.constant 1 : index
    %c0_7 = arith.constant 0 : index
    %c0_8 = arith.constant 0 : index
    %20 = vector.load %arg2[%c1, %c0_7, %c0_8] : memref<27x8x128xbf16, #tpu.memory_space<vmem>>, vector<1x8x128xbf16>
    %21 = vector.shape_cast %20 : vector<1x8x128xbf16> to vector<8x128xbf16>
    %22 = arith.extf %21 : vector<8x128xbf16> to vector<8x128xf32>
    %23 = vector.extract_strided_slice %11 {offsets = [1, 0], sizes = [1, 128], strides = [1, 1]} : vector<27x128xf32> to vector<1x128xf32>
    %24 = vector.broadcast %23 : vector<1x128xf32> to vector<8x128xf32>
    %25 = arith.mulf %22, %24 : vector<8x128xf32>
    %26 = arith.addf %19, %25 : vector<8x128xf32>
    %c2 = arith.constant 2 : index
    %c0_9 = arith.constant 0 : index
    %c0_10 = arith.constant 0 : index
    %27 = vector.load %arg2[%c2, %c0_9, %c0_10] : memref<27x8x128xbf16, #tpu.memory_space<vmem>>, vector<1x8x128xbf16>
    %28 = vector.shape_cast %27 : vector<1x8x128xbf16> to vector<8x128xbf16>
    %29 = arith.extf %28 : vector<8x128xbf16> to vector<8x128xf32>
    %30 = vector.extract_strided_slice %11 {offsets = [2, 0], sizes = [1, 128], strides = [1, 1]} : vector<27x128xf32> to vector<1x128xf32>
    %31 = vector.broadcast %30 : vector<1x128xf32> to vector<8x128xf32>
    %32 = arith.mulf %29, %31 : vector<8x128xf32>
    %33 = arith.addf %26, %32 : vector<8x128xf32>
    %c3 = arith.constant 3 : index
    %c0_11 = arith.constant 0 : index
    %c0_12 = arith.constant 0 : index
    %34 = vector.load %arg2[%c3, %c0_11, %c0_12] : memref<27x8x128xbf16, #tpu.memory_space<vmem>>, vector<1x8x128xbf16>
    %35 = vector.shape_cast %34 : vector<1x8x128xbf16> to vector<8x128xbf16>
    %36 = arith.extf %35 : vector<8x128xbf16> to vector<8x128xf32>
    %37 = vector.extract_strided_slice %11 {offsets = [3, 0], sizes = [1, 128], strides = [1, 1]} : vector<27x128xf32> to vector<1x128xf32>
    %38 = vector.broadcast %37 : vector<1x128xf32> to vector<8x128xf32>
    %39 = arith.mulf %36, %38 : vector<8x128xf32>
    %40 = arith.addf %33, %39 : vector<8x128xf32>
    %c4 = arith.constant 4 : index
    %c0_13 = arith.constant 0 : index
    %c0_14 = arith.constant 0 : index
    %41 = vector.load %arg2[%c4, %c0_13, %c0_14] : memref<27x8x128xbf16, #tpu.memory_space<vmem>>, vector<1x8x128xbf16>
    %42 = vector.shape_cast %41 : vector<1x8x128xbf16> to vector<8x128xbf16>
    %43 = arith.extf %42 : vector<8x128xbf16> to vector<8x128xf32>
    %44 = vector.extract_strided_slice %11 {offsets = [4, 0], sizes = [1, 128], strides = [1, 1]} : vector<27x128xf32> to vector<1x128xf32>
    %45 = vector.broadcast %44 : vector<1x128xf32> to vector<8x128xf32>
    %46 = arith.mulf %43, %45 : vector<8x128xf32>
    %47 = arith.addf %40, %46 : vector<8x128xf32>
    %c5 = arith.constant 5 : index
    %c0_15 = arith.constant 0 : index
    %c0_16 = arith.constant 0 : index
    %48 = vector.load %arg2[%c5, %c0_15, %c0_16] : memref<27x8x128xbf16, #tpu.memory_space<vmem>>, vector<1x8x128xbf16>
    %49 = vector.shape_cast %48 : vector<1x8x128xbf16> to vector<8x128xbf16>
    %50 = arith.extf %49 : vector<8x128xbf16> to vector<8x128xf32>
    %51 = vector.extract_strided_slice %11 {offsets = [5, 0], sizes = [1, 128], strides = [1, 1]} : vector<27x128xf32> to vector<1x128xf32>
    %52 = vector.broadcast %51 : vector<1x128xf32> to vector<8x128xf32>
    %53 = arith.mulf %50, %52 : vector<8x128xf32>
    %54 = arith.addf %47, %53 : vector<8x128xf32>
    %c6 = arith.constant 6 : index
    %c0_17 = arith.constant 0 : index
    %c0_18 = arith.constant 0 : index
    %55 = vector.load %arg2[%c6, %c0_17, %c0_18] : memref<27x8x128xbf16, #tpu.memory_space<vmem>>, vector<1x8x128xbf16>
    %56 = vector.shape_cast %55 : vector<1x8x128xbf16> to vector<8x128xbf16>
    %57 = arith.extf %56 : vector<8x128xbf16> to vector<8x128xf32>
    %58 = vector.extract_strided_slice %11 {offsets = [6, 0], sizes = [1, 128], strides = [1, 1]} : vector<27x128xf32> to vector<1x128xf32>
    %59 = vector.broadcast %58 : vector<1x128xf32> to vector<8x128xf32>
    %60 = arith.mulf %57, %59 : vector<8x128xf32>
    %61 = arith.addf %54, %60 : vector<8x128xf32>
    %c7 = arith.constant 7 : index
    %c0_19 = arith.constant 0 : index
    %c0_20 = arith.constant 0 : index
    %62 = vector.load %arg2[%c7, %c0_19, %c0_20] : memref<27x8x128xbf16, #tpu.memory_space<vmem>>, vector<1x8x128xbf16>
    %63 = vector.shape_cast %62 : vector<1x8x128xbf16> to vector<8x128xbf16>
    %64 = arith.extf %63 : vector<8x128xbf16> to vector<8x128xf32>
    %65 = vector.extract_strided_slice %11 {offsets = [7, 0], sizes = [1, 128], strides = [1, 1]} : vector<27x128xf32> to vector<1x128xf32>
    %66 = vector.broadcast %65 : vector<1x128xf32> to vector<8x128xf32>
    %67 = arith.mulf %64, %66 : vector<8x128xf32>
    %68 = arith.addf %61, %67 : vector<8x128xf32>
    %c8 = arith.constant 8 : index
    %c0_21 = arith.constant 0 : index
    %c0_22 = arith.constant 0 : index
    %69 = vector.load %arg2[%c8, %c0_21, %c0_22] : memref<27x8x128xbf16, #tpu.memory_space<vmem>>, vector<1x8x128xbf16>
    %70 = vector.shape_cast %69 : vector<1x8x128xbf16> to vector<8x128xbf16>
    %71 = arith.extf %70 : vector<8x128xbf16> to vector<8x128xf32>
    %72 = vector.extract_strided_slice %11 {offsets = [8, 0], sizes = [1, 128], strides = [1, 1]} : vector<27x128xf32> to vector<1x128xf32>
    %73 = vector.broadcast %72 : vector<1x128xf32> to vector<8x128xf32>
    %74 = arith.mulf %71, %73 : vector<8x128xf32>
    %75 = arith.addf %68, %74 : vector<8x128xf32>
    %c9 = arith.constant 9 : index
    %c0_23 = arith.constant 0 : index
    %c0_24 = arith.constant 0 : index
    %76 = vector.load %arg2[%c9, %c0_23, %c0_24] : memref<27x8x128xbf16, #tpu.memory_space<vmem>>, vector<1x8x128xbf16>
    %77 = vector.shape_cast %76 : vector<1x8x128xbf16> to vector<8x128xbf16>
    %78 = arith.extf %77 : vector<8x128xbf16> to vector<8x128xf32>
    %79 = vector.extract_strided_slice %11 {offsets = [9, 0], sizes = [1, 128], strides = [1, 1]} : vector<27x128xf32> to vector<1x128xf32>
    %80 = vector.broadcast %79 : vector<1x128xf32> to vector<8x128xf32>
    %81 = arith.mulf %78, %80 : vector<8x128xf32>
    %82 = arith.addf %75, %81 : vector<8x128xf32>
    %c10 = arith.constant 10 : index
    %c0_25 = arith.constant 0 : index
    %c0_26 = arith.constant 0 : index
    %83 = vector.load %arg2[%c10, %c0_25, %c0_26] : memref<27x8x128xbf16, #tpu.memory_space<vmem>>, vector<1x8x128xbf16>
    %84 = vector.shape_cast %83 : vector<1x8x128xbf16> to vector<8x128xbf16>
    %85 = arith.extf %84 : vector<8x128xbf16> to vector<8x128xf32>
    %86 = vector.extract_strided_slice %11 {offsets = [10, 0], sizes = [1, 128], strides = [1, 1]} : vector<27x128xf32> to vector<1x128xf32>
    %87 = vector.broadcast %86 : vector<1x128xf32> to vector<8x128xf32>
    %88 = arith.mulf %85, %87 : vector<8x128xf32>
    %89 = arith.addf %82, %88 : vector<8x128xf32>
    %c11 = arith.constant 11 : index
    %c0_27 = arith.constant 0 : index
    %c0_28 = arith.constant 0 : index
    %90 = vector.load %arg2[%c11, %c0_27, %c0_28] : memref<27x8x128xbf16, #tpu.memory_space<vmem>>, vector<1x8x128xbf16>
    %91 = vector.shape_cast %90 : vector<1x8x128xbf16> to vector<8x128xbf16>
    %92 = arith.extf %91 : vector<8x128xbf16> to vector<8x128xf32>
    %93 = vector.extract_strided_slice %11 {offsets = [11, 0], sizes = [1, 128], strides = [1, 1]} : vector<27x128xf32> to vector<1x128xf32>
    %94 = vector.broadcast %93 : vector<1x128xf32> to vector<8x128xf32>
    %95 = arith.mulf %92, %94 : vector<8x128xf32>
    %96 = arith.addf %89, %95 : vector<8x128xf32>
    %c12 = arith.constant 12 : index
    %c0_29 = arith.constant 0 : index
    %c0_30 = arith.constant 0 : index
    %97 = vector.load %arg2[%c12, %c0_29, %c0_30] : memref<27x8x128xbf16, #tpu.memory_space<vmem>>, vector<1x8x128xbf16>
    %98 = vector.shape_cast %97 : vector<1x8x128xbf16> to vector<8x128xbf16>
    %99 = arith.extf %98 : vector<8x128xbf16> to vector<8x128xf32>
    %100 = vector.extract_strided_slice %11 {offsets = [12, 0], sizes = [1, 128], strides = [1, 1]} : vector<27x128xf32> to vector<1x128xf32>
    %101 = vector.broadcast %100 : vector<1x128xf32> to vector<8x128xf32>
    %102 = arith.mulf %99, %101 : vector<8x128xf32>
    %103 = arith.addf %96, %102 : vector<8x128xf32>
    %c13 = arith.constant 13 : index
    %c0_31 = arith.constant 0 : index
    %c0_32 = arith.constant 0 : index
    %104 = vector.load %arg2[%c13, %c0_31, %c0_32] : memref<27x8x128xbf16, #tpu.memory_space<vmem>>, vector<1x8x128xbf16>
    %105 = vector.shape_cast %104 : vector<1x8x128xbf16> to vector<8x128xbf16>
    %106 = arith.extf %105 : vector<8x128xbf16> to vector<8x128xf32>
    %107 = vector.extract_strided_slice %11 {offsets = [13, 0], sizes = [1, 128], strides = [1, 1]} : vector<27x128xf32> to vector<1x128xf32>
    %108 = vector.broadcast %107 : vector<1x128xf32> to vector<8x128xf32>
    %109 = arith.mulf %106, %108 : vector<8x128xf32>
    %110 = arith.addf %103, %109 : vector<8x128xf32>
    %c14 = arith.constant 14 : index
    %c0_33 = arith.constant 0 : index
    %c0_34 = arith.constant 0 : index
    %111 = vector.load %arg2[%c14, %c0_33, %c0_34] : memref<27x8x128xbf16, #tpu.memory_space<vmem>>, vector<1x8x128xbf16>
    %112 = vector.shape_cast %111 : vector<1x8x128xbf16> to vector<8x128xbf16>
    %113 = arith.extf %112 : vector<8x128xbf16> to vector<8x128xf32>
    %114 = vector.extract_strided_slice %11 {offsets = [14, 0], sizes = [1, 128], strides = [1, 1]} : vector<27x128xf32> to vector<1x128xf32>
    %115 = vector.broadcast %114 : vector<1x128xf32> to vector<8x128xf32>
    %116 = arith.mulf %113, %115 : vector<8x128xf32>
    %117 = arith.addf %110, %116 : vector<8x128xf32>
    %c15 = arith.constant 15 : index
    %c0_35 = arith.constant 0 : index
    %c0_36 = arith.constant 0 : index
    %118 = vector.load %arg2[%c15, %c0_35, %c0_36] : memref<27x8x128xbf16, #tpu.memory_space<vmem>>, vector<1x8x128xbf16>
    %119 = vector.shape_cast %118 : vector<1x8x128xbf16> to vector<8x128xbf16>
    %120 = arith.extf %119 : vector<8x128xbf16> to vector<8x128xf32>
    %121 = vector.extract_strided_slice %11 {offsets = [15, 0], sizes = [1, 128], strides = [1, 1]} : vector<27x128xf32> to vector<1x128xf32>
    %122 = vector.broadcast %121 : vector<1x128xf32> to vector<8x128xf32>
    %123 = arith.mulf %120, %122 : vector<8x128xf32>
    %124 = arith.addf %117, %123 : vector<8x128xf32>
    %c16 = arith.constant 16 : index
    %c0_37 = arith.constant 0 : index
    %c0_38 = arith.constant 0 : index
    %125 = vector.load %arg2[%c16, %c0_37, %c0_38] : memref<27x8x128xbf16, #tpu.memory_space<vmem>>, vector<1x8x128xbf16>
    %126 = vector.shape_cast %125 : vector<1x8x128xbf16> to vector<8x128xbf16>
    %127 = arith.extf %126 : vector<8x128xbf16> to vector<8x128xf32>
    %128 = vector.extract_strided_slice %11 {offsets = [16, 0], sizes = [1, 128], strides = [1, 1]} : vector<27x128xf32> to vector<1x128xf32>
    %129 = vector.broadcast %128 : vector<1x128xf32> to vector<8x128xf32>
    %130 = arith.mulf %127, %129 : vector<8x128xf32>
    %131 = arith.addf %124, %130 : vector<8x128xf32>
    %c17 = arith.constant 17 : index
    %c0_39 = arith.constant 0 : index
    %c0_40 = arith.constant 0 : index
    %132 = vector.load %arg2[%c17, %c0_39, %c0_40] : memref<27x8x128xbf16, #tpu.memory_space<vmem>>, vector<1x8x128xbf16>
    %133 = vector.shape_cast %132 : vector<1x8x128xbf16> to vector<8x128xbf16>
    %134 = arith.extf %133 : vector<8x128xbf16> to vector<8x128xf32>
    %135 = vector.extract_strided_slice %11 {offsets = [17, 0], sizes = [1, 128], strides = [1, 1]} : vector<27x128xf32> to vector<1x128xf32>
    %136 = vector.broadcast %135 : vector<1x128xf32> to vector<8x128xf32>
    %137 = arith.mulf %134, %136 : vector<8x128xf32>
    %138 = arith.addf %131, %137 : vector<8x128xf32>
    %c18 = arith.constant 18 : index
    %c0_41 = arith.constant 0 : index
    %c0_42 = arith.constant 0 : index
    %139 = vector.load %arg2[%c18, %c0_41, %c0_42] : memref<27x8x128xbf16, #tpu.memory_space<vmem>>, vector<1x8x128xbf16>
    %140 = vector.shape_cast %139 : vector<1x8x128xbf16> to vector<8x128xbf16>
    %141 = arith.extf %140 : vector<8x128xbf16> to vector<8x128xf32>
    %142 = vector.extract_strided_slice %11 {offsets = [18, 0], sizes = [1, 128], strides = [1, 1]} : vector<27x128xf32> to vector<1x128xf32>
    %143 = vector.broadcast %142 : vector<1x128xf32> to vector<8x128xf32>
    %144 = arith.mulf %141, %143 : vector<8x128xf32>
    %145 = arith.addf %138, %144 : vector<8x128xf32>
    %c19 = arith.constant 19 : index
    %c0_43 = arith.constant 0 : index
    %c0_44 = arith.constant 0 : index
    %146 = vector.load %arg2[%c19, %c0_43, %c0_44] : memref<27x8x128xbf16, #tpu.memory_space<vmem>>, vector<1x8x128xbf16>
    %147 = vector.shape_cast %146 : vector<1x8x128xbf16> to vector<8x128xbf16>
    %148 = arith.extf %147 : vector<8x128xbf16> to vector<8x128xf32>
    %149 = vector.extract_strided_slice %11 {offsets = [19, 0], sizes = [1, 128], strides = [1, 1]} : vector<27x128xf32> to vector<1x128xf32>
    %150 = vector.broadcast %149 : vector<1x128xf32> to vector<8x128xf32>
    %151 = arith.mulf %148, %150 : vector<8x128xf32>
    %152 = arith.addf %145, %151 : vector<8x128xf32>
    %c20 = arith.constant 20 : index
    %c0_45 = arith.constant 0 : index
    %c0_46 = arith.constant 0 : index
    %153 = vector.load %arg2[%c20, %c0_45, %c0_46] : memref<27x8x128xbf16, #tpu.memory_space<vmem>>, vector<1x8x128xbf16>
    %154 = vector.shape_cast %153 : vector<1x8x128xbf16> to vector<8x128xbf16>
    %155 = arith.extf %154 : vector<8x128xbf16> to vector<8x128xf32>
    %156 = vector.extract_strided_slice %11 {offsets = [20, 0], sizes = [1, 128], strides = [1, 1]} : vector<27x128xf32> to vector<1x128xf32>
    %157 = vector.broadcast %156 : vector<1x128xf32> to vector<8x128xf32>
    %158 = arith.mulf %155, %157 : vector<8x128xf32>
    %159 = arith.addf %152, %158 : vector<8x128xf32>
    %c21 = arith.constant 21 : index
    %c0_47 = arith.constant 0 : index
    %c0_48 = arith.constant 0 : index
    %160 = vector.load %arg2[%c21, %c0_47, %c0_48] : memref<27x8x128xbf16, #tpu.memory_space<vmem>>, vector<1x8x128xbf16>
    %161 = vector.shape_cast %160 : vector<1x8x128xbf16> to vector<8x128xbf16>
    %162 = arith.extf %161 : vector<8x128xbf16> to vector<8x128xf32>
    %163 = vector.extract_strided_slice %11 {offsets = [21, 0], sizes = [1, 128], strides = [1, 1]} : vector<27x128xf32> to vector<1x128xf32>
    %164 = vector.broadcast %163 : vector<1x128xf32> to vector<8x128xf32>
    %165 = arith.mulf %162, %164 : vector<8x128xf32>
    %166 = arith.addf %159, %165 : vector<8x128xf32>
    %c22 = arith.constant 22 : index
    %c0_49 = arith.constant 0 : index
    %c0_50 = arith.constant 0 : index
    %167 = vector.load %arg2[%c22, %c0_49, %c0_50] : memref<27x8x128xbf16, #tpu.memory_space<vmem>>, vector<1x8x128xbf16>
    %168 = vector.shape_cast %167 : vector<1x8x128xbf16> to vector<8x128xbf16>
    %169 = arith.extf %168 : vector<8x128xbf16> to vector<8x128xf32>
    %170 = vector.extract_strided_slice %11 {offsets = [22, 0], sizes = [1, 128], strides = [1, 1]} : vector<27x128xf32> to vector<1x128xf32>
    %171 = vector.broadcast %170 : vector<1x128xf32> to vector<8x128xf32>
    %172 = arith.mulf %169, %171 : vector<8x128xf32>
    %173 = arith.addf %166, %172 : vector<8x128xf32>
    %c23 = arith.constant 23 : index
    %c0_51 = arith.constant 0 : index
    %c0_52 = arith.constant 0 : index
    %174 = vector.load %arg2[%c23, %c0_51, %c0_52] : memref<27x8x128xbf16, #tpu.memory_space<vmem>>, vector<1x8x128xbf16>
    %175 = vector.shape_cast %174 : vector<1x8x128xbf16> to vector<8x128xbf16>
    %176 = arith.extf %175 : vector<8x128xbf16> to vector<8x128xf32>
    %177 = vector.extract_strided_slice %11 {offsets = [23, 0], sizes = [1, 128], strides = [1, 1]} : vector<27x128xf32> to vector<1x128xf32>
    %178 = vector.broadcast %177 : vector<1x128xf32> to vector<8x128xf32>
    %179 = arith.mulf %176, %178 : vector<8x128xf32>
    %180 = arith.addf %173, %179 : vector<8x128xf32>
    %c24 = arith.constant 24 : index
    %c0_53 = arith.constant 0 : index
    %c0_54 = arith.constant 0 : index
    %181 = vector.load %arg2[%c24, %c0_53, %c0_54] : memref<27x8x128xbf16, #tpu.memory_space<vmem>>, vector<1x8x128xbf16>
    %182 = vector.shape_cast %181 : vector<1x8x128xbf16> to vector<8x128xbf16>
    %183 = arith.extf %182 : vector<8x128xbf16> to vector<8x128xf32>
    %184 = vector.extract_strided_slice %11 {offsets = [24, 0], sizes = [1, 128], strides = [1, 1]} : vector<27x128xf32> to vector<1x128xf32>
    %185 = vector.broadcast %184 : vector<1x128xf32> to vector<8x128xf32>
    %186 = arith.mulf %183, %185 : vector<8x128xf32>
    %187 = arith.addf %180, %186 : vector<8x128xf32>
    %c25 = arith.constant 25 : index
    %c0_55 = arith.constant 0 : index
    %c0_56 = arith.constant 0 : index
    %188 = vector.load %arg2[%c25, %c0_55, %c0_56] : memref<27x8x128xbf16, #tpu.memory_space<vmem>>, vector<1x8x128xbf16>
    %189 = vector.shape_cast %188 : vector<1x8x128xbf16> to vector<8x128xbf16>
    %190 = arith.extf %189 : vector<8x128xbf16> to vector<8x128xf32>
    %191 = vector.extract_strided_slice %11 {offsets = [25, 0], sizes = [1, 128], strides = [1, 1]} : vector<27x128xf32> to vector<1x128xf32>
    %192 = vector.broadcast %191 : vector<1x128xf32> to vector<8x128xf32>
    %193 = arith.mulf %190, %192 : vector<8x128xf32>
    %194 = arith.addf %187, %193 : vector<8x128xf32>
    %c26 = arith.constant 26 : index
    %c0_57 = arith.constant 0 : index
    %c0_58 = arith.constant 0 : index
    %195 = vector.load %arg2[%c26, %c0_57, %c0_58] : memref<27x8x128xbf16, #tpu.memory_space<vmem>>, vector<1x8x128xbf16>
    %196 = vector.shape_cast %195 : vector<1x8x128xbf16> to vector<8x128xbf16>
    %197 = arith.extf %196 : vector<8x128xbf16> to vector<8x128xf32>
    %198 = vector.extract_strided_slice %11 {offsets = [26, 0], sizes = [1, 128], strides = [1, 1]} : vector<27x128xf32> to vector<1x128xf32>
    %199 = vector.broadcast %198 : vector<1x128xf32> to vector<8x128xf32>
    %200 = arith.mulf %197, %199 : vector<8x128xf32>
    %201 = arith.addf %194, %200 : vector<8x128xf32>
    %c0_59 = arith.constant 0 : index
    %c0_60 = arith.constant 0 : index
    %c0_61 = arith.constant 0 : index
    %202 = vector.load %arg3[%c0_59, %c0_60, %c0_61] : memref<8x8x128xf32, #tpu.memory_space<vmem>>, vector<1x8x128xf32>
    %203 = vector.shape_cast %202 : vector<1x8x128xf32> to vector<8x128xf32>
    %204 = vector.shape_cast %201 : vector<8x128xf32> to vector<1x8x128xf32>
    tpu.vector_store %arg3[%c0_59, %c0_60, %c0_61], %204 {strides = array<i32>} : memref<8x8x128xf32, #tpu.memory_space<vmem>>, vector<1x8x128xf32>,
    %c1_62 = arith.constant 1 : index
    %c0_63 = arith.constant 0 : index
    %c0_64 = arith.constant 0 : index
    %205 = vector.load %arg1[%c1_62, %c0_63, %c0_64] : memref<8x27x128xf32, #tpu.memory_space<vmem>>, vector<1x27x128xf32>
    %206 = vector.shape_cast %205 : vector<1x27x128xf32> to vector<27x128xf32>
    %cst_65 = arith.constant dense<0xFF800000> : vector<128xf32>
    %207 = vector.multi_reduction <maximumf>, %206, %cst_65 [0] : vector<27x128xf32> to vector<128xf32>
    %208 = vector.shape_cast %207 : vector<128xf32> to vector<1x128xf32>
    %209 = vector.broadcast %208 : vector<1x128xf32> to vector<27x128xf32>
    %210 = arith.subf %206, %209 : vector<27x128xf32>
    %211 = math.exp %210 : vector<27x128xf32>
    %cst_66 = arith.constant dense<0.000000e+00> : vector<128xf32>
    %212 = vector.multi_reduction <add>, %211, %cst_66 [0] : vector<27x128xf32> to vector<128xf32>
    %213 = vector.shape_cast %212 : vector<128xf32> to vector<1x128xf32>
    %214 = tpu.reciprocal %213 {approx = true} : vector<1x128xf32> -> vector<1x128xf32>
    %215 = vector.broadcast %214 : vector<1x128xf32> to vector<27x128xf32>
    %216 = arith.mulf %211, %215 : vector<27x128xf32>
    %cst_67 = arith.constant 0.000000e+00 : f32
    %217 = vector.broadcast %cst_67 : f32 to vector<8x128xf32>
    %c0_68 = arith.constant 0 : index
    %c0_69 = arith.constant 0 : index
    %c0_70 = arith.constant 0 : index
    %218 = vector.load %arg2[%c0_68, %c0_69, %c0_70] : memref<27x8x128xbf16, #tpu.memory_space<vmem>>, vector<1x8x128xbf16>
    %219 = vector.shape_cast %218 : vector<1x8x128xbf16> to vector<8x128xbf16>
    %220 = arith.extf %219 : vector<8x128xbf16> to vector<8x128xf32>
    %221 = vector.extract_strided_slice %216 {offsets = [0, 0], sizes = [1, 128], strides = [1, 1]} : vector<27x128xf32> to vector<1x128xf32>
    %222 = vector.broadcast %221 : vector<1x128xf32> to vector<8x128xf32>
    %223 = arith.mulf %220, %222 : vector<8x128xf32>
    %224 = arith.addf %217, %223 : vector<8x128xf32>
    %c1_71 = arith.constant 1 : index
    %c0_72 = arith.constant 0 : index
    %c0_73 = arith.constant 0 : index
    %225 = vector.load %arg2[%c1_71, %c0_72, %c0_73] : memref<27x8x128xbf16, #tpu.memory_space<vmem>>, vector<1x8x128xbf16>
    %226 = vector.shape_cast %225 : vector<1x8x128xbf16> to vector<8x128xbf16>
    %227 = arith.extf %226 : vector<8x128xbf16> to vector<8x128xf32>
    %228 = vector.extract_strided_slice %216 {offsets = [1, 0], sizes = [1, 128], strides = [1, 1]} : vector<27x128xf32> to vector<1x128xf32>
    %229 = vector.broadcast %228 : vector<1x128xf32> to vector<8x128xf32>
    %230 = arith.mulf %227, %229 : vector<8x128xf32>
    %231 = arith.addf %224, %230 : vector<8x128xf32>
    %c2_74 = arith.constant 2 : index
    %c0_75 = arith.constant 0 : index
    %c0_76 = arith.constant 0 : index
    %232 = vector.load %arg2[%c2_74, %c0_75, %c0_76] : memref<27x8x128xbf16, #tpu.memory_space<vmem>>, vector<1x8x128xbf16>
    %233 = vector.shape_cast %232 : vector<1x8x128xbf16> to vector<8x128xbf16>
    %234 = arith.extf %233 : vector<8x128xbf16> to vector<8x128xf32>
    %235 = vector.extract_strided_slice %216 {offsets = [2, 0], sizes = [1, 128], strides = [1, 1]} : vector<27x128xf32> to vector<1x128xf32>
    %236 = vector.broadcast %235 : vector<1x128xf32> to vector<8x128xf32>
    %237 = arith.mulf %234, %236 : vector<8x128xf32>
    %238 = arith.addf %231, %237 : vector<8x128xf32>
    %c3_77 = arith.constant 3 : index
    %c0_78 = arith.constant 0 : index
    %c0_79 = arith.constant 0 : index
    %239 = vector.load %arg2[%c3_77, %c0_78, %c0_79] : memref<27x8x128xbf16, #tpu.memory_space<vmem>>, vector<1x8x128xbf16>
    %240 = vector.shape_cast %239 : vector<1x8x128xbf16> to vector<8x128xbf16>
    %241 = arith.extf %240 : vector<8x128xbf16> to vector<8x128xf32>
    %242 = vector.extract_strided_slice %216 {offsets = [3, 0], sizes = [1, 128], strides = [1, 1]} : vector<27x128xf32> to vector<1x128xf32>
    %243 = vector.broadcast %242 : vector<1x128xf32> to vector<8x128xf32>
    %244 = arith.mulf %241, %243 : vector<8x128xf32>
    %245 = arith.addf %238, %244 : vector<8x128xf32>
    %c4_80 = arith.constant 4 : index
    %c0_81 = arith.constant 0 : index
    %c0_82 = arith.constant 0 : index
    %246 = vector.load %arg2[%c4_80, %c0_81, %c0_82] : memref<27x8x128xbf16, #tpu.memory_space<vmem>>, vector<1x8x128xbf16>
    %247 = vector.shape_cast %246 : vector<1x8x128xbf16> to vector<8x128xbf16>
    %248 = arith.extf %247 : vector<8x128xbf16> to vector<8x128xf32>
    %249 = vector.extract_strided_slice %216 {offsets = [4, 0], sizes = [1, 128], strides = [1, 1]} : vector<27x128xf32> to vector<1x128xf32>
    %250 = vector.broadcast %249 : vector<1x128xf32> to vector<8x128xf32>
    %251 = arith.mulf %248, %250 : vector<8x128xf32>
    %252 = arith.addf %245, %251 : vector<8x128xf32>
    %c5_83 = arith.constant 5 : index
    %c0_84 = arith.constant 0 : index
    %c0_85 = arith.constant 0 : index
    %253 = vector.load %arg2[%c5_83, %c0_84, %c0_85] : memref<27x8x128xbf16, #tpu.memory_space<vmem>>, vector<1x8x128xbf16>
    %254 = vector.shape_cast %253 : vector<1x8x128xbf16> to vector<8x128xbf16>
    %255 = arith.extf %254 : vector<8x128xbf16> to vector<8x128xf32>
    %256 = vector.extract_strided_slice %216 {offsets = [5, 0], sizes = [1, 128], strides = [1, 1]} : vector<27x128xf32> to vector<1x128xf32>
    %257 = vector.broadcast %256 : vector<1x128xf32> to vector<8x128xf32>
    %258 = arith.mulf %255, %257 : vector<8x128xf32>
    %259 = arith.addf %252, %258 : vector<8x128xf32>
    %c6_86 = arith.constant 6 : index
    %c0_87 = arith.constant 0 : index
    %c0_88 = arith.constant 0 : index
    %260 = vector.load %arg2[%c6_86, %c0_87, %c0_88] : memref<27x8x128xbf16, #tpu.memory_space<vmem>>, vector<1x8x128xbf16>
    %261 = vector.shape_cast %260 : vector<1x8x128xbf16> to vector<8x128xbf16>
    %262 = arith.extf %261 : vector<8x128xbf16> to vector<8x128xf32>
    %263 = vector.extract_strided_slice %216 {offsets = [6, 0], sizes = [1, 128], strides = [1, 1]} : vector<27x128xf32> to vector<1x128xf32>
    %264 = vector.broadcast %263 : vector<1x128xf32> to vector<8x128xf32>
    %265 = arith.mulf %262, %264 : vector<8x128xf32>
    %266 = arith.addf %259, %265 : vector<8x128xf32>
    %c7_89 = arith.constant 7 : index
    %c0_90 = arith.constant 0 : index
    %c0_91 = arith.constant 0 : index
    %267 = vector.load %arg2[%c7_89, %c0_90, %c0_91] : memref<27x8x128xbf16, #tpu.memory_space<vmem>>, vector<1x8x128xbf16>
    %268 = vector.shape_cast %267 : vector<1x8x128xbf16> to vector<8x128xbf16>
    %269 = arith.extf %268 : vector<8x128xbf16> to vector<8x128xf32>
    %270 = vector.extract_strided_slice %216 {offsets = [7, 0], sizes = [1, 128], strides = [1, 1]} : vector<27x128xf32> to vector<1x128xf32>
    %271 = vector.broadcast %270 : vector<1x128xf32> to vector<8x128xf32>
    %272 = arith.mulf %269, %271 : vector<8x128xf32>
    %273 = arith.addf %266, %272 : vector<8x128xf32>
    %c8_92 = arith.constant 8 : index
    %c0_93 = arith.constant 0 : index
    %c0_94 = arith.constant 0 : index
    %274 = vector.load %arg2[%c8_92, %c0_93, %c0_94] : memref<27x8x128xbf16, #tpu.memory_space<vmem>>, vector<1x8x128xbf16>
    %275 = vector.shape_cast %274 : vector<1x8x128xbf16> to vector<8x128xbf16>
    %276 = arith.extf %275 : vector<8x128xbf16> to vector<8x128xf32>
    %277 = vector.extract_strided_slice %216 {offsets = [8, 0], sizes = [1, 128], strides = [1, 1]} : vector<27x128xf32> to vector<1x128xf32>
    %278 = vector.broadcast %277 : vector<1x128xf32> to vector<8x128xf32>
    %279 = arith.mulf %276, %278 : vector<8x128xf32>
    %280 = arith.addf %273, %279 : vector<8x128xf32>
    %c9_95 = arith.constant 9 : index
    %c0_96 = arith.constant 0 : index
    %c0_97 = arith.constant 0 : index
    %281 = vector.load %arg2[%c9_95, %c0_96, %c0_97] : memref<27x8x128xbf16, #tpu.memory_space<vmem>>, vector<1x8x128xbf16>
    %282 = vector.shape_cast %281 : vector<1x8x128xbf16> to vector<8x128xbf16>
    %283 = arith.extf %282 : vector<8x128xbf16> to vector<8x128xf32>
    %284 = vector.extract_strided_slice %216 {offsets = [9, 0], sizes = [1, 128], strides = [1, 1]} : vector<27x128xf32> to vector<1x128xf32>
    %285 = vector.broadcast %284 : vector<1x128xf32> to vector<8x128xf32>
    %286 = arith.mulf %283, %285 : vector<8x128xf32>
    %287 = arith.addf %280, %286 : vector<8x128xf32>
    %c10_98 = arith.constant 10 : index
    %c0_99 = arith.constant 0 : index
    %c0_100 = arith.constant 0 : index
    %288 = vector.load %arg2[%c10_98, %c0_99, %c0_100] : memref<27x8x128xbf16, #tpu.memory_space<vmem>>, vector<1x8x128xbf16>
    %289 = vector.shape_cast %288 : vector<1x8x128xbf16> to vector<8x128xbf16>
    %290 = arith.extf %289 : vector<8x128xbf16> to vector<8x128xf32>
    %291 = vector.extract_strided_slice %216 {offsets = [10, 0], sizes = [1, 128], strides = [1, 1]} : vector<27x128xf32> to vector<1x128xf32>
    %292 = vector.broadcast %291 : vector<1x128xf32> to vector<8x128xf32>
    %293 = arith.mulf %290, %292 : vector<8x128xf32>
    %294 = arith.addf %287, %293 : vector<8x128xf32>
    %c11_101 = arith.constant 11 : index
    %c0_102 = arith.constant 0 : index
    %c0_103 = arith.constant 0 : index
    %295 = vector.load %arg2[%c11_101, %c0_102, %c0_103] : memref<27x8x128xbf16, #tpu.memory_space<vmem>>, vector<1x8x128xbf16>
    %296 = vector.shape_cast %295 : vector<1x8x128xbf16> to vector<8x128xbf16>
    %297 = arith.extf %296 : vector<8x128xbf16> to vector<8x128xf32>
    %298 = vector.extract_strided_slice %216 {offsets = [11, 0], sizes = [1, 128], strides = [1, 1]} : vector<27x128xf32> to vector<1x128xf32>
    %299 = vector.broadcast %298 : vector<1x128xf32> to vector<8x128xf32>
    %300 = arith.mulf %297, %299 : vector<8x128xf32>
    %301 = arith.addf %294, %300 : vector<8x128xf32>
    %c12_104 = arith.constant 12 : index
    %c0_105 = arith.constant 0 : index
    %c0_106 = arith.constant 0 : index
    %302 = vector.load %arg2[%c12_104, %c0_105, %c0_106] : memref<27x8x128xbf16, #tpu.memory_space<vmem>>, vector<1x8x128xbf16>
    %303 = vector.shape_cast %302 : vector<1x8x128xbf16> to vector<8x128xbf16>
    %304 = arith.extf %303 : vector<8x128xbf16> to vector<8x128xf32>
    %305 = vector.extract_strided_slice %216 {offsets = [12, 0], sizes = [1, 128], strides = [1, 1]} : vector<27x128xf32> to vector<1x128xf32>
    %306 = vector.broadcast %305 : vector<1x128xf32> to vector<8x128xf32>
    %307 = arith.mulf %304, %306 : vector<8x128xf32>
    %308 = arith.addf %301, %307 : vector<8x128xf32>
    %c13_107 = arith.constant 13 : index
    %c0_108 = arith.constant 0 : index
    %c0_109 = arith.constant 0 : index
    %309 = vector.load %arg2[%c13_107, %c0_108, %c0_109] : memref<27x8x128xbf16, #tpu.memory_space<vmem>>, vector<1x8x128xbf16>
    %310 = vector.shape_cast %309 : vector<1x8x128xbf16> to vector<8x128xbf16>
    %311 = arith.extf %310 : vector<8x128xbf16> to vector<8x128xf32>
    %312 = vector.extract_strided_slice %216 {offsets = [13, 0], sizes = [1, 128], strides = [1, 1]} : vector<27x128xf32> to vector<1x128xf32>
    %313 = vector.broadcast %312 : vector<1x128xf32> to vector<8x128xf32>
    %314 = arith.mulf %311, %313 : vector<8x128xf32>
    %315 = arith.addf %308, %314 : vector<8x128xf32>
    %c14_110 = arith.constant 14 : index
    %c0_111 = arith.constant 0 : index
    %c0_112 = arith.constant 0 : index
    %316 = vector.load %arg2[%c14_110, %c0_111, %c0_112] : memref<27x8x128xbf16, #tpu.memory_space<vmem>>, vector<1x8x128xbf16>
    %317 = vector.shape_cast %316 : vector<1x8x128xbf16> to vector<8x128xbf16>
    %318 = arith.extf %317 : vector<8x128xbf16> to vector<8x128xf32>
    %319 = vector.extract_strided_slice %216 {offsets = [14, 0], sizes = [1, 128], strides = [1, 1]} : vector<27x128xf32> to vector<1x128xf32>
    %320 = vector.broadcast %319 : vector<1x128xf32> to vector<8x128xf32>
    %321 = arith.mulf %318, %320 : vector<8x128xf32>
    %322 = arith.addf %315, %321 : vector<8x128xf32>
    %c15_113 = arith.constant 15 : index
    %c0_114 = arith.constant 0 : index
    %c0_115 = arith.constant 0 : index
    %323 = vector.load %arg2[%c15_113, %c0_114, %c0_115] : memref<27x8x128xbf16, #tpu.memory_space<vmem>>, vector<1x8x128xbf16>
    %324 = vector.shape_cast %323 : vector<1x8x128xbf16> to vector<8x128xbf16>
    %325 = arith.extf %324 : vector<8x128xbf16> to vector<8x128xf32>
    %326 = vector.extract_strided_slice %216 {offsets = [15, 0], sizes = [1, 128], strides = [1, 1]} : vector<27x128xf32> to vector<1x128xf32>
    %327 = vector.broadcast %326 : vector<1x128xf32> to vector<8x128xf32>
    %328 = arith.mulf %325, %327 : vector<8x128xf32>
    %329 = arith.addf %322, %328 : vector<8x128xf32>
    %c16_116 = arith.constant 16 : index
    %c0_117 = arith.constant 0 : index
    %c0_118 = arith.constant 0 : index
    %330 = vector.load %arg2[%c16_116, %c0_117, %c0_118] : memref<27x8x128xbf16, #tpu.memory_space<vmem>>, vector<1x8x128xbf16>
    %331 = vector.shape_cast %330 : vector<1x8x128xbf16> to vector<8x128xbf16>
    %332 = arith.extf %331 : vector<8x128xbf16> to vector<8x128xf32>
    %333 = vector.extract_strided_slice %216 {offsets = [16, 0], sizes = [1, 128], strides = [1, 1]} : vector<27x128xf32> to vector<1x128xf32>
    %334 = vector.broadcast %333 : vector<1x128xf32> to vector<8x128xf32>
    %335 = arith.mulf %332, %334 : vector<8x128xf32>
    %336 = arith.addf %329, %335 : vector<8x128xf32>
    %c17_119 = arith.constant 17 : index
    %c0_120 = arith.constant 0 : index
    %c0_121 = arith.constant 0 : index
    %337 = vector.load %arg2[%c17_119, %c0_120, %c0_121] : memref<27x8x128xbf16, #tpu.memory_space<vmem>>, vector<1x8x128xbf16>
    %338 = vector.shape_cast %337 : vector<1x8x128xbf16> to vector<8x128xbf16>
    %339 = arith.extf %338 : vector<8x128xbf16> to vector<8x128xf32>
    %340 = vector.extract_strided_slice %216 {offsets = [17, 0], sizes = [1, 128], strides = [1, 1]} : vector<27x128xf32> to vector<1x128xf32>
    %341 = vector.broadcast %340 : vector<1x128xf32> to vector<8x128xf32>
    %342 = arith.mulf %339, %341 : vector<8x128xf32>
    %343 = arith.addf %336, %342 : vector<8x128xf32>
    %c18_122 = arith.constant 18 : index
    %c0_123 = arith.constant 0 : index
    %c0_124 = arith.constant 0 : index
    %344 = vector.load %arg2[%c18_122, %c0_123, %c0_124] : memref<27x8x128xbf16, #tpu.memory_space<vmem>>, vector<1x8x128xbf16>
    %345 = vector.shape_cast %344 : vector<1x8x128xbf16> to vector<8x128xbf16>
    %346 = arith.extf %345 : vector<8x128xbf16> to vector<8x128xf32>
    %347 = vector.extract_strided_slice %216 {offsets = [18, 0], sizes = [1, 128], strides = [1, 1]} : vector<27x128xf32> to vector<1x128xf32>
    %348 = vector.broadcast %347 : vector<1x128xf32> to vector<8x128xf32>
    %349 = arith.mulf %346, %348 : vector<8x128xf32>
    %350 = arith.addf %343, %349 : vector<8x128xf32>
    %c19_125 = arith.constant 19 : index
    %c0_126 = arith.constant 0 : index
    %c0_127 = arith.constant 0 : index
    %351 = vector.load %arg2[%c19_125, %c0_126, %c0_127] : memref<27x8x128xbf16, #tpu.memory_space<vmem>>, vector<1x8x128xbf16>
    %352 = vector.shape_cast %351 : vector<1x8x128xbf16> to vector<8x128xbf16>
    %353 = arith.extf %352 : vector<8x128xbf16> to vector<8x128xf32>
    %354 = vector.extract_strided_slice %216 {offsets = [19, 0], sizes = [1, 128], strides = [1, 1]} : vector<27x128xf32> to vector<1x128xf32>
    %355 = vector.broadcast %354 : vector<1x128xf32> to vector<8x128xf32>
    %356 = arith.mulf %353, %355 : vector<8x128xf32>
    %357 = arith.addf %350, %356 : vector<8x128xf32>
    %c20_128 = arith.constant 20 : index
    %c0_129 = arith.constant 0 : index
    %c0_130 = arith.constant 0 : index
    %358 = vector.load %arg2[%c20_128, %c0_129, %c0_130] : memref<27x8x128xbf16, #tpu.memory_space<vmem>>, vector<1x8x128xbf16>
    %359 = vector.shape_cast %358 : vector<1x8x128xbf16> to vector<8x128xbf16>
    %360 = arith.extf %359 : vector<8x128xbf16> to vector<8x128xf32>
    %361 = vector.extract_strided_slice %216 {offsets = [20, 0], sizes = [1, 128], strides = [1, 1]} : vector<27x128xf32> to vector<1x128xf32>
    %362 = vector.broadcast %361 : vector<1x128xf32> to vector<8x128xf32>
    %363 = arith.mulf %360, %362 : vector<8x128xf32>
    %364 = arith.addf %357, %363 : vector<8x128xf32>
    %c21_131 = arith.constant 21 : index
    %c0_132 = arith.constant 0 : index
    %c0_133 = arith.constant 0 : index
    %365 = vector.load %arg2[%c21_131, %c0_132, %c0_133] : memref<27x8x128xbf16, #tpu.memory_space<vmem>>, vector<1x8x128xbf16>
    %366 = vector.shape_cast %365 : vector<1x8x128xbf16> to vector<8x128xbf16>
    %367 = arith.extf %366 : vector<8x128xbf16> to vector<8x128xf32>
    %368 = vector.extract_strided_slice %216 {offsets = [21, 0], sizes = [1, 128], strides = [1, 1]} : vector<27x128xf32> to vector<1x128xf32>
    %369 = vector.broadcast %368 : vector<1x128xf32> to vector<8x128xf32>
    %370 = arith.mulf %367, %369 : vector<8x128xf32>
    %371 = arith.addf %364, %370 : vector<8x128xf32>
    %c22_134 = arith.constant 22 : index
    %c0_135 = arith.constant 0 : index
    %c0_136 = arith.constant 0 : index
    %372 = vector.load %arg2[%c22_134, %c0_135, %c0_136] : memref<27x8x128xbf16, #tpu.memory_space<vmem>>, vector<1x8x128xbf16>
    %373 = vector.shape_cast %372 : vector<1x8x128xbf16> to vector<8x128xbf16>
    %374 = arith.extf %373 : vector<8x128xbf16> to vector<8x128xf32>
    %375 = vector.extract_strided_slice %216 {offsets = [22, 0], sizes = [1, 128], strides = [1, 1]} : vector<27x128xf32> to vector<1x128xf32>
    %376 = vector.broadcast %375 : vector<1x128xf32> to vector<8x128xf32>
    %377 = arith.mulf %374, %376 : vector<8x128xf32>
    %378 = arith.addf %371, %377 : vector<8x128xf32>
    %c23_137 = arith.constant 23 : index
    %c0_138 = arith.constant 0 : index
    %c0_139 = arith.constant 0 : index
    %379 = vector.load %arg2[%c23_137, %c0_138, %c0_139] : memref<27x8x128xbf16, #tpu.memory_space<vmem>>, vector<1x8x128xbf16>
    %380 = vector.shape_cast %379 : vector<1x8x128xbf16> to vector<8x128xbf16>
    %381 = arith.extf %380 : vector<8x128xbf16> to vector<8x128xf32>
    %382 = vector.extract_strided_slice %216 {offsets = [23, 0], sizes = [1, 128], strides = [1, 1]} : vector<27x128xf32> to vector<1x128xf32>
    %383 = vector.broadcast %382 : vector<1x128xf32> to vector<8x128xf32>
    %384 = arith.mulf %381, %383 : vector<8x128xf32>
    %385 = arith.addf %378, %384 : vector<8x128xf32>
    %c24_140 = arith.constant 24 : index
    %c0_141 = arith.constant 0 : index
    %c0_142 = arith.constant 0 : index
    %386 = vector.load %arg2[%c24_140, %c0_141, %c0_142] : memref<27x8x128xbf16, #tpu.memory_space<vmem>>, vector<1x8x128xbf16>
    %387 = vector.shape_cast %386 : vector<1x8x128xbf16> to vector<8x128xbf16>
    %388 = arith.extf %387 : vector<8x128xbf16> to vector<8x128xf32>
    %389 = vector.extract_strided_slice %216 {offsets = [24, 0], sizes = [1, 128], strides = [1, 1]} : vector<27x128xf32> to vector<1x128xf32>
    %390 = vector.broadcast %389 : vector<1x128xf32> to vector<8x128xf32>
    %391 = arith.mulf %388, %390 : vector<8x128xf32>
    %392 = arith.addf %385, %391 : vector<8x128xf32>
    %c25_143 = arith.constant 25 : index
    %c0_144 = arith.constant 0 : index
    %c0_145 = arith.constant 0 : index
    %393 = vector.load %arg2[%c25_143, %c0_144, %c0_145] : memref<27x8x128xbf16, #tpu.memory_space<vmem>>, vector<1x8x128xbf16>
    %394 = vector.shape_cast %393 : vector<1x8x128xbf16> to vector<8x128xbf16>
    %395 = arith.extf %394 : vector<8x128xbf16> to vector<8x128xf32>
    %396 = vector.extract_strided_slice %216 {offsets = [25, 0], sizes = [1, 128], strides = [1, 1]} : vector<27x128xf32> to vector<1x128xf32>
    %397 = vector.broadcast %396 : vector<1x128xf32> to vector<8x128xf32>
    %398 = arith.mulf %395, %397 : vector<8x128xf32>
    %399 = arith.addf %392, %398 : vector<8x128xf32>
    %c26_146 = arith.constant 26 : index
    %c0_147 = arith.constant 0 : index
    %c0_148 = arith.constant 0 : index
    %400 = vector.load %arg2[%c26_146, %c0_147, %c0_148] : memref<27x8x128xbf16, #tpu.memory_space<vmem>>, vector<1x8x128xbf16>
    %401 = vector.shape_cast %400 : vector<1x8x128xbf16> to vector<8x128xbf16>
    %402 = arith.extf %401 : vector<8x128xbf16> to vector<8x128xf32>
    %403 = vector.extract_strided_slice %216 {offsets = [26, 0], sizes = [1, 128], strides = [1, 1]} : vector<27x128xf32> to vector<1x128xf32>
    %404 = vector.broadcast %403 : vector<1x128xf32> to vector<8x128xf32>
    %405 = arith.mulf %402, %404 : vector<8x128xf32>
    %406 = arith.addf %399, %405 : vector<8x128xf32>
    %c1_149 = arith.constant 1 : index
    %c0_150 = arith.constant 0 : index
    %c0_151 = arith.constant 0 : index
    %407 = vector.load %arg3[%c1_149, %c0_150, %c0_151] : memref<8x8x128xf32, #tpu.memory_space<vmem>>, vector<1x8x128xf32>
    %408 = vector.shape_cast %407 : vector<1x8x128xf32> to vector<8x128xf32>
    %409 = vector.shape_cast %406 : vector<8x128xf32> to vector<1x8x128xf32>
    tpu.vector_store %arg3[%c1_149, %c0_150, %c0_151], %409 {strides = array<i32>} : memref<8x8x128xf32, #tpu.memory_space<vmem>>, vector<1x8x128xf32>,
    %c2_152 = arith.constant 2 : index
    %c0_153 = arith.constant 0 : index
    %c0_154 = arith.constant 0 : index
    %410 = vector.load %arg1[%c2_152, %c0_153, %c0_154] : memref<8x27x128xf32, #tpu.memory_space<vmem>>, vector<1x27x128xf32>
    %411 = vector.shape_cast %410 : vector<1x27x128xf32> to vector<27x128xf32>
    %cst_155 = arith.constant dense<0xFF800000> : vector<128xf32>
    %412 = vector.multi_reduction <maximumf>, %411, %cst_155 [0] : vector<27x128xf32> to vector<128xf32>
    %413 = vector.shape_cast %412 : vector<128xf32> to vector<1x128xf32>
    %414 = vector.broadcast %413 : vector<1x128xf32> to vector<27x128xf32>
    %415 = arith.subf %411, %414 : vector<27x128xf32>
    %416 = math.exp %415 : vector<27x128xf32>
    %cst_156 = arith.constant dense<0.000000e+00> : vector<128xf32>
    %417 = vector.multi_reduction <add>, %416, %cst_156 [0] : vector<27x128xf32> to vector<128xf32>
    %418 = vector.shape_cast %417 : vector<128xf32> to vector<1x128xf32>
    %419 = tpu.reciprocal %418 {approx = true} : vector<1x128xf32> -> vector<1x128xf32>
    %420 = vector.broadcast %419 : vector<1x128xf32> to vector<27x128xf32>
    %421 = arith.mulf %416, %420 : vector<27x128xf32>
    %cst_157 = arith.constant 0.000000e+00 : f32
    %422 = vector.broadcast %cst_157 : f32 to vector<8x128xf32>
    %c0_158 = arith.constant 0 : index
    %c0_159 = arith.constant 0 : index
    %c0_160 = arith.constant 0 : index
    %423 = vector.load %arg2[%c0_158, %c0_159, %c0_160] : memref<27x8x128xbf16, #tpu.memory_space<vmem>>, vector<1x8x128xbf16>
    %424 = vector.shape_cast %423 : vector<1x8x128xbf16> to vector<8x128xbf16>
    %425 = arith.extf %424 : vector<8x128xbf16> to vector<8x128xf32>
    %426 = vector.extract_strided_slice %421 {offsets = [0, 0], sizes = [1, 128], strides = [1, 1]} : vector<27x128xf32> to vector<1x128xf32>
    %427 = vector.broadcast %426 : vector<1x128xf32> to vector<8x128xf32>
    %428 = arith.mulf %425, %427 : vector<8x128xf32>
    %429 = arith.addf %422, %428 : vector<8x128xf32>
    %c1_161 = arith.constant 1 : index
    %c0_162 = arith.constant 0 : index
    %c0_163 = arith.constant 0 : index
    %430 = vector.load %arg2[%c1_161, %c0_162, %c0_163] : memref<27x8x128xbf16, #tpu.memory_space<vmem>>, vector<1x8x128xbf16>
    %431 = vector.shape_cast %430 : vector<1x8x128xbf16> to vector<8x128xbf16>
    %432 = arith.extf %431 : vector<8x128xbf16> to vector<8x128xf32>
    %433 = vector.extract_strided_slice %421 {offsets = [1, 0], sizes = [1, 128], strides = [1, 1]} : vector<27x128xf32> to vector<1x128xf32>
    %434 = vector.broadcast %433 : vector<1x128xf32> to vector<8x128xf32>
    %435 = arith.mulf %432, %434 : vector<8x128xf32>
    %436 = arith.addf %429, %435 : vector<8x128xf32>
    %c2_164 = arith.constant 2 : index
    %c0_165 = arith.constant 0 : index
    %c0_166 = arith.constant 0 : index
    %437 = vector.load %arg2[%c2_164, %c0_165, %c0_166] : memref<27x8x128xbf16, #tpu.memory_space<vmem>>, vector<1x8x128xbf16>
    %438 = vector.shape_cast %437 : vector<1x8x128xbf16> to vector<8x128xbf16>
    %439 = arith.extf %438 : vector<8x128xbf16> to vector<8x128xf32>
    %440 = vector.extract_strided_slice %421 {offsets = [2, 0], sizes = [1, 128], strides = [1, 1]} : vector<27x128xf32> to vector<1x128xf32>
    %441 = vector.broadcast %440 : vector<1x128xf32> to vector<8x128xf32>
    %442 = arith.mulf %439, %441 : vector<8x128xf32>
    %443 = arith.addf %436, %442 : vector<8x128xf32>
    %c3_167 = arith.constant 3 : index
    %c0_168 = arith.constant 0 : index
    %c0_169 = arith.constant 0 : index
    %444 = vector.load %arg2[%c3_167, %c0_168, %c0_169] : memref<27x8x128xbf16, #tpu.memory_space<vmem>>, vector<1x8x128xbf16>
    %445 = vector.shape_cast %444 : vector<1x8x128xbf16> to vector<8x128xbf16>
    %446 = arith.extf %445 : vector<8x128xbf16> to vector<8x128xf32>
    %447 = vector.extract_strided_slice %421 {offsets = [3, 0], sizes = [1, 128], strides = [1, 1]} : vector<27x128xf32> to vector<1x128xf32>
    %448 = vector.broadcast %447 : vector<1x128xf32> to vector<8x128xf32>
    %449 = arith.mulf %446, %448 : vector<8x128xf32>
    %450 = arith.addf %443, %449 : vector<8x128xf32>
    %c4_170 = arith.constant 4 : index
    %c0_171 = arith.constant 0 : index
    %c0_172 = arith.constant 0 : index
    %451 = vector.load %arg2[%c4_170, %c0_171, %c0_172] : memref<27x8x128xbf16, #tpu.memory_space<vmem>>, vector<1x8x128xbf16>
    %452 = vector.shape_cast %451 : vector<1x8x128xbf16> to vector<8x128xbf16>
    %453 = arith.extf %452 : vector<8x128xbf16> to vector<8x128xf32>
    %454 = vector.extract_strided_slice %421 {offsets = [4, 0], sizes = [1, 128], strides = [1, 1]} : vector<27x128xf32> to vector<1x128xf32>
    %455 = vector.broadcast %454 : vector<1x128xf32> to vector<8x128xf32>
    %456 = arith.mulf %453, %455 : vector<8x128xf32>
    %457 = arith.addf %450, %456 : vector<8x128xf32>
    %c5_173 = arith.constant 5 : index
    %c0_174 = arith.constant 0 : index
    %c0_175 = arith.constant 0 : index
    %458 = vector.load %arg2[%c5_173, %c0_174, %c0_175] : memref<27x8x128xbf16, #tpu.memory_space<vmem>>, vector<1x8x128xbf16>
    %459 = vector.shape_cast %458 : vector<1x8x128xbf16> to vector<8x128xbf16>
    %460 = arith.extf %459 : vector<8x128xbf16> to vector<8x128xf32>
    %461 = vector.extract_strided_slice %421 {offsets = [5, 0], sizes = [1, 128], strides = [1, 1]} : vector<27x128xf32> to vector<1x128xf32>
    %462 = vector.broadcast %461 : vector<1x128xf32> to vector<8x128xf32>
    %463 = arith.mulf %460, %462 : vector<8x128xf32>
    %464 = arith.addf %457, %463 : vector<8x128xf32>
    %c6_176 = arith.constant 6 : index
    %c0_177 = arith.constant 0 : index
    %c0_178 = arith.constant 0 : index
    %465 = vector.load %arg2[%c6_176, %c0_177, %c0_178] : memref<27x8x128xbf16, #tpu.memory_space<vmem>>, vector<1x8x128xbf16>
    %466 = vector.shape_cast %465 : vector<1x8x128xbf16> to vector<8x128xbf16>
    %467 = arith.extf %466 : vector<8x128xbf16> to vector<8x128xf32>
    %468 = vector.extract_strided_slice %421 {offsets = [6, 0], sizes = [1, 128], strides = [1, 1]} : vector<27x128xf32> to vector<1x128xf32>
    %469 = vector.broadcast %468 : vector<1x128xf32> to vector<8x128xf32>
    %470 = arith.mulf %467, %469 : vector<8x128xf32>
    %471 = arith.addf %464, %470 : vector<8x128xf32>
    %c7_179 = arith.constant 7 : index
    %c0_180 = arith.constant 0 : index
    %c0_181 = arith.constant 0 : index
    %472 = vector.load %arg2[%c7_179, %c0_180, %c0_181] : memref<27x8x128xbf16, #tpu.memory_space<vmem>>, vector<1x8x128xbf16>
    %473 = vector.shape_cast %472 : vector<1x8x128xbf16> to vector<8x128xbf16>
    %474 = arith.extf %473 : vector<8x128xbf16> to vector<8x128xf32>
    %475 = vector.extract_strided_slice %421 {offsets = [7, 0], sizes = [1, 128], strides = [1, 1]} : vector<27x128xf32> to vector<1x128xf32>
    %476 = vector.broadcast %475 : vector<1x128xf32> to vector<8x128xf32>
    %477 = arith.mulf %474, %476 : vector<8x128xf32>
    %478 = arith.addf %471, %477 : vector<8x128xf32>
    %c8_182 = arith.constant 8 : index
    %c0_183 = arith.constant 0 : index
    %c0_184 = arith.constant 0 : index
    %479 = vector.load %arg2[%c8_182, %c0_183, %c0_184] : memref<27x8x128xbf16, #tpu.memory_space<vmem>>, vector<1x8x128xbf16>
    %480 = vector.shape_cast %479 : vector<1x8x128xbf16> to vector<8x128xbf16>
    %481 = arith.extf %480 : vector<8x128xbf16> to vector<8x128xf32>
    %482 = vector.extract_strided_slice %421 {offsets = [8, 0], sizes = [1, 128], strides = [1, 1]} : vector<27x128xf32> to vector<1x128xf32>
    %483 = vector.broadcast %482 : vector<1x128xf32> to vector<8x128xf32>
    %484 = arith.mulf %481, %483 : vector<8x128xf32>
    %485 = arith.addf %478, %484 : vector<8x128xf32>
    %c9_185 = arith.constant 9 : index
    %c0_186 = arith.constant 0 : index
    %c0_187 = arith.constant 0 : index
    %486 = vector.load %arg2[%c9_185, %c0_186, %c0_187] : memref<27x8x128xbf16, #tpu.memory_space<vmem>>, vector<1x8x128xbf16>
    %487 = vector.shape_cast %486 : vector<1x8x128xbf16> to vector<8x128xbf16>
    %488 = arith.extf %487 : vector<8x128xbf16> to vector<8x128xf32>
    %489 = vector.extract_strided_slice %421 {offsets = [9, 0], sizes = [1, 128], strides = [1, 1]} : vector<27x128xf32> to vector<1x128xf32>
    %490 = vector.broadcast %489 : vector<1x128xf32> to vector<8x128xf32>
    %491 = arith.mulf %488, %490 : vector<8x128xf32>
    %492 = arith.addf %485, %491 : vector<8x128xf32>
    %c10_188 = arith.constant 10 : index
    %c0_189 = arith.constant 0 : index
    %c0_190 = arith.constant 0 : index
    %493 = vector.load %arg2[%c10_188, %c0_189, %c0_190] : memref<27x8x128xbf16, #tpu.memory_space<vmem>>, vector<1x8x128xbf16>
    %494 = vector.shape_cast %493 : vector<1x8x128xbf16> to vector<8x128xbf16>
    %495 = arith.extf %494 : vector<8x128xbf16> to vector<8x128xf32>
    %496 = vector.extract_strided_slice %421 {offsets = [10, 0], sizes = [1, 128], strides = [1, 1]} : vector<27x128xf32> to vector<1x128xf32>
    %497 = vector.broadcast %496 : vector<1x128xf32> to vector<8x128xf32>
    %498 = arith.mulf %495, %497 : vector<8x128xf32>
    %499 = arith.addf %492, %498 : vector<8x128xf32>
    %c11_191 = arith.constant 11 : index
    %c0_192 = arith.constant 0 : index
    %c0_193 = arith.constant 0 : index
    %500 = vector.load %arg2[%c11_191, %c0_192, %c0_193] : memref<27x8x128xbf16, #tpu.memory_space<vmem>>, vector<1x8x128xbf16>
    %501 = vector.shape_cast %500 : vector<1x8x128xbf16> to vector<8x128xbf16>
    %502 = arith.extf %501 : vector<8x128xbf16> to vector<8x128xf32>
    %503 = vector.extract_strided_slice %421 {offsets = [11, 0], sizes = [1, 128], strides = [1, 1]} : vector<27x128xf32> to vector<1x128xf32>
    %504 = vector.broadcast %503 : vector<1x128xf32> to vector<8x128xf32>
    %505 = arith.mulf %502, %504 : vector<8x128xf32>
    %506 = arith.addf %499, %505 : vector<8x128xf32>
    %c12_194 = arith.constant 12 : index
    %c0_195 = arith.constant 0 : index
    %c0_196 = arith.constant 0 : index
    %507 = vector.load %arg2[%c12_194, %c0_195, %c0_196] : memref<27x8x128xbf16, #tpu.memory_space<vmem>>, vector<1x8x128xbf16>
    %508 = vector.shape_cast %507 : vector<1x8x128xbf16> to vector<8x128xbf16>
    %509 = arith.extf %508 : vector<8x128xbf16> to vector<8x128xf32>
    %510 = vector.extract_strided_slice %421 {offsets = [12, 0], sizes = [1, 128], strides = [1, 1]} : vector<27x128xf32> to vector<1x128xf32>
    %511 = vector.broadcast %510 : vector<1x128xf32> to vector<8x128xf32>
    %512 = arith.mulf %509, %511 : vector<8x128xf32>
    %513 = arith.addf %506, %512 : vector<8x128xf32>
    %c13_197 = arith.constant 13 : index
    %c0_198 = arith.constant 0 : index
    %c0_199 = arith.constant 0 : index
    %514 = vector.load %arg2[%c13_197, %c0_198, %c0_199] : memref<27x8x128xbf16, #tpu.memory_space<vmem>>, vector<1x8x128xbf16>
    %515 = vector.shape_cast %514 : vector<1x8x128xbf16> to vector<8x128xbf16>
    %516 = arith.extf %515 : vector<8x128xbf16> to vector<8x128xf32>
    %517 = vector.extract_strided_slice %421 {offsets = [13, 0], sizes = [1, 128], strides = [1, 1]} : vector<27x128xf32> to vector<1x128xf32>
    %518 = vector.broadcast %517 : vector<1x128xf32> to vector<8x128xf32>
    %519 = arith.mulf %516, %518 : vector<8x128xf32>
    %520 = arith.addf %513, %519 : vector<8x128xf32>
    %c14_200 = arith.constant 14 : index
    %c0_201 = arith.constant 0 : index
    %c0_202 = arith.constant 0 : index
    %521 = vector.load %arg2[%c14_200, %c0_201, %c0_202] : memref<27x8x128xbf16, #tpu.memory_space<vmem>>, vector<1x8x128xbf16>
    %522 = vector.shape_cast %521 : vector<1x8x128xbf16> to vector<8x128xbf16>
    %523 = arith.extf %522 : vector<8x128xbf16> to vector<8x128xf32>
    %524 = vector.extract_strided_slice %421 {offsets = [14, 0], sizes = [1, 128], strides = [1, 1]} : vector<27x128xf32> to vector<1x128xf32>
    %525 = vector.broadcast %524 : vector<1x128xf32> to vector<8x128xf32>
    %526 = arith.mulf %523, %525 : vector<8x128xf32>
    %527 = arith.addf %520, %526 : vector<8x128xf32>
    %c15_203 = arith.constant 15 : index
    %c0_204 = arith.constant 0 : index
    %c0_205 = arith.constant 0 : index
    %528 = vector.load %arg2[%c15_203, %c0_204, %c0_205] : memref<27x8x128xbf16, #tpu.memory_space<vmem>>, vector<1x8x128xbf16>
    %529 = vector.shape_cast %528 : vector<1x8x128xbf16> to vector<8x128xbf16>
    %530 = arith.extf %529 : vector<8x128xbf16> to vector<8x128xf32>
    %531 = vector.extract_strided_slice %421 {offsets = [15, 0], sizes = [1, 128], strides = [1, 1]} : vector<27x128xf32> to vector<1x128xf32>
    %532 = vector.broadcast %531 : vector<1x128xf32> to vector<8x128xf32>
    %533 = arith.mulf %530, %532 : vector<8x128xf32>
    %534 = arith.addf %527, %533 : vector<8x128xf32>
    %c16_206 = arith.constant 16 : index
    %c0_207 = arith.constant 0 : index
    %c0_208 = arith.constant 0 : index
    %535 = vector.load %arg2[%c16_206, %c0_207, %c0_208] : memref<27x8x128xbf16, #tpu.memory_space<vmem>>, vector<1x8x128xbf16>
    %536 = vector.shape_cast %535 : vector<1x8x128xbf16> to vector<8x128xbf16>
    %537 = arith.extf %536 : vector<8x128xbf16> to vector<8x128xf32>
    %538 = vector.extract_strided_slice %421 {offsets = [16, 0], sizes = [1, 128], strides = [1, 1]} : vector<27x128xf32> to vector<1x128xf32>
    %539 = vector.broadcast %538 : vector<1x128xf32> to vector<8x128xf32>
    %540 = arith.mulf %537, %539 : vector<8x128xf32>
    %541 = arith.addf %534, %540 : vector<8x128xf32>
    %c17_209 = arith.constant 17 : index
    %c0_210 = arith.constant 0 : index
    %c0_211 = arith.constant 0 : index
    %542 = vector.load %arg2[%c17_209, %c0_210, %c0_211] : memref<27x8x128xbf16, #tpu.memory_space<vmem>>, vector<1x8x128xbf16>
    %543 = vector.shape_cast %542 : vector<1x8x128xbf16> to vector<8x128xbf16>
    %544 = arith.extf %543 : vector<8x128xbf16> to vector<8x128xf32>
    %545 = vector.extract_strided_slice %421 {offsets = [17, 0], sizes = [1, 128], strides = [1, 1]} : vector<27x128xf32> to vector<1x128xf32>
    %546 = vector.broadcast %545 : vector<1x128xf32> to vector<8x128xf32>
    %547 = arith.mulf %544, %546 : vector<8x128xf32>
    %548 = arith.addf %541, %547 : vector<8x128xf32>
    %c18_212 = arith.constant 18 : index
    %c0_213 = arith.constant 0 : index
    %c0_214 = arith.constant 0 : index
    %549 = vector.load %arg2[%c18_212, %c0_213, %c0_214] : memref<27x8x128xbf16, #tpu.memory_space<vmem>>, vector<1x8x128xbf16>
    %550 = vector.shape_cast %549 : vector<1x8x128xbf16> to vector<8x128xbf16>
    %551 = arith.extf %550 : vector<8x128xbf16> to vector<8x128xf32>
    %552 = vector.extract_strided_slice %421 {offsets = [18, 0], sizes = [1, 128], strides = [1, 1]} : vector<27x128xf32> to vector<1x128xf32>
    %553 = vector.broadcast %552 : vector<1x128xf32> to vector<8x128xf32>
    %554 = arith.mulf %551, %553 : vector<8x128xf32>
    %555 = arith.addf %548, %554 : vector<8x128xf32>
    %c19_215 = arith.constant 19 : index
    %c0_216 = arith.constant 0 : index
    %c0_217 = arith.constant 0 : index
    %556 = vector.load %arg2[%c19_215, %c0_216, %c0_217] : memref<27x8x128xbf16, #tpu.memory_space<vmem>>, vector<1x8x128xbf16>
    %557 = vector.shape_cast %556 : vector<1x8x128xbf16> to vector<8x128xbf16>
    %558 = arith.extf %557 : vector<8x128xbf16> to vector<8x128xf32>
    %559 = vector.extract_strided_slice %421 {offsets = [19, 0], sizes = [1, 128], strides = [1, 1]} : vector<27x128xf32> to vector<1x128xf32>
    %560 = vector.broadcast %559 : vector<1x128xf32> to vector<8x128xf32>
    %561 = arith.mulf %558, %560 : vector<8x128xf32>
    %562 = arith.addf %555, %561 : vector<8x128xf32>
    %c20_218 = arith.constant 20 : index
    %c0_219 = arith.constant 0 : index
    %c0_220 = arith.constant 0 : index
    %563 = vector.load %arg2[%c20_218, %c0_219, %c0_220] : memref<27x8x128xbf16, #tpu.memory_space<vmem>>, vector<1x8x128xbf16>
    %564 = vector.shape_cast %563 : vector<1x8x128xbf16> to vector<8x128xbf16>
    %565 = arith.extf %564 : vector<8x128xbf16> to vector<8x128xf32>
    %566 = vector.extract_strided_slice %421 {offsets = [20, 0], sizes = [1, 128], strides = [1, 1]} : vector<27x128xf32> to vector<1x128xf32>
    %567 = vector.broadcast %566 : vector<1x128xf32> to vector<8x128xf32>
    %568 = arith.mulf %565, %567 : vector<8x128xf32>
    %569 = arith.addf %562, %568 : vector<8x128xf32>
    %c21_221 = arith.constant 21 : index
    %c0_222 = arith.constant 0 : index
    %c0_223 = arith.constant 0 : index
    %570 = vector.load %arg2[%c21_221, %c0_222, %c0_223] : memref<27x8x128xbf16, #tpu.memory_space<vmem>>, vector<1x8x128xbf16>
    %571 = vector.shape_cast %570 : vector<1x8x128xbf16> to vector<8x128xbf16>
    %572 = arith.extf %571 : vector<8x128xbf16> to vector<8x128xf32>
    %573 = vector.extract_strided_slice %421 {offsets = [21, 0], sizes = [1, 128], strides = [1, 1]} : vector<27x128xf32> to vector<1x128xf32>
    %574 = vector.broadcast %573 : vector<1x128xf32> to vector<8x128xf32>
    %575 = arith.mulf %572, %574 : vector<8x128xf32>
    %576 = arith.addf %569, %575 : vector<8x128xf32>
    %c22_224 = arith.constant 22 : index
    %c0_225 = arith.constant 0 : index
    %c0_226 = arith.constant 0 : index
    %577 = vector.load %arg2[%c22_224, %c0_225, %c0_226] : memref<27x8x128xbf16, #tpu.memory_space<vmem>>, vector<1x8x128xbf16>
    %578 = vector.shape_cast %577 : vector<1x8x128xbf16> to vector<8x128xbf16>
    %579 = arith.extf %578 : vector<8x128xbf16> to vector<8x128xf32>
    %580 = vector.extract_strided_slice %421 {offsets = [22, 0], sizes = [1, 128], strides = [1, 1]} : vector<27x128xf32> to vector<1x128xf32>
    %581 = vector.broadcast %580 : vector<1x128xf32> to vector<8x128xf32>
    %582 = arith.mulf %579, %581 : vector<8x128xf32>
    %583 = arith.addf %576, %582 : vector<8x128xf32>
    %c23_227 = arith.constant 23 : index
    %c0_228 = arith.constant 0 : index
    %c0_229 = arith.constant 0 : index
    %584 = vector.load %arg2[%c23_227, %c0_228, %c0_229] : memref<27x8x128xbf16, #tpu.memory_space<vmem>>, vector<1x8x128xbf16>
    %585 = vector.shape_cast %584 : vector<1x8x128xbf16> to vector<8x128xbf16>
    %586 = arith.extf %585 : vector<8x128xbf16> to vector<8x128xf32>
    %587 = vector.extract_strided_slice %421 {offsets = [23, 0], sizes = [1, 128], strides = [1, 1]} : vector<27x128xf32> to vector<1x128xf32>
    %588 = vector.broadcast %587 : vector<1x128xf32> to vector<8x128xf32>
    %589 = arith.mulf %586, %588 : vector<8x128xf32>
    %590 = arith.addf %583, %589 : vector<8x128xf32>
    %c24_230 = arith.constant 24 : index
    %c0_231 = arith.constant 0 : index
    %c0_232 = arith.constant 0 : index
    %591 = vector.load %arg2[%c24_230, %c0_231, %c0_232] : memref<27x8x128xbf16, #tpu.memory_space<vmem>>, vector<1x8x128xbf16>
    %592 = vector.shape_cast %591 : vector<1x8x128xbf16> to vector<8x128xbf16>
    %593 = arith.extf %592 : vector<8x128xbf16> to vector<8x128xf32>
    %594 = vector.extract_strided_slice %421 {offsets = [24, 0], sizes = [1, 128], strides = [1, 1]} : vector<27x128xf32> to vector<1x128xf32>
    %595 = vector.broadcast %594 : vector<1x128xf32> to vector<8x128xf32>
    %596 = arith.mulf %593, %595 : vector<8x128xf32>
    %597 = arith.addf %590, %596 : vector<8x128xf32>
    %c25_233 = arith.constant 25 : index
    %c0_234 = arith.constant 0 : index
    %c0_235 = arith.constant 0 : index
    %598 = vector.load %arg2[%c25_233, %c0_234, %c0_235] : memref<27x8x128xbf16, #tpu.memory_space<vmem>>, vector<1x8x128xbf16>
    %599 = vector.shape_cast %598 : vector<1x8x128xbf16> to vector<8x128xbf16>
    %600 = arith.extf %599 : vector<8x128xbf16> to vector<8x128xf32>
    %601 = vector.extract_strided_slice %421 {offsets = [25, 0], sizes = [1, 128], strides = [1, 1]} : vector<27x128xf32> to vector<1x128xf32>
    %602 = vector.broadcast %601 : vector<1x128xf32> to vector<8x128xf32>
    %603 = arith.mulf %600, %602 : vector<8x128xf32>
    %604 = arith.addf %597, %603 : vector<8x128xf32>
    %c26_236 = arith.constant 26 : index
    %c0_237 = arith.constant 0 : index
    %c0_238 = arith.constant 0 : index
    %605 = vector.load %arg2[%c26_236, %c0_237, %c0_238] : memref<27x8x128xbf16, #tpu.memory_space<vmem>>, vector<1x8x128xbf16>
    %606 = vector.shape_cast %605 : vector<1x8x128xbf16> to vector<8x128xbf16>
    %607 = arith.extf %606 : vector<8x128xbf16> to vector<8x128xf32>
    %608 = vector.extract_strided_slice %421 {offsets = [26, 0], sizes = [1, 128], strides = [1, 1]} : vector<27x128xf32> to vector<1x128xf32>
    %609 = vector.broadcast %608 : vector<1x128xf32> to vector<8x128xf32>
    %610 = arith.mulf %607, %609 : vector<8x128xf32>
    %611 = arith.addf %604, %610 : vector<8x128xf32>
    %c2_239 = arith.constant 2 : index
    %c0_240 = arith.constant 0 : index
    %c0_241 = arith.constant 0 : index
    %612 = vector.load %arg3[%c2_239, %c0_240, %c0_241] : memref<8x8x128xf32, #tpu.memory_space<vmem>>, vector<1x8x128xf32>
    %613 = vector.shape_cast %612 : vector<1x8x128xf32> to vector<8x128xf32>
    %614 = vector.shape_cast %611 : vector<8x128xf32> to vector<1x8x128xf32>
    tpu.vector_store %arg3[%c2_239, %c0_240, %c0_241], %614 {strides = array<i32>} : memref<8x8x128xf32, #tpu.memory_space<vmem>>, vector<1x8x128xf32>,
    %c3_242 = arith.constant 3 : index
    %c0_243 = arith.constant 0 : index
    %c0_244 = arith.constant 0 : index
    %615 = vector.load %arg1[%c3_242, %c0_243, %c0_244] : memref<8x27x128xf32, #tpu.memory_space<vmem>>, vector<1x27x128xf32>
    %616 = vector.shape_cast %615 : vector<1x27x128xf32> to vector<27x128xf32>
    %cst_245 = arith.constant dense<0xFF800000> : vector<128xf32>
    %617 = vector.multi_reduction <maximumf>, %616, %cst_245 [0] : vector<27x128xf32> to vector<128xf32>
    %618 = vector.shape_cast %617 : vector<128xf32> to vector<1x128xf32>
    %619 = vector.broadcast %618 : vector<1x128xf32> to vector<27x128xf32>
    %620 = arith.subf %616, %619 : vector<27x128xf32>
    %621 = math.exp %620 : vector<27x128xf32>
    %cst_246 = arith.constant dense<0.000000e+00> : vector<128xf32>
    %622 = vector.multi_reduction <add>, %621, %cst_246 [0] : vector<27x128xf32> to vector<128xf32>
    %623 = vector.shape_cast %622 : vector<128xf32> to vector<1x128xf32>
    %624 = tpu.reciprocal %623 {approx = true} : vector<1x128xf32> -> vector<1x128xf32>
    %625 = vector.broadcast %624 : vector<1x128xf32> to vector<27x128xf32>
    %626 = arith.mulf %621, %625 : vector<27x128xf32>
    %cst_247 = arith.constant 0.000000e+00 : f32
    %627 = vector.broadcast %cst_247 : f32 to vector<8x128xf32>
    %c0_248 = arith.constant 0 : index
    %c0_249 = arith.constant 0 : index
    %c0_250 = arith.constant 0 : index
    %628 = vector.load %arg2[%c0_248, %c0_249, %c0_250] : memref<27x8x128xbf16, #tpu.memory_space<vmem>>, vector<1x8x128xbf16>
    %629 = vector.shape_cast %628 : vector<1x8x128xbf16> to vector<8x128xbf16>
    %630 = arith.extf %629 : vector<8x128xbf16> to vector<8x128xf32>
    %631 = vector.extract_strided_slice %626 {offsets = [0, 0], sizes = [1, 128], strides = [1, 1]} : vector<27x128xf32> to vector<1x128xf32>
    %632 = vector.broadcast %631 : vector<1x128xf32> to vector<8x128xf32>
    %633 = arith.mulf %630, %632 : vector<8x128xf32>
    %634 = arith.addf %627, %633 : vector<8x128xf32>
    %c1_251 = arith.constant 1 : index
    %c0_252 = arith.constant 0 : index
    %c0_253 = arith.constant 0 : index
    %635 = vector.load %arg2[%c1_251, %c0_252, %c0_253] : memref<27x8x128xbf16, #tpu.memory_space<vmem>>, vector<1x8x128xbf16>
    %636 = vector.shape_cast %635 : vector<1x8x128xbf16> to vector<8x128xbf16>
    %637 = arith.extf %636 : vector<8x128xbf16> to vector<8x128xf32>
    %638 = vector.extract_strided_slice %626 {offsets = [1, 0], sizes = [1, 128], strides = [1, 1]} : vector<27x128xf32> to vector<1x128xf32>
    %639 = vector.broadcast %638 : vector<1x128xf32> to vector<8x128xf32>
    %640 = arith.mulf %637, %639 : vector<8x128xf32>
    %641 = arith.addf %634, %640 : vector<8x128xf32>
    %c2_254 = arith.constant 2 : index
    %c0_255 = arith.constant 0 : index
    %c0_256 = arith.constant 0 : index
    %642 = vector.load %arg2[%c2_254, %c0_255, %c0_256] : memref<27x8x128xbf16, #tpu.memory_space<vmem>>, vector<1x8x128xbf16>
    %643 = vector.shape_cast %642 : vector<1x8x128xbf16> to vector<8x128xbf16>
    %644 = arith.extf %643 : vector<8x128xbf16> to vector<8x128xf32>
    %645 = vector.extract_strided_slice %626 {offsets = [2, 0], sizes = [1, 128], strides = [1, 1]} : vector<27x128xf32> to vector<1x128xf32>
    %646 = vector.broadcast %645 : vector<1x128xf32> to vector<8x128xf32>
    %647 = arith.mulf %644, %646 : vector<8x128xf32>
    %648 = arith.addf %641, %647 : vector<8x128xf32>
    %c3_257 = arith.constant 3 : index
    %c0_258 = arith.constant 0 : index
    %c0_259 = arith.constant 0 : index
    %649 = vector.load %arg2[%c3_257, %c0_258, %c0_259] : memref<27x8x128xbf16, #tpu.memory_space<vmem>>, vector<1x8x128xbf16>
    %650 = vector.shape_cast %649 : vector<1x8x128xbf16> to vector<8x128xbf16>
    %651 = arith.extf %650 : vector<8x128xbf16> to vector<8x128xf32>
    %652 = vector.extract_strided_slice %626 {offsets = [3, 0], sizes = [1, 128], strides = [1, 1]} : vector<27x128xf32> to vector<1x128xf32>
    %653 = vector.broadcast %652 : vector<1x128xf32> to vector<8x128xf32>
    %654 = arith.mulf %651, %653 : vector<8x128xf32>
    %655 = arith.addf %648, %654 : vector<8x128xf32>
    %c4_260 = arith.constant 4 : index
    %c0_261 = arith.constant 0 : index
    %c0_262 = arith.constant 0 : index
    %656 = vector.load %arg2[%c4_260, %c0_261, %c0_262] : memref<27x8x128xbf16, #tpu.memory_space<vmem>>, vector<1x8x128xbf16>
    %657 = vector.shape_cast %656 : vector<1x8x128xbf16> to vector<8x128xbf16>
    %658 = arith.extf %657 : vector<8x128xbf16> to vector<8x128xf32>
    %659 = vector.extract_strided_slice %626 {offsets = [4, 0], sizes = [1, 128], strides = [1, 1]} : vector<27x128xf32> to vector<1x128xf32>
    %660 = vector.broadcast %659 : vector<1x128xf32> to vector<8x128xf32>
    %661 = arith.mulf %658, %660 : vector<8x128xf32>
    %662 = arith.addf %655, %661 : vector<8x128xf32>
    %c5_263 = arith.constant 5 : index
    %c0_264 = arith.constant 0 : index
    %c0_265 = arith.constant 0 : index
    %663 = vector.load %arg2[%c5_263, %c0_264, %c0_265] : memref<27x8x128xbf16, #tpu.memory_space<vmem>>, vector<1x8x128xbf16>
    %664 = vector.shape_cast %663 : vector<1x8x128xbf16> to vector<8x128xbf16>
    %665 = arith.extf %664 : vector<8x128xbf16> to vector<8x128xf32>
    %666 = vector.extract_strided_slice %626 {offsets = [5, 0], sizes = [1, 128], strides = [1, 1]} : vector<27x128xf32> to vector<1x128xf32>
    %667 = vector.broadcast %666 : vector<1x128xf32> to vector<8x128xf32>
    %668 = arith.mulf %665, %667 : vector<8x128xf32>
    %669 = arith.addf %662, %668 : vector<8x128xf32>
    %c6_266 = arith.constant 6 : index
    %c0_267 = arith.constant 0 : index
    %c0_268 = arith.constant 0 : index
    %670 = vector.load %arg2[%c6_266, %c0_267, %c0_268] : memref<27x8x128xbf16, #tpu.memory_space<vmem>>, vector<1x8x128xbf16>
    %671 = vector.shape_cast %670 : vector<1x8x128xbf16> to vector<8x128xbf16>
    %672 = arith.extf %671 : vector<8x128xbf16> to vector<8x128xf32>
    %673 = vector.extract_strided_slice %626 {offsets = [6, 0], sizes = [1, 128], strides = [1, 1]} : vector<27x128xf32> to vector<1x128xf32>
    %674 = vector.broadcast %673 : vector<1x128xf32> to vector<8x128xf32>
    %675 = arith.mulf %672, %674 : vector<8x128xf32>
    %676 = arith.addf %669, %675 : vector<8x128xf32>
    %c7_269 = arith.constant 7 : index
    %c0_270 = arith.constant 0 : index
    %c0_271 = arith.constant 0 : index
    %677 = vector.load %arg2[%c7_269, %c0_270, %c0_271] : memref<27x8x128xbf16, #tpu.memory_space<vmem>>, vector<1x8x128xbf16>
    %678 = vector.shape_cast %677 : vector<1x8x128xbf16> to vector<8x128xbf16>
    %679 = arith.extf %678 : vector<8x128xbf16> to vector<8x128xf32>
    %680 = vector.extract_strided_slice %626 {offsets = [7, 0], sizes = [1, 128], strides = [1, 1]} : vector<27x128xf32> to vector<1x128xf32>
    %681 = vector.broadcast %680 : vector<1x128xf32> to vector<8x128xf32>
    %682 = arith.mulf %679, %681 : vector<8x128xf32>
    %683 = arith.addf %676, %682 : vector<8x128xf32>
    %c8_272 = arith.constant 8 : index
    %c0_273 = arith.constant 0 : index
    %c0_274 = arith.constant 0 : index
    %684 = vector.load %arg2[%c8_272, %c0_273, %c0_274] : memref<27x8x128xbf16, #tpu.memory_space<vmem>>, vector<1x8x128xbf16>
    %685 = vector.shape_cast %684 : vector<1x8x128xbf16> to vector<8x128xbf16>
    %686 = arith.extf %685 : vector<8x128xbf16> to vector<8x128xf32>
    %687 = vector.extract_strided_slice %626 {offsets = [8, 0], sizes = [1, 128], strides = [1, 1]} : vector<27x128xf32> to vector<1x128xf32>
    %688 = vector.broadcast %687 : vector<1x128xf32> to vector<8x128xf32>
    %689 = arith.mulf %686, %688 : vector<8x128xf32>
    %690 = arith.addf %683, %689 : vector<8x128xf32>
    %c9_275 = arith.constant 9 : index
    %c0_276 = arith.constant 0 : index
    %c0_277 = arith.constant 0 : index
    %691 = vector.load %arg2[%c9_275, %c0_276, %c0_277] : memref<27x8x128xbf16, #tpu.memory_space<vmem>>, vector<1x8x128xbf16>
    %692 = vector.shape_cast %691 : vector<1x8x128xbf16> to vector<8x128xbf16>
    %693 = arith.extf %692 : vector<8x128xbf16> to vector<8x128xf32>
    %694 = vector.extract_strided_slice %626 {offsets = [9, 0], sizes = [1, 128], strides = [1, 1]} : vector<27x128xf32> to vector<1x128xf32>
    %695 = vector.broadcast %694 : vector<1x128xf32> to vector<8x128xf32>
    %696 = arith.mulf %693, %695 : vector<8x128xf32>
    %697 = arith.addf %690, %696 : vector<8x128xf32>
    %c10_278 = arith.constant 10 : index
    %c0_279 = arith.constant 0 : index
    %c0_280 = arith.constant 0 : index
    %698 = vector.load %arg2[%c10_278, %c0_279, %c0_280] : memref<27x8x128xbf16, #tpu.memory_space<vmem>>, vector<1x8x128xbf16>
    %699 = vector.shape_cast %698 : vector<1x8x128xbf16> to vector<8x128xbf16>
    %700 = arith.extf %699 : vector<8x128xbf16> to vector<8x128xf32>
    %701 = vector.extract_strided_slice %626 {offsets = [10, 0], sizes = [1, 128], strides = [1, 1]} : vector<27x128xf32> to vector<1x128xf32>
    %702 = vector.broadcast %701 : vector<1x128xf32> to vector<8x128xf32>
    %703 = arith.mulf %700, %702 : vector<8x128xf32>
    %704 = arith.addf %697, %703 : vector<8x128xf32>
    %c11_281 = arith.constant 11 : index
    %c0_282 = arith.constant 0 : index
    %c0_283 = arith.constant 0 : index
    %705 = vector.load %arg2[%c11_281, %c0_282, %c0_283] : memref<27x8x128xbf16, #tpu.memory_space<vmem>>, vector<1x8x128xbf16>
    %706 = vector.shape_cast %705 : vector<1x8x128xbf16> to vector<8x128xbf16>
    %707 = arith.extf %706 : vector<8x128xbf16> to vector<8x128xf32>
    %708 = vector.extract_strided_slice %626 {offsets = [11, 0], sizes = [1, 128], strides = [1, 1]} : vector<27x128xf32> to vector<1x128xf32>
    %709 = vector.broadcast %708 : vector<1x128xf32> to vector<8x128xf32>
    %710 = arith.mulf %707, %709 : vector<8x128xf32>
    %711 = arith.addf %704, %710 : vector<8x128xf32>
    %c12_284 = arith.constant 12 : index
    %c0_285 = arith.constant 0 : index
    %c0_286 = arith.constant 0 : index
    %712 = vector.load %arg2[%c12_284, %c0_285, %c0_286] : memref<27x8x128xbf16, #tpu.memory_space<vmem>>, vector<1x8x128xbf16>
    %713 = vector.shape_cast %712 : vector<1x8x128xbf16> to vector<8x128xbf16>
    %714 = arith.extf %713 : vector<8x128xbf16> to vector<8x128xf32>
    %715 = vector.extract_strided_slice %626 {offsets = [12, 0], sizes = [1, 128], strides = [1, 1]} : vector<27x128xf32> to vector<1x128xf32>
    %716 = vector.broadcast %715 : vector<1x128xf32> to vector<8x128xf32>
    %717 = arith.mulf %714, %716 : vector<8x128xf32>
    %718 = arith.addf %711, %717 : vector<8x128xf32>
    %c13_287 = arith.constant 13 : index
    %c0_288 = arith.constant 0 : index
    %c0_289 = arith.constant 0 : index
    %719 = vector.load %arg2[%c13_287, %c0_288, %c0_289] : memref<27x8x128xbf16, #tpu.memory_space<vmem>>, vector<1x8x128xbf16>
    %720 = vector.shape_cast %719 : vector<1x8x128xbf16> to vector<8x128xbf16>
    %721 = arith.extf %720 : vector<8x128xbf16> to vector<8x128xf32>
    %722 = vector.extract_strided_slice %626 {offsets = [13, 0], sizes = [1, 128], strides = [1, 1]} : vector<27x128xf32> to vector<1x128xf32>
    %723 = vector.broadcast %722 : vector<1x128xf32> to vector<8x128xf32>
    %724 = arith.mulf %721, %723 : vector<8x128xf32>
    %725 = arith.addf %718, %724 : vector<8x128xf32>
    %c14_290 = arith.constant 14 : index
    %c0_291 = arith.constant 0 : index
    %c0_292 = arith.constant 0 : index
    %726 = vector.load %arg2[%c14_290, %c0_291, %c0_292] : memref<27x8x128xbf16, #tpu.memory_space<vmem>>, vector<1x8x128xbf16>
    %727 = vector.shape_cast %726 : vector<1x8x128xbf16> to vector<8x128xbf16>
    %728 = arith.extf %727 : vector<8x128xbf16> to vector<8x128xf32>
    %729 = vector.extract_strided_slice %626 {offsets = [14, 0], sizes = [1, 128], strides = [1, 1]} : vector<27x128xf32> to vector<1x128xf32>
    %730 = vector.broadcast %729 : vector<1x128xf32> to vector<8x128xf32>
    %731 = arith.mulf %728, %730 : vector<8x128xf32>
    %732 = arith.addf %725, %731 : vector<8x128xf32>
    %c15_293 = arith.constant 15 : index
    %c0_294 = arith.constant 0 : index
    %c0_295 = arith.constant 0 : index
    %733 = vector.load %arg2[%c15_293, %c0_294, %c0_295] : memref<27x8x128xbf16, #tpu.memory_space<vmem>>, vector<1x8x128xbf16>
    %734 = vector.shape_cast %733 : vector<1x8x128xbf16> to vector<8x128xbf16>
    %735 = arith.extf %734 : vector<8x128xbf16> to vector<8x128xf32>
    %736 = vector.extract_strided_slice %626 {offsets = [15, 0], sizes = [1, 128], strides = [1, 1]} : vector<27x128xf32> to vector<1x128xf32>
    %737 = vector.broadcast %736 : vector<1x128xf32> to vector<8x128xf32>
    %738 = arith.mulf %735, %737 : vector<8x128xf32>
    %739 = arith.addf %732, %738 : vector<8x128xf32>
    %c16_296 = arith.constant 16 : index
    %c0_297 = arith.constant 0 : index
    %c0_298 = arith.constant 0 : index
    %740 = vector.load %arg2[%c16_296, %c0_297, %c0_298] : memref<27x8x128xbf16, #tpu.memory_space<vmem>>, vector<1x8x128xbf16>
    %741 = vector.shape_cast %740 : vector<1x8x128xbf16> to vector<8x128xbf16>
    %742 = arith.extf %741 : vector<8x128xbf16> to vector<8x128xf32>
    %743 = vector.extract_strided_slice %626 {offsets = [16, 0], sizes = [1, 128], strides = [1, 1]} : vector<27x128xf32> to vector<1x128xf32>
    %744 = vector.broadcast %743 : vector<1x128xf32> to vector<8x128xf32>
    %745 = arith.mulf %742, %744 : vector<8x128xf32>
    %746 = arith.addf %739, %745 : vector<8x128xf32>
    %c17_299 = arith.constant 17 : index
    %c0_300 = arith.constant 0 : index
    %c0_301 = arith.constant 0 : index
    %747 = vector.load %arg2[%c17_299, %c0_300, %c0_301] : memref<27x8x128xbf16, #tpu.memory_space<vmem>>, vector<1x8x128xbf16>
    %748 = vector.shape_cast %747 : vector<1x8x128xbf16> to vector<8x128xbf16>
    %749 = arith.extf %748 : vector<8x128xbf16> to vector<8x128xf32>
    %750 = vector.extract_strided_slice %626 {offsets = [17, 0], sizes = [1, 128], strides = [1, 1]} : vector<27x128xf32> to vector<1x128xf32>
    %751 = vector.broadcast %750 : vector<1x128xf32> to vector<8x128xf32>
    %752 = arith.mulf %749, %751 : vector<8x128xf32>
    %753 = arith.addf %746, %752 : vector<8x128xf32>
    %c18_302 = arith.constant 18 : index
    %c0_303 = arith.constant 0 : index
    %c0_304 = arith.constant 0 : index
    %754 = vector.load %arg2[%c18_302, %c0_303, %c0_304] : memref<27x8x128xbf16, #tpu.memory_space<vmem>>, vector<1x8x128xbf16>
    %755 = vector.shape_cast %754 : vector<1x8x128xbf16> to vector<8x128xbf16>
    %756 = arith.extf %755 : vector<8x128xbf16> to vector<8x128xf32>
    %757 = vector.extract_strided_slice %626 {offsets = [18, 0], sizes = [1, 128], strides = [1, 1]} : vector<27x128xf32> to vector<1x128xf32>
    %758 = vector.broadcast %757 : vector<1x128xf32> to vector<8x128xf32>
    %759 = arith.mulf %756, %758 : vector<8x128xf32>
    %760 = arith.addf %753, %759 : vector<8x128xf32>
    %c19_305 = arith.constant 19 : index
    %c0_306 = arith.constant 0 : index
    %c0_307 = arith.constant 0 : index
    %761 = vector.load %arg2[%c19_305, %c0_306, %c0_307] : memref<27x8x128xbf16, #tpu.memory_space<vmem>>, vector<1x8x128xbf16>
    %762 = vector.shape_cast %761 : vector<1x8x128xbf16> to vector<8x128xbf16>
    %763 = arith.extf %762 : vector<8x128xbf16> to vector<8x128xf32>
    %764 = vector.extract_strided_slice %626 {offsets = [19, 0], sizes = [1, 128], strides = [1, 1]} : vector<27x128xf32> to vector<1x128xf32>
    %765 = vector.broadcast %764 : vector<1x128xf32> to vector<8x128xf32>
    %766 = arith.mulf %763, %765 : vector<8x128xf32>
    %767 = arith.addf %760, %766 : vector<8x128xf32>
    %c20_308 = arith.constant 20 : index
    %c0_309 = arith.constant 0 : index
    %c0_310 = arith.constant 0 : index
    %768 = vector.load %arg2[%c20_308, %c0_309, %c0_310] : memref<27x8x128xbf16, #tpu.memory_space<vmem>>, vector<1x8x128xbf16>
    %769 = vector.shape_cast %768 : vector<1x8x128xbf16> to vector<8x128xbf16>
    %770 = arith.extf %769 : vector<8x128xbf16> to vector<8x128xf32>
    %771 = vector.extract_strided_slice %626 {offsets = [20, 0], sizes = [1, 128], strides = [1, 1]} : vector<27x128xf32> to vector<1x128xf32>
    %772 = vector.broadcast %771 : vector<1x128xf32> to vector<8x128xf32>
    %773 = arith.mulf %770, %772 : vector<8x128xf32>
    %774 = arith.addf %767, %773 : vector<8x128xf32>
    %c21_311 = arith.constant 21 : index
    %c0_312 = arith.constant 0 : index
    %c0_313 = arith.constant 0 : index
    %775 = vector.load %arg2[%c21_311, %c0_312, %c0_313] : memref<27x8x128xbf16, #tpu.memory_space<vmem>>, vector<1x8x128xbf16>
    %776 = vector.shape_cast %775 : vector<1x8x128xbf16> to vector<8x128xbf16>
    %777 = arith.extf %776 : vector<8x128xbf16> to vector<8x128xf32>
    %778 = vector.extract_strided_slice %626 {offsets = [21, 0], sizes = [1, 128], strides = [1, 1]} : vector<27x128xf32> to vector<1x128xf32>
    %779 = vector.broadcast %778 : vector<1x128xf32> to vector<8x128xf32>
    %780 = arith.mulf %777, %779 : vector<8x128xf32>
    %781 = arith.addf %774, %780 : vector<8x128xf32>
    %c22_314 = arith.constant 22 : index
    %c0_315 = arith.constant 0 : index
    %c0_316 = arith.constant 0 : index
    %782 = vector.load %arg2[%c22_314, %c0_315, %c0_316] : memref<27x8x128xbf16, #tpu.memory_space<vmem>>, vector<1x8x128xbf16>
    %783 = vector.shape_cast %782 : vector<1x8x128xbf16> to vector<8x128xbf16>
    %784 = arith.extf %783 : vector<8x128xbf16> to vector<8x128xf32>
    %785 = vector.extract_strided_slice %626 {offsets = [22, 0], sizes = [1, 128], strides = [1, 1]} : vector<27x128xf32> to vector<1x128xf32>
    %786 = vector.broadcast %785 : vector<1x128xf32> to vector<8x128xf32>
    %787 = arith.mulf %784, %786 : vector<8x128xf32>
    %788 = arith.addf %781, %787 : vector<8x128xf32>
    %c23_317 = arith.constant 23 : index
    %c0_318 = arith.constant 0 : index
    %c0_319 = arith.constant 0 : index
    %789 = vector.load %arg2[%c23_317, %c0_318, %c0_319] : memref<27x8x128xbf16, #tpu.memory_space<vmem>>, vector<1x8x128xbf16>
    %790 = vector.shape_cast %789 : vector<1x8x128xbf16> to vector<8x128xbf16>
    %791 = arith.extf %790 : vector<8x128xbf16> to vector<8x128xf32>
    %792 = vector.extract_strided_slice %626 {offsets = [23, 0], sizes = [1, 128], strides = [1, 1]} : vector<27x128xf32> to vector<1x128xf32>
    %793 = vector.broadcast %792 : vector<1x128xf32> to vector<8x128xf32>
    %794 = arith.mulf %791, %793 : vector<8x128xf32>
    %795 = arith.addf %788, %794 : vector<8x128xf32>
    %c24_320 = arith.constant 24 : index
    %c0_321 = arith.constant 0 : index
    %c0_322 = arith.constant 0 : index
    %796 = vector.load %arg2[%c24_320, %c0_321, %c0_322] : memref<27x8x128xbf16, #tpu.memory_space<vmem>>, vector<1x8x128xbf16>
    %797 = vector.shape_cast %796 : vector<1x8x128xbf16> to vector<8x128xbf16>
    %798 = arith.extf %797 : vector<8x128xbf16> to vector<8x128xf32>
    %799 = vector.extract_strided_slice %626 {offsets = [24, 0], sizes = [1, 128], strides = [1, 1]} : vector<27x128xf32> to vector<1x128xf32>
    %800 = vector.broadcast %799 : vector<1x128xf32> to vector<8x128xf32>
    %801 = arith.mulf %798, %800 : vector<8x128xf32>
    %802 = arith.addf %795, %801 : vector<8x128xf32>
    %c25_323 = arith.constant 25 : index
    %c0_324 = arith.constant 0 : index
    %c0_325 = arith.constant 0 : index
    %803 = vector.load %arg2[%c25_323, %c0_324, %c0_325] : memref<27x8x128xbf16, #tpu.memory_space<vmem>>, vector<1x8x128xbf16>
    %804 = vector.shape_cast %803 : vector<1x8x128xbf16> to vector<8x128xbf16>
    %805 = arith.extf %804 : vector<8x128xbf16> to vector<8x128xf32>
    %806 = vector.extract_strided_slice %626 {offsets = [25, 0], sizes = [1, 128], strides = [1, 1]} : vector<27x128xf32> to vector<1x128xf32>
    %807 = vector.broadcast %806 : vector<1x128xf32> to vector<8x128xf32>
    %808 = arith.mulf %805, %807 : vector<8x128xf32>
    %809 = arith.addf %802, %808 : vector<8x128xf32>
    %c26_326 = arith.constant 26 : index
    %c0_327 = arith.constant 0 : index
    %c0_328 = arith.constant 0 : index
    %810 = vector.load %arg2[%c26_326, %c0_327, %c0_328] : memref<27x8x128xbf16, #tpu.memory_space<vmem>>, vector<1x8x128xbf16>
    %811 = vector.shape_cast %810 : vector<1x8x128xbf16> to vector<8x128xbf16>
    %812 = arith.extf %811 : vector<8x128xbf16> to vector<8x128xf32>
    %813 = vector.extract_strided_slice %626 {offsets = [26, 0], sizes = [1, 128], strides = [1, 1]} : vector<27x128xf32> to vector<1x128xf32>
    %814 = vector.broadcast %813 : vector<1x128xf32> to vector<8x128xf32>
    %815 = arith.mulf %812, %814 : vector<8x128xf32>
    %816 = arith.addf %809, %815 : vector<8x128xf32>
    %c3_329 = arith.constant 3 : index
    %c0_330 = arith.constant 0 : index
    %c0_331 = arith.constant 0 : index
    %817 = vector.load %arg3[%c3_329, %c0_330, %c0_331] : memref<8x8x128xf32, #tpu.memory_space<vmem>>, vector<1x8x128xf32>
    %818 = vector.shape_cast %817 : vector<1x8x128xf32> to vector<8x128xf32>
    %819 = vector.shape_cast %816 : vector<8x128xf32> to vector<1x8x128xf32>
    tpu.vector_store %arg3[%c3_329, %c0_330, %c0_331], %819 {strides = array<i32>} : memref<8x8x128xf32, #tpu.memory_space<vmem>>, vector<1x8x128xf32>,
    %c4_332 = arith.constant 4 : index
    %c0_333 = arith.constant 0 : index
    %c0_334 = arith.constant 0 : index
    %820 = vector.load %arg1[%c4_332, %c0_333, %c0_334] : memref<8x27x128xf32, #tpu.memory_space<vmem>>, vector<1x27x128xf32>
    %821 = vector.shape_cast %820 : vector<1x27x128xf32> to vector<27x128xf32>
    %cst_335 = arith.constant dense<0xFF800000> : vector<128xf32>
    %822 = vector.multi_reduction <maximumf>, %821, %cst_335 [0] : vector<27x128xf32> to vector<128xf32>
    %823 = vector.shape_cast %822 : vector<128xf32> to vector<1x128xf32>
    %824 = vector.broadcast %823 : vector<1x128xf32> to vector<27x128xf32>
    %825 = arith.subf %821, %824 : vector<27x128xf32>
    %826 = math.exp %825 : vector<27x128xf32>
    %cst_336 = arith.constant dense<0.000000e+00> : vector<128xf32>
    %827 = vector.multi_reduction <add>, %826, %cst_336 [0] : vector<27x128xf32> to vector<128xf32>
    %828 = vector.shape_cast %827 : vector<128xf32> to vector<1x128xf32>
    %829 = tpu.reciprocal %828 {approx = true} : vector<1x128xf32> -> vector<1x128xf32>
    %830 = vector.broadcast %829 : vector<1x128xf32> to vector<27x128xf32>
    %831 = arith.mulf %826, %830 : vector<27x128xf32>
    %cst_337 = arith.constant 0.000000e+00 : f32
    %832 = vector.broadcast %cst_337 : f32 to vector<8x128xf32>
    %c0_338 = arith.constant 0 : index
    %c0_339 = arith.constant 0 : index
    %c0_340 = arith.constant 0 : index
    %833 = vector.load %arg2[%c0_338, %c0_339, %c0_340] : memref<27x8x128xbf16, #tpu.memory_space<vmem>>, vector<1x8x128xbf16>
    %834 = vector.shape_cast %833 : vector<1x8x128xbf16> to vector<8x128xbf16>
    %835 = arith.extf %834 : vector<8x128xbf16> to vector<8x128xf32>
    %836 = vector.extract_strided_slice %831 {offsets = [0, 0], sizes = [1, 128], strides = [1, 1]} : vector<27x128xf32> to vector<1x128xf32>
    %837 = vector.broadcast %836 : vector<1x128xf32> to vector<8x128xf32>
    %838 = arith.mulf %835, %837 : vector<8x128xf32>
    %839 = arith.addf %832, %838 : vector<8x128xf32>
    %c1_341 = arith.constant 1 : index
    %c0_342 = arith.constant 0 : index
    %c0_343 = arith.constant 0 : index
    %840 = vector.load %arg2[%c1_341, %c0_342, %c0_343] : memref<27x8x128xbf16, #tpu.memory_space<vmem>>, vector<1x8x128xbf16>
    %841 = vector.shape_cast %840 : vector<1x8x128xbf16> to vector<8x128xbf16>
    %842 = arith.extf %841 : vector<8x128xbf16> to vector<8x128xf32>
    %843 = vector.extract_strided_slice %831 {offsets = [1, 0], sizes = [1, 128], strides = [1, 1]} : vector<27x128xf32> to vector<1x128xf32>
    %844 = vector.broadcast %843 : vector<1x128xf32> to vector<8x128xf32>
    %845 = arith.mulf %842, %844 : vector<8x128xf32>
    %846 = arith.addf %839, %845 : vector<8x128xf32>
    %c2_344 = arith.constant 2 : index
    %c0_345 = arith.constant 0 : index
    %c0_346 = arith.constant 0 : index
    %847 = vector.load %arg2[%c2_344, %c0_345, %c0_346] : memref<27x8x128xbf16, #tpu.memory_space<vmem>>, vector<1x8x128xbf16>
    %848 = vector.shape_cast %847 : vector<1x8x128xbf16> to vector<8x128xbf16>
    %849 = arith.extf %848 : vector<8x128xbf16> to vector<8x128xf32>
    %850 = vector.extract_strided_slice %831 {offsets = [2, 0], sizes = [1, 128], strides = [1, 1]} : vector<27x128xf32> to vector<1x128xf32>
    %851 = vector.broadcast %850 : vector<1x128xf32> to vector<8x128xf32>
    %852 = arith.mulf %849, %851 : vector<8x128xf32>
    %853 = arith.addf %846, %852 : vector<8x128xf32>
    %c3_347 = arith.constant 3 : index
    %c0_348 = arith.constant 0 : index
    %c0_349 = arith.constant 0 : index
    %854 = vector.load %arg2[%c3_347, %c0_348, %c0_349] : memref<27x8x128xbf16, #tpu.memory_space<vmem>>, vector<1x8x128xbf16>
    %855 = vector.shape_cast %854 : vector<1x8x128xbf16> to vector<8x128xbf16>
    %856 = arith.extf %855 : vector<8x128xbf16> to vector<8x128xf32>
    %857 = vector.extract_strided_slice %831 {offsets = [3, 0], sizes = [1, 128], strides = [1, 1]} : vector<27x128xf32> to vector<1x128xf32>
    %858 = vector.broadcast %857 : vector<1x128xf32> to vector<8x128xf32>
    %859 = arith.mulf %856, %858 : vector<8x128xf32>
    %860 = arith.addf %853, %859 : vector<8x128xf32>
    %c4_350 = arith.constant 4 : index
    %c0_351 = arith.constant 0 : index
    %c0_352 = arith.constant 0 : index
    %861 = vector.load %arg2[%c4_350, %c0_351, %c0_352] : memref<27x8x128xbf16, #tpu.memory_space<vmem>>, vector<1x8x128xbf16>
    %862 = vector.shape_cast %861 : vector<1x8x128xbf16> to vector<8x128xbf16>
    %863 = arith.extf %862 : vector<8x128xbf16> to vector<8x128xf32>
    %864 = vector.extract_strided_slice %831 {offsets = [4, 0], sizes = [1, 128], strides = [1, 1]} : vector<27x128xf32> to vector<1x128xf32>
    %865 = vector.broadcast %864 : vector<1x128xf32> to vector<8x128xf32>
    %866 = arith.mulf %863, %865 : vector<8x128xf32>
    %867 = arith.addf %860, %866 : vector<8x128xf32>
    %c5_353 = arith.constant 5 : index
    %c0_354 = arith.constant 0 : index
    %c0_355 = arith.constant 0 : index
    %868 = vector.load %arg2[%c5_353, %c0_354, %c0_355] : memref<27x8x128xbf16, #tpu.memory_space<vmem>>, vector<1x8x128xbf16>
    %869 = vector.shape_cast %868 : vector<1x8x128xbf16> to vector<8x128xbf16>
    %870 = arith.extf %869 : vector<8x128xbf16> to vector<8x128xf32>
    %871 = vector.extract_strided_slice %831 {offsets = [5, 0], sizes = [1, 128], strides = [1, 1]} : vector<27x128xf32> to vector<1x128xf32>
    %872 = vector.broadcast %871 : vector<1x128xf32> to vector<8x128xf32>
    %873 = arith.mulf %870, %872 : vector<8x128xf32>
    %874 = arith.addf %867, %873 : vector<8x128xf32>
    %c6_356 = arith.constant 6 : index
    %c0_357 = arith.constant 0 : index
    %c0_358 = arith.constant 0 : index
    %875 = vector.load %arg2[%c6_356, %c0_357, %c0_358] : memref<27x8x128xbf16, #tpu.memory_space<vmem>>, vector<1x8x128xbf16>
    %876 = vector.shape_cast %875 : vector<1x8x128xbf16> to vector<8x128xbf16>
    %877 = arith.extf %876 : vector<8x128xbf16> to vector<8x128xf32>
    %878 = vector.extract_strided_slice %831 {offsets = [6, 0], sizes = [1, 128], strides = [1, 1]} : vector<27x128xf32> to vector<1x128xf32>
    %879 = vector.broadcast %878 : vector<1x128xf32> to vector<8x128xf32>
    %880 = arith.mulf %877, %879 : vector<8x128xf32>
    %881 = arith.addf %874, %880 : vector<8x128xf32>
    %c7_359 = arith.constant 7 : index
    %c0_360 = arith.constant 0 : index
    %c0_361 = arith.constant 0 : index
    %882 = vector.load %arg2[%c7_359, %c0_360, %c0_361] : memref<27x8x128xbf16, #tpu.memory_space<vmem>>, vector<1x8x128xbf16>
    %883 = vector.shape_cast %882 : vector<1x8x128xbf16> to vector<8x128xbf16>
    %884 = arith.extf %883 : vector<8x128xbf16> to vector<8x128xf32>
    %885 = vector.extract_strided_slice %831 {offsets = [7, 0], sizes = [1, 128], strides = [1, 1]} : vector<27x128xf32> to vector<1x128xf32>
    %886 = vector.broadcast %885 : vector<1x128xf32> to vector<8x128xf32>
    %887 = arith.mulf %884, %886 : vector<8x128xf32>
    %888 = arith.addf %881, %887 : vector<8x128xf32>
    %c8_362 = arith.constant 8 : index
    %c0_363 = arith.constant 0 : index
    %c0_364 = arith.constant 0 : index
    %889 = vector.load %arg2[%c8_362, %c0_363, %c0_364] : memref<27x8x128xbf16, #tpu.memory_space<vmem>>, vector<1x8x128xbf16>
    %890 = vector.shape_cast %889 : vector<1x8x128xbf16> to vector<8x128xbf16>
    %891 = arith.extf %890 : vector<8x128xbf16> to vector<8x128xf32>
    %892 = vector.extract_strided_slice %831 {offsets = [8, 0], sizes = [1, 128], strides = [1, 1]} : vector<27x128xf32> to vector<1x128xf32>
    %893 = vector.broadcast %892 : vector<1x128xf32> to vector<8x128xf32>
    %894 = arith.mulf %891, %893 : vector<8x128xf32>
    %895 = arith.addf %888, %894 : vector<8x128xf32>
    %c9_365 = arith.constant 9 : index
    %c0_366 = arith.constant 0 : index
    %c0_367 = arith.constant 0 : index
    %896 = vector.load %arg2[%c9_365, %c0_366, %c0_367] : memref<27x8x128xbf16, #tpu.memory_space<vmem>>, vector<1x8x128xbf16>
    %897 = vector.shape_cast %896 : vector<1x8x128xbf16> to vector<8x128xbf16>
    %898 = arith.extf %897 : vector<8x128xbf16> to vector<8x128xf32>
    %899 = vector.extract_strided_slice %831 {offsets = [9, 0], sizes = [1, 128], strides = [1, 1]} : vector<27x128xf32> to vector<1x128xf32>
    %900 = vector.broadcast %899 : vector<1x128xf32> to vector<8x128xf32>
    %901 = arith.mulf %898, %900 : vector<8x128xf32>
    %902 = arith.addf %895, %901 : vector<8x128xf32>
    %c10_368 = arith.constant 10 : index
    %c0_369 = arith.constant 0 : index
    %c0_370 = arith.constant 0 : index
    %903 = vector.load %arg2[%c10_368, %c0_369, %c0_370] : memref<27x8x128xbf16, #tpu.memory_space<vmem>>, vector<1x8x128xbf16>
    %904 = vector.shape_cast %903 : vector<1x8x128xbf16> to vector<8x128xbf16>
    %905 = arith.extf %904 : vector<8x128xbf16> to vector<8x128xf32>
    %906 = vector.extract_strided_slice %831 {offsets = [10, 0], sizes = [1, 128], strides = [1, 1]} : vector<27x128xf32> to vector<1x128xf32>
    %907 = vector.broadcast %906 : vector<1x128xf32> to vector<8x128xf32>
    %908 = arith.mulf %905, %907 : vector<8x128xf32>
    %909 = arith.addf %902, %908 : vector<8x128xf32>
    %c11_371 = arith.constant 11 : index
    %c0_372 = arith.constant 0 : index
    %c0_373 = arith.constant 0 : index
    %910 = vector.load %arg2[%c11_371, %c0_372, %c0_373] : memref<27x8x128xbf16, #tpu.memory_space<vmem>>, vector<1x8x128xbf16>
    %911 = vector.shape_cast %910 : vector<1x8x128xbf16> to vector<8x128xbf16>
    %912 = arith.extf %911 : vector<8x128xbf16> to vector<8x128xf32>
    %913 = vector.extract_strided_slice %831 {offsets = [11, 0], sizes = [1, 128], strides = [1, 1]} : vector<27x128xf32> to vector<1x128xf32>
    %914 = vector.broadcast %913 : vector<1x128xf32> to vector<8x128xf32>
    %915 = arith.mulf %912, %914 : vector<8x128xf32>
    %916 = arith.addf %909, %915 : vector<8x128xf32>
    %c12_374 = arith.constant 12 : index
    %c0_375 = arith.constant 0 : index
    %c0_376 = arith.constant 0 : index
    %917 = vector.load %arg2[%c12_374, %c0_375, %c0_376] : memref<27x8x128xbf16, #tpu.memory_space<vmem>>, vector<1x8x128xbf16>
    %918 = vector.shape_cast %917 : vector<1x8x128xbf16> to vector<8x128xbf16>
    %919 = arith.extf %918 : vector<8x128xbf16> to vector<8x128xf32>
    %920 = vector.extract_strided_slice %831 {offsets = [12, 0], sizes = [1, 128], strides = [1, 1]} : vector<27x128xf32> to vector<1x128xf32>
    %921 = vector.broadcast %920 : vector<1x128xf32> to vector<8x128xf32>
    %922 = arith.mulf %919, %921 : vector<8x128xf32>
    %923 = arith.addf %916, %922 : vector<8x128xf32>
    %c13_377 = arith.constant 13 : index
    %c0_378 = arith.constant 0 : index
    %c0_379 = arith.constant 0 : index
    %924 = vector.load %arg2[%c13_377, %c0_378, %c0_379] : memref<27x8x128xbf16, #tpu.memory_space<vmem>>, vector<1x8x128xbf16>
    %925 = vector.shape_cast %924 : vector<1x8x128xbf16> to vector<8x128xbf16>
    %926 = arith.extf %925 : vector<8x128xbf16> to vector<8x128xf32>
    %927 = vector.extract_strided_slice %831 {offsets = [13, 0], sizes = [1, 128], strides = [1, 1]} : vector<27x128xf32> to vector<1x128xf32>
    %928 = vector.broadcast %927 : vector<1x128xf32> to vector<8x128xf32>
    %929 = arith.mulf %926, %928 : vector<8x128xf32>
    %930 = arith.addf %923, %929 : vector<8x128xf32>
    %c14_380 = arith.constant 14 : index
    %c0_381 = arith.constant 0 : index
    %c0_382 = arith.constant 0 : index
    %931 = vector.load %arg2[%c14_380, %c0_381, %c0_382] : memref<27x8x128xbf16, #tpu.memory_space<vmem>>, vector<1x8x128xbf16>
    %932 = vector.shape_cast %931 : vector<1x8x128xbf16> to vector<8x128xbf16>
    %933 = arith.extf %932 : vector<8x128xbf16> to vector<8x128xf32>
    %934 = vector.extract_strided_slice %831 {offsets = [14, 0], sizes = [1, 128], strides = [1, 1]} : vector<27x128xf32> to vector<1x128xf32>
    %935 = vector.broadcast %934 : vector<1x128xf32> to vector<8x128xf32>
    %936 = arith.mulf %933, %935 : vector<8x128xf32>
    %937 = arith.addf %930, %936 : vector<8x128xf32>
    %c15_383 = arith.constant 15 : index
    %c0_384 = arith.constant 0 : index
    %c0_385 = arith.constant 0 : index
    %938 = vector.load %arg2[%c15_383, %c0_384, %c0_385] : memref<27x8x128xbf16, #tpu.memory_space<vmem>>, vector<1x8x128xbf16>
    %939 = vector.shape_cast %938 : vector<1x8x128xbf16> to vector<8x128xbf16>
    %940 = arith.extf %939 : vector<8x128xbf16> to vector<8x128xf32>
    %941 = vector.extract_strided_slice %831 {offsets = [15, 0], sizes = [1, 128], strides = [1, 1]} : vector<27x128xf32> to vector<1x128xf32>
    %942 = vector.broadcast %941 : vector<1x128xf32> to vector<8x128xf32>
    %943 = arith.mulf %940, %942 : vector<8x128xf32>
    %944 = arith.addf %937, %943 : vector<8x128xf32>
    %c16_386 = arith.constant 16 : index
    %c0_387 = arith.constant 0 : index
    %c0_388 = arith.constant 0 : index
    %945 = vector.load %arg2[%c16_386, %c0_387, %c0_388] : memref<27x8x128xbf16, #tpu.memory_space<vmem>>, vector<1x8x128xbf16>
    %946 = vector.shape_cast %945 : vector<1x8x128xbf16> to vector<8x128xbf16>
    %947 = arith.extf %946 : vector<8x128xbf16> to vector<8x128xf32>
    %948 = vector.extract_strided_slice %831 {offsets = [16, 0], sizes = [1, 128], strides = [1, 1]} : vector<27x128xf32> to vector<1x128xf32>
    %949 = vector.broadcast %948 : vector<1x128xf32> to vector<8x128xf32>
    %950 = arith.mulf %947, %949 : vector<8x128xf32>
    %951 = arith.addf %944, %950 : vector<8x128xf32>
    %c17_389 = arith.constant 17 : index
    %c0_390 = arith.constant 0 : index
    %c0_391 = arith.constant 0 : index
    %952 = vector.load %arg2[%c17_389, %c0_390, %c0_391] : memref<27x8x128xbf16, #tpu.memory_space<vmem>>, vector<1x8x128xbf16>
    %953 = vector.shape_cast %952 : vector<1x8x128xbf16> to vector<8x128xbf16>
    %954 = arith.extf %953 : vector<8x128xbf16> to vector<8x128xf32>
    %955 = vector.extract_strided_slice %831 {offsets = [17, 0], sizes = [1, 128], strides = [1, 1]} : vector<27x128xf32> to vector<1x128xf32>
    %956 = vector.broadcast %955 : vector<1x128xf32> to vector<8x128xf32>
    %957 = arith.mulf %954, %956 : vector<8x128xf32>
    %958 = arith.addf %951, %957 : vector<8x128xf32>
    %c18_392 = arith.constant 18 : index
    %c0_393 = arith.constant 0 : index
    %c0_394 = arith.constant 0 : index
    %959 = vector.load %arg2[%c18_392, %c0_393, %c0_394] : memref<27x8x128xbf16, #tpu.memory_space<vmem>>, vector<1x8x128xbf16>
    %960 = vector.shape_cast %959 : vector<1x8x128xbf16> to vector<8x128xbf16>
    %961 = arith.extf %960 : vector<8x128xbf16> to vector<8x128xf32>
    %962 = vector.extract_strided_slice %831 {offsets = [18, 0], sizes = [1, 128], strides = [1, 1]} : vector<27x128xf32> to vector<1x128xf32>
    %963 = vector.broadcast %962 : vector<1x128xf32> to vector<8x128xf32>
    %964 = arith.mulf %961, %963 : vector<8x128xf32>
    %965 = arith.addf %958, %964 : vector<8x128xf32>
    %c19_395 = arith.constant 19 : index
    %c0_396 = arith.constant 0 : index
    %c0_397 = arith.constant 0 : index
    %966 = vector.load %arg2[%c19_395, %c0_396, %c0_397] : memref<27x8x128xbf16, #tpu.memory_space<vmem>>, vector<1x8x128xbf16>
    %967 = vector.shape_cast %966 : vector<1x8x128xbf16> to vector<8x128xbf16>
    %968 = arith.extf %967 : vector<8x128xbf16> to vector<8x128xf32>
    %969 = vector.extract_strided_slice %831 {offsets = [19, 0], sizes = [1, 128], strides = [1, 1]} : vector<27x128xf32> to vector<1x128xf32>
    %970 = vector.broadcast %969 : vector<1x128xf32> to vector<8x128xf32>
    %971 = arith.mulf %968, %970 : vector<8x128xf32>
    %972 = arith.addf %965, %971 : vector<8x128xf32>
    %c20_398 = arith.constant 20 : index
    %c0_399 = arith.constant 0 : index
    %c0_400 = arith.constant 0 : index
    %973 = vector.load %arg2[%c20_398, %c0_399, %c0_400] : memref<27x8x128xbf16, #tpu.memory_space<vmem>>, vector<1x8x128xbf16>
    %974 = vector.shape_cast %973 : vector<1x8x128xbf16> to vector<8x128xbf16>
    %975 = arith.extf %974 : vector<8x128xbf16> to vector<8x128xf32>
    %976 = vector.extract_strided_slice %831 {offsets = [20, 0], sizes = [1, 128], strides = [1, 1]} : vector<27x128xf32> to vector<1x128xf32>
    %977 = vector.broadcast %976 : vector<1x128xf32> to vector<8x128xf32>
    %978 = arith.mulf %975, %977 : vector<8x128xf32>
    %979 = arith.addf %972, %978 : vector<8x128xf32>
    %c21_401 = arith.constant 21 : index
    %c0_402 = arith.constant 0 : index
    %c0_403 = arith.constant 0 : index
    %980 = vector.load %arg2[%c21_401, %c0_402, %c0_403] : memref<27x8x128xbf16, #tpu.memory_space<vmem>>, vector<1x8x128xbf16>
    %981 = vector.shape_cast %980 : vector<1x8x128xbf16> to vector<8x128xbf16>
    %982 = arith.extf %981 : vector<8x128xbf16> to vector<8x128xf32>
    %983 = vector.extract_strided_slice %831 {offsets = [21, 0], sizes = [1, 128], strides = [1, 1]} : vector<27x128xf32> to vector<1x128xf32>
    %984 = vector.broadcast %983 : vector<1x128xf32> to vector<8x128xf32>
    %985 = arith.mulf %982, %984 : vector<8x128xf32>
    %986 = arith.addf %979, %985 : vector<8x128xf32>
    %c22_404 = arith.constant 22 : index
    %c0_405 = arith.constant 0 : index
    %c0_406 = arith.constant 0 : index
    %987 = vector.load %arg2[%c22_404, %c0_405, %c0_406] : memref<27x8x128xbf16, #tpu.memory_space<vmem>>, vector<1x8x128xbf16>
    %988 = vector.shape_cast %987 : vector<1x8x128xbf16> to vector<8x128xbf16>
    %989 = arith.extf %988 : vector<8x128xbf16> to vector<8x128xf32>
    %990 = vector.extract_strided_slice %831 {offsets = [22, 0], sizes = [1, 128], strides = [1, 1]} : vector<27x128xf32> to vector<1x128xf32>
    %991 = vector.broadcast %990 : vector<1x128xf32> to vector<8x128xf32>
    %992 = arith.mulf %989, %991 : vector<8x128xf32>
    %993 = arith.addf %986, %992 : vector<8x128xf32>
    %c23_407 = arith.constant 23 : index
    %c0_408 = arith.constant 0 : index
    %c0_409 = arith.constant 0 : index
    %994 = vector.load %arg2[%c23_407, %c0_408, %c0_409] : memref<27x8x128xbf16, #tpu.memory_space<vmem>>, vector<1x8x128xbf16>
    %995 = vector.shape_cast %994 : vector<1x8x128xbf16> to vector<8x128xbf16>
    %996 = arith.extf %995 : vector<8x128xbf16> to vector<8x128xf32>
    %997 = vector.extract_strided_slice %831 {offsets = [23, 0], sizes = [1, 128], strides = [1, 1]} : vector<27x128xf32> to vector<1x128xf32>
    %998 = vector.broadcast %997 : vector<1x128xf32> to vector<8x128xf32>
    %999 = arith.mulf %996, %998 : vector<8x128xf32>
    %1000 = arith.addf %993, %999 : vector<8x128xf32>
    %c24_410 = arith.constant 24 : index
    %c0_411 = arith.constant 0 : index
    %c0_412 = arith.constant 0 : index
    %1001 = vector.load %arg2[%c24_410, %c0_411, %c0_412] : memref<27x8x128xbf16, #tpu.memory_space<vmem>>, vector<1x8x128xbf16>
    %1002 = vector.shape_cast %1001 : vector<1x8x128xbf16> to vector<8x128xbf16>
    %1003 = arith.extf %1002 : vector<8x128xbf16> to vector<8x128xf32>
    %1004 = vector.extract_strided_slice %831 {offsets = [24, 0], sizes = [1, 128], strides = [1, 1]} : vector<27x128xf32> to vector<1x128xf32>
    %1005 = vector.broadcast %1004 : vector<1x128xf32> to vector<8x128xf32>
    %1006 = arith.mulf %1003, %1005 : vector<8x128xf32>
    %1007 = arith.addf %1000, %1006 : vector<8x128xf32>
    %c25_413 = arith.constant 25 : index
    %c0_414 = arith.constant 0 : index
    %c0_415 = arith.constant 0 : index
    %1008 = vector.load %arg2[%c25_413, %c0_414, %c0_415] : memref<27x8x128xbf16, #tpu.memory_space<vmem>>, vector<1x8x128xbf16>
    %1009 = vector.shape_cast %1008 : vector<1x8x128xbf16> to vector<8x128xbf16>
    %1010 = arith.extf %1009 : vector<8x128xbf16> to vector<8x128xf32>
    %1011 = vector.extract_strided_slice %831 {offsets = [25, 0], sizes = [1, 128], strides = [1, 1]} : vector<27x128xf32> to vector<1x128xf32>
    %1012 = vector.broadcast %1011 : vector<1x128xf32> to vector<8x128xf32>
    %1013 = arith.mulf %1010, %1012 : vector<8x128xf32>
    %1014 = arith.addf %1007, %1013 : vector<8x128xf32>
    %c26_416 = arith.constant 26 : index
    %c0_417 = arith.constant 0 : index
    %c0_418 = arith.constant 0 : index
    %1015 = vector.load %arg2[%c26_416, %c0_417, %c0_418] : memref<27x8x128xbf16, #tpu.memory_space<vmem>>, vector<1x8x128xbf16>
    %1016 = vector.shape_cast %1015 : vector<1x8x128xbf16> to vector<8x128xbf16>
    %1017 = arith.extf %1016 : vector<8x128xbf16> to vector<8x128xf32>
    %1018 = vector.extract_strided_slice %831 {offsets = [26, 0], sizes = [1, 128], strides = [1, 1]} : vector<27x128xf32> to vector<1x128xf32>
    %1019 = vector.broadcast %1018 : vector<1x128xf32> to vector<8x128xf32>
    %1020 = arith.mulf %1017, %1019 : vector<8x128xf32>
    %1021 = arith.addf %1014, %1020 : vector<8x128xf32>
    %c4_419 = arith.constant 4 : index
    %c0_420 = arith.constant 0 : index
    %c0_421 = arith.constant 0 : index
    %1022 = vector.load %arg3[%c4_419, %c0_420, %c0_421] : memref<8x8x128xf32, #tpu.memory_space<vmem>>, vector<1x8x128xf32>
    %1023 = vector.shape_cast %1022 : vector<1x8x128xf32> to vector<8x128xf32>
    %1024 = vector.shape_cast %1021 : vector<8x128xf32> to vector<1x8x128xf32>
    tpu.vector_store %arg3[%c4_419, %c0_420, %c0_421], %1024 {strides = array<i32>} : memref<8x8x128xf32, #tpu.memory_space<vmem>>, vector<1x8x128xf32>,
    %c5_422 = arith.constant 5 : index
    %c0_423 = arith.constant 0 : index
    %c0_424 = arith.constant 0 : index
    %1025 = vector.load %arg1[%c5_422, %c0_423, %c0_424] : memref<8x27x128xf32, #tpu.memory_space<vmem>>, vector<1x27x128xf32>
    %1026 = vector.shape_cast %1025 : vector<1x27x128xf32> to vector<27x128xf32>
    %cst_425 = arith.constant dense<0xFF800000> : vector<128xf32>
    %1027 = vector.multi_reduction <maximumf>, %1026, %cst_425 [0] : vector<27x128xf32> to vector<128xf32>
    %1028 = vector.shape_cast %1027 : vector<128xf32> to vector<1x128xf32>
    %1029 = vector.broadcast %1028 : vector<1x128xf32> to vector<27x128xf32>
    %1030 = arith.subf %1026, %1029 : vector<27x128xf32>
    %1031 = math.exp %1030 : vector<27x128xf32>
    %cst_426 = arith.constant dense<0.000000e+00> : vector<128xf32>
    %1032 = vector.multi_reduction <add>, %1031, %cst_426 [0] : vector<27x128xf32> to vector<128xf32>
    %1033 = vector.shape_cast %1032 : vector<128xf32> to vector<1x128xf32>
    %1034 = tpu.reciprocal %1033 {approx = true} : vector<1x128xf32> -> vector<1x128xf32>
    %1035 = vector.broadcast %1034 : vector<1x128xf32> to vector<27x128xf32>
    %1036 = arith.mulf %1031, %1035 : vector<27x128xf32>
    %cst_427 = arith.constant 0.000000e+00 : f32
    %1037 = vector.broadcast %cst_427 : f32 to vector<8x128xf32>
    %c0_428 = arith.constant 0 : index
    %c0_429 = arith.constant 0 : index
    %c0_430 = arith.constant 0 : index
    %1038 = vector.load %arg2[%c0_428, %c0_429, %c0_430] : memref<27x8x128xbf16, #tpu.memory_space<vmem>>, vector<1x8x128xbf16>
    %1039 = vector.shape_cast %1038 : vector<1x8x128xbf16> to vector<8x128xbf16>
    %1040 = arith.extf %1039 : vector<8x128xbf16> to vector<8x128xf32>
    %1041 = vector.extract_strided_slice %1036 {offsets = [0, 0], sizes = [1, 128], strides = [1, 1]} : vector<27x128xf32> to vector<1x128xf32>
    %1042 = vector.broadcast %1041 : vector<1x128xf32> to vector<8x128xf32>
    %1043 = arith.mulf %1040, %1042 : vector<8x128xf32>
    %1044 = arith.addf %1037, %1043 : vector<8x128xf32>
    %c1_431 = arith.constant 1 : index
    %c0_432 = arith.constant 0 : index
    %c0_433 = arith.constant 0 : index
    %1045 = vector.load %arg2[%c1_431, %c0_432, %c0_433] : memref<27x8x128xbf16, #tpu.memory_space<vmem>>, vector<1x8x128xbf16>
    %1046 = vector.shape_cast %1045 : vector<1x8x128xbf16> to vector<8x128xbf16>
    %1047 = arith.extf %1046 : vector<8x128xbf16> to vector<8x128xf32>
    %1048 = vector.extract_strided_slice %1036 {offsets = [1, 0], sizes = [1, 128], strides = [1, 1]} : vector<27x128xf32> to vector<1x128xf32>
    %1049 = vector.broadcast %1048 : vector<1x128xf32> to vector<8x128xf32>
    %1050 = arith.mulf %1047, %1049 : vector<8x128xf32>
    %1051 = arith.addf %1044, %1050 : vector<8x128xf32>
    %c2_434 = arith.constant 2 : index
    %c0_435 = arith.constant 0 : index
    %c0_436 = arith.constant 0 : index
    %1052 = vector.load %arg2[%c2_434, %c0_435, %c0_436] : memref<27x8x128xbf16, #tpu.memory_space<vmem>>, vector<1x8x128xbf16>
    %1053 = vector.shape_cast %1052 : vector<1x8x128xbf16> to vector<8x128xbf16>
    %1054 = arith.extf %1053 : vector<8x128xbf16> to vector<8x128xf32>
    %1055 = vector.extract_strided_slice %1036 {offsets = [2, 0], sizes = [1, 128], strides = [1, 1]} : vector<27x128xf32> to vector<1x128xf32>
    %1056 = vector.broadcast %1055 : vector<1x128xf32> to vector<8x128xf32>
    %1057 = arith.mulf %1054, %1056 : vector<8x128xf32>
    %1058 = arith.addf %1051, %1057 : vector<8x128xf32>
    %c3_437 = arith.constant 3 : index
    %c0_438 = arith.constant 0 : index
    %c0_439 = arith.constant 0 : index
    %1059 = vector.load %arg2[%c3_437, %c0_438, %c0_439] : memref<27x8x128xbf16, #tpu.memory_space<vmem>>, vector<1x8x128xbf16>
    %1060 = vector.shape_cast %1059 : vector<1x8x128xbf16> to vector<8x128xbf16>
    %1061 = arith.extf %1060 : vector<8x128xbf16> to vector<8x128xf32>
    %1062 = vector.extract_strided_slice %1036 {offsets = [3, 0], sizes = [1, 128], strides = [1, 1]} : vector<27x128xf32> to vector<1x128xf32>
    %1063 = vector.broadcast %1062 : vector<1x128xf32> to vector<8x128xf32>
    %1064 = arith.mulf %1061, %1063 : vector<8x128xf32>
    %1065 = arith.addf %1058, %1064 : vector<8x128xf32>
    %c4_440 = arith.constant 4 : index
    %c0_441 = arith.constant 0 : index
    %c0_442 = arith.constant 0 : index
    %1066 = vector.load %arg2[%c4_440, %c0_441, %c0_442] : memref<27x8x128xbf16, #tpu.memory_space<vmem>>, vector<1x8x128xbf16>
    %1067 = vector.shape_cast %1066 : vector<1x8x128xbf16> to vector<8x128xbf16>
    %1068 = arith.extf %1067 : vector<8x128xbf16> to vector<8x128xf32>
    %1069 = vector.extract_strided_slice %1036 {offsets = [4, 0], sizes = [1, 128], strides = [1, 1]} : vector<27x128xf32> to vector<1x128xf32>
    %1070 = vector.broadcast %1069 : vector<1x128xf32> to vector<8x128xf32>
    %1071 = arith.mulf %1068, %1070 : vector<8x128xf32>
    %1072 = arith.addf %1065, %1071 : vector<8x128xf32>
    %c5_443 = arith.constant 5 : index
    %c0_444 = arith.constant 0 : index
    %c0_445 = arith.constant 0 : index
    %1073 = vector.load %arg2[%c5_443, %c0_444, %c0_445] : memref<27x8x128xbf16, #tpu.memory_space<vmem>>, vector<1x8x128xbf16>
    %1074 = vector.shape_cast %1073 : vector<1x8x128xbf16> to vector<8x128xbf16>
    %1075 = arith.extf %1074 : vector<8x128xbf16> to vector<8x128xf32>
    %1076 = vector.extract_strided_slice %1036 {offsets = [5, 0], sizes = [1, 128], strides = [1, 1]} : vector<27x128xf32> to vector<1x128xf32>
    %1077 = vector.broadcast %1076 : vector<1x128xf32> to vector<8x128xf32>
    %1078 = arith.mulf %1075, %1077 : vector<8x128xf32>
    %1079 = arith.addf %1072, %1078 : vector<8x128xf32>
    %c6_446 = arith.constant 6 : index
    %c0_447 = arith.constant 0 : index
    %c0_448 = arith.constant 0 : index
    %1080 = vector.load %arg2[%c6_446, %c0_447, %c0_448] : memref<27x8x128xbf16, #tpu.memory_space<vmem>>, vector<1x8x128xbf16>
    %1081 = vector.shape_cast %1080 : vector<1x8x128xbf16> to vector<8x128xbf16>
    %1082 = arith.extf %1081 : vector<8x128xbf16> to vector<8x128xf32>
    %1083 = vector.extract_strided_slice %1036 {offsets = [6, 0], sizes = [1, 128], strides = [1, 1]} : vector<27x128xf32> to vector<1x128xf32>
    %1084 = vector.broadcast %1083 : vector<1x128xf32> to vector<8x128xf32>
    %1085 = arith.mulf %1082, %1084 : vector<8x128xf32>
    %1086 = arith.addf %1079, %1085 : vector<8x128xf32>
    %c7_449 = arith.constant 7 : index
    %c0_450 = arith.constant 0 : index
    %c0_451 = arith.constant 0 : index
    %1087 = vector.load %arg2[%c7_449, %c0_450, %c0_451] : memref<27x8x128xbf16, #tpu.memory_space<vmem>>, vector<1x8x128xbf16>
    %1088 = vector.shape_cast %1087 : vector<1x8x128xbf16> to vector<8x128xbf16>
    %1089 = arith.extf %1088 : vector<8x128xbf16> to vector<8x128xf32>
    %1090 = vector.extract_strided_slice %1036 {offsets = [7, 0], sizes = [1, 128], strides = [1, 1]} : vector<27x128xf32> to vector<1x128xf32>
    %1091 = vector.broadcast %1090 : vector<1x128xf32> to vector<8x128xf32>
    %1092 = arith.mulf %1089, %1091 : vector<8x128xf32>
    %1093 = arith.addf %1086, %1092 : vector<8x128xf32>
    %c8_452 = arith.constant 8 : index
    %c0_453 = arith.constant 0 : index
    %c0_454 = arith.constant 0 : index
    %1094 = vector.load %arg2[%c8_452, %c0_453, %c0_454] : memref<27x8x128xbf16, #tpu.memory_space<vmem>>, vector<1x8x128xbf16>
    %1095 = vector.shape_cast %1094 : vector<1x8x128xbf16> to vector<8x128xbf16>
    %1096 = arith.extf %1095 : vector<8x128xbf16> to vector<8x128xf32>
    %1097 = vector.extract_strided_slice %1036 {offsets = [8, 0], sizes = [1, 128], strides = [1, 1]} : vector<27x128xf32> to vector<1x128xf32>
    %1098 = vector.broadcast %1097 : vector<1x128xf32> to vector<8x128xf32>
    %1099 = arith.mulf %1096, %1098 : vector<8x128xf32>
    %1100 = arith.addf %1093, %1099 : vector<8x128xf32>
    %c9_455 = arith.constant 9 : index
    %c0_456 = arith.constant 0 : index
    %c0_457 = arith.constant 0 : index
    %1101 = vector.load %arg2[%c9_455, %c0_456, %c0_457] : memref<27x8x128xbf16, #tpu.memory_space<vmem>>, vector<1x8x128xbf16>
    %1102 = vector.shape_cast %1101 : vector<1x8x128xbf16> to vector<8x128xbf16>
    %1103 = arith.extf %1102 : vector<8x128xbf16> to vector<8x128xf32>
    %1104 = vector.extract_strided_slice %1036 {offsets = [9, 0], sizes = [1, 128], strides = [1, 1]} : vector<27x128xf32> to vector<1x128xf32>
    %1105 = vector.broadcast %1104 : vector<1x128xf32> to vector<8x128xf32>
    %1106 = arith.mulf %1103, %1105 : vector<8x128xf32>
    %1107 = arith.addf %1100, %1106 : vector<8x128xf32>
    %c10_458 = arith.constant 10 : index
    %c0_459 = arith.constant 0 : index
    %c0_460 = arith.constant 0 : index
    %1108 = vector.load %arg2[%c10_458, %c0_459, %c0_460] : memref<27x8x128xbf16, #tpu.memory_space<vmem>>, vector<1x8x128xbf16>
    %1109 = vector.shape_cast %1108 : vector<1x8x128xbf16> to vector<8x128xbf16>
    %1110 = arith.extf %1109 : vector<8x128xbf16> to vector<8x128xf32>
    %1111 = vector.extract_strided_slice %1036 {offsets = [10, 0], sizes = [1, 128], strides = [1, 1]} : vector<27x128xf32> to vector<1x128xf32>
    %1112 = vector.broadcast %1111 : vector<1x128xf32> to vector<8x128xf32>
    %1113 = arith.mulf %1110, %1112 : vector<8x128xf32>
    %1114 = arith.addf %1107, %1113 : vector<8x128xf32>
    %c11_461 = arith.constant 11 : index
    %c0_462 = arith.constant 0 : index
    %c0_463 = arith.constant 0 : index
    %1115 = vector.load %arg2[%c11_461, %c0_462, %c0_463] : memref<27x8x128xbf16, #tpu.memory_space<vmem>>, vector<1x8x128xbf16>
    %1116 = vector.shape_cast %1115 : vector<1x8x128xbf16> to vector<8x128xbf16>
    %1117 = arith.extf %1116 : vector<8x128xbf16> to vector<8x128xf32>
    %1118 = vector.extract_strided_slice %1036 {offsets = [11, 0], sizes = [1, 128], strides = [1, 1]} : vector<27x128xf32> to vector<1x128xf32>
    %1119 = vector.broadcast %1118 : vector<1x128xf32> to vector<8x128xf32>
    %1120 = arith.mulf %1117, %1119 : vector<8x128xf32>
    %1121 = arith.addf %1114, %1120 : vector<8x128xf32>
    %c12_464 = arith.constant 12 : index
    %c0_465 = arith.constant 0 : index
    %c0_466 = arith.constant 0 : index
    %1122 = vector.load %arg2[%c12_464, %c0_465, %c0_466] : memref<27x8x128xbf16, #tpu.memory_space<vmem>>, vector<1x8x128xbf16>
    %1123 = vector.shape_cast %1122 : vector<1x8x128xbf16> to vector<8x128xbf16>
    %1124 = arith.extf %1123 : vector<8x128xbf16> to vector<8x128xf32>
    %1125 = vector.extract_strided_slice %1036 {offsets = [12, 0], sizes = [1, 128], strides = [1, 1]} : vector<27x128xf32> to vector<1x128xf32>
    %1126 = vector.broadcast %1125 : vector<1x128xf32> to vector<8x128xf32>
    %1127 = arith.mulf %1124, %1126 : vector<8x128xf32>
    %1128 = arith.addf %1121, %1127 : vector<8x128xf32>
    %c13_467 = arith.constant 13 : index
    %c0_468 = arith.constant 0 : index
    %c0_469 = arith.constant 0 : index
    %1129 = vector.load %arg2[%c13_467, %c0_468, %c0_469] : memref<27x8x128xbf16, #tpu.memory_space<vmem>>, vector<1x8x128xbf16>
    %1130 = vector.shape_cast %1129 : vector<1x8x128xbf16> to vector<8x128xbf16>
    %1131 = arith.extf %1130 : vector<8x128xbf16> to vector<8x128xf32>
    %1132 = vector.extract_strided_slice %1036 {offsets = [13, 0], sizes = [1, 128], strides = [1, 1]} : vector<27x128xf32> to vector<1x128xf32>
    %1133 = vector.broadcast %1132 : vector<1x128xf32> to vector<8x128xf32>
    %1134 = arith.mulf %1131, %1133 : vector<8x128xf32>
    %1135 = arith.addf %1128, %1134 : vector<8x128xf32>
    %c14_470 = arith.constant 14 : index
    %c0_471 = arith.constant 0 : index
    %c0_472 = arith.constant 0 : index
    %1136 = vector.load %arg2[%c14_470, %c0_471, %c0_472] : memref<27x8x128xbf16, #tpu.memory_space<vmem>>, vector<1x8x128xbf16>
    %1137 = vector.shape_cast %1136 : vector<1x8x128xbf16> to vector<8x128xbf16>
    %1138 = arith.extf %1137 : vector<8x128xbf16> to vector<8x128xf32>
    %1139 = vector.extract_strided_slice %1036 {offsets = [14, 0], sizes = [1, 128], strides = [1, 1]} : vector<27x128xf32> to vector<1x128xf32>
    %1140 = vector.broadcast %1139 : vector<1x128xf32> to vector<8x128xf32>
    %1141 = arith.mulf %1138, %1140 : vector<8x128xf32>
    %1142 = arith.addf %1135, %1141 : vector<8x128xf32>
    %c15_473 = arith.constant 15 : index
    %c0_474 = arith.constant 0 : index
    %c0_475 = arith.constant 0 : index
    %1143 = vector.load %arg2[%c15_473, %c0_474, %c0_475] : memref<27x8x128xbf16, #tpu.memory_space<vmem>>, vector<1x8x128xbf16>
    %1144 = vector.shape_cast %1143 : vector<1x8x128xbf16> to vector<8x128xbf16>
    %1145 = arith.extf %1144 : vector<8x128xbf16> to vector<8x128xf32>
    %1146 = vector.extract_strided_slice %1036 {offsets = [15, 0], sizes = [1, 128], strides = [1, 1]} : vector<27x128xf32> to vector<1x128xf32>
    %1147 = vector.broadcast %1146 : vector<1x128xf32> to vector<8x128xf32>
    %1148 = arith.mulf %1145, %1147 : vector<8x128xf32>
    %1149 = arith.addf %1142, %1148 : vector<8x128xf32>
    %c16_476 = arith.constant 16 : index
    %c0_477 = arith.constant 0 : index
    %c0_478 = arith.constant 0 : index
    %1150 = vector.load %arg2[%c16_476, %c0_477, %c0_478] : memref<27x8x128xbf16, #tpu.memory_space<vmem>>, vector<1x8x128xbf16>
    %1151 = vector.shape_cast %1150 : vector<1x8x128xbf16> to vector<8x128xbf16>
    %1152 = arith.extf %1151 : vector<8x128xbf16> to vector<8x128xf32>
    %1153 = vector.extract_strided_slice %1036 {offsets = [16, 0], sizes = [1, 128], strides = [1, 1]} : vector<27x128xf32> to vector<1x128xf32>
    %1154 = vector.broadcast %1153 : vector<1x128xf32> to vector<8x128xf32>
    %1155 = arith.mulf %1152, %1154 : vector<8x128xf32>
    %1156 = arith.addf %1149, %1155 : vector<8x128xf32>
    %c17_479 = arith.constant 17 : index
    %c0_480 = arith.constant 0 : index
    %c0_481 = arith.constant 0 : index
    %1157 = vector.load %arg2[%c17_479, %c0_480, %c0_481] : memref<27x8x128xbf16, #tpu.memory_space<vmem>>, vector<1x8x128xbf16>
    %1158 = vector.shape_cast %1157 : vector<1x8x128xbf16> to vector<8x128xbf16>
    %1159 = arith.extf %1158 : vector<8x128xbf16> to vector<8x128xf32>
    %1160 = vector.extract_strided_slice %1036 {offsets = [17, 0], sizes = [1, 128], strides = [1, 1]} : vector<27x128xf32> to vector<1x128xf32>
    %1161 = vector.broadcast %1160 : vector<1x128xf32> to vector<8x128xf32>
    %1162 = arith.mulf %1159, %1161 : vector<8x128xf32>
    %1163 = arith.addf %1156, %1162 : vector<8x128xf32>
    %c18_482 = arith.constant 18 : index
    %c0_483 = arith.constant 0 : index
    %c0_484 = arith.constant 0 : index
    %1164 = vector.load %arg2[%c18_482, %c0_483, %c0_484] : memref<27x8x128xbf16, #tpu.memory_space<vmem>>, vector<1x8x128xbf16>
    %1165 = vector.shape_cast %1164 : vector<1x8x128xbf16> to vector<8x128xbf16>
    %1166 = arith.extf %1165 : vector<8x128xbf16> to vector<8x128xf32>
    %1167 = vector.extract_strided_slice %1036 {offsets = [18, 0], sizes = [1, 128], strides = [1, 1]} : vector<27x128xf32> to vector<1x128xf32>
    %1168 = vector.broadcast %1167 : vector<1x128xf32> to vector<8x128xf32>
    %1169 = arith.mulf %1166, %1168 : vector<8x128xf32>
    %1170 = arith.addf %1163, %1169 : vector<8x128xf32>
    %c19_485 = arith.constant 19 : index
    %c0_486 = arith.constant 0 : index
    %c0_487 = arith.constant 0 : index
    %1171 = vector.load %arg2[%c19_485, %c0_486, %c0_487] : memref<27x8x128xbf16, #tpu.memory_space<vmem>>, vector<1x8x128xbf16>
    %1172 = vector.shape_cast %1171 : vector<1x8x128xbf16> to vector<8x128xbf16>
    %1173 = arith.extf %1172 : vector<8x128xbf16> to vector<8x128xf32>
    %1174 = vector.extract_strided_slice %1036 {offsets = [19, 0], sizes = [1, 128], strides = [1, 1]} : vector<27x128xf32> to vector<1x128xf32>
    %1175 = vector.broadcast %1174 : vector<1x128xf32> to vector<8x128xf32>
    %1176 = arith.mulf %1173, %1175 : vector<8x128xf32>
    %1177 = arith.addf %1170, %1176 : vector<8x128xf32>
    %c20_488 = arith.constant 20 : index
    %c0_489 = arith.constant 0 : index
    %c0_490 = arith.constant 0 : index
    %1178 = vector.load %arg2[%c20_488, %c0_489, %c0_490] : memref<27x8x128xbf16, #tpu.memory_space<vmem>>, vector<1x8x128xbf16>
    %1179 = vector.shape_cast %1178 : vector<1x8x128xbf16> to vector<8x128xbf16>
    %1180 = arith.extf %1179 : vector<8x128xbf16> to vector<8x128xf32>
    %1181 = vector.extract_strided_slice %1036 {offsets = [20, 0], sizes = [1, 128], strides = [1, 1]} : vector<27x128xf32> to vector<1x128xf32>
    %1182 = vector.broadcast %1181 : vector<1x128xf32> to vector<8x128xf32>
    %1183 = arith.mulf %1180, %1182 : vector<8x128xf32>
    %1184 = arith.addf %1177, %1183 : vector<8x128xf32>
    %c21_491 = arith.constant 21 : index
    %c0_492 = arith.constant 0 : index
    %c0_493 = arith.constant 0 : index
    %1185 = vector.load %arg2[%c21_491, %c0_492, %c0_493] : memref<27x8x128xbf16, #tpu.memory_space<vmem>>, vector<1x8x128xbf16>
    %1186 = vector.shape_cast %1185 : vector<1x8x128xbf16> to vector<8x128xbf16>
    %1187 = arith.extf %1186 : vector<8x128xbf16> to vector<8x128xf32>
    %1188 = vector.extract_strided_slice %1036 {offsets = [21, 0], sizes = [1, 128], strides = [1, 1]} : vector<27x128xf32> to vector<1x128xf32>
    %1189 = vector.broadcast %1188 : vector<1x128xf32> to vector<8x128xf32>
    %1190 = arith.mulf %1187, %1189 : vector<8x128xf32>
    %1191 = arith.addf %1184, %1190 : vector<8x128xf32>
    %c22_494 = arith.constant 22 : index
    %c0_495 = arith.constant 0 : index
    %c0_496 = arith.constant 0 : index
    %1192 = vector.load %arg2[%c22_494, %c0_495, %c0_496] : memref<27x8x128xbf16, #tpu.memory_space<vmem>>, vector<1x8x128xbf16>
    %1193 = vector.shape_cast %1192 : vector<1x8x128xbf16> to vector<8x128xbf16>
    %1194 = arith.extf %1193 : vector<8x128xbf16> to vector<8x128xf32>
    %1195 = vector.extract_strided_slice %1036 {offsets = [22, 0], sizes = [1, 128], strides = [1, 1]} : vector<27x128xf32> to vector<1x128xf32>
    %1196 = vector.broadcast %1195 : vector<1x128xf32> to vector<8x128xf32>
    %1197 = arith.mulf %1194, %1196 : vector<8x128xf32>
    %1198 = arith.addf %1191, %1197 : vector<8x128xf32>
    %c23_497 = arith.constant 23 : index
    %c0_498 = arith.constant 0 : index
    %c0_499 = arith.constant 0 : index
    %1199 = vector.load %arg2[%c23_497, %c0_498, %c0_499] : memref<27x8x128xbf16, #tpu.memory_space<vmem>>, vector<1x8x128xbf16>
    %1200 = vector.shape_cast %1199 : vector<1x8x128xbf16> to vector<8x128xbf16>
    %1201 = arith.extf %1200 : vector<8x128xbf16> to vector<8x128xf32>
    %1202 = vector.extract_strided_slice %1036 {offsets = [23, 0], sizes = [1, 128], strides = [1, 1]} : vector<27x128xf32> to vector<1x128xf32>
    %1203 = vector.broadcast %1202 : vector<1x128xf32> to vector<8x128xf32>
    %1204 = arith.mulf %1201, %1203 : vector<8x128xf32>
    %1205 = arith.addf %1198, %1204 : vector<8x128xf32>
    %c24_500 = arith.constant 24 : index
    %c0_501 = arith.constant 0 : index
    %c0_502 = arith.constant 0 : index
    %1206 = vector.load %arg2[%c24_500, %c0_501, %c0_502] : memref<27x8x128xbf16, #tpu.memory_space<vmem>>, vector<1x8x128xbf16>
    %1207 = vector.shape_cast %1206 : vector<1x8x128xbf16> to vector<8x128xbf16>
    %1208 = arith.extf %1207 : vector<8x128xbf16> to vector<8x128xf32>
    %1209 = vector.extract_strided_slice %1036 {offsets = [24, 0], sizes = [1, 128], strides = [1, 1]} : vector<27x128xf32> to vector<1x128xf32>
    %1210 = vector.broadcast %1209 : vector<1x128xf32> to vector<8x128xf32>
    %1211 = arith.mulf %1208, %1210 : vector<8x128xf32>
    %1212 = arith.addf %1205, %1211 : vector<8x128xf32>
    %c25_503 = arith.constant 25 : index
    %c0_504 = arith.constant 0 : index
    %c0_505 = arith.constant 0 : index
    %1213 = vector.load %arg2[%c25_503, %c0_504, %c0_505] : memref<27x8x128xbf16, #tpu.memory_space<vmem>>, vector<1x8x128xbf16>
    %1214 = vector.shape_cast %1213 : vector<1x8x128xbf16> to vector<8x128xbf16>
    %1215 = arith.extf %1214 : vector<8x128xbf16> to vector<8x128xf32>
    %1216 = vector.extract_strided_slice %1036 {offsets = [25, 0], sizes = [1, 128], strides = [1, 1]} : vector<27x128xf32> to vector<1x128xf32>
    %1217 = vector.broadcast %1216 : vector<1x128xf32> to vector<8x128xf32>
    %1218 = arith.mulf %1215, %1217 : vector<8x128xf32>
    %1219 = arith.addf %1212, %1218 : vector<8x128xf32>
    %c26_506 = arith.constant 26 : index
    %c0_507 = arith.constant 0 : index
    %c0_508 = arith.constant 0 : index
    %1220 = vector.load %arg2[%c26_506, %c0_507, %c0_508] : memref<27x8x128xbf16, #tpu.memory_space<vmem>>, vector<1x8x128xbf16>
    %1221 = vector.shape_cast %1220 : vector<1x8x128xbf16> to vector<8x128xbf16>
    %1222 = arith.extf %1221 : vector<8x128xbf16> to vector<8x128xf32>
    %1223 = vector.extract_strided_slice %1036 {offsets = [26, 0], sizes = [1, 128], strides = [1, 1]} : vector<27x128xf32> to vector<1x128xf32>
    %1224 = vector.broadcast %1223 : vector<1x128xf32> to vector<8x128xf32>
    %1225 = arith.mulf %1222, %1224 : vector<8x128xf32>
    %1226 = arith.addf %1219, %1225 : vector<8x128xf32>
    %c5_509 = arith.constant 5 : index
    %c0_510 = arith.constant 0 : index
    %c0_511 = arith.constant 0 : index
    %1227 = vector.load %arg3[%c5_509, %c0_510, %c0_511] : memref<8x8x128xf32, #tpu.memory_space<vmem>>, vector<1x8x128xf32>
    %1228 = vector.shape_cast %1227 : vector<1x8x128xf32> to vector<8x128xf32>
    %1229 = vector.shape_cast %1226 : vector<8x128xf32> to vector<1x8x128xf32>
    tpu.vector_store %arg3[%c5_509, %c0_510, %c0_511], %1229 {strides = array<i32>} : memref<8x8x128xf32, #tpu.memory_space<vmem>>, vector<1x8x128xf32>,
    %c6_512 = arith.constant 6 : index
    %c0_513 = arith.constant 0 : index
    %c0_514 = arith.constant 0 : index
    %1230 = vector.load %arg1[%c6_512, %c0_513, %c0_514] : memref<8x27x128xf32, #tpu.memory_space<vmem>>, vector<1x27x128xf32>
    %1231 = vector.shape_cast %1230 : vector<1x27x128xf32> to vector<27x128xf32>
    %cst_515 = arith.constant dense<0xFF800000> : vector<128xf32>
    %1232 = vector.multi_reduction <maximumf>, %1231, %cst_515 [0] : vector<27x128xf32> to vector<128xf32>
    %1233 = vector.shape_cast %1232 : vector<128xf32> to vector<1x128xf32>
    %1234 = vector.broadcast %1233 : vector<1x128xf32> to vector<27x128xf32>
    %1235 = arith.subf %1231, %1234 : vector<27x128xf32>
    %1236 = math.exp %1235 : vector<27x128xf32>
    %cst_516 = arith.constant dense<0.000000e+00> : vector<128xf32>
    %1237 = vector.multi_reduction <add>, %1236, %cst_516 [0] : vector<27x128xf32> to vector<128xf32>
    %1238 = vector.shape_cast %1237 : vector<128xf32> to vector<1x128xf32>
    %1239 = tpu.reciprocal %1238 {approx = true} : vector<1x128xf32> -> vector<1x128xf32>
    %1240 = vector.broadcast %1239 : vector<1x128xf32> to vector<27x128xf32>
    %1241 = arith.mulf %1236, %1240 : vector<27x128xf32>
    %cst_517 = arith.constant 0.000000e+00 : f32
    %1242 = vector.broadcast %cst_517 : f32 to vector<8x128xf32>
    %c0_518 = arith.constant 0 : index
    %c0_519 = arith.constant 0 : index
    %c0_520 = arith.constant 0 : index
    %1243 = vector.load %arg2[%c0_518, %c0_519, %c0_520] : memref<27x8x128xbf16, #tpu.memory_space<vmem>>, vector<1x8x128xbf16>
    %1244 = vector.shape_cast %1243 : vector<1x8x128xbf16> to vector<8x128xbf16>
    %1245 = arith.extf %1244 : vector<8x128xbf16> to vector<8x128xf32>
    %1246 = vector.extract_strided_slice %1241 {offsets = [0, 0], sizes = [1, 128], strides = [1, 1]} : vector<27x128xf32> to vector<1x128xf32>
    %1247 = vector.broadcast %1246 : vector<1x128xf32> to vector<8x128xf32>
    %1248 = arith.mulf %1245, %1247 : vector<8x128xf32>
    %1249 = arith.addf %1242, %1248 : vector<8x128xf32>
    %c1_521 = arith.constant 1 : index
    %c0_522 = arith.constant 0 : index
    %c0_523 = arith.constant 0 : index
    %1250 = vector.load %arg2[%c1_521, %c0_522, %c0_523] : memref<27x8x128xbf16, #tpu.memory_space<vmem>>, vector<1x8x128xbf16>
    %1251 = vector.shape_cast %1250 : vector<1x8x128xbf16> to vector<8x128xbf16>
    %1252 = arith.extf %1251 : vector<8x128xbf16> to vector<8x128xf32>
    %1253 = vector.extract_strided_slice %1241 {offsets = [1, 0], sizes = [1, 128], strides = [1, 1]} : vector<27x128xf32> to vector<1x128xf32>
    %1254 = vector.broadcast %1253 : vector<1x128xf32> to vector<8x128xf32>
    %1255 = arith.mulf %1252, %1254 : vector<8x128xf32>
    %1256 = arith.addf %1249, %1255 : vector<8x128xf32>
    %c2_524 = arith.constant 2 : index
    %c0_525 = arith.constant 0 : index
    %c0_526 = arith.constant 0 : index
    %1257 = vector.load %arg2[%c2_524, %c0_525, %c0_526] : memref<27x8x128xbf16, #tpu.memory_space<vmem>>, vector<1x8x128xbf16>
    %1258 = vector.shape_cast %1257 : vector<1x8x128xbf16> to vector<8x128xbf16>
    %1259 = arith.extf %1258 : vector<8x128xbf16> to vector<8x128xf32>
    %1260 = vector.extract_strided_slice %1241 {offsets = [2, 0], sizes = [1, 128], strides = [1, 1]} : vector<27x128xf32> to vector<1x128xf32>
    %1261 = vector.broadcast %1260 : vector<1x128xf32> to vector<8x128xf32>
    %1262 = arith.mulf %1259, %1261 : vector<8x128xf32>
    %1263 = arith.addf %1256, %1262 : vector<8x128xf32>
    %c3_527 = arith.constant 3 : index
    %c0_528 = arith.constant 0 : index
    %c0_529 = arith.constant 0 : index
    %1264 = vector.load %arg2[%c3_527, %c0_528, %c0_529] : memref<27x8x128xbf16, #tpu.memory_space<vmem>>, vector<1x8x128xbf16>
    %1265 = vector.shape_cast %1264 : vector<1x8x128xbf16> to vector<8x128xbf16>
    %1266 = arith.extf %1265 : vector<8x128xbf16> to vector<8x128xf32>
    %1267 = vector.extract_strided_slice %1241 {offsets = [3, 0], sizes = [1, 128], strides = [1, 1]} : vector<27x128xf32> to vector<1x128xf32>
    %1268 = vector.broadcast %1267 : vector<1x128xf32> to vector<8x128xf32>
    %1269 = arith.mulf %1266, %1268 : vector<8x128xf32>
    %1270 = arith.addf %1263, %1269 : vector<8x128xf32>
    %c4_530 = arith.constant 4 : index
    %c0_531 = arith.constant 0 : index
    %c0_532 = arith.constant 0 : index
    %1271 = vector.load %arg2[%c4_530, %c0_531, %c0_532] : memref<27x8x128xbf16, #tpu.memory_space<vmem>>, vector<1x8x128xbf16>
    %1272 = vector.shape_cast %1271 : vector<1x8x128xbf16> to vector<8x128xbf16>
    %1273 = arith.extf %1272 : vector<8x128xbf16> to vector<8x128xf32>
    %1274 = vector.extract_strided_slice %1241 {offsets = [4, 0], sizes = [1, 128], strides = [1, 1]} : vector<27x128xf32> to vector<1x128xf32>
    %1275 = vector.broadcast %1274 : vector<1x128xf32> to vector<8x128xf32>
    %1276 = arith.mulf %1273, %1275 : vector<8x128xf32>
    %1277 = arith.addf %1270, %1276 : vector<8x128xf32>
    %c5_533 = arith.constant 5 : index
    %c0_534 = arith.constant 0 : index
    %c0_535 = arith.constant 0 : index
    %1278 = vector.load %arg2[%c5_533, %c0_534, %c0_535] : memref<27x8x128xbf16, #tpu.memory_space<vmem>>, vector<1x8x128xbf16>
    %1279 = vector.shape_cast %1278 : vector<1x8x128xbf16> to vector<8x128xbf16>
    %1280 = arith.extf %1279 : vector<8x128xbf16> to vector<8x128xf32>
    %1281 = vector.extract_strided_slice %1241 {offsets = [5, 0], sizes = [1, 128], strides = [1, 1]} : vector<27x128xf32> to vector<1x128xf32>
    %1282 = vector.broadcast %1281 : vector<1x128xf32> to vector<8x128xf32>
    %1283 = arith.mulf %1280, %1282 : vector<8x128xf32>
    %1284 = arith.addf %1277, %1283 : vector<8x128xf32>
    %c6_536 = arith.constant 6 : index
    %c0_537 = arith.constant 0 : index
    %c0_538 = arith.constant 0 : index
    %1285 = vector.load %arg2[%c6_536, %c0_537, %c0_538] : memref<27x8x128xbf16, #tpu.memory_space<vmem>>, vector<1x8x128xbf16>
    %1286 = vector.shape_cast %1285 : vector<1x8x128xbf16> to vector<8x128xbf16>
    %1287 = arith.extf %1286 : vector<8x128xbf16> to vector<8x128xf32>
    %1288 = vector.extract_strided_slice %1241 {offsets = [6, 0], sizes = [1, 128], strides = [1, 1]} : vector<27x128xf32> to vector<1x128xf32>
    %1289 = vector.broadcast %1288 : vector<1x128xf32> to vector<8x128xf32>
    %1290 = arith.mulf %1287, %1289 : vector<8x128xf32>
    %1291 = arith.addf %1284, %1290 : vector<8x128xf32>
    %c7_539 = arith.constant 7 : index
    %c0_540 = arith.constant 0 : index
    %c0_541 = arith.constant 0 : index
    %1292 = vector.load %arg2[%c7_539, %c0_540, %c0_541] : memref<27x8x128xbf16, #tpu.memory_space<vmem>>, vector<1x8x128xbf16>
    %1293 = vector.shape_cast %1292 : vector<1x8x128xbf16> to vector<8x128xbf16>
    %1294 = arith.extf %1293 : vector<8x128xbf16> to vector<8x128xf32>
    %1295 = vector.extract_strided_slice %1241 {offsets = [7, 0], sizes = [1, 128], strides = [1, 1]} : vector<27x128xf32> to vector<1x128xf32>
    %1296 = vector.broadcast %1295 : vector<1x128xf32> to vector<8x128xf32>
    %1297 = arith.mulf %1294, %1296 : vector<8x128xf32>
    %1298 = arith.addf %1291, %1297 : vector<8x128xf32>
    %c8_542 = arith.constant 8 : index
    %c0_543 = arith.constant 0 : index
    %c0_544 = arith.constant 0 : index
    %1299 = vector.load %arg2[%c8_542, %c0_543, %c0_544] : memref<27x8x128xbf16, #tpu.memory_space<vmem>>, vector<1x8x128xbf16>
    %1300 = vector.shape_cast %1299 : vector<1x8x128xbf16> to vector<8x128xbf16>
    %1301 = arith.extf %1300 : vector<8x128xbf16> to vector<8x128xf32>
    %1302 = vector.extract_strided_slice %1241 {offsets = [8, 0], sizes = [1, 128], strides = [1, 1]} : vector<27x128xf32> to vector<1x128xf32>
    %1303 = vector.broadcast %1302 : vector<1x128xf32> to vector<8x128xf32>
    %1304 = arith.mulf %1301, %1303 : vector<8x128xf32>
    %1305 = arith.addf %1298, %1304 : vector<8x128xf32>
    %c9_545 = arith.constant 9 : index
    %c0_546 = arith.constant 0 : index
    %c0_547 = arith.constant 0 : index
    %1306 = vector.load %arg2[%c9_545, %c0_546, %c0_547] : memref<27x8x128xbf16, #tpu.memory_space<vmem>>, vector<1x8x128xbf16>
    %1307 = vector.shape_cast %1306 : vector<1x8x128xbf16> to vector<8x128xbf16>
    %1308 = arith.extf %1307 : vector<8x128xbf16> to vector<8x128xf32>
    %1309 = vector.extract_strided_slice %1241 {offsets = [9, 0], sizes = [1, 128], strides = [1, 1]} : vector<27x128xf32> to vector<1x128xf32>
    %1310 = vector.broadcast %1309 : vector<1x128xf32> to vector<8x128xf32>
    %1311 = arith.mulf %1308, %1310 : vector<8x128xf32>
    %1312 = arith.addf %1305, %1311 : vector<8x128xf32>
    %c10_548 = arith.constant 10 : index
    %c0_549 = arith.constant 0 : index
    %c0_550 = arith.constant 0 : index
    %1313 = vector.load %arg2[%c10_548, %c0_549, %c0_550] : memref<27x8x128xbf16, #tpu.memory_space<vmem>>, vector<1x8x128xbf16>
    %1314 = vector.shape_cast %1313 : vector<1x8x128xbf16> to vector<8x128xbf16>
    %1315 = arith.extf %1314 : vector<8x128xbf16> to vector<8x128xf32>
    %1316 = vector.extract_strided_slice %1241 {offsets = [10, 0], sizes = [1, 128], strides = [1, 1]} : vector<27x128xf32> to vector<1x128xf32>
    %1317 = vector.broadcast %1316 : vector<1x128xf32> to vector<8x128xf32>
    %1318 = arith.mulf %1315, %1317 : vector<8x128xf32>
    %1319 = arith.addf %1312, %1318 : vector<8x128xf32>
    %c11_551 = arith.constant 11 : index
    %c0_552 = arith.constant 0 : index
    %c0_553 = arith.constant 0 : index
    %1320 = vector.load %arg2[%c11_551, %c0_552, %c0_553] : memref<27x8x128xbf16, #tpu.memory_space<vmem>>, vector<1x8x128xbf16>
    %1321 = vector.shape_cast %1320 : vector<1x8x128xbf16> to vector<8x128xbf16>
    %1322 = arith.extf %1321 : vector<8x128xbf16> to vector<8x128xf32>
    %1323 = vector.extract_strided_slice %1241 {offsets = [11, 0], sizes = [1, 128], strides = [1, 1]} : vector<27x128xf32> to vector<1x128xf32>
    %1324 = vector.broadcast %1323 : vector<1x128xf32> to vector<8x128xf32>
    %1325 = arith.mulf %1322, %1324 : vector<8x128xf32>
    %1326 = arith.addf %1319, %1325 : vector<8x128xf32>
    %c12_554 = arith.constant 12 : index
    %c0_555 = arith.constant 0 : index
    %c0_556 = arith.constant 0 : index
    %1327 = vector.load %arg2[%c12_554, %c0_555, %c0_556] : memref<27x8x128xbf16, #tpu.memory_space<vmem>>, vector<1x8x128xbf16>
    %1328 = vector.shape_cast %1327 : vector<1x8x128xbf16> to vector<8x128xbf16>
    %1329 = arith.extf %1328 : vector<8x128xbf16> to vector<8x128xf32>
    %1330 = vector.extract_strided_slice %1241 {offsets = [12, 0], sizes = [1, 128], strides = [1, 1]} : vector<27x128xf32> to vector<1x128xf32>
    %1331 = vector.broadcast %1330 : vector<1x128xf32> to vector<8x128xf32>
    %1332 = arith.mulf %1329, %1331 : vector<8x128xf32>
    %1333 = arith.addf %1326, %1332 : vector<8x128xf32>
    %c13_557 = arith.constant 13 : index
    %c0_558 = arith.constant 0 : index
    %c0_559 = arith.constant 0 : index
    %1334 = vector.load %arg2[%c13_557, %c0_558, %c0_559] : memref<27x8x128xbf16, #tpu.memory_space<vmem>>, vector<1x8x128xbf16>
    %1335 = vector.shape_cast %1334 : vector<1x8x128xbf16> to vector<8x128xbf16>
    %1336 = arith.extf %1335 : vector<8x128xbf16> to vector<8x128xf32>
    %1337 = vector.extract_strided_slice %1241 {offsets = [13, 0], sizes = [1, 128], strides = [1, 1]} : vector<27x128xf32> to vector<1x128xf32>
    %1338 = vector.broadcast %1337 : vector<1x128xf32> to vector<8x128xf32>
    %1339 = arith.mulf %1336, %1338 : vector<8x128xf32>
    %1340 = arith.addf %1333, %1339 : vector<8x128xf32>
    %c14_560 = arith.constant 14 : index
    %c0_561 = arith.constant 0 : index
    %c0_562 = arith.constant 0 : index
    %1341 = vector.load %arg2[%c14_560, %c0_561, %c0_562] : memref<27x8x128xbf16, #tpu.memory_space<vmem>>, vector<1x8x128xbf16>
    %1342 = vector.shape_cast %1341 : vector<1x8x128xbf16> to vector<8x128xbf16>
    %1343 = arith.extf %1342 : vector<8x128xbf16> to vector<8x128xf32>
    %1344 = vector.extract_strided_slice %1241 {offsets = [14, 0], sizes = [1, 128], strides = [1, 1]} : vector<27x128xf32> to vector<1x128xf32>
    %1345 = vector.broadcast %1344 : vector<1x128xf32> to vector<8x128xf32>
    %1346 = arith.mulf %1343, %1345 : vector<8x128xf32>
    %1347 = arith.addf %1340, %1346 : vector<8x128xf32>
    %c15_563 = arith.constant 15 : index
    %c0_564 = arith.constant 0 : index
    %c0_565 = arith.constant 0 : index
    %1348 = vector.load %arg2[%c15_563, %c0_564, %c0_565] : memref<27x8x128xbf16, #tpu.memory_space<vmem>>, vector<1x8x128xbf16>
    %1349 = vector.shape_cast %1348 : vector<1x8x128xbf16> to vector<8x128xbf16>
    %1350 = arith.extf %1349 : vector<8x128xbf16> to vector<8x128xf32>
    %1351 = vector.extract_strided_slice %1241 {offsets = [15, 0], sizes = [1, 128], strides = [1, 1]} : vector<27x128xf32> to vector<1x128xf32>
    %1352 = vector.broadcast %1351 : vector<1x128xf32> to vector<8x128xf32>
    %1353 = arith.mulf %1350, %1352 : vector<8x128xf32>
    %1354 = arith.addf %1347, %1353 : vector<8x128xf32>
    %c16_566 = arith.constant 16 : index
    %c0_567 = arith.constant 0 : index
    %c0_568 = arith.constant 0 : index
    %1355 = vector.load %arg2[%c16_566, %c0_567, %c0_568] : memref<27x8x128xbf16, #tpu.memory_space<vmem>>, vector<1x8x128xbf16>
    %1356 = vector.shape_cast %1355 : vector<1x8x128xbf16> to vector<8x128xbf16>
    %1357 = arith.extf %1356 : vector<8x128xbf16> to vector<8x128xf32>
    %1358 = vector.extract_strided_slice %1241 {offsets = [16, 0], sizes = [1, 128], strides = [1, 1]} : vector<27x128xf32> to vector<1x128xf32>
    %1359 = vector.broadcast %1358 : vector<1x128xf32> to vector<8x128xf32>
    %1360 = arith.mulf %1357, %1359 : vector<8x128xf32>
    %1361 = arith.addf %1354, %1360 : vector<8x128xf32>
    %c17_569 = arith.constant 17 : index
    %c0_570 = arith.constant 0 : index
    %c0_571 = arith.constant 0 : index
    %1362 = vector.load %arg2[%c17_569, %c0_570, %c0_571] : memref<27x8x128xbf16, #tpu.memory_space<vmem>>, vector<1x8x128xbf16>
    %1363 = vector.shape_cast %1362 : vector<1x8x128xbf16> to vector<8x128xbf16>
    %1364 = arith.extf %1363 : vector<8x128xbf16> to vector<8x128xf32>
    %1365 = vector.extract_strided_slice %1241 {offsets = [17, 0], sizes = [1, 128], strides = [1, 1]} : vector<27x128xf32> to vector<1x128xf32>
    %1366 = vector.broadcast %1365 : vector<1x128xf32> to vector<8x128xf32>
    %1367 = arith.mulf %1364, %1366 : vector<8x128xf32>
    %1368 = arith.addf %1361, %1367 : vector<8x128xf32>
    %c18_572 = arith.constant 18 : index
    %c0_573 = arith.constant 0 : index
    %c0_574 = arith.constant 0 : index
    %1369 = vector.load %arg2[%c18_572, %c0_573, %c0_574] : memref<27x8x128xbf16, #tpu.memory_space<vmem>>, vector<1x8x128xbf16>
    %1370 = vector.shape_cast %1369 : vector<1x8x128xbf16> to vector<8x128xbf16>
    %1371 = arith.extf %1370 : vector<8x128xbf16> to vector<8x128xf32>
    %1372 = vector.extract_strided_slice %1241 {offsets = [18, 0], sizes = [1, 128], strides = [1, 1]} : vector<27x128xf32> to vector<1x128xf32>
    %1373 = vector.broadcast %1372 : vector<1x128xf32> to vector<8x128xf32>
    %1374 = arith.mulf %1371, %1373 : vector<8x128xf32>
    %1375 = arith.addf %1368, %1374 : vector<8x128xf32>
    %c19_575 = arith.constant 19 : index
    %c0_576 = arith.constant 0 : index
    %c0_577 = arith.constant 0 : index
    %1376 = vector.load %arg2[%c19_575, %c0_576, %c0_577] : memref<27x8x128xbf16, #tpu.memory_space<vmem>>, vector<1x8x128xbf16>
    %1377 = vector.shape_cast %1376 : vector<1x8x128xbf16> to vector<8x128xbf16>
    %1378 = arith.extf %1377 : vector<8x128xbf16> to vector<8x128xf32>
    %1379 = vector.extract_strided_slice %1241 {offsets = [19, 0], sizes = [1, 128], strides = [1, 1]} : vector<27x128xf32> to vector<1x128xf32>
    %1380 = vector.broadcast %1379 : vector<1x128xf32> to vector<8x128xf32>
    %1381 = arith.mulf %1378, %1380 : vector<8x128xf32>
    %1382 = arith.addf %1375, %1381 : vector<8x128xf32>
    %c20_578 = arith.constant 20 : index
    %c0_579 = arith.constant 0 : index
    %c0_580 = arith.constant 0 : index
    %1383 = vector.load %arg2[%c20_578, %c0_579, %c0_580] : memref<27x8x128xbf16, #tpu.memory_space<vmem>>, vector<1x8x128xbf16>
    %1384 = vector.shape_cast %1383 : vector<1x8x128xbf16> to vector<8x128xbf16>
    %1385 = arith.extf %1384 : vector<8x128xbf16> to vector<8x128xf32>
    %1386 = vector.extract_strided_slice %1241 {offsets = [20, 0], sizes = [1, 128], strides = [1, 1]} : vector<27x128xf32> to vector<1x128xf32>
    %1387 = vector.broadcast %1386 : vector<1x128xf32> to vector<8x128xf32>
    %1388 = arith.mulf %1385, %1387 : vector<8x128xf32>
    %1389 = arith.addf %1382, %1388 : vector<8x128xf32>
    %c21_581 = arith.constant 21 : index
    %c0_582 = arith.constant 0 : index
    %c0_583 = arith.constant 0 : index
    %1390 = vector.load %arg2[%c21_581, %c0_582, %c0_583] : memref<27x8x128xbf16, #tpu.memory_space<vmem>>, vector<1x8x128xbf16>
    %1391 = vector.shape_cast %1390 : vector<1x8x128xbf16> to vector<8x128xbf16>
    %1392 = arith.extf %1391 : vector<8x128xbf16> to vector<8x128xf32>
    %1393 = vector.extract_strided_slice %1241 {offsets = [21, 0], sizes = [1, 128], strides = [1, 1]} : vector<27x128xf32> to vector<1x128xf32>
    %1394 = vector.broadcast %1393 : vector<1x128xf32> to vector<8x128xf32>
    %1395 = arith.mulf %1392, %1394 : vector<8x128xf32>
    %1396 = arith.addf %1389, %1395 : vector<8x128xf32>
    %c22_584 = arith.constant 22 : index
    %c0_585 = arith.constant 0 : index
    %c0_586 = arith.constant 0 : index
    %1397 = vector.load %arg2[%c22_584, %c0_585, %c0_586] : memref<27x8x128xbf16, #tpu.memory_space<vmem>>, vector<1x8x128xbf16>
    %1398 = vector.shape_cast %1397 : vector<1x8x128xbf16> to vector<8x128xbf16>
    %1399 = arith.extf %1398 : vector<8x128xbf16> to vector<8x128xf32>
    %1400 = vector.extract_strided_slice %1241 {offsets = [22, 0], sizes = [1, 128], strides = [1, 1]} : vector<27x128xf32> to vector<1x128xf32>
    %1401 = vector.broadcast %1400 : vector<1x128xf32> to vector<8x128xf32>
    %1402 = arith.mulf %1399, %1401 : vector<8x128xf32>
    %1403 = arith.addf %1396, %1402 : vector<8x128xf32>
    %c23_587 = arith.constant 23 : index
    %c0_588 = arith.constant 0 : index
    %c0_589 = arith.constant 0 : index
    %1404 = vector.load %arg2[%c23_587, %c0_588, %c0_589] : memref<27x8x128xbf16, #tpu.memory_space<vmem>>, vector<1x8x128xbf16>
    %1405 = vector.shape_cast %1404 : vector<1x8x128xbf16> to vector<8x128xbf16>
    %1406 = arith.extf %1405 : vector<8x128xbf16> to vector<8x128xf32>
    %1407 = vector.extract_strided_slice %1241 {offsets = [23, 0], sizes = [1, 128], strides = [1, 1]} : vector<27x128xf32> to vector<1x128xf32>
    %1408 = vector.broadcast %1407 : vector<1x128xf32> to vector<8x128xf32>
    %1409 = arith.mulf %1406, %1408 : vector<8x128xf32>
    %1410 = arith.addf %1403, %1409 : vector<8x128xf32>
    %c24_590 = arith.constant 24 : index
    %c0_591 = arith.constant 0 : index
    %c0_592 = arith.constant 0 : index
    %1411 = vector.load %arg2[%c24_590, %c0_591, %c0_592] : memref<27x8x128xbf16, #tpu.memory_space<vmem>>, vector<1x8x128xbf16>
    %1412 = vector.shape_cast %1411 : vector<1x8x128xbf16> to vector<8x128xbf16>
    %1413 = arith.extf %1412 : vector<8x128xbf16> to vector<8x128xf32>
    %1414 = vector.extract_strided_slice %1241 {offsets = [24, 0], sizes = [1, 128], strides = [1, 1]} : vector<27x128xf32> to vector<1x128xf32>
    %1415 = vector.broadcast %1414 : vector<1x128xf32> to vector<8x128xf32>
    %1416 = arith.mulf %1413, %1415 : vector<8x128xf32>
    %1417 = arith.addf %1410, %1416 : vector<8x128xf32>
    %c25_593 = arith.constant 25 : index
    %c0_594 = arith.constant 0 : index
    %c0_595 = arith.constant 0 : index
    %1418 = vector.load %arg2[%c25_593, %c0_594, %c0_595] : memref<27x8x128xbf16, #tpu.memory_space<vmem>>, vector<1x8x128xbf16>
    %1419 = vector.shape_cast %1418 : vector<1x8x128xbf16> to vector<8x128xbf16>
    %1420 = arith.extf %1419 : vector<8x128xbf16> to vector<8x128xf32>
    %1421 = vector.extract_strided_slice %1241 {offsets = [25, 0], sizes = [1, 128], strides = [1, 1]} : vector<27x128xf32> to vector<1x128xf32>
    %1422 = vector.broadcast %1421 : vector<1x128xf32> to vector<8x128xf32>
    %1423 = arith.mulf %1420, %1422 : vector<8x128xf32>
    %1424 = arith.addf %1417, %1423 : vector<8x128xf32>
    %c26_596 = arith.constant 26 : index
    %c0_597 = arith.constant 0 : index
    %c0_598 = arith.constant 0 : index
    %1425 = vector.load %arg2[%c26_596, %c0_597, %c0_598] : memref<27x8x128xbf16, #tpu.memory_space<vmem>>, vector<1x8x128xbf16>
    %1426 = vector.shape_cast %1425 : vector<1x8x128xbf16> to vector<8x128xbf16>
    %1427 = arith.extf %1426 : vector<8x128xbf16> to vector<8x128xf32>
    %1428 = vector.extract_strided_slice %1241 {offsets = [26, 0], sizes = [1, 128], strides = [1, 1]} : vector<27x128xf32> to vector<1x128xf32>
    %1429 = vector.broadcast %1428 : vector<1x128xf32> to vector<8x128xf32>
    %1430 = arith.mulf %1427, %1429 : vector<8x128xf32>
    %1431 = arith.addf %1424, %1430 : vector<8x128xf32>
    %c6_599 = arith.constant 6 : index
    %c0_600 = arith.constant 0 : index
    %c0_601 = arith.constant 0 : index
    %1432 = vector.load %arg3[%c6_599, %c0_600, %c0_601] : memref<8x8x128xf32, #tpu.memory_space<vmem>>, vector<1x8x128xf32>
    %1433 = vector.shape_cast %1432 : vector<1x8x128xf32> to vector<8x128xf32>
    %1434 = vector.shape_cast %1431 : vector<8x128xf32> to vector<1x8x128xf32>
    tpu.vector_store %arg3[%c6_599, %c0_600, %c0_601], %1434 {strides = array<i32>} : memref<8x8x128xf32, #tpu.memory_space<vmem>>, vector<1x8x128xf32>,
    %c7_602 = arith.constant 7 : index
    %c0_603 = arith.constant 0 : index
    %c0_604 = arith.constant 0 : index
    %1435 = vector.load %arg1[%c7_602, %c0_603, %c0_604] : memref<8x27x128xf32, #tpu.memory_space<vmem>>, vector<1x27x128xf32>
    %1436 = vector.shape_cast %1435 : vector<1x27x128xf32> to vector<27x128xf32>
    %cst_605 = arith.constant dense<0xFF800000> : vector<128xf32>
    %1437 = vector.multi_reduction <maximumf>, %1436, %cst_605 [0] : vector<27x128xf32> to vector<128xf32>
    %1438 = vector.shape_cast %1437 : vector<128xf32> to vector<1x128xf32>
    %1439 = vector.broadcast %1438 : vector<1x128xf32> to vector<27x128xf32>
    %1440 = arith.subf %1436, %1439 : vector<27x128xf32>
    %1441 = math.exp %1440 : vector<27x128xf32>
    %cst_606 = arith.constant dense<0.000000e+00> : vector<128xf32>
    %1442 = vector.multi_reduction <add>, %1441, %cst_606 [0] : vector<27x128xf32> to vector<128xf32>
    %1443 = vector.shape_cast %1442 : vector<128xf32> to vector<1x128xf32>
    %1444 = tpu.reciprocal %1443 {approx = true} : vector<1x128xf32> -> vector<1x128xf32>
    %1445 = vector.broadcast %1444 : vector<1x128xf32> to vector<27x128xf32>
    %1446 = arith.mulf %1441, %1445 : vector<27x128xf32>
    %cst_607 = arith.constant 0.000000e+00 : f32
    %1447 = vector.broadcast %cst_607 : f32 to vector<8x128xf32>
    %c0_608 = arith.constant 0 : index
    %c0_609 = arith.constant 0 : index
    %c0_610 = arith.constant 0 : index
    %1448 = vector.load %arg2[%c0_608, %c0_609, %c0_610] : memref<27x8x128xbf16, #tpu.memory_space<vmem>>, vector<1x8x128xbf16>
    %1449 = vector.shape_cast %1448 : vector<1x8x128xbf16> to vector<8x128xbf16>
    %1450 = arith.extf %1449 : vector<8x128xbf16> to vector<8x128xf32>
    %1451 = vector.extract_strided_slice %1446 {offsets = [0, 0], sizes = [1, 128], strides = [1, 1]} : vector<27x128xf32> to vector<1x128xf32>
    %1452 = vector.broadcast %1451 : vector<1x128xf32> to vector<8x128xf32>
    %1453 = arith.mulf %1450, %1452 : vector<8x128xf32>
    %1454 = arith.addf %1447, %1453 : vector<8x128xf32>
    %c1_611 = arith.constant 1 : index
    %c0_612 = arith.constant 0 : index
    %c0_613 = arith.constant 0 : index
    %1455 = vector.load %arg2[%c1_611, %c0_612, %c0_613] : memref<27x8x128xbf16, #tpu.memory_space<vmem>>, vector<1x8x128xbf16>
    %1456 = vector.shape_cast %1455 : vector<1x8x128xbf16> to vector<8x128xbf16>
    %1457 = arith.extf %1456 : vector<8x128xbf16> to vector<8x128xf32>
    %1458 = vector.extract_strided_slice %1446 {offsets = [1, 0], sizes = [1, 128], strides = [1, 1]} : vector<27x128xf32> to vector<1x128xf32>
    %1459 = vector.broadcast %1458 : vector<1x128xf32> to vector<8x128xf32>
    %1460 = arith.mulf %1457, %1459 : vector<8x128xf32>
    %1461 = arith.addf %1454, %1460 : vector<8x128xf32>
    %c2_614 = arith.constant 2 : index
    %c0_615 = arith.constant 0 : index
    %c0_616 = arith.constant 0 : index
    %1462 = vector.load %arg2[%c2_614, %c0_615, %c0_616] : memref<27x8x128xbf16, #tpu.memory_space<vmem>>, vector<1x8x128xbf16>
    %1463 = vector.shape_cast %1462 : vector<1x8x128xbf16> to vector<8x128xbf16>
    %1464 = arith.extf %1463 : vector<8x128xbf16> to vector<8x128xf32>
    %1465 = vector.extract_strided_slice %1446 {offsets = [2, 0], sizes = [1, 128], strides = [1, 1]} : vector<27x128xf32> to vector<1x128xf32>
    %1466 = vector.broadcast %1465 : vector<1x128xf32> to vector<8x128xf32>
    %1467 = arith.mulf %1464, %1466 : vector<8x128xf32>
    %1468 = arith.addf %1461, %1467 : vector<8x128xf32>
    %c3_617 = arith.constant 3 : index
    %c0_618 = arith.constant 0 : index
    %c0_619 = arith.constant 0 : index
    %1469 = vector.load %arg2[%c3_617, %c0_618, %c0_619] : memref<27x8x128xbf16, #tpu.memory_space<vmem>>, vector<1x8x128xbf16>
    %1470 = vector.shape_cast %1469 : vector<1x8x128xbf16> to vector<8x128xbf16>
    %1471 = arith.extf %1470 : vector<8x128xbf16> to vector<8x128xf32>
    %1472 = vector.extract_strided_slice %1446 {offsets = [3, 0], sizes = [1, 128], strides = [1, 1]} : vector<27x128xf32> to vector<1x128xf32>
    %1473 = vector.broadcast %1472 : vector<1x128xf32> to vector<8x128xf32>
    %1474 = arith.mulf %1471, %1473 : vector<8x128xf32>
    %1475 = arith.addf %1468, %1474 : vector<8x128xf32>
    %c4_620 = arith.constant 4 : index
    %c0_621 = arith.constant 0 : index
    %c0_622 = arith.constant 0 : index
    %1476 = vector.load %arg2[%c4_620, %c0_621, %c0_622] : memref<27x8x128xbf16, #tpu.memory_space<vmem>>, vector<1x8x128xbf16>
    %1477 = vector.shape_cast %1476 : vector<1x8x128xbf16> to vector<8x128xbf16>
    %1478 = arith.extf %1477 : vector<8x128xbf16> to vector<8x128xf32>
    %1479 = vector.extract_strided_slice %1446 {offsets = [4, 0], sizes = [1, 128], strides = [1, 1]} : vector<27x128xf32> to vector<1x128xf32>
    %1480 = vector.broadcast %1479 : vector<1x128xf32> to vector<8x128xf32>
    %1481 = arith.mulf %1478, %1480 : vector<8x128xf32>
    %1482 = arith.addf %1475, %1481 : vector<8x128xf32>
    %c5_623 = arith.constant 5 : index
    %c0_624 = arith.constant 0 : index
    %c0_625 = arith.constant 0 : index
    %1483 = vector.load %arg2[%c5_623, %c0_624, %c0_625] : memref<27x8x128xbf16, #tpu.memory_space<vmem>>, vector<1x8x128xbf16>
    %1484 = vector.shape_cast %1483 : vector<1x8x128xbf16> to vector<8x128xbf16>
    %1485 = arith.extf %1484 : vector<8x128xbf16> to vector<8x128xf32>
    %1486 = vector.extract_strided_slice %1446 {offsets = [5, 0], sizes = [1, 128], strides = [1, 1]} : vector<27x128xf32> to vector<1x128xf32>
    %1487 = vector.broadcast %1486 : vector<1x128xf32> to vector<8x128xf32>
    %1488 = arith.mulf %1485, %1487 : vector<8x128xf32>
    %1489 = arith.addf %1482, %1488 : vector<8x128xf32>
    %c6_626 = arith.constant 6 : index
    %c0_627 = arith.constant 0 : index
    %c0_628 = arith.constant 0 : index
    %1490 = vector.load %arg2[%c6_626, %c0_627, %c0_628] : memref<27x8x128xbf16, #tpu.memory_space<vmem>>, vector<1x8x128xbf16>
    %1491 = vector.shape_cast %1490 : vector<1x8x128xbf16> to vector<8x128xbf16>
    %1492 = arith.extf %1491 : vector<8x128xbf16> to vector<8x128xf32>
    %1493 = vector.extract_strided_slice %1446 {offsets = [6, 0], sizes = [1, 128], strides = [1, 1]} : vector<27x128xf32> to vector<1x128xf32>
    %1494 = vector.broadcast %1493 : vector<1x128xf32> to vector<8x128xf32>
    %1495 = arith.mulf %1492, %1494 : vector<8x128xf32>
    %1496 = arith.addf %1489, %1495 : vector<8x128xf32>
    %c7_629 = arith.constant 7 : index
    %c0_630 = arith.constant 0 : index
    %c0_631 = arith.constant 0 : index
    %1497 = vector.load %arg2[%c7_629, %c0_630, %c0_631] : memref<27x8x128xbf16, #tpu.memory_space<vmem>>, vector<1x8x128xbf16>
    %1498 = vector.shape_cast %1497 : vector<1x8x128xbf16> to vector<8x128xbf16>
    %1499 = arith.extf %1498 : vector<8x128xbf16> to vector<8x128xf32>
    %1500 = vector.extract_strided_slice %1446 {offsets = [7, 0], sizes = [1, 128], strides = [1, 1]} : vector<27x128xf32> to vector<1x128xf32>
    %1501 = vector.broadcast %1500 : vector<1x128xf32> to vector<8x128xf32>
    %1502 = arith.mulf %1499, %1501 : vector<8x128xf32>
    %1503 = arith.addf %1496, %1502 : vector<8x128xf32>
    %c8_632 = arith.constant 8 : index
    %c0_633 = arith.constant 0 : index
    %c0_634 = arith.constant 0 : index
    %1504 = vector.load %arg2[%c8_632, %c0_633, %c0_634] : memref<27x8x128xbf16, #tpu.memory_space<vmem>>, vector<1x8x128xbf16>
    %1505 = vector.shape_cast %1504 : vector<1x8x128xbf16> to vector<8x128xbf16>
    %1506 = arith.extf %1505 : vector<8x128xbf16> to vector<8x128xf32>
    %1507 = vector.extract_strided_slice %1446 {offsets = [8, 0], sizes = [1, 128], strides = [1, 1]} : vector<27x128xf32> to vector<1x128xf32>
    %1508 = vector.broadcast %1507 : vector<1x128xf32> to vector<8x128xf32>
    %1509 = arith.mulf %1506, %1508 : vector<8x128xf32>
    %1510 = arith.addf %1503, %1509 : vector<8x128xf32>
    %c9_635 = arith.constant 9 : index
    %c0_636 = arith.constant 0 : index
    %c0_637 = arith.constant 0 : index
    %1511 = vector.load %arg2[%c9_635, %c0_636, %c0_637] : memref<27x8x128xbf16, #tpu.memory_space<vmem>>, vector<1x8x128xbf16>
    %1512 = vector.shape_cast %1511 : vector<1x8x128xbf16> to vector<8x128xbf16>
    %1513 = arith.extf %1512 : vector<8x128xbf16> to vector<8x128xf32>
    %1514 = vector.extract_strided_slice %1446 {offsets = [9, 0], sizes = [1, 128], strides = [1, 1]} : vector<27x128xf32> to vector<1x128xf32>
    %1515 = vector.broadcast %1514 : vector<1x128xf32> to vector<8x128xf32>
    %1516 = arith.mulf %1513, %1515 : vector<8x128xf32>
    %1517 = arith.addf %1510, %1516 : vector<8x128xf32>
    %c10_638 = arith.constant 10 : index
    %c0_639 = arith.constant 0 : index
    %c0_640 = arith.constant 0 : index
    %1518 = vector.load %arg2[%c10_638, %c0_639, %c0_640] : memref<27x8x128xbf16, #tpu.memory_space<vmem>>, vector<1x8x128xbf16>
    %1519 = vector.shape_cast %1518 : vector<1x8x128xbf16> to vector<8x128xbf16>
    %1520 = arith.extf %1519 : vector<8x128xbf16> to vector<8x128xf32>
    %1521 = vector.extract_strided_slice %1446 {offsets = [10, 0], sizes = [1, 128], strides = [1, 1]} : vector<27x128xf32> to vector<1x128xf32>
    %1522 = vector.broadcast %1521 : vector<1x128xf32> to vector<8x128xf32>
    %1523 = arith.mulf %1520, %1522 : vector<8x128xf32>
    %1524 = arith.addf %1517, %1523 : vector<8x128xf32>
    %c11_641 = arith.constant 11 : index
    %c0_642 = arith.constant 0 : index
    %c0_643 = arith.constant 0 : index
    %1525 = vector.load %arg2[%c11_641, %c0_642, %c0_643] : memref<27x8x128xbf16, #tpu.memory_space<vmem>>, vector<1x8x128xbf16>
    %1526 = vector.shape_cast %1525 : vector<1x8x128xbf16> to vector<8x128xbf16>
    %1527 = arith.extf %1526 : vector<8x128xbf16> to vector<8x128xf32>
    %1528 = vector.extract_strided_slice %1446 {offsets = [11, 0], sizes = [1, 128], strides = [1, 1]} : vector<27x128xf32> to vector<1x128xf32>
    %1529 = vector.broadcast %1528 : vector<1x128xf32> to vector<8x128xf32>
    %1530 = arith.mulf %1527, %1529 : vector<8x128xf32>
    %1531 = arith.addf %1524, %1530 : vector<8x128xf32>
    %c12_644 = arith.constant 12 : index
    %c0_645 = arith.constant 0 : index
    %c0_646 = arith.constant 0 : index
    %1532 = vector.load %arg2[%c12_644, %c0_645, %c0_646] : memref<27x8x128xbf16, #tpu.memory_space<vmem>>, vector<1x8x128xbf16>
    %1533 = vector.shape_cast %1532 : vector<1x8x128xbf16> to vector<8x128xbf16>
    %1534 = arith.extf %1533 : vector<8x128xbf16> to vector<8x128xf32>
    %1535 = vector.extract_strided_slice %1446 {offsets = [12, 0], sizes = [1, 128], strides = [1, 1]} : vector<27x128xf32> to vector<1x128xf32>
    %1536 = vector.broadcast %1535 : vector<1x128xf32> to vector<8x128xf32>
    %1537 = arith.mulf %1534, %1536 : vector<8x128xf32>
    %1538 = arith.addf %1531, %1537 : vector<8x128xf32>
    %c13_647 = arith.constant 13 : index
    %c0_648 = arith.constant 0 : index
    %c0_649 = arith.constant 0 : index
    %1539 = vector.load %arg2[%c13_647, %c0_648, %c0_649] : memref<27x8x128xbf16, #tpu.memory_space<vmem>>, vector<1x8x128xbf16>
    %1540 = vector.shape_cast %1539 : vector<1x8x128xbf16> to vector<8x128xbf16>
    %1541 = arith.extf %1540 : vector<8x128xbf16> to vector<8x128xf32>
    %1542 = vector.extract_strided_slice %1446 {offsets = [13, 0], sizes = [1, 128], strides = [1, 1]} : vector<27x128xf32> to vector<1x128xf32>
    %1543 = vector.broadcast %1542 : vector<1x128xf32> to vector<8x128xf32>
    %1544 = arith.mulf %1541, %1543 : vector<8x128xf32>
    %1545 = arith.addf %1538, %1544 : vector<8x128xf32>
    %c14_650 = arith.constant 14 : index
    %c0_651 = arith.constant 0 : index
    %c0_652 = arith.constant 0 : index
    %1546 = vector.load %arg2[%c14_650, %c0_651, %c0_652] : memref<27x8x128xbf16, #tpu.memory_space<vmem>>, vector<1x8x128xbf16>
    %1547 = vector.shape_cast %1546 : vector<1x8x128xbf16> to vector<8x128xbf16>
    %1548 = arith.extf %1547 : vector<8x128xbf16> to vector<8x128xf32>
    %1549 = vector.extract_strided_slice %1446 {offsets = [14, 0], sizes = [1, 128], strides = [1, 1]} : vector<27x128xf32> to vector<1x128xf32>
    %1550 = vector.broadcast %1549 : vector<1x128xf32> to vector<8x128xf32>
    %1551 = arith.mulf %1548, %1550 : vector<8x128xf32>
    %1552 = arith.addf %1545, %1551 : vector<8x128xf32>
    %c15_653 = arith.constant 15 : index
    %c0_654 = arith.constant 0 : index
    %c0_655 = arith.constant 0 : index
    %1553 = vector.load %arg2[%c15_653, %c0_654, %c0_655] : memref<27x8x128xbf16, #tpu.memory_space<vmem>>, vector<1x8x128xbf16>
    %1554 = vector.shape_cast %1553 : vector<1x8x128xbf16> to vector<8x128xbf16>
    %1555 = arith.extf %1554 : vector<8x128xbf16> to vector<8x128xf32>
    %1556 = vector.extract_strided_slice %1446 {offsets = [15, 0], sizes = [1, 128], strides = [1, 1]} : vector<27x128xf32> to vector<1x128xf32>
    %1557 = vector.broadcast %1556 : vector<1x128xf32> to vector<8x128xf32>
    %1558 = arith.mulf %1555, %1557 : vector<8x128xf32>
    %1559 = arith.addf %1552, %1558 : vector<8x128xf32>
    %c16_656 = arith.constant 16 : index
    %c0_657 = arith.constant 0 : index
    %c0_658 = arith.constant 0 : index
    %1560 = vector.load %arg2[%c16_656, %c0_657, %c0_658] : memref<27x8x128xbf16, #tpu.memory_space<vmem>>, vector<1x8x128xbf16>
    %1561 = vector.shape_cast %1560 : vector<1x8x128xbf16> to vector<8x128xbf16>
    %1562 = arith.extf %1561 : vector<8x128xbf16> to vector<8x128xf32>
    %1563 = vector.extract_strided_slice %1446 {offsets = [16, 0], sizes = [1, 128], strides = [1, 1]} : vector<27x128xf32> to vector<1x128xf32>
    %1564 = vector.broadcast %1563 : vector<1x128xf32> to vector<8x128xf32>
    %1565 = arith.mulf %1562, %1564 : vector<8x128xf32>
    %1566 = arith.addf %1559, %1565 : vector<8x128xf32>
    %c17_659 = arith.constant 17 : index
    %c0_660 = arith.constant 0 : index
    %c0_661 = arith.constant 0 : index
    %1567 = vector.load %arg2[%c17_659, %c0_660, %c0_661] : memref<27x8x128xbf16, #tpu.memory_space<vmem>>, vector<1x8x128xbf16>
    %1568 = vector.shape_cast %1567 : vector<1x8x128xbf16> to vector<8x128xbf16>
    %1569 = arith.extf %1568 : vector<8x128xbf16> to vector<8x128xf32>
    %1570 = vector.extract_strided_slice %1446 {offsets = [17, 0], sizes = [1, 128], strides = [1, 1]} : vector<27x128xf32> to vector<1x128xf32>
    %1571 = vector.broadcast %1570 : vector<1x128xf32> to vector<8x128xf32>
    %1572 = arith.mulf %1569, %1571 : vector<8x128xf32>
    %1573 = arith.addf %1566, %1572 : vector<8x128xf32>
    %c18_662 = arith.constant 18 : index
    %c0_663 = arith.constant 0 : index
    %c0_664 = arith.constant 0 : index
    %1574 = vector.load %arg2[%c18_662, %c0_663, %c0_664] : memref<27x8x128xbf16, #tpu.memory_space<vmem>>, vector<1x8x128xbf16>
    %1575 = vector.shape_cast %1574 : vector<1x8x128xbf16> to vector<8x128xbf16>
    %1576 = arith.extf %1575 : vector<8x128xbf16> to vector<8x128xf32>
    %1577 = vector.extract_strided_slice %1446 {offsets = [18, 0], sizes = [1, 128], strides = [1, 1]} : vector<27x128xf32> to vector<1x128xf32>
    %1578 = vector.broadcast %1577 : vector<1x128xf32> to vector<8x128xf32>
    %1579 = arith.mulf %1576, %1578 : vector<8x128xf32>
    %1580 = arith.addf %1573, %1579 : vector<8x128xf32>
    %c19_665 = arith.constant 19 : index
    %c0_666 = arith.constant 0 : index
    %c0_667 = arith.constant 0 : index
    %1581 = vector.load %arg2[%c19_665, %c0_666, %c0_667] : memref<27x8x128xbf16, #tpu.memory_space<vmem>>, vector<1x8x128xbf16>
    %1582 = vector.shape_cast %1581 : vector<1x8x128xbf16> to vector<8x128xbf16>
    %1583 = arith.extf %1582 : vector<8x128xbf16> to vector<8x128xf32>
    %1584 = vector.extract_strided_slice %1446 {offsets = [19, 0], sizes = [1, 128], strides = [1, 1]} : vector<27x128xf32> to vector<1x128xf32>
    %1585 = vector.broadcast %1584 : vector<1x128xf32> to vector<8x128xf32>
    %1586 = arith.mulf %1583, %1585 : vector<8x128xf32>
    %1587 = arith.addf %1580, %1586 : vector<8x128xf32>
    %c20_668 = arith.constant 20 : index
    %c0_669 = arith.constant 0 : index
    %c0_670 = arith.constant 0 : index
    %1588 = vector.load %arg2[%c20_668, %c0_669, %c0_670] : memref<27x8x128xbf16, #tpu.memory_space<vmem>>, vector<1x8x128xbf16>
    %1589 = vector.shape_cast %1588 : vector<1x8x128xbf16> to vector<8x128xbf16>
    %1590 = arith.extf %1589 : vector<8x128xbf16> to vector<8x128xf32>
    %1591 = vector.extract_strided_slice %1446 {offsets = [20, 0], sizes = [1, 128], strides = [1, 1]} : vector<27x128xf32> to vector<1x128xf32>
    %1592 = vector.broadcast %1591 : vector<1x128xf32> to vector<8x128xf32>
    %1593 = arith.mulf %1590, %1592 : vector<8x128xf32>
    %1594 = arith.addf %1587, %1593 : vector<8x128xf32>
    %c21_671 = arith.constant 21 : index
    %c0_672 = arith.constant 0 : index
    %c0_673 = arith.constant 0 : index
    %1595 = vector.load %arg2[%c21_671, %c0_672, %c0_673] : memref<27x8x128xbf16, #tpu.memory_space<vmem>>, vector<1x8x128xbf16>
    %1596 = vector.shape_cast %1595 : vector<1x8x128xbf16> to vector<8x128xbf16>
    %1597 = arith.extf %1596 : vector<8x128xbf16> to vector<8x128xf32>
    %1598 = vector.extract_strided_slice %1446 {offsets = [21, 0], sizes = [1, 128], strides = [1, 1]} : vector<27x128xf32> to vector<1x128xf32>
    %1599 = vector.broadcast %1598 : vector<1x128xf32> to vector<8x128xf32>
    %1600 = arith.mulf %1597, %1599 : vector<8x128xf32>
    %1601 = arith.addf %1594, %1600 : vector<8x128xf32>
    %c22_674 = arith.constant 22 : index
    %c0_675 = arith.constant 0 : index
    %c0_676 = arith.constant 0 : index
    %1602 = vector.load %arg2[%c22_674, %c0_675, %c0_676] : memref<27x8x128xbf16, #tpu.memory_space<vmem>>, vector<1x8x128xbf16>
    %1603 = vector.shape_cast %1602 : vector<1x8x128xbf16> to vector<8x128xbf16>
    %1604 = arith.extf %1603 : vector<8x128xbf16> to vector<8x128xf32>
    %1605 = vector.extract_strided_slice %1446 {offsets = [22, 0], sizes = [1, 128], strides = [1, 1]} : vector<27x128xf32> to vector<1x128xf32>
    %1606 = vector.broadcast %1605 : vector<1x128xf32> to vector<8x128xf32>
    %1607 = arith.mulf %1604, %1606 : vector<8x128xf32>
    %1608 = arith.addf %1601, %1607 : vector<8x128xf32>
    %c23_677 = arith.constant 23 : index
    %c0_678 = arith.constant 0 : index
    %c0_679 = arith.constant 0 : index
    %1609 = vector.load %arg2[%c23_677, %c0_678, %c0_679] : memref<27x8x128xbf16, #tpu.memory_space<vmem>>, vector<1x8x128xbf16>
    %1610 = vector.shape_cast %1609 : vector<1x8x128xbf16> to vector<8x128xbf16>
    %1611 = arith.extf %1610 : vector<8x128xbf16> to vector<8x128xf32>
    %1612 = vector.extract_strided_slice %1446 {offsets = [23, 0], sizes = [1, 128], strides = [1, 1]} : vector<27x128xf32> to vector<1x128xf32>
    %1613 = vector.broadcast %1612 : vector<1x128xf32> to vector<8x128xf32>
    %1614 = arith.mulf %1611, %1613 : vector<8x128xf32>
    %1615 = arith.addf %1608, %1614 : vector<8x128xf32>
    %c24_680 = arith.constant 24 : index
    %c0_681 = arith.constant 0 : index
    %c0_682 = arith.constant 0 : index
    %1616 = vector.load %arg2[%c24_680, %c0_681, %c0_682] : memref<27x8x128xbf16, #tpu.memory_space<vmem>>, vector<1x8x128xbf16>
    %1617 = vector.shape_cast %1616 : vector<1x8x128xbf16> to vector<8x128xbf16>
    %1618 = arith.extf %1617 : vector<8x128xbf16> to vector<8x128xf32>
    %1619 = vector.extract_strided_slice %1446 {offsets = [24, 0], sizes = [1, 128], strides = [1, 1]} : vector<27x128xf32> to vector<1x128xf32>
    %1620 = vector.broadcast %1619 : vector<1x128xf32> to vector<8x128xf32>
    %1621 = arith.mulf %1618, %1620 : vector<8x128xf32>
    %1622 = arith.addf %1615, %1621 : vector<8x128xf32>
    %c25_683 = arith.constant 25 : index
    %c0_684 = arith.constant 0 : index
    %c0_685 = arith.constant 0 : index
    %1623 = vector.load %arg2[%c25_683, %c0_684, %c0_685] : memref<27x8x128xbf16, #tpu.memory_space<vmem>>, vector<1x8x128xbf16>
    %1624 = vector.shape_cast %1623 : vector<1x8x128xbf16> to vector<8x128xbf16>
    %1625 = arith.extf %1624 : vector<8x128xbf16> to vector<8x128xf32>
    %1626 = vector.extract_strided_slice %1446 {offsets = [25, 0], sizes = [1, 128], strides = [1, 1]} : vector<27x128xf32> to vector<1x128xf32>
    %1627 = vector.broadcast %1626 : vector<1x128xf32> to vector<8x128xf32>
    %1628 = arith.mulf %1625, %1627 : vector<8x128xf32>
    %1629 = arith.addf %1622, %1628 : vector<8x128xf32>
    %c26_686 = arith.constant 26 : index
    %c0_687 = arith.constant 0 : index
    %c0_688 = arith.constant 0 : index
    %1630 = vector.load %arg2[%c26_686, %c0_687, %c0_688] : memref<27x8x128xbf16, #tpu.memory_space<vmem>>, vector<1x8x128xbf16>
    %1631 = vector.shape_cast %1630 : vector<1x8x128xbf16> to vector<8x128xbf16>
    %1632 = arith.extf %1631 : vector<8x128xbf16> to vector<8x128xf32>
    %1633 = vector.extract_strided_slice %1446 {offsets = [26, 0], sizes = [1, 128], strides = [1, 1]} : vector<27x128xf32> to vector<1x128xf32>
    %1634 = vector.broadcast %1633 : vector<1x128xf32> to vector<8x128xf32>
    %1635 = arith.mulf %1632, %1634 : vector<8x128xf32>
    %1636 = arith.addf %1629, %1635 : vector<8x128xf32>
    %c7_689 = arith.constant 7 : index
    %c0_690 = arith.constant 0 : index
    %c0_691 = arith.constant 0 : index
    %1637 = vector.load %arg3[%c7_689, %c0_690, %c0_691] : memref<8x8x128xf32, #tpu.memory_space<vmem>>, vector<1x8x128xf32>
    %1638 = vector.shape_cast %1637 : vector<1x8x128xf32> to vector<8x128xf32>
    %1639 = vector.shape_cast %1636 : vector<8x128xf32> to vector<1x8x128xf32>
    tpu.vector_store %arg3[%c7_689, %c0_690, %c0_691], %1639 {strides = array<i32>} : memref<8x8x128xf32, #tpu.memory_space<vmem>>, vector<1x8x128xf32>,
    return
  }
  func.func @transform_0(%arg0: i32) -> (i32, i32, i32) {
    %c0_i32 = arith.constant 0 : i32
    %c0_i32_0 = arith.constant 0 : i32
    %c0_i32_1 = arith.constant 0 : i32
    return %c0_i32, %c0_i32_0, %arg0 : i32, i32, i32
  }
  func.func @transform_1(%arg0: i32) -> (i32, i32, i32) {
    %c0_i32 = arith.constant 0 : i32
    %c0_i32_0 = arith.constant 0 : i32
    %c0_i32_1 = arith.constant 0 : i32
    return %c0_i32, %c0_i32_0, %arg0 : i32, i32, i32
  }
  func.func @transform_2(%arg0: i32) -> (i32, i32, i32) {
    %c0_i32 = arith.constant 0 : i32
    %c0_i32_0 = arith.constant 0 : i32
    %c0_i32_1 = arith.constant 0 : i32
    return %c0_i32, %c0_i32_0, %arg0 : i32, i32, i32
  }
}

</mosaic_0001>

<bundles_post_ra>
// kernel: filtering_block_forward.6
= control target key start
LH: loop header
LB: loop body
LE: loop exit
PB: predicated region body
PF: predicated region fallthrough
CT: control target
= control target key end

     0   :  { %vm105_vm0 = vcmask 1043456   ;;  %v181_v0 = vmov 0   ;;  %vm92_vm1 = vcmask 64512   ;;  %s265_s2 = inlined_call_operand.vmem [shape: f32[64,1], index: 2, kind: input, shape index: {}]   ;;  %s266_s1 = inlined_call_operand.vmem [shape: bf16[8,128], index: 1, kind: input, shape index: {}]   ;;  %s267_s0 = inlined_call_operand.vmem [shape: bf16[64,8], index: 0, kind: input, shape index: {}]   ;;  %s268_s3 = inlined_call_operand.vmem [shape: f32[64,128], index: 3, kind: output, shape index: {}]  }
   0x1   :  { %179 = vset.pattern.permute.xlu1 %v181_v0  ;;  %178 = vset.pattern.permute.xlu0 %v181_v0  ;;  %v26_v1 = vld [vmem:[%s265_s2 + $0x10] sm:$0xff]  ;;  %v24_v2 = vld [vmem:[%s265_s2] sm:$0xff]  ;;  %v171_v6 = vld [vmem:[%s267_s0 + $0x8] sm:$0xff] }
   0x2   :  { %v23_v3 = vld [vmem:[%s266_s1] sm:$0xf]  ;;  %44 = vperm.xlu1 %179, %v26_v1   ;;  %34 = vperm.xlu0 %178, %v24_v2   ;;  %v172_v7 = vld [vmem:[%s267_s0 + $0x10] sm:$0xff]  ;;  %v173_v8 = vld [vmem:[%s267_s0 + $0x18] sm:$0xff] }
   0x3   :  { %v107_v4 = vsel %vm105_vm0, %v23_v3, 0  ;;  %v170_v5 = vld [vmem:[%s267_s0] sm:$0xff]  ;;  %180 = vset.pattern.permute.xlu2 %v181_v0  ;;  %v27_v10 = vld [vmem:[%s265_s2 + $0x18] sm:$0xff]  ;;  %v25_v11 = vld [vmem:[%s265_s2 + $0x8] sm:$0xff] }
   0x4   :  { %116 = vmatpush.bf16.msra.mxu0 %v107_v4  ;;  %174 = vmatpush.bf16.msra.mxu1 %v107_v4  ;;  %v28_v9 = vld [vmem:[%s265_s2 + $0x20] sm:$0xff]  ;;  %v29_v12 = vld [vmem:[%s265_s2 + $0x28] sm:$0xff]  ;;  %v31_v13 = vld [vmem:[%s265_s2 + $0x38] sm:$0xff] }
   0x5   :  { %175 = vmatpush.bf16.msra.mxu2 %v107_v4  ;;  %176 = vmatpush.bf16.msra.mxu3 %v107_v4  ;;  %v30_v14 = vld [vmem:[%s265_s2 + $0x30] sm:$0xff] }
   0x6   :  { %54 = vperm.xlu2 %180, %v28_v9  }
   0x7   :  { %166 = vmatmul.msk.bf16.vlgmr.msra.gmra.mxu0 %vm92_vm1, %v170_v5  ;;  %167 = vmatmul.msk.bf16.vlgmr.msra.gmra.mxu1 %vm92_vm1, %v171_v6 }
   0x8   :  { %168 = vmatmul.msk.bf16.vlgmr.msra.gmra.mxu2 %vm92_vm1, %v172_v7  ;;  %169 = vmatmul.msk.bf16.vlgmr.msra.gmra.mxu3 %vm92_vm1, %v173_v8 }
   0xa   :  { %49 = vperm.xlu1 %179, %v27_v10   ;;  %39 = vperm.xlu0 %178, %v25_v11  }
   0xe   :  { %59 = vperm.xlu2 %180, %v29_v12  }
  0x12   :  { %69 = vperm.xlu1 %179, %v31_v13   ;;  %64 = vperm.xlu0 %178, %v30_v14  }
  0x60   :  { %v55_v23 = vpop.permute.xlu2 %54 }
  0x68   :  { %v60_v34 = vpop.permute.xlu2 %59 }
  0x74   :  { %v35_v15 = vpop.permute.xlu0 %34  ;;  %v45_v16 = vpop.permute.xlu1 %44 }
  0x7c   :  { %v40_v17 = vpop.permute.xlu0 %39  ;;  %v50_v22 = vpop.permute.xlu1 %49 }
  0x84   :  { %v118_v18 = vpop.f32.mrf.mxu0  ;;  %v123_v19 = vpop.f32.mrf.mxu1 }
  0x85   :  { %v119_v20 = vadd.f32 %v118_v18, %v35_v15  ;;  %v124_v21 = vadd.f32 %v123_v19, %v45_v16  ;;  %v65_v24 = vpop.permute.xlu0 %64  ;;  %v70_v33 = vpop.permute.xlu1 %69 }
  0x87   :  { %138 = vst [vmem:[%s268_s3] sm:$0xff] %v119_v20 }
  0x88   :  { %140 = vst [vmem:[%s268_s3 + $0x10] sm:$0xff] %v124_v21 }
  0x8b   :  { %v128_v25 = vpop.f32.mrf.mxu2  ;;  %v133_v26 = vpop.f32.mrf.mxu3 }
  0x8c   :  { %v129_v27 = vadd.f32 %v128_v25, %v55_v23  ;;  %v134_v28 = vadd.f32 %v133_v26, %v65_v24  ;;  %v120_v29 = vpop.f32.mrf.mxu0  ;;  %v125_v30 = vpop.f32.mrf.mxu1 }
  0x8d   :  { %v121_v31 = vadd.f32 %v120_v29, %v40_v17  ;;  %v126_v32 = vadd.f32 %v125_v30, %v50_v22 }
  0x8e   :  { %142 = vst [vmem:[%s268_s3 + $0x20] sm:$0xff] %v129_v27 }
  0x8f   :  { %144 = vst [vmem:[%s268_s3 + $0x30] sm:$0xff] %v134_v28 }
  0x90   :  { %139 = vst [vmem:[%s268_s3 + $0x8] sm:$0xff] %v121_v31 }
  0x91   :  { %141 = vst [vmem:[%s268_s3 + $0x18] sm:$0xff] %v126_v32 }
  0x93   :  { %v130_v35 = vpop.f32.mrf.mxu2  ;;  %v135_v36 = vpop.f32.mrf.mxu3 }
  0x94   :  { %v131_v37 = vadd.f32 %v130_v35, %v60_v34  ;;  %v136_v38 = vadd.f32 %v135_v36, %v70_v33 }
  0x96   :  { %143 = vst [vmem:[%s268_s3 + $0x28] sm:$0xff] %v131_v37 }
  0x97   :  { %145 = vst [vmem:[%s268_s3 + $0x38] sm:$0xff] %v136_v38 }

// kernel: filtering_block_forward.7
= control target key start
LH: loop header
LB: loop body
LE: loop exit
PB: predicated region body
PF: predicated region fallthrough
CT: control target
= control target key end

     0   :  { %s1296_s12 = smov 0   ;;  %s1298_s13 = smov 0   ;;  %s1601_s0 = inlined_call_operand.vmem [shape: bf16[8,432], index: 0, kind: input, shape index: {}]   ;;  %s1602_s1 = inlined_call_operand.vmem [shape: bf16[432,512], index: 1, kind: input, shape index: {}]   ;;  %s1603_s2 = inlined_call_operand.vmem [shape: f32[8,1], index: 2, kind: input, shape index: {}]   ;;  %s1604_s3 = inlined_call_operand.vmem [shape: f32[8,512], index: 3, kind: output, shape index: {}]  }
   0x1   :  { %s1300_s14 = smov 0  }
   0x2 LB: > { %s939_s15 = sadd.s32 4294967295, %s1273_s14   ;;  %s1313_s16 = sadd.s32 1, %s1273_s14   ;;  %s1273_s14 = sphi %s1300_s14, %s1607_s14   ;;  %s1269_s13 = sphi %s1298_s13, %s1606_s13   ;;  %s1265_s12 = sphi %s1296_s12, %s1605_s12  }
   0x3   : > { %s38_s17 = ssub.s32 %s1273_s14, %s1313_s16  ;;  %s41_s18 = sadd.s32 1, %s1269_s13 }
   0x4   : > { %p39_p0 = scmp.eq.s32.totalorder %s38_s17, 0  ;;  %p48_p1 = scmp.ne.s32.totalorder %s1269_s13, %s1265_s12 }
   0x5   : > { %p49_p2 = scmp.eq.s32.totalorder %s1273_s14, 0  ;;  %p942_p4 = scmp.ge.s32.totalorder %s1273_s14, 2 }
   0x6   : > { %s1322_s19 = scalar_select %p39_p0, %s1269_s13, %s41_s18  }
   0x7   : > { %p50_p3 = por %p49_p2, %p48_p1  ;;  %127 = sbr.rel (%p942_p4) target bundleno = 70 (0x46), region = 24 }
   0xc   : > { %130 = sbr.rel (!%p50_p3) target bundleno = 70 (0x46), region = 28  ;;  %s132_s20 = sand.u32 (%p50_p3), 1, %s1269_s13  }
   0xd   : > { %s1168_s21 = sshll.u32 (%p50_p3), %s1273_s14, 3  ;;  %s1223_s22 = smul.u32 (%p50_p3), 432, %s132_s20 }
   0xe   : > { %s1330_s25 = scalar_lea.vmem (%p50_p3), %s1602_s1, %s1168_s21 }
   0xf   : > { %v272_v0 = vld [vmem:[%s1330_s25] sm:$0xff] (%p50_p3)  ;;  %v274_v1 = vld [vmem:[%s1330_s25 + $0x10] sm:$0xff] (%p50_p3)  ;;  %s1335_s26 = scalar_lea.vmem (%p50_p3), [#allocation2], %s1223_s22 }
  0x10   : > { %v276_v2 = vld [vmem:[%s1330_s25 + $0x20] sm:$0xff] (%p50_p3)  ;;  %273 = vst [vmem:[%s1335_s26] sm:$0xff] (%p50_p3), %v272_v0  ;;  %v278_v3 = vld [vmem:[%s1330_s25 + $0x30] sm:$0xff] (%p50_p3) }
  0x11   : > { %275 = vst [vmem:[%s1335_s26 + $0x8] sm:$0xff] %v274_v1  ;;  %v280_v4 = vld [vmem:[%s1330_s25 + $0x40] sm:$0xff]  ;;  %v282_v5 = vld [vmem:[%s1330_s25 + $0x50] sm:$0xff] }
  0x12   : > { %277 = vst [vmem:[%s1335_s26 + $0x10] sm:$0xff] %v276_v2  ;;  %v284_v6 = vld [vmem:[%s1330_s25 + $0x60] sm:$0xff]  ;;  %v286_v7 = vld [vmem:[%s1330_s25 + $0x70] sm:$0xff] }
  0x13   : > { %279 = vst [vmem:[%s1335_s26 + $0x18] sm:$0xff] %v278_v3  ;;  %v288_v8 = vld [vmem:[%s1330_s25 + $0x80] sm:$0xff]  ;;  %v290_v9 = vld [vmem:[%s1330_s25 + $0x90] sm:$0xff] }
  0x14   : > { %281 = vst [vmem:[%s1335_s26 + $0x20] sm:$0xff] %v280_v4  ;;  %v292_v10 = vld [vmem:[%s1330_s25 + $0xa0] sm:$0xff]  ;;  %v294_v11 = vld [vmem:[%s1330_s25 + $0xb0] sm:$0xff] }
  0x15   : > { %283 = vst [vmem:[%s1335_s26 + $0x28] sm:$0xff] %v282_v5  ;;  %v296_v12 = vld [vmem:[%s1330_s25 + $0xc0] sm:$0xff]  ;;  %v298_v13 = vld [vmem:[%s1330_s25 + $0xd0] sm:$0xff] }
  0x16   : > { %285 = vst [vmem:[%s1335_s26 + $0x30] sm:$0xff] %v284_v6  ;;  %v300_v14 = vld [vmem:[%s1330_s25 + $0xe0] sm:$0xff]  ;;  %v302_v15 = vld [vmem:[%s1330_s25 + $0xf0] sm:$0xff] }
  0x17   : > { %287 = vst [vmem:[%s1335_s26 + $0x38] sm:$0xff] %v286_v7  ;;  %v304_v16 = vld [vmem:[%s1330_s25 + $0x100] sm:$0xff]  ;;  %v306_v17 = vld [vmem:[%s1330_s25 + $0x110] sm:$0xff] }
  0x18   : > { %289 = vst [vmem:[%s1335_s26 + $0x40] sm:$0xff] %v288_v8  ;;  %v308_v18 = vld [vmem:[%s1330_s25 + $0x120] sm:$0xff]  ;;  %v310_v19 = vld [vmem:[%s1330_s25 + $0x130] sm:$0xff] }
  0x19   : > { %291 = vst [vmem:[%s1335_s26 + $0x48] sm:$0xff] %v290_v9  ;;  %v312_v20 = vld [vmem:[%s1330_s25 + $0x140] sm:$0xff]  ;;  %v314_v21 = vld [vmem:[%s1330_s25 + $0x150] sm:$0xff] }
  0x1a   : > { %293 = vst [vmem:[%s1335_s26 + $0x50] sm:$0xff] %v292_v10  ;;  %v316_v22 = vld [vmem:[%s1330_s25 + $0x160] sm:$0xff]  ;;  %v318_v23 = vld [vmem:[%s1330_s25 + $0x170] sm:$0xff] }
  0x1b   : > { %295 = vst [vmem:[%s1335_s26 + $0x58] sm:$0xff] %v294_v11  ;;  %v320_v24 = vld [vmem:[%s1330_s25 + $0x180] sm:$0xff]  ;;  %v322_v25 = vld [vmem:[%s1330_s25 + $0x190] sm:$0xff] }
  0x1c   : > { %297 = vst [vmem:[%s1335_s26 + $0x60] sm:$0xff] %v296_v12  ;;  %v324_v26 = vld [vmem:[%s1330_s25 + $0x1a0] sm:$0xff]  ;;  %v326_v27 = vld [vmem:[%s1330_s25 + $0x1b0] sm:$0xff] }
  0x1d   : > { %299 = vst [vmem:[%s1335_s26 + $0x68] sm:$0xff] %v298_v13  ;;  %v328_v28 = vld [vmem:[%s1330_s25 + $0x1c0] sm:$0xff]  ;;  %v330_v29 = vld [vmem:[%s1330_s25 + $0x1d0] sm:$0xff] }
  0x1e   : > { %301 = vst [vmem:[%s1335_s26 + $0x70] sm:$0xff] %v300_v14  ;;  %v332_v30 = vld [vmem:[%s1330_s25 + $0x1e0] sm:$0xff]  ;;  %v334_v31 = vld [vmem:[%s1330_s25 + $0x1f0] sm:$0xff] }
  0x1f   : > { %303 = vst [vmem:[%s1335_s26 + $0x78] sm:$0xff] %v302_v15  ;;  %v336_v32 = vld [vmem:[%s1330_s25 + $0x200] sm:$0xff]  ;;  %v338_v33 = vld [vmem:[%s1330_s25 + $0x210] sm:$0xff] }
  0x20   : > { %305 = vst [vmem:[%s1335_s26 + $0x80] sm:$0xff] %v304_v16  ;;  %v340_v34 = vld [vmem:[%s1330_s25 + $0x220] sm:$0xff]  ;;  %v342_v35 = vld [vmem:[%s1330_s25 + $0x230] sm:$0xff] }
  0x21   : > { %307 = vst [vmem:[%s1335_s26 + $0x88] sm:$0xff] %v306_v17  ;;  %v344_v36 = vld [vmem:[%s1330_s25 + $0x240] sm:$0xff]  ;;  %v346_v37 = vld [vmem:[%s1330_s25 + $0x250] sm:$0xff] }
  0x22   : > { %309 = vst [vmem:[%s1335_s26 + $0x90] sm:$0xff] %v308_v18  ;;  %v348_v38 = vld [vmem:[%s1330_s25 + $0x260] sm:$0xff]  ;;  %v350_v39 = vld [vmem:[%s1330_s25 + $0x270] sm:$0xff] }
  0x23   : > { %311 = vst [vmem:[%s1335_s26 + $0x98] sm:$0xff] %v310_v19  ;;  %v352_v40 = vld [vmem:[%s1330_s25 + $0x280] sm:$0xff]  ;;  %v354_v41 = vld [vmem:[%s1330_s25 + $0x290] sm:$0xff] }
  0x24   : > { %313 = vst [vmem:[%s1335_s26 + $0xa0] sm:$0xff] %v312_v20  ;;  %v356_v42 = vld [vmem:[%s1330_s25 + $0x2a0] sm:$0xff]  ;;  %v358_v43 = vld [vmem:[%s1330_s25 + $0x2b0] sm:$0xff] }
  0x25   : > { %315 = vst [vmem:[%s1335_s26 + $0xa8] sm:$0xff] %v314_v21  ;;  %v360_v44 = vld [vmem:[%s1330_s25 + $0x2c0] sm:$0xff]  ;;  %v362_v45 = vld [vmem:[%s1330_s25 + $0x2d0] sm:$0xff] }
  0x26   : > { %317 = vst [vmem:[%s1335_s26 + $0xb0] sm:$0xff] %v316_v22  ;;  %v364_v46 = vld [vmem:[%s1330_s25 + $0x2e0] sm:$0xff]  ;;  %v366_v47 = vld [vmem:[%s1330_s25 + $0x2f0] sm:$0xff] }
  0x27   : > { %319 = vst [vmem:[%s1335_s26 + $0xb8] sm:$0xff] %v318_v23  ;;  %v368_v48 = vld [vmem:[%s1330_s25 + $0x300] sm:$0xff]  ;;  %v370_v49 = vld [vmem:[%s1330_s25 + $0x310] sm:$0xff] }
  0x28   : > { %321 = vst [vmem:[%s1335_s26 + $0xc0] sm:$0xff] %v320_v24  ;;  %v372_v50 = vld [vmem:[%s1330_s25 + $0x320] sm:$0xff]  ;;  %v374_v51 = vld [vmem:[%s1330_s25 + $0x330] sm:$0xff] }
  0x29   : > { %323 = vst [vmem:[%s1335_s26 + $0xc8] sm:$0xff] %v322_v25  ;;  %v376_v52 = vld [vmem:[%s1330_s25 + $0x340] sm:$0xff]  ;;  %v378_v53 = vld [vmem:[%s1330_s25 + $0x350] sm:$0xff] }
  0x2a   : > { %325 = vst [vmem:[%s1335_s26 + $0xd0] sm:$0xff] %v324_v26 }
  0x2b   : > { %327 = vst [vmem:[%s1335_s26 + $0xd8] sm:$0xff] %v326_v27 }
  0x2c   : > { %329 = vst [vmem:[%s1335_s26 + $0xe0] sm:$0xff] %v328_v28 }
  0x2d   : > { %331 = vst [vmem:[%s1335_s26 + $0xe8] sm:$0xff] %v330_v29 }
  0x2e   : > { %333 = vst [vmem:[%s1335_s26 + $0xf0] sm:$0xff] %v332_v30 }
  0x2f   : > { %335 = vst [vmem:[%s1335_s26 + $0xf8] sm:$0xff] %v334_v31 }
  0x30   : > { %337 = vst [vmem:[%s1335_s26 + $0x100] sm:$0xff] %v336_v32 }
  0x31   : > { %339 = vst [vmem:[%s1335_s26 + $0x108] sm:$0xff] %v338_v33 }
  0x32   : > { %341 = vst [vmem:[%s1335_s26 + $0x110] sm:$0xff] %v340_v34 }
  0x33   : > { %343 = vst [vmem:[%s1335_s26 + $0x118] sm:$0xff] %v342_v35 }
  0x34   : > { %345 = vst [vmem:[%s1335_s26 + $0x120] sm:$0xff] %v344_v36 }
  0x35   : > { %347 = vst [vmem:[%s1335_s26 + $0x128] sm:$0xff] %v346_v37 }
  0x36   : > { %349 = vst [vmem:[%s1335_s26 + $0x130] sm:$0xff] %v348_v38 }
  0x37   : > { %351 = vst [vmem:[%s1335_s26 + $0x138] sm:$0xff] %v350_v39 }
  0x38   : > { %353 = vst [vmem:[%s1335_s26 + $0x140] sm:$0xff] %v352_v40 }
  0x39   : > { %355 = vst [vmem:[%s1335_s26 + $0x148] sm:$0xff] %v354_v41 }
  0x3a   : > { %357 = vst [vmem:[%s1335_s26 + $0x150] sm:$0xff] %v356_v42 }
  0x3b   : > { %359 = vst [vmem:[%s1335_s26 + $0x158] sm:$0xff] %v358_v43 }
  0x3c   : > { %361 = vst [vmem:[%s1335_s26 + $0x160] sm:$0xff] %v360_v44 }
  0x3d   : > { %363 = vst [vmem:[%s1335_s26 + $0x168] sm:$0xff] %v362_v45 }
  0x3e   : > { %365 = vst [vmem:[%s1335_s26 + $0x170] sm:$0xff] %v364_v46 }
  0x3f   : > { %367 = vst [vmem:[%s1335_s26 + $0x178] sm:$0xff] %v366_v47 }
  0x40   : > { %369 = vst [vmem:[%s1335_s26 + $0x180] sm:$0xff] %v368_v48 }
  0x41   : > { %371 = vst [vmem:[%s1335_s26 + $0x188] sm:$0xff] %v370_v49 }
  0x42   : > { %373 = vst [vmem:[%s1335_s26 + $0x190] sm:$0xff] %v372_v50 }
  0x43   : > { %375 = vst [vmem:[%s1335_s26 + $0x198] sm:$0xff] %v374_v51 }
  0x44   : > { %377 = vst [vmem:[%s1335_s26 + $0x1a0] sm:$0xff] %v376_v52 }
  0x45   : > { %379 = vst [vmem:[%s1335_s26 + $0x1a8] sm:$0xff] %v378_v53 }
  0x46 PF: > { %p945_p5 = scmp.ge.s32.totalorder %s1273_s14, 1  ;;  %p384_p6 = scmp.lt.s32.totalorder %s1273_s14, 3 }
  0x48   : > { %p385_p7 = pnand %p945_p5, %p384_p6 }
  0x49   : > { %s391_s27 = sand.u32 (!%p385_p7), 1, %s1265_s12   ;;  %s946_s9 = sshll.u32 (!%p385_p7), %s939_s15, 1 }
  0x4a   : > { %388 = sbr.rel (%p385_p7) target bundleno = 280 (0x118), region = 66  ;;  %p416_p8 = scmp.lt.s32.totalorder (!%p385_p7), %s946_s9, 3 }
  0x4b   : > { %s1224_s28 = smul.u32 (!%p385_p7), 432, %s391_s27 }
  0x4d   : > { %s1445_s29 = scalar_lea.vmem (!%p385_p7), [#allocation2], %s1224_s28 }
  0x4f   : > { %v1006_v54 = vld [vmem:[%s1445_s29 + $0x70] sm:$0xf]  ;;  %v1184_v55 = vld [vmem:[%s1445_s29 + $0x74] sm:$0xf0]  ;;  %v998_v63 = vld [vmem:[%s1445_s29 + $0x60] sm:$0xf] }
  0x50   : > { %v1070_v56 = vld [vmem:[%s1445_s29 + $0xf0] sm:$0xf]  ;;  %v1007_v57 = vor.u32 %v1184_v55, %v1006_v54  ;;  %v1200_v58 = vld [vmem:[%s1445_s29 + $0xf4] sm:$0xf0]  ;;  %v1182_v0 = vld [vmem:[%s1445_s29 + $0x64] sm:$0xf0] }
  0x51   : > { %v1134_v59 = vld [vmem:[%s1445_s29 + $0x170] sm:$0xf]  ;;  %v1216_v60 = vld [vmem:[%s1445_s29 + $0x174] sm:$0xf0]  ;;  %v1071_v61 = vor.u32 %v1200_v58, %v1070_v56  ;;  %v1062_v1 = vld [vmem:[%s1445_s29 + $0xe0] sm:$0xf]  ;;  %v999_v2 = vor.u32 %v1182_v0, %v998_v63 }
  0x52   : > { %v1135_v62 = vor.u32 %v1216_v60, %v1134_v59  ;;  %771 = vmatpush.bf16.msra.mxu0 %v1007_v57  ;;  %v1198_v3 = vld [vmem:[%s1445_s29 + $0xe4] sm:$0xf0]  ;;  %v1126_v4 = vld [vmem:[%s1445_s29 + $0x160] sm:$0xf]  ;;  %v990_v10 = vld [vmem:[%s1445_s29 + $0x50] sm:$0xf] }
  0x53   : > { %v1214_v5 = vld [vmem:[%s1445_s29 + $0x164] sm:$0xf0]  ;;  %784 = vmatpush.bf16.msra.mxu1 %v1071_v61  ;;  %v1063_v6 = vor.u32 %v1198_v3, %v1062_v1  ;;  %v1158_v8 = vld [vmem:[%s1445_s29 + $0x1a0] sm:$0xf]  ;;  %v1180_v12 = vld [vmem:[%s1445_s29 + $0x54] sm:$0xf0] }
  0x54   : > { %797 = vmatpush.bf16.msra.mxu2 %v1135_v62  ;;  %v1127_v7 = vor.u32 %v1214_v5, %v1126_v4  ;;  %v1222_v9 = vld [vmem:[%s1445_s29 + $0x1a4] sm:$0xf0]  ;;  %v1054_v13 = vld [vmem:[%s1445_s29 + $0xd0] sm:$0xf]  ;;  %v1196_v14 = vld [vmem:[%s1445_s29 + $0xd4] sm:$0xf0]  ;;  %v991_v18 = vor.u32 %v1180_v12, %v990_v10 }
  0x55   : > { %v1159_v11 = vor.u32 %v1222_v9, %v1158_v8  ;;  %v1118_v15 = vld [vmem:[%s1445_s29 + $0x150] sm:$0xf]  ;;  %v1212_v16 = vld [vmem:[%s1445_s29 + $0x154] sm:$0xf0]  ;;  %v982_v20 = vld [vmem:[%s1445_s29 + $0x40] sm:$0xf]  ;;  %v1055_v22 = vor.u32 %v1196_v14, %v1054_v13 }
  0x56   : > { %v1150_v17 = vld [vmem:[%s1445_s29 + $0x190] sm:$0xf]  ;;  %772 = vmatpush.bf16.msra.mxu0 %v999_v2  ;;  %v1220_v19 = vld [vmem:[%s1445_s29 + $0x194] sm:$0xf0]  ;;  %v1178_v21 = vld [vmem:[%s1445_s29 + $0x44] sm:$0xf0]  ;;  %v1119_v23 = vor.u32 %v1212_v16, %v1118_v15 }
  0x57   : > { %815 = vmatpush.bf16.msra.mxu3 %v1159_v11  ;;  %785 = vmatpush.bf16.msra.mxu1 %v1063_v6  ;;  %v1151_v24 = vor.u32 %v1220_v19, %v1150_v17  ;;  %v1046_v25 = vld [vmem:[%s1445_s29 + $0xc0] sm:$0xf]  ;;  %v1194_v26 = vld [vmem:[%s1445_s29 + $0xc4] sm:$0xf0]  ;;  %v1183_v31 = vld [vmem:[%s1445_s29 + $0x74] sm:$0xf]  ;;  %v983_v33 = vor.u32 %v1178_v21, %v982_v20 }
  0x58   : > { %798 = vmatpush.bf16.msra.mxu2 %v1127_v7  ;;  %v1110_v27 = vld [vmem:[%s1445_s29 + $0x140] sm:$0xf]  ;;  %v1210_v28 = vld [vmem:[%s1445_s29 + $0x144] sm:$0xf0]  ;;  %v1008_v32 = vld [vmem:[%s1445_s29 + $0x78] sm:$0xf0]  ;;  %v1047_v36 = vor.u32 %v1194_v26, %v1046_v25 }
  0x59   : > { %v1142_v29 = vld [vmem:[%s1445_s29 + $0x180] sm:$0xf]  ;;  %v1218_v30 = vld [vmem:[%s1445_s29 + $0x184] sm:$0xf0]  ;;  %v1111_v37 = vor.u32 %v1210_v28, %v1110_v27  ;;  %v974_v38 = vld [vmem:[%s1445_s29 + $0x30] sm:$0xf]  ;;  %v1011_v41 = vor.u32 %v1183_v31, %v1008_v32 }
  0x5a   : > { %773 = vmatpush.bf16.msra.mxu0 %v991_v18  ;;  %v1143_v34 = vor.u32 %v1218_v30, %v1142_v29  ;;  %v1482_v35 = vld [vmem:[%s1601_s0 + $0x8] sm:$0xff]  ;;  %v1038_v40 = vld [vmem:[%s1445_s29 + $0xb0] sm:$0xf]  ;;  %v1181_v45 = vld [vmem:[%s1445_s29 + $0x64] sm:$0xf]  ;;  %vm767_vm0 = vcmask 392192  }
  0x5b   : > { %816 = vmatpush.bf16.msra.mxu3 %v1151_v24  ;;  %786 = vmatpush.bf16.msra.mxu1 %v1055_v22  ;;  %v1176_v39 = vld [vmem:[%s1445_s29 + $0x34] sm:$0xf0]  ;;  %v1102_v43 = vld [vmem:[%s1445_s29 + $0x130] sm:$0xf]  ;;  %v1000_v46 = vld [vmem:[%s1445_s29 + $0x68] sm:$0xf0]  ;;  %v489_v47 = vunpack.c.h.b16 %v1482_v35  ;;  %v488_v28 = vunpack.c.l.b16 %v1482_v35 }
  0x5c   : > { %799 = vmatpush.bf16.msra.mxu2 %v1119_v23  ;;  %v1192_v42 = vld [vmem:[%s1445_s29 + $0xb4] sm:$0xf0]  ;;  %v975_v48 = vor.u32 %v1176_v39, %v974_v38  ;;  %v966_v51 = vld [vmem:[%s1445_s29 + $0x20] sm:$0xf]  ;;  %v1174_v52 = vld [vmem:[%s1445_s29 + $0x24] sm:$0xf0]  ;;  %v1003_v54 = vor.u32 %v1181_v45, %v1000_v46 }
  0x5d   : > { %v1208_v44 = vld [vmem:[%s1445_s29 + $0x134] sm:$0xf0]  ;;  %v1039_v49 = vor.u32 %v1192_v42, %v1038_v40  ;;  %v1030_v53 = vld [vmem:[%s1445_s29 + $0xa0] sm:$0xf]  ;;  %v1190_v55 = vld [vmem:[%s1445_s29 + $0xa4] sm:$0xf0]  ;;  %v1501_v60 = vpack.c.b16 %v489_v47, %v489_v47  ;;  %v967_v61 = vor.u32 %v1174_v52, %v966_v51  ;;  %v1537_v42 = vpack.c.b16 %v488_v28, %v488_v28 }
  0x5e   : > { %774 = vmatpush.bf16.msra.mxu0 %v983_v33  ;;  %v1103_v50 = vor.u32 %v1208_v44, %v1102_v43  ;;  %v1094_v56 = vld [vmem:[%s1445_s29 + $0x120] sm:$0xf]  ;;  %v1206_v57 = vld [vmem:[%s1445_s29 + $0x124] sm:$0xf0]  ;;  %v1179_v58 = vld [vmem:[%s1445_s29 + $0x54] sm:$0xf]  ;;  %v1031_v63 = vor.u32 %v1190_v55, %v1030_v53 }
  0x5f   : > { %817 = vmatpush.bf16.msra.mxu3 %v1143_v34  ;;  %787 = vmatpush.bf16.msra.mxu1 %v1047_v36  ;;  %v992_v59 = vld [vmem:[%s1445_s29 + $0x58] sm:$0xf0]  ;;  %v958_v62 = vld [vmem:[%s1445_s29 + $0x10] sm:$0xf]  ;;  %v1095_v0 = vor.u32 %v1206_v57, %v1094_v56  ;;  %v1172_v1 = vld [vmem:[%s1445_s29 + $0x14] sm:$0xf0] }
  0x60   : > { %800 = vmatpush.bf16.msra.mxu2 %v1111_v37  ;;  %v1022_v2 = vld [vmem:[%s1445_s29 + $0x90] sm:$0xf]  ;;  %v995_v3 = vor.u32 %v1179_v58, %v992_v59  ;;  %v1188_v4 = vld [vmem:[%s1445_s29 + $0x94] sm:$0xf0]  ;;  %v1177_v7 = vld [vmem:[%s1445_s29 + $0x44] sm:$0xf]  ;;  %v959_v9 = vor.u32 %v1172_v1, %v958_v62 }
  0x61   : > { %v1086_v5 = vld [vmem:[%s1445_s29 + $0x110] sm:$0xf]  ;;  %v1204_v6 = vld [vmem:[%s1445_s29 + $0x114] sm:$0xf0]  ;;  %v984_v8 = vld [vmem:[%s1445_s29 + $0x48] sm:$0xf0]  ;;  %v1023_v12 = vor.u32 %v1188_v4, %v1022_v2 }
  0x62   : > { %775 = vmatpush.bf16.msra.mxu0 %v975_v48  ;;  %1164 = vmatmul.msk.bf16.vlgmr.msra.gmra.mxu3 %vm767_vm0, %v1501_v60  ;;  %v950_v10 = vld [vmem:[%s1445_s29] sm:$0xf]  ;;  %v1087_v13 = vor.u32 %v1204_v6, %v1086_v5  ;;  %v1170_v14 = vld [vmem:[%s1445_s29 + $0x4] sm:$0xf0]  ;;  %v987_v17 = vor.u32 %v1177_v7, %v984_v8  ;;  %v1199_v20 = vld [vmem:[%s1445_s29 + $0xf4] sm:$0xf] }
  0x63   : > { %823 = vmatpush.bf16.msrb.mxu3 %v1011_v41  ;;  %788 = vmatpush.bf16.msra.mxu1 %v1039_v49  ;;  %v422_v11 = vld [vmem:[%s1601_s0] sm:$0xff]  ;;  %v1186_v16 = vld [vmem:[%s1445_s29 + $0x84] sm:$0xf0]  ;;  %v1072_v21 = vld [vmem:[%s1445_s29 + $0xf8] sm:$0xf0]  ;;  %v951_v25 = vor.u32 %v1170_v14, %v950_v10  ;;  %s1609_s9 = smov (!%p416_p8, %s946_s9), 3 }
  0x64   : > { %801 = vmatpush.bf16.msra.mxu2 %v1103_v50  ;;  %v1014_v15 = vld [vmem:[%s1445_s29 + $0x80] sm:$0xf]  ;;  %v1202_v19 = vld [vmem:[%s1445_s29 + $0x104] sm:$0xf0]  ;;  %v1215_v22 = vld [vmem:[%s1445_s29 + $0x174] sm:$0xf]  ;;  %v486_v24 = vunpack.c.l.b16 %v422_v11  ;;  %v487_v29 = vunpack.c.h.b16 %v422_v11  ;;  %v1075_v32 = vor.u32 %v1199_v20, %v1072_v21 }
  0x65   : > { %v1078_v18 = vld [vmem:[%s1445_s29 + $0x100] sm:$0xf]  ;;  %v1136_v23 = vld [vmem:[%s1445_s29 + $0x178] sm:$0xf0]  ;;  %v1175_v26 = vld [vmem:[%s1445_s29 + $0x34] sm:$0xf]  ;;  %v1015_v30 = vor.u32 %v1186_v16, %v1014_v15 }
  0x66   : > { %776 = vmatpush.bf16.msra.mxu0 %v967_v61  ;;  %v976_v27 = vld [vmem:[%s1445_s29 + $0x38] sm:$0xf0]  ;;  %v1079_v31 = vor.u32 %v1202_v19, %v1078_v18  ;;  %v1139_v33 = vor.u32 %v1215_v22, %v1136_v23  ;;  %v1197_v34 = vld [vmem:[%s1445_s29 + $0xe4] sm:$0xf]  ;;  %v1160_v37 = vld [vmem:[%s1445_s29 + $0x1a8] sm:$0xf0]  ;;  %v1535_v35 = vpack.c.b16 %v486_v24, %v486_v24  ;;  %v1541_v45 = vpack.c.b16 %v487_v29, %v487_v29 }
  0x67   : > { %824 = vmatpush.bf16.msrb.mxu3 %v1003_v54  ;;  %789 = vmatpush.bf16.msra.mxu1 %v1031_v63  ;;  %v1221_v36 = vld [vmem:[%s1445_s29 + $0x1a4] sm:$0xf]  ;;  %v979_v38 = vor.u32 %v1175_v26, %v976_v27  ;;  %v1064_v39 = vld [vmem:[%s1445_s29 + $0xe8] sm:$0xf0]  ;;  %v1195_v47 = vld [vmem:[%s1445_s29 + $0xd4] sm:$0xf] }
  0x68   : > { %802 = vmatpush.bf16.msra.mxu2 %v1095_v0  ;;  %v1213_v40 = vld [vmem:[%s1445_s29 + $0x164] sm:$0xf]  ;;  %v1128_v41 = vld [vmem:[%s1445_s29 + $0x168] sm:$0xf0]  ;;  %v1163_v46 = vor.u32 %v1221_v36, %v1160_v37  ;;  %v1067_v48 = vor.u32 %v1197_v34, %v1064_v39  ;;  %v1219_v50 = vld [vmem:[%s1445_s29 + $0x194] sm:$0xf] }
  0x69   : > { %v1173_v43 = vld [vmem:[%s1445_s29 + $0x24] sm:$0xf]  ;;  %v968_v44 = vld [vmem:[%s1445_s29 + $0x28] sm:$0xf0]  ;;  %v1131_v49 = vor.u32 %v1213_v40, %v1128_v41  ;;  %v1152_v51 = vld [vmem:[%s1445_s29 + $0x198] sm:$0xf0] }
  0x6a   : > { %777 = vmatpush.bf16.msra.mxu0 %v959_v9  ;;  %v971_v52 = vor.u32 %v1173_v43, %v968_v44  ;;  %v1056_v53 = vld [vmem:[%s1445_s29 + $0xd8] sm:$0xf0]  ;;  %v1211_v54 = vld [vmem:[%s1445_s29 + $0x154] sm:$0xf]  ;;  %v1155_v59 = vor.u32 %v1219_v50, %v1152_v51  ;;  %v1275_v61 = vmov 0   ;;  %s947_s10 = sshll.u32 %s1609_s9, 3 }
  0x6b   : > { %825 = vmatpush.bf16.msrb.mxu3 %v995_v3  ;;  %790 = vmatpush.bf16.msra.mxu1 %v1023_v12  ;;  %v1120_v55 = vld [vmem:[%s1445_s29 + $0x158] sm:$0xf0]  ;;  %v1171_v56 = vld [vmem:[%s1445_s29 + $0x14] sm:$0xf]  ;;  %v1059_v62 = vor.u32 %v1195_v47, %v1056_v53  ;;  %v1193_v0 = vld [vmem:[%s1445_s29 + $0xc4] sm:$0xf]  ;;  %s419_s17 = scalar_lea.vmem %s1604_s3, %s947_s10 }
  0x6c   : > { %803 = vmatpush.bf16.msra.mxu2 %v1087_v13  ;;  %v960_v57 = vld [vmem:[%s1445_s29 + $0x18] sm:$0xf0]  ;;  %v478_v58 = vld [vmem:[%s1603_s2] sm:$0xff]  ;;  %1250 = vset.pattern.permute.xlu0 %v1275_v61  ;;  %v1123_v63 = vor.u32 %v1211_v54, %v1120_v55  ;;  %v1144_v2 = vld [vmem:[%s1445_s29 + $0x188] sm:$0xf0] }
  0x6d   : > { %v1217_v1 = vld [vmem:[%s1445_s29 + $0x184] sm:$0xf]  ;;  %v963_v3 = vor.u32 %v1171_v56, %v960_v57  ;;  %v1048_v4 = vld [vmem:[%s1445_s29 + $0xc8] sm:$0xf0]  ;;  %481 = vperm.xlu0 %1250, %v478_v58   ;;  %v1191_v13 = vld [vmem:[%s1445_s29 + $0xb4] sm:$0xf] }
  0x6e   : > { %778 = vmatpush.bf16.msra.mxu0 %v951_v25  ;;  %v1209_v5 = vld [vmem:[%s1445_s29 + $0x144] sm:$0xf]  ;;  %v1112_v6 = vld [vmem:[%s1445_s29 + $0x148] sm:$0xf0]  ;;  %v1147_v9 = vor.u32 %v1217_v1, %v1144_v2  ;;  %v1051_v10 = vor.u32 %v1193_v0, %v1048_v4  ;;  %v1040_v14 = vld [vmem:[%s1445_s29 + $0xb8] sm:$0xf0] }
  0x6f   : > { %826 = vmatpush.bf16.msrb.mxu3 %v987_v17  ;;  %791 = vmatpush.bf16.msra.mxu1 %v1015_v30  ;;  %v1169_v7 = vld [vmem:[%s1445_s29 + $0x4] sm:$0xf]  ;;  %v952_v8 = vld [vmem:[%s1445_s29 + $0x8] sm:$0xf0]  ;;  %v1115_v11 = vor.u32 %v1209_v5, %v1112_v6  ;;  %v1207_v15 = vld [vmem:[%s1445_s29 + $0x134] sm:$0xf]  ;;  %v1043_v17 = vor.u32 %v1191_v13, %v1040_v14 }
  0x70   : > { %804 = vmatpush.bf16.msra.mxu2 %v1079_v31  ;;  %v955_v12 = vor.u32 %v1169_v7, %v952_v8  ;;  %v1104_v16 = vld [vmem:[%s1445_s29 + $0x138] sm:$0xf0]  ;;  %v1189_v19 = vld [vmem:[%s1445_s29 + $0xa4] sm:$0xf]  ;;  %v1032_v20 = vld [vmem:[%s1445_s29 + $0xa8] sm:$0xf0] }
  0x71   : > { %779 = vmatmul.bf16.vlgmr.msra.gmra.mxu0 %v1535_v35  ;;  %v1107_v18 = vor.u32 %v1207_v15, %v1104_v16  ;;  %v1205_v21 = vld [vmem:[%s1445_s29 + $0x124] sm:$0xf]  ;;  %v1096_v22 = vld [vmem:[%s1445_s29 + $0x128] sm:$0xf0]  ;;  %v1035_v23 = vor.u32 %v1189_v19, %v1032_v20  ;;  %v1187_v25 = vld [vmem:[%s1445_s29 + $0x94] sm:$0xf] }
  0x72   : > { %836 = vmatpush.bf16.msrb.mxu0 %v1075_v32  ;;  %792 = vmatmul.bf16.vlgmr.msra.gmra.mxu1 %v1541_v45  ;;  %v1099_v24 = vor.u32 %v1205_v21, %v1096_v22  ;;  %v1024_v26 = vld [vmem:[%s1445_s29 + $0x98] sm:$0xf0]  ;;  %v1203_v27 = vld [vmem:[%s1445_s29 + $0x114] sm:$0xf]  ;;  %v1185_v31 = vld [vmem:[%s1445_s29 + $0x84] sm:$0xf] }
  0x73   : > { %849 = vmatpush.bf16.msrb.mxu1 %v1139_v33  ;;  %827 = vmatpush.bf16.msrb.mxu3 %v979_v38  ;;  %v1088_v28 = vld [vmem:[%s1445_s29 + $0x118] sm:$0xf0]  ;;  %v1027_v29 = vor.u32 %v1187_v25, %v1024_v26  ;;  %v1016_v32 = vld [vmem:[%s1445_s29 + $0x88] sm:$0xf0]  ;;  %v1201_v33 = vld [vmem:[%s1445_s29 + $0x104] sm:$0xf] }
  0x74   : > { %805 = vmatmul.bf16.vlgmr.msra.gmra.mxu2 %v1537_v42  ;;  %v1091_v30 = vor.u32 %v1203_v27, %v1088_v28  ;;  %v1080_v34 = vld [vmem:[%s1445_s29 + $0x108] sm:$0xf0]  ;;  %v1019_v36 = vor.u32 %v1185_v31, %v1016_v32 }
  0x75   : > { %867 = vmatpush.bf16.msrb.mxu2 %v1163_v46  ;;  %v1083_v37 = vor.u32 %v1201_v33, %v1080_v34 }
  0x76   : > { %837 = vmatpush.bf16.msrb.mxu0 %v1067_v48 }
  0x77   : > { %850 = vmatpush.bf16.msrb.mxu1 %v1131_v49  ;;  %828 = vmatpush.bf16.msrb.mxu3 %v971_v52 }
  0x79   : > { %868 = vmatpush.bf16.msrb.mxu2 %v1155_v59 }
  0x7a   : > { %838 = vmatpush.bf16.msrb.mxu0 %v1059_v62 }
  0x7b   : > { %851 = vmatpush.bf16.msrb.mxu1 %v1123_v63  ;;  %829 = vmatpush.bf16.msrb.mxu3 %v963_v3 }
  0x7d   : > { %869 = vmatpush.bf16.msrb.mxu2 %v1147_v9 }
  0x7e   : > { %839 = vmatpush.bf16.msrb.mxu0 %v1051_v10 }
  0x7f   : > { %852 = vmatpush.bf16.msrb.mxu1 %v1115_v11  ;;  %830 = vmatpush.bf16.msrb.mxu3 %v955_v12 }
  0x82   : > { %831 = vmatmul.bf16.vlgmr.msrb.gmra.mxu3 %v1535_v35  ;;  %840 = vmatpush.bf16.msrb.mxu0 %v1043_v17 }
  0x83   : > { %853 = vmatpush.bf16.msrb.mxu1 %v1107_v18 }
  0x84   : > { %1165 = vmatmul.msk.bf16.vlgmr.msrb.gmra.mxu2 %vm767_vm0, %v1501_v60 }
  0x86   : > { %841 = vmatpush.bf16.msrb.mxu0 %v1035_v23 }
  0x87   : > { %854 = vmatpush.bf16.msrb.mxu1 %v1099_v24 }
  0x8a   : > { %842 = vmatpush.bf16.msrb.mxu0 %v1027_v29 }
  0x8b   : > { %855 = vmatpush.bf16.msrb.mxu1 %v1091_v30 }
  0x8e   : > { %843 = vmatpush.bf16.msrb.mxu0 %v1019_v36 }
  0x8f   : > { %856 = vmatpush.bf16.msrb.mxu1 %v1083_v37 }
  0x91   : > { %844 = vmatmul.bf16.vlgmr.msrb.gmra.mxu0 %v1541_v45 }
  0x92   : > { %857 = vmatmul.bf16.vlgmr.msrb.gmra.mxu1 %v1537_v42 }
  0xdf   : > { %v482_v38 = vpop.permute.xlu0 %481 }
  0xe5   : > { %v819_v60 = vpop.f32.mrf.mxu3 }
  0xed   : > { %v821_v35 = vpop.f32.mrf.mxu3 }
  0xee   : > { %v780_v39 = vpop.f32.mrf.mxu0 }
  0xef   : > { %v793_v40 = vpop.f32.mrf.mxu1  ;;  %v781_v41 = vadd.f32 %v780_v39, %v482_v38 }
  0xf1   : > { %v794_v43 = vadd.f32 %v793_v40, %v781_v41 }
  0xf6   : > { %v782_v47 = vpop.f32.mrf.mxu0 }
  0xf7   : > { %v806_v44 = vpop.f32.mrf.mxu2  ;;  %v795_v42 = vpop.f32.mrf.mxu1 }
  0xf8   : > { %v807_v46 = vadd.f32 %v806_v44, %v794_v43 }
  0xfa   : > { %v820_v45 = vadd.f32 %v819_v60, %v807_v46 }
  0xfc   : > { %875 = vst [vmem:[%s419_s17] sm:$0xff] %v820_v45 }
  0xff   : > { %v808_v48 = vpop.f32.mrf.mxu2 }
 0x105   : > { %v832_v49 = vpop.f32.mrf.mxu3 }
 0x106   : > { %v833_v51 = vadd.f32 %v832_v49, %v482_v38 }
 0x107   : > { %v871_v50 = vpop.f32.mrf.mxu2 }
 0x10d   : > { %v834_v52 = vpop.f32.mrf.mxu3 }
 0x10e   : > { %v845_v53 = vpop.f32.mrf.mxu0 }
 0x10f   : > { %v846_v54 = vadd.f32 %v845_v53, %v833_v51  ;;  %v858_v55 = vpop.f32.mrf.mxu1  ;;  %v873_v56 = vpop.f32.mrf.mxu2 }
 0x111   : > { %v859_v57 = vadd.f32 %v858_v55, %v846_v54 }
 0x113   : > { %v872_v58 = vadd.f32 %v871_v50, %v859_v57 }
 0x115   : > { %876 = vst [vmem:[%s419_s17 + $0x8] sm:$0xff] %v872_v58 }
 0x116   : > { %v847_v59 = vpop.f32.mrf.mxu0 }
 0x117   : > { %v860_v61 = vpop.f32.mrf.mxu1 }
 0x118 PF: > { %p10_p9 = scmp.ge.s32.totalorder %s1313_s16, 4   ;;  %s1605_s12 = smov %s1269_s13 }
 0x119   : > { %s1606_s13 = smov %s1322_s19  ;;  %s1607_s14 = smov %s1313_s16 }
 0x11a   :  { %12 = sbr.rel (!%p10_p9) target bundleno = 2 (0x2), region = 105 }

// kernel: filtering_block_forward.8
= control target key start
LH: loop header
LB: loop body
LE: loop exit
PB: predicated region body
PF: predicated region fallthrough
CT: control target
= control target key end

     0   :  { %s833_s12 = smov 0   ;;  %s835_s13 = smov 0   ;;  %s1004_s0 = inlined_call_operand.vmem [shape: bf16[8,216], index: 0, kind: input, shape index: {}]   ;;  %s1005_s1 = inlined_call_operand.vmem [shape: bf16[216,512], index: 1, kind: input, shape index: {}]   ;;  %s1006_s2 = inlined_call_operand.vmem [shape: f32[8,1], index: 2, kind: input, shape index: {}]   ;;  %s1007_s3 = inlined_call_operand.vmem [shape: f32[8,512], index: 3, kind: output, shape index: {}]  }
   0x1   :  { %s837_s14 = smov 0  }
   0x2 LB: > { %s616_s15 = sadd.s32 4294967295, %s810_s14   ;;  %s850_s16 = sadd.s32 1, %s810_s14   ;;  %s810_s14 = sphi %s837_s14, %s1010_s14   ;;  %s806_s13 = sphi %s835_s13, %s1009_s13   ;;  %s802_s12 = sphi %s833_s12, %s1008_s12  }
   0x3   : > { %s38_s17 = ssub.s32 %s810_s14, %s850_s16  ;;  %s41_s18 = sadd.s32 1, %s806_s13 }
   0x4   : > { %p39_p0 = scmp.eq.s32.totalorder %s38_s17, 0  ;;  %p48_p1 = scmp.ne.s32.totalorder %s806_s13, %s802_s12 }
   0x5   : > { %p49_p2 = scmp.eq.s32.totalorder %s810_s14, 0  ;;  %p619_p4 = scmp.ge.s32.totalorder %s810_s14, 2 }
   0x6   : > { %s859_s19 = scalar_select %p39_p0, %s806_s13, %s41_s18  }
   0x7   : > { %p50_p3 = por %p49_p2, %p48_p1  ;;  %127 = sbr.rel (%p619_p4) target bundleno = 43 (0x2b), region = 24 }
   0xc   : > { %130 = sbr.rel (!%p50_p3) target bundleno = 43 (0x2b), region = 28  ;;  %s132_s20 = sand.u32 (%p50_p3), 1, %s806_s13  }
   0xd   : > { %s733_s21 = sshll.u32 (%p50_p3), %s810_s14, 3  ;;  %s760_s22 = smul.u32 (%p50_p3), 216, %s132_s20 }
   0xe   : > { %s867_s25 = scalar_lea.vmem (%p50_p3), %s1005_s1, %s733_s21 }
   0xf   : > { %v218_v0 = vld [vmem:[%s867_s25] sm:$0xff] (%p50_p3)  ;;  %v220_v1 = vld [vmem:[%s867_s25 + $0x10] sm:$0xff] (%p50_p3)  ;;  %s872_s26 = scalar_lea.vmem (%p50_p3), [#allocation2], %s760_s22 }
  0x10   : > { %v222_v2 = vld [vmem:[%s867_s25 + $0x20] sm:$0xff] (%p50_p3)  ;;  %219 = vst [vmem:[%s872_s26] sm:$0xff] (%p50_p3), %v218_v0  ;;  %v224_v3 = vld [vmem:[%s867_s25 + $0x30] sm:$0xff] (%p50_p3) }
  0x11   : > { %221 = vst [vmem:[%s872_s26 + $0x8] sm:$0xff] %v220_v1  ;;  %v226_v4 = vld [vmem:[%s867_s25 + $0x40] sm:$0xff]  ;;  %v228_v5 = vld [vmem:[%s867_s25 + $0x50] sm:$0xff] }
  0x12   : > { %223 = vst [vmem:[%s872_s26 + $0x10] sm:$0xff] %v222_v2  ;;  %v230_v6 = vld [vmem:[%s867_s25 + $0x60] sm:$0xff]  ;;  %v232_v7 = vld [vmem:[%s867_s25 + $0x70] sm:$0xff] }
  0x13   : > { %225 = vst [vmem:[%s872_s26 + $0x18] sm:$0xff] %v224_v3  ;;  %v234_v8 = vld [vmem:[%s867_s25 + $0x80] sm:$0xff]  ;;  %v236_v9 = vld [vmem:[%s867_s25 + $0x90] sm:$0xff] }
  0x14   : > { %227 = vst [vmem:[%s872_s26 + $0x20] sm:$0xff] %v226_v4  ;;  %v238_v10 = vld [vmem:[%s867_s25 + $0xa0] sm:$0xff]  ;;  %v240_v11 = vld [vmem:[%s867_s25 + $0xb0] sm:$0xff] }
  0x15   : > { %229 = vst [vmem:[%s872_s26 + $0x28] sm:$0xff] %v228_v5  ;;  %v242_v12 = vld [vmem:[%s867_s25 + $0xc0] sm:$0xff]  ;;  %v244_v13 = vld [vmem:[%s867_s25 + $0xd0] sm:$0xff] }
  0x16   : > { %231 = vst [vmem:[%s872_s26 + $0x30] sm:$0xff] %v230_v6  ;;  %v246_v14 = vld [vmem:[%s867_s25 + $0xe0] sm:$0xff]  ;;  %v248_v15 = vld [vmem:[%s867_s25 + $0xf0] sm:$0xff] }
  0x17   : > { %233 = vst [vmem:[%s872_s26 + $0x38] sm:$0xff] %v232_v7  ;;  %v250_v16 = vld [vmem:[%s867_s25 + $0x100] sm:$0xff]  ;;  %v252_v17 = vld [vmem:[%s867_s25 + $0x110] sm:$0xff] }
  0x18   : > { %235 = vst [vmem:[%s872_s26 + $0x40] sm:$0xff] %v234_v8  ;;  %v254_v18 = vld [vmem:[%s867_s25 + $0x120] sm:$0xff]  ;;  %v256_v19 = vld [vmem:[%s867_s25 + $0x130] sm:$0xff] }
  0x19   : > { %237 = vst [vmem:[%s872_s26 + $0x48] sm:$0xff] %v236_v9  ;;  %v258_v20 = vld [vmem:[%s867_s25 + $0x140] sm:$0xff]  ;;  %v260_v21 = vld [vmem:[%s867_s25 + $0x150] sm:$0xff] }
  0x1a   : > { %239 = vst [vmem:[%s872_s26 + $0x50] sm:$0xff] %v238_v10  ;;  %v262_v22 = vld [vmem:[%s867_s25 + $0x160] sm:$0xff]  ;;  %v264_v23 = vld [vmem:[%s867_s25 + $0x170] sm:$0xff] }
  0x1b   : > { %241 = vst [vmem:[%s872_s26 + $0x58] sm:$0xff] %v240_v11  ;;  %v266_v24 = vld [vmem:[%s867_s25 + $0x180] sm:$0xff]  ;;  %v268_v25 = vld [vmem:[%s867_s25 + $0x190] sm:$0xff] }
  0x1c   : > { %243 = vst [vmem:[%s872_s26 + $0x60] sm:$0xff] %v242_v12  ;;  %v270_v26 = vld [vmem:[%s867_s25 + $0x1a0] sm:$0xff] }
  0x1d   : > { %245 = vst [vmem:[%s872_s26 + $0x68] sm:$0xff] %v244_v13 }
  0x1e   : > { %247 = vst [vmem:[%s872_s26 + $0x70] sm:$0xff] %v246_v14 }
  0x1f   : > { %249 = vst [vmem:[%s872_s26 + $0x78] sm:$0xff] %v248_v15 }
  0x20   : > { %251 = vst [vmem:[%s872_s26 + $0x80] sm:$0xff] %v250_v16 }
  0x21   : > { %253 = vst [vmem:[%s872_s26 + $0x88] sm:$0xff] %v252_v17 }
  0x22   : > { %255 = vst [vmem:[%s872_s26 + $0x90] sm:$0xff] %v254_v18 }
  0x23   : > { %257 = vst [vmem:[%s872_s26 + $0x98] sm:$0xff] %v256_v19 }
  0x24   : > { %259 = vst [vmem:[%s872_s26 + $0xa0] sm:$0xff] %v258_v20 }
  0x25   : > { %261 = vst [vmem:[%s872_s26 + $0xa8] sm:$0xff] %v260_v21 }
  0x26   : > { %263 = vst [vmem:[%s872_s26 + $0xb0] sm:$0xff] %v262_v22 }
  0x27   : > { %265 = vst [vmem:[%s872_s26 + $0xb8] sm:$0xff] %v264_v23 }
  0x28   : > { %267 = vst [vmem:[%s872_s26 + $0xc0] sm:$0xff] %v266_v24 }
  0x29   : > { %269 = vst [vmem:[%s872_s26 + $0xc8] sm:$0xff] %v268_v25 }
  0x2a   : > { %271 = vst [vmem:[%s872_s26 + $0xd0] sm:$0xff] %v270_v26 }
  0x2b PF: > { %p622_p5 = scmp.ge.s32.totalorder %s810_s14, 1  ;;  %p276_p6 = scmp.lt.s32.totalorder %s810_s14, 3 }
  0x2d   : > { %p277_p7 = pnand %p622_p5, %p276_p6 }
  0x2e   : > { %s283_s27 = sand.u32 (!%p277_p7), 1, %s802_s12   ;;  %s623_s7 = sshll.u32 (!%p277_p7), %s616_s15, 1 }
  0x2f   : > { %280 = sbr.rel (%p277_p7) target bundleno = 227 (0xe3), region = 66  ;;  %p308_p8 = scmp.lt.s32.totalorder (!%p277_p7), %s623_s7, 3 }
  0x30   : > { %s761_s28 = smul.u32 (!%p277_p7), 216, %s283_s27 }
  0x32   : > { %s928_s29 = scalar_lea.vmem (!%p277_p7), [#allocation2], %s761_s28 }
  0x34   : > { %v683_v27 = vld [vmem:[%s928_s29 + $0x70] sm:$0xf]  ;;  %v749_v28 = vld [vmem:[%s928_s29 + $0x74] sm:$0xf0]  ;;  %v748_v29 = vld [vmem:[%s928_s29 + $0x74] sm:$0xf] }
  0x35   : > { %v684_v30 = vor.u32 %v749_v28, %v683_v27  ;;  %v685_v31 = vld [vmem:[%s928_s29 + $0x78] sm:$0xf0]  ;;  %v341_v32 = vld [vmem:[%s928_s29 + $0xd0] sm:$0xff]  ;;  %v675_v33 = vld [vmem:[%s928_s29 + $0x60] sm:$0xf]  ;;  %vm493_vm0 = vcmask 1043456  }
  0x36   : > { %v688_v34 = vor.u32 %v748_v29, %v685_v31  ;;  %v434_v35 = vunpack.c.h.b16 %v341_v32  ;;  %v747_v36 = vld [vmem:[%s928_s29 + $0x64] sm:$0xf0]  ;;  %v746_v37 = vld [vmem:[%s928_s29 + $0x64] sm:$0xf]  ;;  %v677_v38 = vld [vmem:[%s928_s29 + $0x68] sm:$0xf0]  ;;  %v433_v39 = vunpack.c.l.b16 %v341_v32 }
  0x37   : > { %500 = vmatpush.bf16.msra.mxu0 %v684_v30  ;;  %v676_v40 = vor.u32 %v747_v36, %v675_v33  ;;  %v758_v41 = vld [vmem:[%s928_s29 + $0xc4] sm:$0xf]  ;;  %v725_v42 = vld [vmem:[%s928_s29 + $0xc8] sm:$0xf0]  ;;  %v680_v44 = vor.u32 %v746_v37, %v677_v38  ;;  %v667_v46 = vld [vmem:[%s928_s29 + $0x50] sm:$0xf] }
  0x38   : > { %526 = vmatpush.bf16.msra.mxu2 %v688_v34  ;;  %v462_v43 = vpack.c.b16 %v434_v35, %v434_v35  ;;  %v461_v45 = vpack.c.b16 %v433_v39, %v433_v39  ;;  %v745_v47 = vld [vmem:[%s928_s29 + $0x54] sm:$0xf0]  ;;  %v744_v48 = vld [vmem:[%s928_s29 + $0x54] sm:$0xf]  ;;  %v669_v49 = vld [vmem:[%s928_s29 + $0x58] sm:$0xf0]  ;;  %v728_v54 = vor.u32 %v758_v41, %v725_v42 }
  0x39   : > { %v723_v50 = vld [vmem:[%s928_s29 + $0xc0] sm:$0xf]  ;;  %v759_v51 = vld [vmem:[%s928_s29 + $0xc4] sm:$0xf0]  ;;  %v668_v55 = vor.u32 %v745_v47, %v667_v46  ;;  %v756_v56 = vld [vmem:[%s928_s29 + $0xb4] sm:$0xf]  ;;  %v672_v58 = vor.u32 %v744_v48, %v669_v49 }
  0x3a   : > { %v498_v52 = vsel %vm493_vm0, %v462_v43, 0  ;;  %v495_v53 = vsel %vm493_vm0, %v461_v45, 0  ;;  %v717_v57 = vld [vmem:[%s928_s29 + $0xb8] sm:$0xf0]  ;;  %v724_v59 = vor.u32 %v759_v51, %v723_v50  ;;  %v659_v60 = vld [vmem:[%s928_s29 + $0x40] sm:$0xf] }
  0x3b   : > { %541 = vmatpush.bf16.msra.mxu3 %v498_v52  ;;  %501 = vmatpush.bf16.msra.mxu0 %v676_v40  ;;  %v743_v61 = vld [vmem:[%s928_s29 + $0x44] sm:$0xf0]  ;;  %v742_v62 = vld [vmem:[%s928_s29 + $0x44] sm:$0xf]  ;;  %v661_v63 = vld [vmem:[%s928_s29 + $0x48] sm:$0xf0]  ;;  %v720_v2 = vor.u32 %v756_v56, %v717_v57 }
  0x3c   : > { %527 = vmatpush.bf16.msra.mxu2 %v680_v44  ;;  %515 = vmatpush.bf16.msra.mxu1 %v495_v53  ;;  %v715_v0 = vld [vmem:[%s928_s29 + $0xb0] sm:$0xf]  ;;  %v757_v1 = vld [vmem:[%s928_s29 + $0xb4] sm:$0xf0]  ;;  %v660_v3 = vor.u32 %v743_v61, %v659_v60  ;;  %v754_v4 = vld [vmem:[%s928_s29 + $0xa4] sm:$0xf]  ;;  %v664_v6 = vor.u32 %v742_v62, %v661_v63 }
  0x3d   : > { %v709_v5 = vld [vmem:[%s928_s29 + $0xa8] sm:$0xf0]  ;;  %v716_v7 = vor.u32 %v757_v1, %v715_v0  ;;  %v651_v8 = vld [vmem:[%s928_s29 + $0x30] sm:$0xf]  ;;  %v741_v9 = vld [vmem:[%s928_s29 + $0x34] sm:$0xf0] }
  0x3e   : > { %v740_v10 = vld [vmem:[%s928_s29 + $0x34] sm:$0xf]  ;;  %v653_v11 = vld [vmem:[%s928_s29 + $0x38] sm:$0xf0]  ;;  %v707_v12 = vld [vmem:[%s928_s29 + $0xa0] sm:$0xf]  ;;  %v712_v14 = vor.u32 %v754_v4, %v709_v5  ;;  %v652_v15 = vor.u32 %v741_v9, %v651_v8 }
  0x3f   : > { %542 = vmatpush.bf16.msra.mxu3 %v728_v54  ;;  %502 = vmatpush.bf16.msra.mxu0 %v668_v55  ;;  %v755_v13 = vld [vmem:[%s928_s29 + $0xa4] sm:$0xf0]  ;;  %v752_v16 = vld [vmem:[%s928_s29 + $0x94] sm:$0xf]  ;;  %v701_v17 = vld [vmem:[%s928_s29 + $0x98] sm:$0xf0]  ;;  %v656_v18 = vor.u32 %v740_v10, %v653_v11 }
  0x40   : > { %528 = vmatpush.bf16.msra.mxu2 %v672_v58  ;;  %516 = vmatpush.bf16.msra.mxu1 %v724_v59  ;;  %v708_v19 = vor.u32 %v755_v13, %v707_v12  ;;  %v643_v20 = vld [vmem:[%s928_s29 + $0x20] sm:$0xf]  ;;  %v739_v21 = vld [vmem:[%s928_s29 + $0x24] sm:$0xf0]  ;;  %v738_v22 = vld [vmem:[%s928_s29 + $0x24] sm:$0xf]  ;;  %v704_v27 = vor.u32 %v752_v16, %v701_v17 }
  0x41   : > { %v645_v23 = vld [vmem:[%s928_s29 + $0x28] sm:$0xf0]  ;;  %v699_v24 = vld [vmem:[%s928_s29 + $0x90] sm:$0xf]  ;;  %v753_v25 = vld [vmem:[%s928_s29 + $0x94] sm:$0xf0]  ;;  %v644_v28 = vor.u32 %v739_v21, %v643_v20 }
  0x42   : > { %v314_v26 = vld [vmem:[%s1004_s0] sm:$0xff]  ;;  %v648_v32 = vor.u32 %v738_v22, %v645_v23  ;;  %v700_v33 = vor.u32 %v753_v25, %v699_v24  ;;  %v635_v34 = vld [vmem:[%s928_s29 + $0x10] sm:$0xf]  ;;  %v737_v35 = vld [vmem:[%s928_s29 + $0x14] sm:$0xf0]  ;;  %v812_v40 = vmov 0  }
  0x43   : > { %543 = vmatpush.bf16.msra.mxu3 %v720_v2  ;;  %503 = vmatpush.bf16.msra.mxu0 %v660_v3  ;;  %v750_v29 = vld [vmem:[%s928_s29 + $0x84] sm:$0xf]  ;;  %v693_v30 = vld [vmem:[%s928_s29 + $0x88] sm:$0xf0]  ;;  %v736_v36 = vld [vmem:[%s928_s29 + $0x14] sm:$0xf]  ;;  %v350_v41 = vunpack.c.h.b16 %v314_v26  ;;  %v636_v43 = vor.u32 %v737_v35, %v635_v34  ;;  %v349_v51 = vunpack.c.l.b16 %v314_v26 }
  0x44   : > { %529 = vmatpush.bf16.msra.mxu2 %v664_v6  ;;  %517 = vmatpush.bf16.msra.mxu1 %v716_v7  ;;  %v342_v31 = vld [vmem:[%s1006_s2] sm:$0xff]  ;;  %v637_v37 = vld [vmem:[%s928_s29 + $0x18] sm:$0xf0]  ;;  %v696_v42 = vor.u32 %v750_v29, %v693_v30  ;;  %vm489_vm1 = vcmask 719872   ;;  %s1012_s7 = smov (!%p308_p8, %s623_s7), 3 }
  0x45   : > { %v691_v38 = vld [vmem:[%s928_s29 + $0x80] sm:$0xf]  ;;  %v751_v39 = vld [vmem:[%s928_s29 + $0x84] sm:$0xf0]  ;;  %787 = vset.pattern.permute.xlu0 %v812_v40  ;;  %v640_v44 = vor.u32 %v736_v36, %v637_v37  ;;  %v734_v48 = vld [vmem:[%s928_s29 + $0x4] sm:$0xf]  ;;  %v352_v50 = vpack.c.b16 %v350_v41, %v350_v41  ;;  %v351_v54 = vpack.c.b16 %v349_v51, %v349_v51 }
  0x46   : > { %345 = vperm.xlu0 %787, %v342_v31   ;;  %v692_v45 = vor.u32 %v751_v39, %v691_v38  ;;  %v627_v46 = vld [vmem:[%s928_s29] sm:$0xf]  ;;  %v735_v47 = vld [vmem:[%s928_s29 + $0x4] sm:$0xf0]  ;;  %v629_v49 = vld [vmem:[%s928_s29 + $0x8] sm:$0xf0] }
  0x47   : > { %544 = vmatpush.bf16.msra.mxu3 %v712_v14  ;;  %504 = vmatpush.bf16.msra.mxu0 %v652_v15  ;;  %v628_v52 = vor.u32 %v735_v47, %v627_v46  ;;  %v632_v53 = vor.u32 %v734_v48, %v629_v49  ;;  %s624_s8 = sshll.u32 %s1012_s7, 3 }
  0x48   : > { %530 = vmatpush.bf16.msra.mxu2 %v656_v18  ;;  %518 = vmatpush.bf16.msra.mxu1 %v708_v19  ;;  %s311_s11 = scalar_lea.vmem %s1007_s3, %s624_s8 }
  0x4b   : > { %545 = vmatpush.bf16.msra.mxu3 %v704_v27  ;;  %505 = vmatpush.bf16.msra.mxu0 %v644_v28 }
  0x4c   : > { %531 = vmatpush.bf16.msra.mxu2 %v648_v32  ;;  %519 = vmatpush.bf16.msra.mxu1 %v700_v33 }
  0x4f   : > { %546 = vmatpush.bf16.msra.mxu3 %v696_v42  ;;  %506 = vmatpush.bf16.msra.mxu0 %v636_v43 }
  0x50   : > { %532 = vmatpush.bf16.msra.mxu2 %v640_v44  ;;  %520 = vmatpush.bf16.msra.mxu1 %v692_v45 }
  0x52   : > { %730 = vmatmul.msk.bf16.vlgmr.msra.gmra.mxu3 %vm489_vm1, %v352_v50 }
  0x53   : > { %507 = vmatpush.bf16.msra.mxu0 %v628_v52  ;;  %729 = vmatmul.msk.bf16.vlgmr.msra.gmra.mxu1 %vm489_vm1, %v352_v50 }
  0x54   : > { %533 = vmatpush.bf16.msra.mxu2 %v632_v53 }
  0x56   : > { %508 = vmatmul.bf16.vlgmr.msra.gmra.mxu0 %v351_v54 }
  0x57   : > { %534 = vmatmul.bf16.vlgmr.msra.gmra.mxu2 %v351_v54 }
  0xb8   : > { %v346_v56 = vpop.permute.xlu0 %345 }
  0xd0   : > { %v522_v55 = vpop.f32.mrf.mxu1 }
  0xd3   : > { %v509_v57 = vpop.f32.mrf.mxu0 }
  0xd4   : > { %v510_v58 = vadd.f32 %v509_v57, %v346_v56 }
  0xd5   : > { %v548_v59 = vpop.f32.mrf.mxu3 }
  0xd6   : > { %v523_v60 = vadd.f32 %v522_v55, %v510_v58 }
  0xd8   : > { %552 = vst [vmem:[%s311_s11] sm:$0xff] %v523_v60  ;;  %v524_v61 = vpop.f32.mrf.mxu1 }
  0xda   : > { %v535_v62 = vpop.f32.mrf.mxu2 }
  0xdb   : > { %v536_v63 = vadd.f32 %v535_v62, %v346_v56  ;;  %v511_v0 = vpop.f32.mrf.mxu0 }
  0xdd   : > { %v549_v1 = vadd.f32 %v548_v59, %v536_v63  ;;  %v550_v2 = vpop.f32.mrf.mxu3 }
  0xdf   : > { %553 = vst [vmem:[%s311_s11 + $0x8] sm:$0xff] %v549_v1 }
  0xe2   : > { %v537_v3 = vpop.f32.mrf.mxu2 }
  0xe3 PF: > { %p10_p9 = scmp.ge.s32.totalorder %s850_s16, 4   ;;  %s1008_s12 = smov %s806_s13 }
  0xe4   : > { %s1009_s13 = smov %s859_s19  ;;  %s1010_s14 = smov %s850_s16 }
  0xe5   :  { %12 = sbr.rel (!%p10_p9) target bundleno = 2 (0x2), region = 105 }

// kernel: filtering_block_forward.9
= control target key start
LH: loop header
LB: loop body
LE: loop exit
PB: predicated region body
PF: predicated region fallthrough
CT: control target
= control target key end

     0   :  { %s1064_s12 = smov 0   ;;  %s1066_s13 = smov 0   ;;  %s1339_s0 = inlined_call_operand.vmem [shape: bf16[54,216], index: 0, kind: input, shape index: {}]   ;;  %s1340_s1 = inlined_call_operand.vmem [shape: bf16[216,512], index: 1, kind: input, shape index: {}]   ;;  %s1341_s2 = inlined_call_operand.vmem [shape: f32[54,1], index: 2, kind: input, shape index: {}]   ;;  %s1342_s3 = inlined_call_operand.vmem [shape: f32[54,512], index: 3, kind: output, shape index: {}]  }
   0x1   :  { %s1068_s14 = smov 0  }
   0x2 LB: > { %s807_s15 = sadd.s32 4294967295, %s1041_s14   ;;  %s1081_s16 = sadd.s32 1, %s1041_s14   ;;  %s1041_s14 = sphi %s1068_s14, %s1346_s14   ;;  %s1037_s13 = sphi %s1066_s13, %s1345_s13   ;;  %s1033_s12 = sphi %s1064_s12, %s1344_s12  }
   0x3   : > { %s38_s17 = ssub.s32 %s1041_s14, %s1081_s16  ;;  %s41_s18 = sadd.s32 1, %s1037_s13 }
   0x4   : > { %p39_p0 = scmp.eq.s32.totalorder %s38_s17, 0  ;;  %p48_p1 = scmp.ne.s32.totalorder %s1037_s13, %s1033_s12 }
   0x5   : > { %p49_p2 = scmp.eq.s32.totalorder %s1041_s14, 0  ;;  %p99_p3 = scmp.eq.s32.totalorder %s807_s15, 1 }
   0x6   : > { %s1092_s19 = scalar_select %p39_p0, %s1037_s13, %s41_s18  }
   0x7   : > { %p50_p4 = por %p49_p2, %p48_p1  ;;  %p1094_p5 = por %p99_p3, %p48_p1 }
   0x8   : > { %p810_p6 = scmp.ge.s32.totalorder %s1041_s14, 2 }
   0xa   : > { %127 = sbr.rel (%p810_p6) target bundleno = 46 (0x2e), region = 24 }
   0xf   : > { %130 = sbr.rel (!%p50_p4) target bundleno = 46 (0x2e), region = 28  ;;  %s132_s21 = sand.u32 (%p50_p4), 1, %s1037_s13  }
  0x10   : > { %s954_s22 = sshll.u32 (%p50_p4), %s1041_s14, 3  ;;  %s988_s23 = smul.u32 (%p50_p4), 216, %s132_s21 }
  0x11   : > { %s1104_s26 = scalar_lea.vmem (%p50_p4), %s1340_s1, %s954_s22 }
  0x12   : > { %v218_v0 = vld [vmem:[%s1104_s26] sm:$0xff] (%p50_p4)  ;;  %v220_v1 = vld [vmem:[%s1104_s26 + $0x10] sm:$0xff] (%p50_p4)  ;;  %s1109_s27 = scalar_lea.vmem (%p50_p4), [#allocation2], %s988_s23 }
  0x13   : > { %v222_v2 = vld [vmem:[%s1104_s26 + $0x20] sm:$0xff] (%p50_p4)  ;;  %219 = vst [vmem:[%s1109_s27] sm:$0xff] (%p50_p4), %v218_v0  ;;  %v224_v3 = vld [vmem:[%s1104_s26 + $0x30] sm:$0xff] (%p50_p4) }
  0x14   : > { %221 = vst [vmem:[%s1109_s27 + $0x8] sm:$0xff] %v220_v1  ;;  %v226_v4 = vld [vmem:[%s1104_s26 + $0x40] sm:$0xff]  ;;  %v228_v5 = vld [vmem:[%s1104_s26 + $0x50] sm:$0xff] }
  0x15   : > { %223 = vst [vmem:[%s1109_s27 + $0x10] sm:$0xff] %v222_v2  ;;  %v230_v6 = vld [vmem:[%s1104_s26 + $0x60] sm:$0xff]  ;;  %v232_v7 = vld [vmem:[%s1104_s26 + $0x70] sm:$0xff] }
  0x16   : > { %225 = vst [vmem:[%s1109_s27 + $0x18] sm:$0xff] %v224_v3  ;;  %v234_v8 = vld [vmem:[%s1104_s26 + $0x80] sm:$0xff]  ;;  %v236_v9 = vld [vmem:[%s1104_s26 + $0x90] sm:$0xff] }
  0x17   : > { %227 = vst [vmem:[%s1109_s27 + $0x20] sm:$0xff] %v226_v4  ;;  %v238_v10 = vld [vmem:[%s1104_s26 + $0xa0] sm:$0xff]  ;;  %v240_v11 = vld [vmem:[%s1104_s26 + $0xb0] sm:$0xff] }
  0x18   : > { %229 = vst [vmem:[%s1109_s27 + $0x28] sm:$0xff] %v228_v5  ;;  %v242_v12 = vld [vmem:[%s1104_s26 + $0xc0] sm:$0xff]  ;;  %v244_v13 = vld [vmem:[%s1104_s26 + $0xd0] sm:$0xff] }
  0x19   : > { %231 = vst [vmem:[%s1109_s27 + $0x30] sm:$0xff] %v230_v6  ;;  %v246_v14 = vld [vmem:[%s1104_s26 + $0xe0] sm:$0xff]  ;;  %v248_v15 = vld [vmem:[%s1104_s26 + $0xf0] sm:$0xff] }
  0x1a   : > { %233 = vst [vmem:[%s1109_s27 + $0x38] sm:$0xff] %v232_v7  ;;  %v250_v16 = vld [vmem:[%s1104_s26 + $0x100] sm:$0xff]  ;;  %v252_v17 = vld [vmem:[%s1104_s26 + $0x110] sm:$0xff] }
  0x1b   : > { %235 = vst [vmem:[%s1109_s27 + $0x40] sm:$0xff] %v234_v8  ;;  %v254_v18 = vld [vmem:[%s1104_s26 + $0x120] sm:$0xff]  ;;  %v256_v19 = vld [vmem:[%s1104_s26 + $0x130] sm:$0xff] }
  0x1c   : > { %237 = vst [vmem:[%s1109_s27 + $0x48] sm:$0xff] %v236_v9  ;;  %v258_v20 = vld [vmem:[%s1104_s26 + $0x140] sm:$0xff]  ;;  %v260_v21 = vld [vmem:[%s1104_s26 + $0x150] sm:$0xff] }
  0x1d   : > { %239 = vst [vmem:[%s1109_s27 + $0x50] sm:$0xff] %v238_v10  ;;  %v262_v22 = vld [vmem:[%s1104_s26 + $0x160] sm:$0xff]  ;;  %v264_v23 = vld [vmem:[%s1104_s26 + $0x170] sm:$0xff] }
  0x1e   : > { %241 = vst [vmem:[%s1109_s27 + $0x58] sm:$0xff] %v240_v11  ;;  %v266_v24 = vld [vmem:[%s1104_s26 + $0x180] sm:$0xff]  ;;  %v268_v25 = vld [vmem:[%s1104_s26 + $0x190] sm:$0xff] }
  0x1f   : > { %243 = vst [vmem:[%s1109_s27 + $0x60] sm:$0xff] %v242_v12  ;;  %v270_v26 = vld [vmem:[%s1104_s26 + $0x1a0] sm:$0xff] }
  0x20   : > { %245 = vst [vmem:[%s1109_s27 + $0x68] sm:$0xff] %v244_v13 }
  0x21   : > { %247 = vst [vmem:[%s1109_s27 + $0x70] sm:$0xff] %v246_v14 }
  0x22   : > { %249 = vst [vmem:[%s1109_s27 + $0x78] sm:$0xff] %v248_v15 }
  0x23   : > { %251 = vst [vmem:[%s1109_s27 + $0x80] sm:$0xff] %v250_v16 }
  0x24   : > { %253 = vst [vmem:[%s1109_s27 + $0x88] sm:$0xff] %v252_v17 }
  0x25   : > { %255 = vst [vmem:[%s1109_s27 + $0x90] sm:$0xff] %v254_v18 }
  0x26   : > { %257 = vst [vmem:[%s1109_s27 + $0x98] sm:$0xff] %v256_v19 }
  0x27   : > { %259 = vst [vmem:[%s1109_s27 + $0xa0] sm:$0xff] %v258_v20 }
  0x28   : > { %261 = vst [vmem:[%s1109_s27 + $0xa8] sm:$0xff] %v260_v21 }
  0x29   : > { %263 = vst [vmem:[%s1109_s27 + $0xb0] sm:$0xff] %v262_v22 }
  0x2a   : > { %265 = vst [vmem:[%s1109_s27 + $0xb8] sm:$0xff] %v264_v23 }
  0x2b   : > { %267 = vst [vmem:[%s1109_s27 + $0xc0] sm:$0xff] %v266_v24 }
  0x2c   : > { %269 = vst [vmem:[%s1109_s27 + $0xc8] sm:$0xff] %v268_v25 }
  0x2d   : > { %271 = vst [vmem:[%s1109_s27 + $0xd0] sm:$0xff] %v270_v26 }
  0x2e PF: > { %p813_p7 = scmp.ge.s32.totalorder %s1041_s14, 1  ;;  %p276_p8 = scmp.lt.s32.totalorder %s1041_s14, 3 }
  0x30   : > { %p277_p9 = pnand %p813_p7, %p276_p8 }
  0x31   : > { %s283_s28 = sand.u32 (!%p277_p9), 1, %s1033_s12  }
  0x32   : > { %280 = sbr.rel (%p277_p9) target bundleno = 283 (0x11b), region = 66 }
  0x33   : > { %s989_s29 = smul.u32 (!%p277_p9), 216, %s283_s28 }
  0x34   : > { %s990_s6 = smul.u32 (!%p277_p9), 112, %s283_s28 }
  0x35   : > { %s1167_s30 = scalar_lea.vmem (!%p277_p9), [#allocation2], %s989_s29 }
  0x36   : > { %s1292_s7 = scalar_lea.vmem (!%p277_p9), [#allocation3], %s990_s6 }
  0x37   : > { %v896_v27 = vld [vmem:[%s1167_s30 + $0x70] sm:$0xf]  ;;  %v976_v28 = vld [vmem:[%s1167_s30 + $0x74] sm:$0xf0]  ;;  %v975_v29 = vld [vmem:[%s1167_s30 + $0x74] sm:$0xf] }
  0x38   : > { %v897_v30 = vor.u32 %v976_v28, %v896_v27  ;;  %v898_v31 = vld [vmem:[%s1167_s30 + $0x78] sm:$0xf0]  ;;  %v341_v32 = vld [vmem:[%s1167_s30 + $0xd0] sm:$0xff]  ;;  %v888_v33 = vld [vmem:[%s1167_s30 + $0x60] sm:$0xf]  ;;  %vm565_vm0 = vcmask 1043456  }
  0x39   : > { %v901_v34 = vor.u32 %v975_v29, %v898_v31  ;;  %v497_v35 = vunpack.c.h.b16 %v341_v32  ;;  %v974_v36 = vld [vmem:[%s1167_s30 + $0x64] sm:$0xf0]  ;;  %v973_v37 = vld [vmem:[%s1167_s30 + $0x64] sm:$0xf]  ;;  %v890_v38 = vld [vmem:[%s1167_s30 + $0x68] sm:$0xf0]  ;;  %v496_v39 = vunpack.c.l.b16 %v341_v32 }
  0x3a   : > { %572 = vmatpush.bf16.msra.mxu0 %v897_v30  ;;  %v889_v40 = vor.u32 %v974_v36, %v888_v33  ;;  %v985_v41 = vld [vmem:[%s1167_s30 + $0xc4] sm:$0xf]  ;;  %v938_v42 = vld [vmem:[%s1167_s30 + $0xc8] sm:$0xf0]  ;;  %v893_v44 = vor.u32 %v973_v37, %v890_v38  ;;  %v880_v46 = vld [vmem:[%s1167_s30 + $0x50] sm:$0xf] }
  0x3b   : > { %628 = vmatpush.bf16.msra.mxu2 %v901_v34  ;;  %v525_v43 = vpack.c.b16 %v497_v35, %v497_v35  ;;  %v524_v45 = vpack.c.b16 %v496_v39, %v496_v39  ;;  %v972_v47 = vld [vmem:[%s1167_s30 + $0x54] sm:$0xf0]  ;;  %v971_v48 = vld [vmem:[%s1167_s30 + $0x54] sm:$0xf]  ;;  %v882_v49 = vld [vmem:[%s1167_s30 + $0x58] sm:$0xf0]  ;;  %v941_v54 = vor.u32 %v985_v41, %v938_v42 }
  0x3c   : > { %v936_v50 = vld [vmem:[%s1167_s30 + $0xc0] sm:$0xf]  ;;  %v986_v51 = vld [vmem:[%s1167_s30 + $0xc4] sm:$0xf0]  ;;  %v881_v55 = vor.u32 %v972_v47, %v880_v46  ;;  %v983_v56 = vld [vmem:[%s1167_s30 + $0xb4] sm:$0xf]  ;;  %v885_v58 = vor.u32 %v971_v48, %v882_v49 }
  0x3d   : > { %v570_v52 = vsel %vm565_vm0, %v525_v43, 0  ;;  %v567_v53 = vsel %vm565_vm0, %v524_v45, 0  ;;  %v930_v57 = vld [vmem:[%s1167_s30 + $0xb8] sm:$0xf0]  ;;  %v937_v59 = vor.u32 %v986_v51, %v936_v50  ;;  %v872_v60 = vld [vmem:[%s1167_s30 + $0x40] sm:$0xf] }
  0x3e   : > { %658 = vmatpush.bf16.msra.mxu3 %v570_v52  ;;  %573 = vmatpush.bf16.msra.mxu0 %v889_v40  ;;  %v970_v61 = vld [vmem:[%s1167_s30 + $0x44] sm:$0xf0]  ;;  %v969_v62 = vld [vmem:[%s1167_s30 + $0x44] sm:$0xf]  ;;  %v874_v63 = vld [vmem:[%s1167_s30 + $0x48] sm:$0xf0]  ;;  %v933_v2 = vor.u32 %v983_v56, %v930_v57 }
  0x3f   : > { %629 = vmatpush.bf16.msra.mxu2 %v893_v44  ;;  %602 = vmatpush.bf16.msra.mxu1 %v567_v53  ;;  %v928_v0 = vld [vmem:[%s1167_s30 + $0xb0] sm:$0xf]  ;;  %v984_v1 = vld [vmem:[%s1167_s30 + $0xb4] sm:$0xf0]  ;;  %v873_v3 = vor.u32 %v970_v61, %v872_v60  ;;  %v981_v4 = vld [vmem:[%s1167_s30 + $0xa4] sm:$0xf]  ;;  %v877_v6 = vor.u32 %v969_v62, %v874_v63 }
  0x40   : > { %v922_v5 = vld [vmem:[%s1167_s30 + $0xa8] sm:$0xf0]  ;;  %v929_v7 = vor.u32 %v984_v1, %v928_v0  ;;  %v864_v8 = vld [vmem:[%s1167_s30 + $0x30] sm:$0xf]  ;;  %v968_v9 = vld [vmem:[%s1167_s30 + $0x34] sm:$0xf0] }
  0x41   : > { %v967_v10 = vld [vmem:[%s1167_s30 + $0x34] sm:$0xf]  ;;  %v866_v11 = vld [vmem:[%s1167_s30 + $0x38] sm:$0xf0]  ;;  %v920_v12 = vld [vmem:[%s1167_s30 + $0xa0] sm:$0xf]  ;;  %v925_v14 = vor.u32 %v981_v4, %v922_v5  ;;  %v865_v15 = vor.u32 %v968_v9, %v864_v8 }
  0x42   : > { %659 = vmatpush.bf16.msra.mxu3 %v941_v54  ;;  %574 = vmatpush.bf16.msra.mxu0 %v881_v55  ;;  %v982_v13 = vld [vmem:[%s1167_s30 + $0xa4] sm:$0xf0]  ;;  %v979_v16 = vld [vmem:[%s1167_s30 + $0x94] sm:$0xf]  ;;  %v914_v17 = vld [vmem:[%s1167_s30 + $0x98] sm:$0xf0]  ;;  %v869_v18 = vor.u32 %v967_v10, %v866_v11 }
  0x43   : > { %630 = vmatpush.bf16.msra.mxu2 %v885_v58  ;;  %603 = vmatpush.bf16.msra.mxu1 %v937_v59  ;;  %v921_v19 = vor.u32 %v982_v13, %v920_v12  ;;  %v856_v20 = vld [vmem:[%s1167_s30 + $0x20] sm:$0xf]  ;;  %v966_v21 = vld [vmem:[%s1167_s30 + $0x24] sm:$0xf0]  ;;  %v965_v22 = vld [vmem:[%s1167_s30 + $0x24] sm:$0xf]  ;;  %v917_v27 = vor.u32 %v979_v16, %v914_v17 }
  0x44   : > { %v858_v23 = vld [vmem:[%s1167_s30 + $0x28] sm:$0xf0]  ;;  %v912_v24 = vld [vmem:[%s1167_s30 + $0x90] sm:$0xf]  ;;  %v980_v25 = vld [vmem:[%s1167_s30 + $0x94] sm:$0xf0]  ;;  %v857_v28 = vor.u32 %v966_v21, %v856_v20 }
  0x45   : > { %v977_v26 = vld [vmem:[%s1167_s30 + $0x84] sm:$0xf]  ;;  %v906_v29 = vld [vmem:[%s1167_s30 + $0x88] sm:$0xf0]  ;;  %v848_v30 = vld [vmem:[%s1167_s30 + $0x10] sm:$0xf]  ;;  %v861_v32 = vor.u32 %v965_v22, %v858_v23  ;;  %v913_v33 = vor.u32 %v980_v25, %v912_v24 }
  0x46   : > { %660 = vmatpush.bf16.msra.mxu3 %v933_v2  ;;  %575 = vmatpush.bf16.msra.mxu0 %v873_v3  ;;  %v342_v31 = vld [vmem:[%s1341_s2] sm:$0xff]  ;;  %v964_v34 = vld [vmem:[%s1167_s30 + $0x14] sm:$0xf0]  ;;  %v963_v35 = vld [vmem:[%s1167_s30 + $0x14] sm:$0xf]  ;;  %v1043_v40 = vmov 0   ;;  %v909_v41 = vor.u32 %v977_v26, %v906_v29 }
  0x47   : > { %631 = vmatpush.bf16.msra.mxu2 %v877_v6  ;;  %604 = vmatpush.bf16.msra.mxu1 %v929_v7  ;;  %v344_v36 = vld [vmem:[%s1341_s2 + $0x10] sm:$0xff]  ;;  %v904_v38 = vld [vmem:[%s1167_s30 + $0x80] sm:$0xf]  ;;  %v978_v39 = vld [vmem:[%s1167_s30 + $0x84] sm:$0xf0]  ;;  %v849_v42 = vor.u32 %v964_v34, %v848_v30  ;;  %vm552_vm1 = vcmask 719872  }
  0x48   : > { %v850_v37 = vld [vmem:[%s1167_s30 + $0x18] sm:$0xf0]  ;;  %1016 = vset.pattern.permute.xlu0 %v1043_v40  ;;  %1017 = vset.pattern.permute.xlu1 %v1043_v40  ;;  %v955_v43 = vld [vmem:[%s1339_s0 + $0x4] sm:$0xf]  ;;  %v818_v44 = vld [vmem:[%s1339_s0 + $0x8] sm:$0xf0]  ;;  %v905_v46 = vor.u32 %v978_v39, %v904_v38 }
  0x49   : > { %351 = vperm.xlu0 %1016, %v342_v31   ;;  %361 = vperm.xlu1 %1017, %v344_v36   ;;  %v853_v45 = vor.u32 %v963_v35, %v850_v37  ;;  %v840_v47 = vld [vmem:[%s1167_s30] sm:$0xf]  ;;  %v962_v48 = vld [vmem:[%s1167_s30 + $0x4] sm:$0xf0]  ;;  %v961_v49 = vld [vmem:[%s1167_s30 + $0x4] sm:$0xf]  ;;  %v821_v51 = vor.u32 %v955_v43, %v818_v44 }
  0x4a   : > { %661 = vmatpush.bf16.msra.mxu3 %v925_v14  ;;  %576 = vmatpush.bf16.msra.mxu0 %v865_v15  ;;  %v842_v50 = vld [vmem:[%s1167_s30 + $0x8] sm:$0xf0]  ;;  %v841_v52 = vor.u32 %v962_v48, %v840_v47  ;;  %v816_v53 = vld [vmem:[%s1339_s0] sm:$0xf]  ;;  %v956_v54 = vld [vmem:[%s1339_s0 + $0x4] sm:$0xf0] }
  0x4b   : > { %632 = vmatpush.bf16.msra.mxu2 %v869_v18  ;;  %605 = vmatpush.bf16.msra.mxu1 %v921_v19  ;;  %v343_v55 = vld [vmem:[%s1341_s2 + $0x8] sm:$0xff]  ;;  %v845_v56 = vor.u32 %v961_v49, %v842_v50  ;;  %v817_v57 = vor.u32 %v956_v54, %v816_v53  ;;  %v345_v58 = vld [vmem:[%s1341_s2 + $0x18] sm:$0xff]  ;;  %v957_v59 = vld [vmem:[%s1339_s0 + $0x14] sm:$0xf]  ;;  %s987_s12 = sshll.u32 (%p1094_p5), %s807_s15, 4 }
  0x4c   : > { %1018 = vset.pattern.permute.xlu2 %v1043_v40  ;;  %v826_v60 = vld [vmem:[%s1339_s0 + $0x18] sm:$0xf0]  ;;  %v824_v62 = vld [vmem:[%s1339_s0 + $0x10] sm:$0xf]  ;;  %v958_v63 = vld [vmem:[%s1339_s0 + $0x14] sm:$0xf0]  ;;  %s707_s20 = scalar_lea.vmem (%p1094_p5), %s1342_s3, %s987_s12 }
  0x4d   : > { %v829_v61 = vor.u32 %v957_v59, %v826_v60  ;;  %v825_v0 = vor.u32 %v958_v63, %v824_v62  ;;  %v348_v1 = vld [vmem:[%s1341_s2 + $0x30] sm:$0x3f]  ;;  %v346_v2 = vld [vmem:[%s1341_s2 + $0x20] sm:$0xff]  ;;  %v834_v4 = vld [vmem:[%s1339_s0 + $0x28] sm:$0xf0] }
  0x4e   : > { %662 = vmatpush.bf16.msra.mxu3 %v917_v27  ;;  %577 = vmatpush.bf16.msra.mxu0 %v857_v28  ;;  %v959_v3 = vld [vmem:[%s1339_s0 + $0x24] sm:$0xf]  ;;  %v347_v5 = vld [vmem:[%s1341_s2 + $0x28] sm:$0xff]  ;;  %v832_v7 = vld [vmem:[%s1339_s0 + $0x20] sm:$0xf] }
  0x4f   : > { %633 = vmatpush.bf16.msra.mxu2 %v861_v32  ;;  %606 = vmatpush.bf16.msra.mxu1 %v913_v33  ;;  %v837_v6 = vor.u32 %v959_v3, %v834_v4  ;;  %v960_v8 = vld [vmem:[%s1339_s0 + $0x24] sm:$0xf0]  ;;  %v314_v10 = vld [vmem:[%s1339_s0 + $0x30] sm:$0x77] }
  0x50   : > { %371 = vperm.xlu2 %1018, %v346_v2   ;;  %v833_v9 = vor.u32 %v960_v8, %v832_v7  ;;  %v404_v11 = vunpack.c.h.b16 %v314_v10  ;;  %v403_v13 = vunpack.c.l.b16 %v314_v10 }
  0x51   : > { %356 = vperm.xlu0 %1016, %v343_v55   ;;  %366 = vperm.xlu1 %1017, %v345_v58  }
  0x52   : > { %663 = vmatpush.bf16.msra.mxu3 %v909_v41  ;;  %578 = vmatpush.bf16.msra.mxu0 %v849_v42  ;;  %v412_v12 = vpack.c.b16 %v404_v11, %v404_v11  ;;  %v411_v14 = vpack.c.b16 %v403_v13, %v403_v13 }
  0x53   : > { %634 = vmatpush.bf16.msra.mxu2 %v853_v45  ;;  %607 = vmatpush.bf16.msra.mxu1 %v905_v46 }
  0x55   : > { %946 = vmatmul.msk.bf16.vlgmr.msra.gmra.mxu3 %vm552_vm1, %v821_v51 }
  0x56   : > { %579 = vmatpush.bf16.msra.mxu0 %v841_v52  ;;  %942 = vmatmul.msk.bf16.vlgmr.msra.gmra.mxu1 %vm552_vm1, %v821_v51 }
  0x57   : > { %635 = vmatpush.bf16.msra.mxu2 %v845_v56 }
  0x58   : > { %376 = vperm.xlu2 %1018, %v347_v5  }
  0x59   : > { %580 = vmatmul.bf16.vlgmr.msra.gmra.mxu0 %v817_v57  ;;  %381 = vperm.xlu0 %1016, %v348_v1  }
  0x5a   : > { %636 = vmatmul.bf16.vlgmr.msra.gmra.mxu2 %v817_v57 }
  0x65   : > { %947 = vmatmul.msk.bf16.gmra.mxu3 %vm552_vm1, %v829_v61 }
  0x66   : > { %943 = vmatmul.msk.bf16.gmra.mxu1 %vm552_vm1, %v829_v61 }
  0x69   : > { %585 = vmatmul.bf16.gmra.mxu0 %v825_v0 }
  0x6a   : > { %641 = vmatmul.bf16.gmra.mxu2 %v825_v0 }
  0x75   : > { %948 = vmatmul.msk.bf16.gmra.mxu3 %vm552_vm1, %v837_v6 }
  0x76   : > { %944 = vmatmul.msk.bf16.gmra.mxu1 %vm552_vm1, %v837_v6 }
  0x79   : > { %590 = vmatmul.bf16.gmra.mxu0 %v833_v9 }
  0x7a   : > { %646 = vmatmul.bf16.gmra.mxu2 %v833_v9 }
  0x85   : > { %949 = vmatmul.msk.bf16.gmra.mxu3 %vm552_vm1, %v412_v12 }
  0x86   : > { %945 = vmatmul.msk.bf16.gmra.mxu1 %vm552_vm1, %v412_v12 }
  0x89   : > { %595 = vmatmul.bf16.gmra.mxu0 %v411_v14 }
  0x8a   : > { %651 = vmatmul.bf16.gmra.mxu2 %v411_v14 }
  0xaa   : > { %v372_v48 = vpop.permute.xlu2 %371 }
  0xb2   : > { %v377_v58 = vpop.permute.xlu2 %376 }
  0xbb   : > { %v352_v15 = vpop.permute.xlu0 %351  ;;  %v362_v30 = vpop.permute.xlu1 %361 }
  0xc3   : > { %v357_v22 = vpop.permute.xlu0 %356  ;;  %v367_v40 = vpop.permute.xlu1 %366 }
  0xcb   : > { %v382_v4 = vpop.permute.xlu0 %381 }
  0xd3   : > { %v609_v16 = vpop.f32.mrf.mxu1 }
  0xd6   : > { %v581_v17 = vpop.f32.mrf.mxu0 }
  0xd7   : > { %v582_v18 = vadd.f32 %v581_v17, %v352_v15 }
  0xd8   : > { %v665_v19 = vpop.f32.mrf.mxu3 }
  0xd9   : > { %v610_v20 = vadd.f32 %v609_v16, %v582_v18 }
  0xdb   : > { %684 = vst [vmem:[%s1292_s7] sm:$0xff] %v610_v20  ;;  %v611_v21 = vpop.f32.mrf.mxu1 }
  0xdd   : > { %v637_v23 = vpop.f32.mrf.mxu2 }
  0xde   : > { %v638_v24 = vadd.f32 %v637_v23, %v352_v15  ;;  %v583_v25 = vpop.f32.mrf.mxu0 }
  0xdf   : > { %v584_v26 = vadd.f32 %v583_v25, %v357_v22 }
  0xe0   : > { %v666_v27 = vadd.f32 %v665_v19, %v638_v24  ;;  %v667_v28 = vpop.f32.mrf.mxu3 }
  0xe1   : > { %v612_v29 = vadd.f32 %v611_v21, %v584_v26 }
  0xe2   : > { %685 = vst [vmem:[%s1292_s7 + $0x8] sm:$0xff] %v666_v27  ;;  %v720_v18 = vld [vmem:[%s1292_s7] sm:$0xff] (%p1094_p5) }
  0xe3   : > { %686 = vst [vmem:[%s1292_s7 + $0x10] sm:$0xff] %v612_v29  ;;  %v614_v31 = vpop.f32.mrf.mxu1 }
  0xe4   : > { %721 = vst [vmem:[%s707_s20] sm:$0xff] (%p1094_p5), %v720_v18 }
  0xe5   : > { %v639_v32 = vpop.f32.mrf.mxu2 }
  0xe6   : > { %v640_v33 = vadd.f32 %v639_v32, %v357_v22  ;;  %v586_v34 = vpop.f32.mrf.mxu0 }
  0xe7   : > { %v587_v35 = vadd.f32 %v586_v34, %v362_v30 }
  0xe8   : > { %v668_v36 = vadd.f32 %v667_v28, %v640_v33  ;;  %v670_v37 = vpop.f32.mrf.mxu3 }
  0xe9   : > { %v615_v38 = vadd.f32 %v614_v31, %v587_v35  ;;  %v722_v19 = vld [vmem:[%s1292_s7 + $0x8] sm:$0xff] (%p1094_p5) }
  0xea   : > { %687 = vst [vmem:[%s1292_s7 + $0x18] sm:$0xff] %v668_v36  ;;  %v724_v20 = vld [vmem:[%s1292_s7 + $0x10] sm:$0xff] (%p1094_p5) }
  0xeb   : > { %688 = vst [vmem:[%s1292_s7 + $0x20] sm:$0xff] %v615_v38  ;;  %v616_v39 = vpop.f32.mrf.mxu1 }
  0xec   : > { %723 = vst [vmem:[%s707_s20 + $0x8] sm:$0xff] (%p1094_p5), %v722_v19 }
  0xed   : > { %v642_v41 = vpop.f32.mrf.mxu2  ;;  %725 = vst [vmem:[%s707_s20 + $0x20] sm:$0xff] (%p1094_p5), %v724_v20 }
  0xee   : > { %v643_v42 = vadd.f32 %v642_v41, %v362_v30  ;;  %v588_v43 = vpop.f32.mrf.mxu0 }
  0xef   : > { %v589_v44 = vadd.f32 %v588_v43, %v367_v40 }
  0xf0   : > { %v671_v45 = vadd.f32 %v670_v37, %v643_v42  ;;  %v672_v46 = vpop.f32.mrf.mxu3 }
  0xf1   : > { %v617_v47 = vadd.f32 %v616_v39, %v589_v44  ;;  %v726_v21 = vld [vmem:[%s1292_s7 + $0x18] sm:$0xff] (%p1094_p5) }
  0xf2   : > { %689 = vst [vmem:[%s1292_s7 + $0x28] sm:$0xff] %v671_v45  ;;  %v728_v22 = vld [vmem:[%s1292_s7 + $0x20] sm:$0xff] (%p1094_p5) }
  0xf3   : > { %690 = vst [vmem:[%s1292_s7 + $0x30] sm:$0xff] %v617_v47  ;;  %v619_v49 = vpop.f32.mrf.mxu1 }
  0xf4   : > { %727 = vst [vmem:[%s707_s20 + $0x28] sm:$0xff] (%p1094_p5), %v726_v21 }
  0xf5   : > { %v644_v50 = vpop.f32.mrf.mxu2  ;;  %729 = vst [vmem:[%s707_s20 + $0x40] sm:$0xff] (%p1094_p5), %v728_v22 }
  0xf6   : > { %v645_v51 = vadd.f32 %v644_v50, %v367_v40  ;;  %v591_v52 = vpop.f32.mrf.mxu0 }
  0xf7   : > { %v592_v53 = vadd.f32 %v591_v52, %v372_v48 }
  0xf8   : > { %v673_v54 = vadd.f32 %v672_v46, %v645_v51  ;;  %v675_v55 = vpop.f32.mrf.mxu3 }
  0xf9   : > { %v620_v56 = vadd.f32 %v619_v49, %v592_v53  ;;  %v730_v23 = vld [vmem:[%s1292_s7 + $0x28] sm:$0xff] (%p1094_p5) }
  0xfa   : > { %691 = vst [vmem:[%s1292_s7 + $0x38] sm:$0xff] %v673_v54  ;;  %v732_v24 = vld [vmem:[%s1292_s7 + $0x30] sm:$0xff] (%p1094_p5) }
  0xfb   : > { %692 = vst [vmem:[%s1292_s7 + $0x40] sm:$0xff] %v620_v56  ;;  %v621_v57 = vpop.f32.mrf.mxu1 }
  0xfc   : > { %731 = vst [vmem:[%s707_s20 + $0x48] sm:$0xff] (%p1094_p5), %v730_v23 }
  0xfd   : > { %v647_v59 = vpop.f32.mrf.mxu2  ;;  %733 = vst [vmem:[%s707_s20 + $0x60] sm:$0xff] (%p1094_p5), %v732_v24 }
  0xfe   : > { %v648_v60 = vadd.f32 %v647_v59, %v372_v48  ;;  %v593_v61 = vpop.f32.mrf.mxu0 }
  0xff   : > { %v594_v62 = vadd.f32 %v593_v61, %v377_v58 }
 0x100   : > { %v676_v63 = vadd.f32 %v675_v55, %v648_v60  ;;  %v677_v0 = vpop.f32.mrf.mxu3 }
 0x101   : > { %v622_v1 = vadd.f32 %v621_v57, %v594_v62  ;;  %v734_v25 = vld [vmem:[%s1292_s7 + $0x38] sm:$0xff] (%p1094_p5) }
 0x102   : > { %693 = vst [vmem:[%s1292_s7 + $0x48] sm:$0xff] %v676_v63  ;;  %v736_v26 = vld [vmem:[%s1292_s7 + $0x40] sm:$0xff] (%p1094_p5) }
 0x103   : > { %694 = vst [vmem:[%s1292_s7 + $0x50] sm:$0xff] %v622_v1  ;;  %v624_v2 = vpop.f32.mrf.mxu1 }
 0x104   : > { %735 = vst [vmem:[%s707_s20 + $0x68] sm:$0xff] (%p1094_p5), %v734_v25 }
 0x105   : > { %v649_v3 = vpop.f32.mrf.mxu2  ;;  %737 = vst [vmem:[%s707_s20 + $0x80] sm:$0xff] (%p1094_p5), %v736_v26 }
 0x106   : > { %v650_v5 = vadd.f32 %v649_v3, %v377_v58  ;;  %v596_v6 = vpop.f32.mrf.mxu0 }
 0x107   : > { %v597_v7 = vadd.f32 %v596_v6, %v382_v4 }
 0x108   : > { %v678_v8 = vadd.f32 %v677_v0, %v650_v5  ;;  %v680_v9 = vpop.f32.mrf.mxu3 }
 0x109   : > { %v625_v10 = vadd.f32 %v624_v2, %v597_v7  ;;  %v738_v27 = vld [vmem:[%s1292_s7 + $0x48] sm:$0xff] (%p1094_p5) }
 0x10a   : > { %695 = vst [vmem:[%s1292_s7 + $0x58] sm:$0xff] %v678_v8  ;;  %v740_v28 = vld [vmem:[%s1292_s7 + $0x50] sm:$0xff] (%p1094_p5) }
 0x10b   : > { %696 = vst [vmem:[%s1292_s7 + $0x60] sm:$0x3f] %v625_v10  ;;  %v626_v11 = vpop.f32.mrf.mxu1 }
 0x10c   : > { %739 = vst [vmem:[%s707_s20 + $0x88] sm:$0xff] (%p1094_p5), %v738_v27 }
 0x10d   : > { %v652_v12 = vpop.f32.mrf.mxu2  ;;  %741 = vst [vmem:[%s707_s20 + $0xa0] sm:$0xff] (%p1094_p5), %v740_v28 }
 0x10e   : > { %v653_v13 = vadd.f32 %v652_v12, %v382_v4  ;;  %v598_v14 = vpop.f32.mrf.mxu0 }
 0x110   : > { %v681_v15 = vadd.f32 %v680_v9, %v653_v13  ;;  %v682_v16 = vpop.f32.mrf.mxu3 }
 0x111   : > { %704 = sbr.rel (!%p1094_p5) target bundleno = 283 (0x11b), region = 74  ;;  %v742_v29 = vld [vmem:[%s1292_s7 + $0x58] sm:$0xff] (%p1094_p5) }
 0x112   : > { %697 = vst [vmem:[%s1292_s7 + $0x68] sm:$0x3f] %v681_v15  ;;  %v744_v30 = vld [vmem:[%s1292_s7 + $0x60] sm:$0xff] (%p1094_p5) }
 0x113   : > { %743 = vst [vmem:[%s707_s20 + $0xa8] sm:$0xff] (%p1094_p5), %v742_v29 }
 0x114   : > { %745 = vst [vmem:[%s707_s20 + $0xc0] sm:$0xff] (%p1094_p5), %v744_v30 }
 0x115   : > { %v654_v17 = vpop.f32.mrf.mxu2 }
 0x119   : > { %v746_v31 = vld [vmem:[%s1292_s7 + $0x68] sm:$0xff] }
 0x11a   : > { %747 = vst [vmem:[%s707_s20 + $0xc8] sm:$0xff] %v746_v31 }
 0x11b PF: > { %p10_p10 = scmp.ge.s32.totalorder %s1081_s16, 4   ;;  %s1344_s12 = smov %s1037_s13 }
 0x11c   : > { %s1345_s13 = smov %s1092_s19  ;;  %s1346_s14 = smov %s1081_s16 }
 0x11d   :  { %12 = sbr.rel (!%p10_p10) target bundleno = 2 (0x2), region = 128 }

// kernel: filtering_block_forward.11
= control target key start
LH: loop header
LB: loop body
LE: loop exit
PB: predicated region body
PF: predicated region fallthrough
CT: control target
= control target key end

     0   :  { %s973_s12 = smov 0   ;;  %s975_s13 = smov 0   ;;  %s1253_s0 = inlined_call_operand.vmem [shape: f32[27,512], index: 0, kind: input, shape index: {}]   ;;  %s1254_s1 = inlined_call_operand.vmem [shape: bf16[27,8,512], index: 1, kind: input, shape index: {}]   ;;  %s1255_s2 = inlined_call_operand.vmem [shape: f32[8,512], index: 2, kind: input, shape index: {}]   ;;  %s1256_s3 = inlined_call_operand.vmem [shape: f32[8,512], index: 3, kind: output, shape index: {}]  }
   0x1   :  { %s977_s14 = smov 0  }
   0x2 LB: > { %s838_s15 = sadd.s32 4294967295, %s951_s14   ;;  %s990_s16 = sadd.s32 1, %s951_s14   ;;  %s951_s14 = sphi %s977_s14, %s1260_s14   ;;  %s947_s13 = sphi %s975_s13, %s1259_s13   ;;  %s943_s12 = sphi %s973_s12, %s1258_s12  }
   0x3   : > { %s17_s17 = ssub.s32 %s951_s14, %s990_s16  ;;  %s20_s18 = sadd.s32 1, %s947_s13 }
   0x4   : > { %p18_p0 = scmp.eq.s32.totalorder %s17_s17, 0  ;;  %p27_p1 = scmp.ne.s32.totalorder %s947_s13, %s943_s12 }
   0x5   : > { %p28_p2 = scmp.eq.s32.totalorder %s951_s14, 0  ;;  %p841_p4 = scmp.ge.s32.totalorder %s951_s14, 2 }
   0x6   : > { %s999_s19 = scalar_select %p18_p0, %s947_s13, %s20_s18  }
   0x7   : > { %p1001_p3 = por %p28_p2, %p27_p1  ;;  %131 = sbr.rel (%p841_p4) target bundleno = 55 (0x37), region = 16 }
   0xc   : > { %134 = sbr.rel (!%p1001_p3) target bundleno = 24 (0x18), region = 20  ;;  %s136_s21 = sand.u32 (%p1001_p3), 1, %s947_s13  }
   0xd   : > { %s881_s22 = sshll.u32 (%p1001_p3), %s951_s14, 4  ;;  %s842_s23 = sshll.u32 (%p1001_p3), %s136_s21, 6 }
   0xe   : > { %s141_s26 = scalar_lea.vmem (%p1001_p3), %s1253_s0, %s881_s22  ;;  %s138_s27 = scalar_lea.vmem (%p1001_p3), [#allocation2], %s842_s23 }
   0xf   : > { %v154_v0 = vld [vmem:[%s141_s26] sm:$0xff] (%p1001_p3)  ;;  %v156_v1 = vld [vmem:[%s141_s26 + $0x8] sm:$0xff] (%p1001_p3) }
  0x10   : > { %v158_v2 = vld [vmem:[%s141_s26 + $0x20] sm:$0xff] (%p1001_p3)  ;;  %155 = vst [vmem:[%s138_s27] sm:$0xff] (%p1001_p3), %v154_v0  ;;  %v160_v3 = vld [vmem:[%s141_s26 + $0x28] sm:$0xff] (%p1001_p3) }
  0x11   : > { %157 = vst [vmem:[%s138_s27 + $0x8] sm:$0xff] %v156_v1  ;;  %v162_v4 = vld [vmem:[%s141_s26 + $0x40] sm:$0xff]  ;;  %v164_v5 = vld [vmem:[%s141_s26 + $0x48] sm:$0xff] }
  0x12   : > { %159 = vst [vmem:[%s138_s27 + $0x10] sm:$0xff] %v158_v2  ;;  %v166_v6 = vld [vmem:[%s141_s26 + $0x60] sm:$0xff]  ;;  %v168_v7 = vld [vmem:[%s141_s26 + $0x68] sm:$0xff] }
  0x13   : > { %161 = vst [vmem:[%s138_s27 + $0x18] sm:$0xff] %v160_v3 }
  0x14   : > { %163 = vst [vmem:[%s138_s27 + $0x20] sm:$0xff] %v162_v4 }
  0x15   : > { %165 = vst [vmem:[%s138_s27 + $0x28] sm:$0xff] %v164_v5 }
  0x16   : > { %167 = vst [vmem:[%s138_s27 + $0x30] sm:$0xff] %v166_v6 }
  0x17   : > { %169 = vst [vmem:[%s138_s27 + $0x38] sm:$0xff] %v168_v7 }
  0x18 PF: > { %175 = sbr.rel (!%p1001_p3) target bundleno = 55 (0x37), region = 43  ;;  %s177_s28 = sand.u32 (%p1001_p3), 1, %s947_s13  }
  0x19   : > { %s882_s29 = sshll.u32 (%p1001_p3), %s951_s14, 3  ;;  %s883_s30 = smul.u32 (%p1001_p3), 216, %s177_s28 }
  0x1a   : > { %s1020_s6 = scalar_lea.vmem (%p1001_p3), %s1254_s1, %s882_s29 }
  0x1b   : > { %v263_v8 = vld [vmem:[%s1020_s6] sm:$0xff] (%p1001_p3)  ;;  %v265_v9 = vld [vmem:[%s1020_s6 + $0x10] sm:$0xff] (%p1001_p3)  ;;  %s1025_s7 = scalar_lea.vmem (%p1001_p3), [#allocation3], %s883_s30 }
  0x1c   : > { %v267_v10 = vld [vmem:[%s1020_s6 + $0x20] sm:$0xff] (%p1001_p3)  ;;  %264 = vst [vmem:[%s1025_s7] sm:$0xff] (%p1001_p3), %v263_v8  ;;  %v269_v11 = vld [vmem:[%s1020_s6 + $0x30] sm:$0xff] (%p1001_p3) }
  0x1d   : > { %266 = vst [vmem:[%s1025_s7 + $0x8] sm:$0xff] %v265_v9  ;;  %v271_v12 = vld [vmem:[%s1020_s6 + $0x40] sm:$0xff]  ;;  %v273_v13 = vld [vmem:[%s1020_s6 + $0x50] sm:$0xff] }
  0x1e   : > { %268 = vst [vmem:[%s1025_s7 + $0x10] sm:$0xff] %v267_v10  ;;  %v275_v14 = vld [vmem:[%s1020_s6 + $0x60] sm:$0xff]  ;;  %v277_v15 = vld [vmem:[%s1020_s6 + $0x70] sm:$0xff] }
  0x1f   : > { %270 = vst [vmem:[%s1025_s7 + $0x18] sm:$0xff] %v269_v11  ;;  %v279_v16 = vld [vmem:[%s1020_s6 + $0x80] sm:$0xff]  ;;  %v281_v17 = vld [vmem:[%s1020_s6 + $0x90] sm:$0xff] }
  0x20   : > { %272 = vst [vmem:[%s1025_s7 + $0x20] sm:$0xff] %v271_v12  ;;  %v283_v18 = vld [vmem:[%s1020_s6 + $0xa0] sm:$0xff]  ;;  %v285_v19 = vld [vmem:[%s1020_s6 + $0xb0] sm:$0xff] }
  0x21   : > { %274 = vst [vmem:[%s1025_s7 + $0x28] sm:$0xff] %v273_v13  ;;  %v287_v20 = vld [vmem:[%s1020_s6 + $0xc0] sm:$0xff]  ;;  %v289_v21 = vld [vmem:[%s1020_s6 + $0xd0] sm:$0xff] }
  0x22   : > { %276 = vst [vmem:[%s1025_s7 + $0x30] sm:$0xff] %v275_v14  ;;  %v291_v22 = vld [vmem:[%s1020_s6 + $0xe0] sm:$0xff]  ;;  %v293_v23 = vld [vmem:[%s1020_s6 + $0xf0] sm:$0xff] }
  0x23   : > { %278 = vst [vmem:[%s1025_s7 + $0x38] sm:$0xff] %v277_v15  ;;  %v295_v24 = vld [vmem:[%s1020_s6 + $0x100] sm:$0xff]  ;;  %v297_v25 = vld [vmem:[%s1020_s6 + $0x110] sm:$0xff] }
  0x24   : > { %280 = vst [vmem:[%s1025_s7 + $0x40] sm:$0xff] %v279_v16  ;;  %v299_v26 = vld [vmem:[%s1020_s6 + $0x120] sm:$0xff]  ;;  %v301_v27 = vld [vmem:[%s1020_s6 + $0x130] sm:$0xff] }
  0x25   : > { %282 = vst [vmem:[%s1025_s7 + $0x48] sm:$0xff] %v281_v17  ;;  %v303_v28 = vld [vmem:[%s1020_s6 + $0x140] sm:$0xff]  ;;  %v305_v29 = vld [vmem:[%s1020_s6 + $0x150] sm:$0xff] }
  0x26   : > { %284 = vst [vmem:[%s1025_s7 + $0x50] sm:$0xff] %v283_v18  ;;  %v307_v30 = vld [vmem:[%s1020_s6 + $0x160] sm:$0xff]  ;;  %v309_v31 = vld [vmem:[%s1020_s6 + $0x170] sm:$0xff] }
  0x27   : > { %286 = vst [vmem:[%s1025_s7 + $0x58] sm:$0xff] %v285_v19  ;;  %v311_v32 = vld [vmem:[%s1020_s6 + $0x180] sm:$0xff]  ;;  %v313_v33 = vld [vmem:[%s1020_s6 + $0x190] sm:$0xff] }
  0x28   : > { %288 = vst [vmem:[%s1025_s7 + $0x60] sm:$0xff] %v287_v20  ;;  %v315_v34 = vld [vmem:[%s1020_s6 + $0x1a0] sm:$0xff] }
  0x29   : > { %290 = vst [vmem:[%s1025_s7 + $0x68] sm:$0xff] %v289_v21 }
  0x2a   : > { %292 = vst [vmem:[%s1025_s7 + $0x70] sm:$0xff] %v291_v22 }
  0x2b   : > { %294 = vst [vmem:[%s1025_s7 + $0x78] sm:$0xff] %v293_v23 }
  0x2c   : > { %296 = vst [vmem:[%s1025_s7 + $0x80] sm:$0xff] %v295_v24 }
  0x2d   : > { %298 = vst [vmem:[%s1025_s7 + $0x88] sm:$0xff] %v297_v25 }
  0x2e   : > { %300 = vst [vmem:[%s1025_s7 + $0x90] sm:$0xff] %v299_v26 }
  0x2f   : > { %302 = vst [vmem:[%s1025_s7 + $0x98] sm:$0xff] %v301_v27 }
  0x30   : > { %304 = vst [vmem:[%s1025_s7 + $0xa0] sm:$0xff] %v303_v28 }
  0x31   : > { %306 = vst [vmem:[%s1025_s7 + $0xa8] sm:$0xff] %v305_v29 }
  0x32   : > { %308 = vst [vmem:[%s1025_s7 + $0xb0] sm:$0xff] %v307_v30 }
  0x33   : > { %310 = vst [vmem:[%s1025_s7 + $0xb8] sm:$0xff] %v309_v31 }
  0x34   : > { %312 = vst [vmem:[%s1025_s7 + $0xc0] sm:$0xff] %v311_v32 }
  0x35   : > { %314 = vst [vmem:[%s1025_s7 + $0xc8] sm:$0xff] %v313_v33 }
  0x36   : > { %316 = vst [vmem:[%s1025_s7 + $0xd0] sm:$0xff] %v315_v34 }
  0x37 PF: > { %p847_p5 = scmp.ge.s32.totalorder %s951_s14, 1  ;;  %p330_p6 = scmp.lt.s32.totalorder %s951_s14, 3 }
  0x39   : > { %p331_p7 = pnand %p847_p5, %p330_p6 }
  0x3a   : > { %s337_s8 = sand.u32 (!%p331_p7), 1, %s943_s12   ;;  %s849_s11 = sshll.u32 (!%p331_p7), %s838_s15, 1 }
  0x3b   : > { %334 = sbr.rel (%p331_p7) target bundleno = 185 (0xb9), region = 85  ;;  %s848_s9 = sshll.u32 (!%p331_p7), %s337_s8, 6 }
  0x3c   : > { %s339_s10 = scalar_lea.vmem (!%p331_p7), [#allocation2], %s848_s9  ;;  %s884_s17 = smul.u32 (!%p331_p7), 216, %s337_s8 }
  0x3d   : > { %p379_p8 = scmp.lt.s32.totalorder (!%p331_p7), %s849_s11, 3 }
  0x3e   : > { %s1111_s18 = scalar_lea.vmem (!%p331_p7), [#allocation3], %s884_s17 }
  0x40   : > { %v390_v35 = vld [vmem:[%s339_s10] sm:$0xff]  ;;  %v391_v36 = vld [vmem:[%s339_s10 + $0x8] sm:$0xff]  ;;  %v392_v37 = vld [vmem:[%s339_s10 + $0x10] sm:$0xff]  ;;  %vm399_vm0 = vcmask 1042432   ;;  %s1262_s11 = smov (!%p379_p8, %s849_s11), 3 }
  0x41   : > { %v393_v38 = vld [vmem:[%s339_s10 + $0x18] sm:$0xff]  ;;  %v394_v39 = vld [vmem:[%s339_s10 + $0x20] sm:$0xff]  ;;  %v395_v40 = vld [vmem:[%s339_s10 + $0x28] sm:$0xff]  ;;  %s850_s12 = sshll.u32 %s1262_s11, 3 }
  0x42   : > { %v396_v41 = vld [vmem:[%s339_s10 + $0x30] sm:$0x7]  ;;  %v397_v42 = vld [vmem:[%s339_s10 + $0x38] sm:$0x7]  ;;  %v398_v43 = vmax.f32 %v390_v35, %v394_v39  ;;  %v409_v44 = vmax.f32 %v391_v36, %v395_v40  ;;  %s382_s20 = scalar_lea.vmem %s1255_s2, %s850_s12  ;;  %s388_s23 = scalar_lea.vmem %s1256_s3, %s850_s12 }
  0x43   : > { %v400_v45 = vsel %vm399_vm0, %v396_v41, -inf  ;;  %v410_v46 = vsel %vm399_vm0, %v397_v42, -inf }
  0x44   : > { %v401_v47 = vmax.f32 %v392_v37, %v400_v45  ;;  %v411_v48 = vmax.f32 %v393_v38, %v410_v46  ;;  %v854_v45 = vld [vmem:[%s1111_s18 + $0x10] sm:$0xff]  ;;  %v855_v46 = vld [vmem:[%s1111_s18 + $0x18] sm:$0xff] }
  0x46   : > { %v402_v49 = vmax.f32 %v398_v43, %v401_v47  ;;  %v412_v50 = vmax.f32 %v409_v44, %v411_v48  ;;  %v475_v43 = vld [vmem:[%s1111_s18] sm:$0xff]  ;;  %v853_v44 = vld [vmem:[%s1111_s18 + $0x8] sm:$0xff] }
  0x47   : > { %v856_v47 = vld [vmem:[%s1111_s18 + $0x20] sm:$0xff] }
  0x48   : > { %v403_v51 = vrot.slane %v402_v49, 4  ;;  %v413_v52 = vrot.slane %v412_v50, 4 }
  0x4a   : > { %v404_v53 = vmax.f32 %v402_v49, %v403_v51  ;;  %v414_v54 = vmax.f32 %v412_v50, %v413_v52  ;;  %v476_v49 = vunpack.c.l.bf16 %v475_v43  ;;  %v477_v50 = vunpack.c.h.bf16 %v475_v43 }
  0x4b   : > { %v486_v51 = vunpack.c.l.bf16 %v853_v44  ;;  %v487_v52 = vunpack.c.h.bf16 %v853_v44 }
  0x4c   : > { %v405_v55 = vrot.slane %v404_v53, 2  ;;  %v415_v56 = vrot.slane %v414_v54, 2 }
  0x4e   : > { %v406_v57 = vmax.f32 %v404_v53, %v405_v55  ;;  %v416_v58 = vmax.f32 %v414_v54, %v415_v56  ;;  %v1122_v53 = vld [vmem:[%s1111_s18 + $0x28] sm:$0xff]  ;;  %v496_v56 = vunpack.c.l.bf16 %v854_v45 }
  0x50   : > { %v407_v59 = vrot.slane %v406_v57, 1  ;;  %v417_v60 = vrot.slane %v416_v58, 1 }
  0x52   : > { %v408_v61 = vmax.f32 %v406_v57, %v407_v59  ;;  %v418_v62 = vmax.f32 %v416_v58, %v417_v60  ;;  %v497_v57 = vunpack.c.h.bf16 %v854_v45  ;;  %v506_v58 = vunpack.c.l.bf16 %v855_v46 }
  0x53   : > { %v507_v60 = vunpack.c.h.bf16 %v855_v46 }
  0x54   : > { %v419_v63 = vsub.f32 %v390_v35, %v408_v61  ;;  %v420_v0 = vsub.f32 %v391_v36, %v418_v62  ;;  %v421_v1 = vsub.f32 %v392_v37, %v408_v61  ;;  %v422_v2 = vsub.f32 %v393_v38, %v418_v62 }
  0x55   : > { %v423_v3 = vsub.f32 %v394_v39, %v408_v61  ;;  %v424_v4 = vsub.f32 %v395_v40, %v418_v62  ;;  %v425_v5 = vsub.f32 %v396_v41, %v408_v61  ;;  %v426_v9 = vsub.f32 %v397_v42, %v418_v62 }
  0x56   : > { %v427_v6 = vmul.f32 1.442695, %v419_v63  ;;  %v429_v7 = vmul.f32 1.442695, %v420_v0  ;;  %v431_v8 = vmul.f32 1.442695, %v421_v1  ;;  %v516_v61 = vunpack.c.l.bf16 %v856_v47 }
  0x57   : > { %v433_v10 = vmul.f32 1.442695, %v422_v2  ;;  %v435_v11 = vmul.f32 1.442695, %v423_v3  ;;  %v437_v12 = vmul.f32 1.442695, %v424_v4  ;;  %v517_v62 = vunpack.c.h.bf16 %v856_v47 }
  0x58   : > { %909 = vpow2.f32 %v427_v6  ;;  %v439_v13 = vmul.f32 1.442695, %v425_v5  ;;  %v441_v14 = vmul.f32 1.442695, %v426_v9  ;;  %v858_v63 = vld [vmem:[%s1111_s18 + $0x30] sm:$0xff]  ;;  %v526_v3 = vunpack.c.l.bf16 %v1122_v53  ;;  %v473_v4 = vld [vmem:[%s382_s20] sm:$0xff] }
  0x59   : > { %911 = vpow2.f32 %v429_v7  ;;  %v859_v9 = vld [vmem:[%s1111_s18 + $0x38] sm:$0xff] }
  0x5a   : > { %913 = vpow2.f32 %v431_v8  ;;  %v527_v8 = vunpack.c.h.bf16 %v1122_v53 }
  0x5b   : > { %915 = vpow2.f32 %v433_v10  ;;  %v474_v10 = vld [vmem:[%s382_s20 + $0x8] sm:$0xff] }
  0x5c   : > { %917 = vpow2.f32 %v435_v11 }
  0x5d   : > { %919 = vpow2.f32 %v437_v12 }
  0x5e   : > { %v910_v15 = vpop.eup %909  ;;  %921 = vpow2.f32 %v439_v13 }
  0x5f   : > { %v912_v16 = vpop.eup %911  ;;  %923 = vpow2.f32 %v441_v14  ;;  %v536_v14 = vunpack.c.l.bf16 %v858_v63 }
  0x60   : > { %v1085_v17 = vpop.eup %913 }
  0x61   : > { %v1087_v18 = vpop.eup %915  ;;  %v443_v19 = vadd.f32 %v1085_v17, %v910_v15 }
  0x62   : > { %v1090_v20 = vpop.eup %917  ;;  %v453_v21 = vadd.f32 %v1087_v18, %v912_v16 }
  0x63   : > { %v1093_v22 = vpop.eup %919  ;;  %v444_v23 = vadd.f32 %v1090_v20, %v443_v19 }
  0x64   : > { %v1096_v24 = vpop.eup %921  ;;  %v454_v25 = vadd.f32 %v1093_v22, %v453_v21  ;;  %v537_v21 = vunpack.c.h.bf16 %v858_v63 }
  0x65   : > { %v1099_v26 = vpop.eup %923  ;;  %v445_v27 = vsel %vm399_vm0, %v1096_v24, 0.0 }
  0x66   : > { %v446_v28 = vadd.f32 %v445_v27, %v444_v23  ;;  %v455_v29 = vsel %vm399_vm0, %v1099_v26, 0.0  ;;  %v860_v23 = vld [vmem:[%s1111_s18 + $0x40] sm:$0xff] }
  0x67   : > { %v456_v30 = vadd.f32 %v455_v29, %v454_v25  ;;  %v546_v29 = vunpack.c.l.bf16 %v859_v9 }
  0x68   : > { %v447_v31 = vrot.slane %v446_v28, 4 }
  0x69   : > { %v457_v32 = vrot.slane %v456_v30, 4 }
  0x6a   : > { %v448_v33 = vadd.f32 %v447_v31, %v446_v28 }
  0x6b   : > { %v458_v34 = vadd.f32 %v457_v32, %v456_v30 }
  0x6c   : > { %v449_v35 = vrot.slane %v448_v33, 2 }
  0x6d   : > { %v459_v36 = vrot.slane %v458_v34, 2 }
  0x6e   : > { %v450_v37 = vadd.f32 %v449_v35, %v448_v33  ;;  %v547_v33 = vunpack.c.h.bf16 %v859_v9 }
  0x6f   : > { %v460_v38 = vadd.f32 %v459_v36, %v458_v34 }
  0x70   : > { %v451_v39 = vrot.slane %v450_v37, 1 }
  0x71   : > { %v461_v40 = vrot.slane %v460_v38, 1 }
  0x72   : > { %v452_v41 = vadd.f32 %v451_v39, %v450_v37  ;;  %v556_v37 = vunpack.c.l.bf16 %v860_v23 }
  0x73   : > { %v462_v42 = vadd.f32 %v461_v40, %v460_v38 }
  0x74   : > { %925 = vrcp.f32 %v452_v41  ;;  %v557_v41 = vunpack.c.h.bf16 %v860_v23 }
  0x75   : > { %927 = vrcp.f32 %v462_v42  ;;  %v861_v42 = vld [vmem:[%s1111_s18 + $0x48] sm:$0xff] }
  0x76   : > { %v567_v63 = vunpack.c.h.bf16 %v861_v42 }
  0x7a   : > { %v1119_v48 = vpop.eup %925 }
  0x7b   : > { %v1124_v54 = vpop.eup %927  ;;  %v1132_v55 = vmul.f32 %v1119_v48, %v910_v15  ;;  %v1157_v43 = vmul.f32 %v1119_v48, %v1085_v17 }
  0x7c   : > { %v1135_v59 = vmul.f32 %v1124_v54, %v912_v16  ;;  %v1162_v47 = vmul.f32 %v1124_v54, %v1087_v18 }
  0x7d   : > { %v478_v0 = vperm.slane %v1132_v55, 0  ;;  %v488_v1 = vperm.slane %v1132_v55, 1  ;;  %v498_v2 = vperm.slane %v1132_v55, 2  ;;  %v508_v13 = vperm.slane %v1132_v55, 3 }
  0x7e   : > { %v479_v5 = vperm.slane %v1135_v59, 0  ;;  %v489_v6 = vperm.slane %v1135_v59, 1  ;;  %v499_v7 = vperm.slane %v1135_v59, 2  ;;  %v509_v19 = vperm.slane %v1135_v59, 3 }
  0x7f   : > { %v480_v11 = vmul.f32 %v478_v0, %v476_v49  ;;  %v490_v12 = vmul.f32 %v488_v1, %v486_v51  ;;  %v500_v27 = vmul.f32 %v498_v2, %v496_v56  ;;  %v518_v28 = vperm.slane %v1132_v55, 4  ;;  %v863_v0 = vld [vmem:[%s1111_s18 + $0x58] sm:$0xff] }
  0x80   : > { %v481_v15 = vmul.f32 %v479_v5, %v477_v50  ;;  %v491_v16 = vmul.f32 %v489_v6, %v487_v52  ;;  %v501_v31 = vmul.f32 %v499_v7, %v497_v57  ;;  %v519_v32 = vperm.slane %v1135_v59, 4  ;;  %v862_v52 = vld [vmem:[%s1111_s18 + $0x50] sm:$0xff]  ;;  %v864_v7 = vld [vmem:[%s1111_s18 + $0x60] sm:$0xff] }
  0x81   : > { %v482_v25 = vadd.f32 %v480_v11, %v473_v4  ;;  %v510_v35 = vmul.f32 %v508_v13, %v506_v58  ;;  %v528_v36 = vperm.slane %v1132_v55, 5  ;;  %v511_v39 = vmul.f32 %v509_v19, %v507_v60 }
  0x82   : > { %v483_v30 = vadd.f32 %v481_v15, %v474_v10  ;;  %v529_v40 = vperm.slane %v1135_v59, 5  ;;  %v520_v45 = vmul.f32 %v518_v28, %v516_v61  ;;  %v538_v46 = vperm.slane %v1132_v55, 6 }
  0x83   : > { %v492_v34 = vadd.f32 %v490_v12, %v482_v25  ;;  %v521_v50 = vmul.f32 %v519_v32, %v517_v62  ;;  %v539_v51 = vperm.slane %v1135_v59, 6  ;;  %v530_v56 = vmul.f32 %v528_v36, %v526_v3 }
  0x84   : > { %v493_v38 = vadd.f32 %v491_v16, %v483_v30  ;;  %v548_v17 = vperm.slane %v1132_v55, 7  ;;  %v566_v57 = vunpack.c.l.bf16 %v861_v42  ;;  %v531_v60 = vmul.f32 %v529_v40, %v527_v8 }
  0x85   : > { %v502_v44 = vadd.f32 %v500_v27, %v492_v34  ;;  %v549_v61 = vperm.slane %v1135_v59, 7  ;;  %v540_v18 = vmul.f32 %v538_v46, %v536_v14  ;;  %v558_v62 = vperm.slane %v1157_v43, 0  ;;  %v865_v14 = vld [vmem:[%s1111_s18 + $0x68] sm:$0xff] }
  0x86   : > { %v503_v49 = vadd.f32 %v501_v31, %v493_v38  ;;  %v576_v2 = vunpack.c.l.bf16 %v862_v52  ;;  %v541_v5 = vmul.f32 %v539_v51, %v537_v21  ;;  %v559_v3 = vperm.slane %v1162_v47, 0 }
  0x87   : > { %v512_v53 = vadd.f32 %v510_v35, %v502_v44  ;;  %v577_v6 = vunpack.c.h.bf16 %v862_v52  ;;  %v550_v9 = vmul.f32 %v548_v17, %v546_v29  ;;  %v568_v8 = vperm.slane %v1157_v43, 1  ;;  %v866_v29 = vld [vmem:[%s1111_s18 + $0x70] sm:$0xff] }
  0x88   : > { %v513_v58 = vadd.f32 %v511_v39, %v503_v49  ;;  %v586_v59 = vunpack.c.l.bf16 %v863_v0  ;;  %v551_v11 = vmul.f32 %v549_v61, %v547_v33  ;;  %v569_v12 = vperm.slane %v1162_v47, 1 }
  0x89   : > { %v522_v1 = vadd.f32 %v520_v45, %v512_v53  ;;  %v587_v13 = vunpack.c.h.bf16 %v863_v0  ;;  %v560_v16 = vmul.f32 %v558_v62, %v556_v37  ;;  %v578_v19 = vperm.slane %v1157_v43, 2 }
  0x8a   : > { %v523_v4 = vadd.f32 %v521_v50, %v513_v58  ;;  %v596_v21 = vunpack.c.l.bf16 %v864_v7  ;;  %v561_v25 = vmul.f32 %v559_v3, %v557_v41  ;;  %v579_v27 = vperm.slane %v1162_v47, 2  ;;  %v867_v58 = vld [vmem:[%s1111_s18 + $0x78] sm:$0xff] }
  0x8b   : > { %v532_v55 = vadd.f32 %v530_v56, %v522_v1  ;;  %v597_v28 = vunpack.c.h.bf16 %v864_v7  ;;  %v570_v31 = vmul.f32 %v568_v8, %v566_v57  ;;  %v588_v32 = vperm.slane %v1157_v43, 3 }
  0x8c   : > { %v533_v10 = vadd.f32 %v531_v60, %v523_v4  ;;  %v606_v33 = vunpack.c.l.bf16 %v865_v14  ;;  %v571_v35 = vmul.f32 %v569_v12, %v567_v63  ;;  %v589_v36 = vperm.slane %v1162_v47, 3 }
  0x8d   : > { %v542_v15 = vadd.f32 %v540_v18, %v532_v55  ;;  %v607_v38 = vunpack.c.h.bf16 %v865_v14  ;;  %v580_v39 = vmul.f32 %v578_v19, %v576_v2  ;;  %v598_v40 = vperm.slane %v1157_v43, 4  ;;  %v868_v18 = vld [vmem:[%s1111_s18 + $0x80] sm:$0xff]  ;;  %v869_v55 = vld [vmem:[%s1111_s18 + $0x88] sm:$0xff] }
  0x8e   : > { %v543_v23 = vadd.f32 %v541_v5, %v533_v10  ;;  %v616_v41 = vunpack.c.l.bf16 %v866_v29  ;;  %v581_v44 = vmul.f32 %v579_v27, %v577_v6  ;;  %v599_v45 = vperm.slane %v1162_v47, 4 }
  0x8f   : > { %v552_v30 = vadd.f32 %v550_v9, %v542_v15  ;;  %v617_v46 = vunpack.c.h.bf16 %v866_v29  ;;  %v1184_v49 = vmul.f32 %v1119_v48, %v1090_v20  ;;  %v590_v51 = vmul.f32 %v588_v32, %v586_v59 }
  0x90   : > { %v553_v34 = vadd.f32 %v551_v11, %v543_v23  ;;  %v608_v52 = vperm.slane %v1157_v43, 5  ;;  %v1189_v53 = vmul.f32 %v1119_v48, %v1096_v24  ;;  %v591_v17 = vmul.f32 %v589_v36, %v587_v13  ;;  %v870_v13 = vld [vmem:[%s1111_s18 + $0x90] sm:$0xff] }
  0x91   : > { %v562_v37 = vadd.f32 %v560_v16, %v552_v30  ;;  %v609_v57 = vperm.slane %v1162_v47, 5  ;;  %v1195_v60 = vmul.f32 %v1124_v54, %v1093_v22  ;;  %v600_v61 = vmul.f32 %v598_v40, %v596_v21 }
  0x92   : > { %v563_v42 = vadd.f32 %v561_v25, %v553_v34  ;;  %v618_v63 = vperm.slane %v1157_v43, 6  ;;  %v1200_v0 = vmul.f32 %v1124_v54, %v1099_v26  ;;  %v601_v48 = vmul.f32 %v599_v45, %v597_v28  ;;  %v871_v25 = vld [vmem:[%s1111_s18 + $0x98] sm:$0xff]  ;;  %v873_v45 = vld [vmem:[%s1111_s18 + $0xa8] sm:$0xff] }
  0x93   : > { %v572_v50 = vadd.f32 %v570_v31, %v562_v37  ;;  %v619_v1 = vperm.slane %v1162_v47, 6  ;;  %v610_v2 = vmul.f32 %v608_v52, %v606_v33  ;;  %v626_v4 = vunpack.c.l.bf16 %v867_v58 }
  0x94   : > { %v573_v56 = vadd.f32 %v571_v35, %v563_v42  ;;  %v628_v22 = vperm.slane %v1157_v43, 7  ;;  %v611_v3 = vmul.f32 %v609_v57, %v607_v38  ;;  %v627_v6 = vunpack.c.h.bf16 %v867_v58  ;;  %v872_v35 = vld [vmem:[%s1111_s18 + $0xa0] sm:$0xff] }
  0x95   : > { %v582_v20 = vadd.f32 %v580_v39, %v572_v50  ;;  %v629_v7 = vperm.slane %v1162_v47, 7  ;;  %v620_v26 = vmul.f32 %v618_v63, %v616_v41  ;;  %v636_v54 = vunpack.c.l.bf16 %v868_v18 }
  0x96   : > { %v583_v24 = vadd.f32 %v581_v44, %v573_v56  ;;  %v638_v8 = vperm.slane %v1184_v49, 0  ;;  %v621_v10 = vmul.f32 %v619_v1, %v617_v46  ;;  %v637_v11 = vunpack.c.h.bf16 %v868_v18 }
  0x97   : > { %v592_v62 = vadd.f32 %v590_v51, %v582_v20  ;;  %v639_v12 = vperm.slane %v1195_v60, 0  ;;  %v630_v43 = vmul.f32 %v628_v22, %v626_v4  ;;  %v646_v15 = vunpack.c.l.bf16 %v869_v55  ;;  %v874_v20 = vld [vmem:[%s1111_s18 + $0xb0] sm:$0xff]  ;;  %v875_v4 = vld [vmem:[%s1111_s18 + $0xb8] sm:$0xff] }
  0x98   : > { %v593_v5 = vadd.f32 %v591_v17, %v583_v24  ;;  %v648_v16 = vperm.slane %v1184_v49, 1  ;;  %v631_v19 = vmul.f32 %v629_v7, %v627_v6  ;;  %v647_v21 = vunpack.c.h.bf16 %v869_v55 }
  0x99   : > { %v602_v9 = vadd.f32 %v600_v61, %v592_v62  ;;  %v649_v23 = vperm.slane %v1195_v60, 1  ;;  %v640_v28 = vmul.f32 %v638_v8, %v636_v54  ;;  %v656_v29 = vunpack.c.l.bf16 %v870_v13  ;;  %v876_v54 = vld [vmem:[%s1111_s18 + $0xc0] sm:$0xff] }
  0x9a   : > { %v603_v59 = vadd.f32 %v601_v48, %v593_v5  ;;  %v658_v30 = vperm.slane %v1184_v49, 2  ;;  %v641_v32 = vmul.f32 %v639_v12, %v637_v11  ;;  %v657_v33 = vunpack.c.h.bf16 %v870_v13 }
  0x9b   : > { %v612_v14 = vadd.f32 %v610_v2, %v602_v9  ;;  %v659_v34 = vperm.slane %v1195_v60, 2  ;;  %v650_v38 = vmul.f32 %v648_v16, %v646_v15  ;;  %v666_v37 = vunpack.c.l.bf16 %v871_v25  ;;  %v877_v15 = vld [vmem:[%s1111_s18 + $0xc8] sm:$0xff] }
  0x9c   : > { %v613_v47 = vadd.f32 %v611_v3, %v603_v59  ;;  %v668_v39 = vperm.slane %v1184_v49, 3  ;;  %v651_v41 = vmul.f32 %v649_v23, %v647_v21  ;;  %v667_v42 = vunpack.c.h.bf16 %v871_v25 }
  0x9d   : > { %v622_v27 = vadd.f32 %v620_v26, %v612_v14  ;;  %v669_v44 = vperm.slane %v1195_v60, 3  ;;  %v660_v50 = vmul.f32 %v658_v30, %v656_v29  ;;  %v676_v51 = vunpack.c.l.bf16 %v872_v35  ;;  %v878_v29 = vld [vmem:[%s1111_s18 + $0xd0] sm:$0xff] }
  0x9e   : > { %v623_v31 = vadd.f32 %v621_v10, %v613_v47  ;;  %v678_v52 = vperm.slane %v1184_v49, 4  ;;  %v661_v17 = vmul.f32 %v659_v34, %v657_v33  ;;  %v677_v57 = vunpack.c.h.bf16 %v872_v35 }
  0x9f   : > { %v632_v36 = vadd.f32 %v630_v43, %v622_v27  ;;  %v679_v58 = vperm.slane %v1195_v60, 4  ;;  %v670_v63 = vmul.f32 %v668_v39, %v666_v37  ;;  %v686_v24 = vunpack.c.l.bf16 %v873_v45 }
  0xa0   : > { %v633_v40 = vadd.f32 %v631_v19, %v623_v31  ;;  %v688_v48 = vperm.slane %v1184_v49, 5  ;;  %v671_v18 = vmul.f32 %v669_v44, %v667_v42  ;;  %v687_v62 = vunpack.c.h.bf16 %v873_v45 }
  0xa1   : > { %v642_v46 = vadd.f32 %v640_v28, %v632_v36  ;;  %v689_v2 = vperm.slane %v1195_v60, 5  ;;  %v680_v5 = vmul.f32 %v678_v52, %v676_v51  ;;  %v696_v3 = vunpack.c.l.bf16 %v874_v20 }
  0xa2   : > { %v643_v56 = vadd.f32 %v641_v32, %v633_v40  ;;  %v698_v6 = vperm.slane %v1184_v49, 6  ;;  %v681_v55 = vmul.f32 %v679_v58, %v677_v57  ;;  %v697_v9 = vunpack.c.h.bf16 %v874_v20 }
  0xa3   : > { %v652_v61 = vadd.f32 %v650_v38, %v642_v46  ;;  %v699_v26 = vperm.slane %v1195_v60, 6  ;;  %v690_v59 = vmul.f32 %v688_v48, %v686_v24  ;;  %v706_v10 = vunpack.c.l.bf16 %v875_v4 }
  0xa4   : > { %v653_v1 = vadd.f32 %v651_v41, %v643_v56  ;;  %v708_v11 = vperm.slane %v1184_v49, 7  ;;  %v691_v13 = vmul.f32 %v689_v2, %v687_v62  ;;  %v707_v14 = vunpack.c.h.bf16 %v875_v4 }
  0xa5   : > { %v662_v22 = vadd.f32 %v660_v50, %v652_v61  ;;  %v709_v43 = vperm.slane %v1195_v60, 7  ;;  %v700_v47 = vmul.f32 %v698_v6, %v696_v3  ;;  %v716_v19 = vunpack.c.l.bf16 %v876_v54 }
  0xa6   : > { %v663_v7 = vadd.f32 %v661_v17, %v653_v1  ;;  %v718_v21 = vperm.slane %v1189_v53, 0  ;;  %v701_v25 = vmul.f32 %v699_v26, %v697_v9  ;;  %v717_v27 = vunpack.c.h.bf16 %v876_v54 }
  0xa7   : > { %v672_v8 = vadd.f32 %v670_v63, %v662_v22  ;;  %v719_v28 = vperm.slane %v1200_v0, 0  ;;  %v710_v31 = vmul.f32 %v708_v11, %v706_v10  ;;  %v726_v49 = vunpack.c.l.bf16 %v877_v15 }
  0xa8   : > { %v673_v12 = vadd.f32 %v671_v18, %v663_v7  ;;  %v728_v32 = vperm.slane %v1189_v53, 1  ;;  %v711_v34 = vmul.f32 %v709_v43, %v707_v14  ;;  %v727_v60 = vunpack.c.h.bf16 %v877_v15 }
  0xa9   : > { %v682_v16 = vadd.f32 %v680_v5, %v672_v8  ;;  %v729_v35 = vperm.slane %v1200_v0, 1  ;;  %v720_v38 = vmul.f32 %v718_v21, %v716_v19  ;;  %v736_v37 = vunpack.c.l.bf16 %v878_v29 }
  0xaa   : > { %v683_v23 = vadd.f32 %v681_v55, %v673_v12  ;;  %v738_v39 = vperm.slane %v1189_v53, 2  ;;  %v721_v41 = vmul.f32 %v719_v28, %v717_v27  ;;  %v737_v42 = vunpack.c.h.bf16 %v878_v29 }
  0xab   : > { %v692_v30 = vadd.f32 %v690_v59, %v682_v16  ;;  %v739_v44 = vperm.slane %v1200_v0, 2  ;;  %v730_v46 = vmul.f32 %v728_v32, %v726_v49  ;;  %v731_v51 = vmul.f32 %v729_v35, %v727_v60 }
  0xac   : > { %v693_v33 = vadd.f32 %v691_v13, %v683_v23  ;;  %v740_v56 = vmul.f32 %v738_v39, %v736_v37 }
  0xad   : > { %v702_v36 = vadd.f32 %v700_v47, %v692_v30  ;;  %v741_v57 = vmul.f32 %v739_v44, %v737_v42 }
  0xae   : > { %v703_v40 = vadd.f32 %v701_v25, %v693_v33 }
  0xaf   : > { %v712_v45 = vadd.f32 %v710_v31, %v702_v36 }
  0xb0   : > { %v713_v50 = vadd.f32 %v711_v34, %v703_v40 }
  0xb1   : > { %v722_v52 = vadd.f32 %v720_v38, %v712_v45 }
  0xb2   : > { %v723_v17 = vadd.f32 %v721_v41, %v713_v50 }
  0xb3   : > { %v732_v58 = vadd.f32 %v730_v46, %v722_v52 }
  0xb4   : > { %v733_v53 = vadd.f32 %v731_v51, %v723_v17 }
  0xb5   : > { %v742_v20 = vadd.f32 %v740_v56, %v732_v58 }
  0xb6   : > { %v743_v61 = vadd.f32 %v741_v57, %v733_v53 }
  0xb7   : > { %744 = vst [vmem:[%s388_s23] sm:$0xff] %v742_v20 }
  0xb8   : > { %745 = vst [vmem:[%s388_s23 + $0x8] sm:$0xff] %v743_v61 }
  0xb9 PF: > { %p10_p9 = scmp.ge.s32.totalorder %s990_s16, 4   ;;  %s1258_s12 = smov %s947_s13 }
  0xba   : > { %s1259_s13 = smov %s999_s19  ;;  %s1260_s14 = smov %s990_s16 }
  0xbb   :  { %12 = sbr.rel (!%p10_p9) target bundleno = 2 (0x2), region = 165 }

// kernel: filtering_block_forward.10
= control target key start
LH: loop header
LB: loop body
LE: loop exit
PB: predicated region body
PF: predicated region fallthrough
CT: control target
= control target key end

     0   :  { %vm15_vm0 = vcmask 1042432   ;;  %s2986_s0 = inlined_call_operand.vmem [shape: f32[8,27,128], index: 0, kind: input, shape index: {}]   ;;  %s2987_s1 = inlined_call_operand.vmem [shape: bf16[27,8,128], index: 1, kind: input, shape index: {}]   ;;  %s2988_s2 = inlined_call_operand.vmem [shape: f32[8,8,128], index: 2, kind: output, shape index: {}]  }
   0x1   :  { %v11_v0 = vld [vmem:[%s2986_s0] sm:$0xff]  ;;  %v12_v1 = vld [vmem:[%s2986_s0 + $0x8] sm:$0xff]  ;;  %v13_v2 = vld [vmem:[%s2986_s0 + $0x10] sm:$0xff] }
   0x2   :  { %v14_v3 = vld [vmem:[%s2986_s0 + $0x18] sm:$0x7]  ;;  %v17_v4 = vmax.f32 %v11_v0, %v12_v1  ;;  %v1498_v5 = vld [vmem:[%s2986_s0 + $0x20] sm:$0xff]  ;;  %v1499_v6 = vld [vmem:[%s2986_s0 + $0x28] sm:$0xff] }
   0x3   :  { %v16_v7 = vsel %vm15_vm0, %v14_v3, -inf  ;;  %v1500_v8 = vld [vmem:[%s2986_s0 + $0x30] sm:$0xff]  ;;  %v1867_v9 = vld [vmem:[%s2986_s0 + $0x38] sm:$0x7]  ;;  %v221_v10 = vmax.f32 %v1498_v5, %v1499_v6  ;;  %v1872_v11 = vld [vmem:[%s2986_s0 + $0x40] sm:$0xff] }
   0x4   :  { %v18_v12 = vmax.f32 %v13_v2, %v16_v7  ;;  %v220_v13 = vsel %vm15_vm0, %v1867_v9, -inf  ;;  %v1879_v14 = vld [vmem:[%s2986_s0 + $0x48] sm:$0xff]  ;;  %v1884_v15 = vld [vmem:[%s2986_s0 + $0x50] sm:$0xff]  ;;  %v1889_v16 = vld [vmem:[%s2986_s0 + $0x58] sm:$0x7] }
   0x5   :  { %v222_v17 = vmax.f32 %v1500_v8, %v220_v13  ;;  %v399_v18 = vsel %vm15_vm0, %v1889_v16, -inf  ;;  %v400_v19 = vmax.f32 %v1872_v11, %v1879_v14  ;;  %v1899_v35 = vld [vmem:[%s2986_s0 + $0x78] sm:$0x7]  ;;  %v1904_v38 = vld [vmem:[%s2986_s0 + $0x60] sm:$0xff]  ;;  %v1909_v39 = vld [vmem:[%s2986_s0 + $0x68] sm:$0xff] }
   0x6   :  { %v19_v20 = vmax.f32 %v17_v4, %v18_v12  ;;  %v401_v21 = vmax.f32 %v1884_v15, %v399_v18  ;;  %v1914_v40 = vld [vmem:[%s2986_s0 + $0x70] sm:$0xff]  ;;  %v578_v41 = vsel %vm15_vm0, %v1899_v35, -inf  ;;  %v579_v46 = vmax.f32 %v1904_v38, %v1909_v39 }
   0x7   :  { %v223_v22 = vmax.f32 %v221_v10, %v222_v17  ;;  %v580_v47 = vmax.f32 %v1914_v40, %v578_v41 }
   0x8   :  { %v20_v23 = vrot.slane %v19_v20, 4  ;;  %v402_v24 = vmax.f32 %v400_v19, %v401_v21 }
   0x9   :  { %v224_v25 = vrot.slane %v223_v22, 4  ;;  %v581_v63 = vmax.f32 %v579_v46, %v580_v47 }
   0xa   :  { %v21_v26 = vmax.f32 %v19_v20, %v20_v23  ;;  %v403_v27 = vrot.slane %v402_v24, 4 }
   0xb   :  { %v225_v28 = vmax.f32 %v223_v22, %v224_v25  ;;  %v582_v7 = vrot.slane %v581_v63, 4 }
   0xc   :  { %v22_v29 = vrot.slane %v21_v26, 2  ;;  %v404_v30 = vmax.f32 %v402_v24, %v403_v27 }
   0xd   :  { %v226_v31 = vrot.slane %v225_v28, 2 }
   0xe   :  { %v23_v32 = vmax.f32 %v21_v26, %v22_v29  ;;  %v405_v33 = vrot.slane %v404_v30, 2 }
   0xf   :  { %v227_v34 = vmax.f32 %v225_v28, %v226_v31 }
  0x10   :  { %v24_v36 = vrot.slane %v23_v32, 1  ;;  %v406_v37 = vmax.f32 %v404_v30, %v405_v33 }
  0x11   :  { %v228_v42 = vrot.slane %v227_v34, 1 }
  0x12   :  { %v25_v43 = vmax.f32 %v23_v32, %v24_v36  ;;  %v407_v44 = vrot.slane %v406_v37, 1 }
  0x13   :  { %v229_v45 = vmax.f32 %v227_v34, %v228_v42 }
  0x14   :  { %v26_v48 = vsub.f32 %v11_v0, %v25_v43  ;;  %v27_v49 = vsub.f32 %v12_v1, %v25_v43  ;;  %v28_v50 = vsub.f32 %v13_v2, %v25_v43  ;;  %v29_v51 = vsub.f32 %v14_v3, %v25_v43 }
  0x15   :  { %v230_v52 = vsub.f32 %v1498_v5, %v229_v45  ;;  %v231_v53 = vsub.f32 %v1499_v6, %v229_v45  ;;  %v232_v54 = vsub.f32 %v1500_v8, %v229_v45  ;;  %v408_v58 = vmax.f32 %v406_v37, %v407_v44 }
  0x16   :  { %v30_v55 = vmul.f32 1.442695, %v26_v48  ;;  %v32_v56 = vmul.f32 1.442695, %v27_v49  ;;  %v34_v57 = vmul.f32 1.442695, %v28_v50  ;;  %v233_v60 = vsub.f32 %v1867_v9, %v229_v45 }
  0x17   :  { %v36_v59 = vmul.f32 1.442695, %v29_v51  ;;  %v234_v61 = vmul.f32 1.442695, %v230_v52  ;;  %v409_v62 = vsub.f32 %v1872_v11, %v408_v58  ;;  %v236_v0 = vmul.f32 1.442695, %v231_v53 }
  0x18   :  { %1747 = vpow2.f32 %v30_v55  ;;  %v410_v1 = vsub.f32 %v1879_v14, %v408_v58  ;;  %v238_v2 = vmul.f32 1.442695, %v232_v54  ;;  %v411_v3 = vsub.f32 %v1884_v15, %v408_v58 }
  0x19   :  { %1749 = vpow2.f32 %v32_v56  ;;  %v240_v4 = vmul.f32 1.442695, %v233_v60  ;;  %v412_v5 = vsub.f32 %v1889_v16, %v408_v58  ;;  %v413_v6 = vmul.f32 1.442695, %v409_v62  ;;  %v1716_v56 = vld [vmem:[%s2987_s1] sm:$0xff]   ;;  %v1976_v58 = vld [vmem:[%s2987_s1 + $0x10] sm:$0xff]  }
  0x1a   :  { %1751 = vpow2.f32 %v34_v57  ;;  %v415_v8 = vmul.f32 1.442695, %v410_v1  ;;  %v417_v10 = vmul.f32 1.442695, %v411_v3  ;;  %v583_v11 = vmax.f32 %v581_v63, %v582_v7  ;;  %v1473_v57 = vld [vmem:[%s2987_s1 + $0x8] sm:$0xff]  }
  0x1b   :  { %1753 = vpow2.f32 %v36_v59  ;;  %v419_v13 = vmul.f32 1.442695, %v412_v5  ;;  %v1983_v62 = vunpack.c.l.bf16 %v1716_v56  ;;  %v1985_v63 = vunpack.c.h.bf16 %v1716_v56  ;;  %v1999_v7 = vld [vmem:[%s2987_s1 + $0x28] sm:$0xff]   ;;  %v2048_v56 = vld [vmem:[%s2987_s1 + $0x38] sm:$0xff]  }
  0x1c   :  { %1755 = vpow2.f32 %v234_v61  ;;  %v584_v16 = vrot.slane %v583_v11, 2  ;;  %v66_v3 = vunpack.c.l.bf16 %v1473_v57  ;;  %v78_v5 = vunpack.c.l.bf16 %v1976_v58 }
  0x1d   :  { %1757 = vpow2.f32 %v236_v0  ;;  %v1990_v0 = vld [vmem:[%s2987_s1 + $0x20] sm:$0xff]  }
  0x1e   :  { %v1926_v9 = vpop.eup %1747  ;;  %1759 = vpow2.f32 %v238_v2  ;;  %v585_v25 = vmax.f32 %v583_v11, %v584_v16  ;;  %v2013_v16 = vld [vmem:[%s2987_s1 + $0x8] sm:$0xff]  }
  0x1f   :  { %v1928_v12 = vpop.eup %1749  ;;  %1761 = vpow2.f32 %v240_v4  ;;  %v72_v4 = vunpack.c.h.bf16 %v1473_v57  ;;  %v2053_v57 = vld [vmem:[%s2987_s1 + $0x18] sm:$0xff]  }
  0x20   :  { %v1930_v14 = vpop.eup %1751  ;;  %v38_v15 = vadd.f32 %v1928_v12, %v1926_v9  ;;  %1763 = vpow2.f32 %v413_v6  ;;  %v586_v37 = vrot.slane %v585_v25, 1  ;;  %v84_v6 = vunpack.c.h.bf16 %v1976_v58 }
  0x21   :  { %v1934_v17 = vpop.eup %1753  ;;  %1765 = vpow2.f32 %v415_v8 }
  0x22   :  { %v1936_v18 = vpop.eup %1755  ;;  %v39_v19 = vadd.f32 %v1930_v14, %v38_v15  ;;  %v40_v20 = vsel %vm15_vm0, %v1934_v17, 0.0  ;;  %1767 = vpow2.f32 %v417_v10  ;;  %v587_v49 = vmax.f32 %v585_v25, %v586_v37 }
  0x23   :  { %v1941_v21 = vpop.eup %1757  ;;  %1769 = vpow2.f32 %v419_v13  ;;  %v102_v15 = vunpack.c.l.bf16 %v1990_v0  ;;  %v268_v37 = vunpack.c.l.bf16 %v2013_v16 }
  0x24   :  { %v1943_v22 = vpop.eup %1759  ;;  %v41_v23 = vadd.f32 %v40_v20, %v39_v19  ;;  %v242_v24 = vadd.f32 %v1941_v21, %v1936_v18  ;;  %v588_v54 = vsub.f32 %v1904_v38, %v587_v49  ;;  %v589_v55 = vsub.f32 %v1909_v39, %v587_v49  ;;  %v1981_v38 = vld [vmem:[%s2987_s1 + $0x18] sm:$0xff]  }
  0x25   :  { %v1947_v26 = vpop.eup %1761  ;;  %v590_v1 = vsub.f32 %v1914_v40, %v587_v49  ;;  %v591_v2 = vsub.f32 %v1899_v35, %v587_v49  ;;  %v90_v10 = vunpack.c.l.bf16 %v1981_v38  ;;  %v96_v40 = vunpack.c.h.bf16 %v1981_v38 }
  0x26   :  { %v1949_v27 = vpop.eup %1763  ;;  %v42_v28 = vrot.slane %v41_v23, 4  ;;  %v243_v29 = vadd.f32 %v1943_v22, %v242_v24  ;;  %v244_v30 = vsel %vm15_vm0, %v1947_v26, 0.0  ;;  %v592_v61 = vmul.f32 1.442695, %v588_v54 }
  0x27   :  { %v1954_v31 = vpop.eup %1765  ;;  %v594_v39 = vmul.f32 1.442695, %v589_v55  ;;  %v108_v19 = vunpack.c.h.bf16 %v1990_v0  ;;  %v114_v20 = vunpack.c.l.bf16 %v1999_v7  ;;  %v598_v24 = vmul.f32 1.442695, %v591_v2 }
  0x28   :  { %v1956_v32 = vpop.eup %1767  ;;  %v43_v33 = vadd.f32 %v42_v28, %v41_v23  ;;  %v245_v34 = vadd.f32 %v244_v30, %v243_v29  ;;  %v421_v36 = vadd.f32 %v1954_v31, %v1949_v27  ;;  %v596_v23 = vmul.f32 1.442695, %v590_v1  ;;  %v2024_v30 = vld [vmem:[%s2987_s1 + $0x30] sm:$0xff]  }
  0x29   :  { %v1960_v41 = vpop.eup %1769  ;;  %v273_v49 = vunpack.c.h.bf16 %v2013_v16  ;;  %v132_v55 = vunpack.c.h.bf16 %v2024_v30  ;;  %v138_v2 = vunpack.c.l.bf16 %v2048_v56 }
  0x2a   :  { %v44_v42 = vrot.slane %v43_v33, 2  ;;  %v246_v43 = vrot.slane %v245_v34, 4  ;;  %v422_v44 = vadd.f32 %v1956_v32, %v421_v36  ;;  %v423_v45 = vsel %vm15_vm0, %v1960_v41, 0.0 }
  0x2c   :  { %v45_v46 = vadd.f32 %v44_v42, %v43_v33  ;;  %v247_v47 = vadd.f32 %v246_v43, %v245_v34  ;;  %v424_v48 = vadd.f32 %v423_v45, %v422_v44  ;;  %v2029_v33 = vld [vmem:[%s2987_s1 + $0x10] sm:$0xff]   ;;  %v120_v34 = vunpack.c.h.bf16 %v1999_v7 }
  0x2d   :  { %v1491_v7 = vld [vmem:[%s2987_s1 + $0x50] sm:$0xff]  }
  0x2e   :  { %v46_v50 = vrot.slane %v45_v46, 1  ;;  %v248_v52 = vrot.slane %v247_v47, 2  ;;  %v425_v53 = vrot.slane %v424_v48, 4 }
  0x30   :  { %v47_v51 = vadd.f32 %v46_v50, %v45_v46  ;;  %v249_v59 = vadd.f32 %v248_v52, %v247_v47  ;;  %v426_v60 = vadd.f32 %v425_v53, %v424_v48  ;;  %v126_v48 = vunpack.c.l.bf16 %v2024_v30  ;;  %v2076_v30 = vld [vmem:[%s2987_s1 + $0x20] sm:$0xff]  }
  0x31   :  { %v278_v50 = vunpack.c.l.bf16 %v2029_v33 }
  0x32   :  { %1771 = vrcp.f32 %v47_v51  ;;  %v250_v11 = vrot.slane %v249_v59, 1  ;;  %v427_v13 = vrot.slane %v426_v60, 2 }
  0x33   :  { %1773 = vpow2.f32 %v592_v61 }
  0x34   :  { %1775 = vpow2.f32 %v594_v39  ;;  %v251_v36 = vadd.f32 %v250_v11, %v249_v59  ;;  %v428_v42 = vadd.f32 %v427_v13, %v426_v60  ;;  %v283_v59 = vunpack.c.h.bf16 %v2029_v33  ;;  %v1511_v33 = vld [vmem:[%s2987_s1 + $0x28] sm:$0xff]  }
  0x35   :  { %1777 = vpow2.f32 %v596_v23 }
  0x36   :  { %v429_v60 = vrot.slane %v428_v42, 1  ;;  %1779 = vpow2.f32 %v598_v24  ;;  %v293_v24 = vunpack.c.h.bf16 %v2053_v57 }
  0x37   :  { %1781 = vrcp.f32 %v251_v36 }
  0x38   :  { %v2001_v8 = vpop.eup %1771  ;;  %v430_v36 = vadd.f32 %v429_v60, %v428_v42 }
  0x39   :  { %v2006_v35 = vmul.f32 %v2001_v8, %v1926_v9  ;;  %v2036_v47 = vpop.eup %1773  ;;  %v50_v58 = vmul.f32 %v2001_v8, %v1928_v12 }
  0x3a   :  { %v2041_v51 = vpop.eup %1775  ;;  %1783 = vrcp.f32 %v430_v36 }
  0x3b   :  { %v55_v25 = vperm.slane %v2006_v35, 0  ;;  %v61_v9 = vperm.slane %v2006_v35, 1  ;;  %v67_v28 = vperm.slane %v2006_v35, 2  ;;  %v73_v29 = vperm.slane %v2006_v35, 3 }
  0x3c   :  { %v79_v46 = vperm.slane %v2006_v35, 4  ;;  %v85_v54 = vperm.slane %v2006_v35, 5  ;;  %v91_v1 = vperm.slane %v2006_v35, 6  ;;  %v2064_v11 = vadd.f32 %v2041_v51, %v2036_v47 }
  0x3d   :  { %v56_v43 = vmul.f32 %v1983_v62, %v55_v25  ;;  %v62_v44 = vmul.f32 %v1985_v63, %v61_v9  ;;  %v68_v45 = vmul.f32 %v67_v28, %v66_v3  ;;  %v74_v53 = vmul.f32 %v73_v29, %v72_v4  ;;  %v1487_v29 = vld [vmem:[%s2987_s1 + $0x40] sm:$0xff]  }
  0x3e   :  { %v80_v39 = vmul.f32 %v79_v46, %v78_v5  ;;  %v144_v3 = vunpack.c.h.bf16 %v2048_v56  ;;  %v288_v4 = vunpack.c.l.bf16 %v2053_v57  ;;  %v86_v13 = vmul.f32 %v85_v54, %v84_v6  ;;  %v2068_v5 = vpop.eup %1777 }
  0x3f   :  { %v63_v52 = vadd.f32 %v62_v44, %v56_v43  ;;  %v97_v23 = vperm.slane %v2006_v35, 7  ;;  %v103_v25 = vperm.slane %v50_v58, 0  ;;  %v109_v9 = vperm.slane %v50_v58, 1 }
  0x40   :  { %v115_v28 = vperm.slane %v50_v58, 2  ;;  %v2080_v6 = vmul.f32 %v2001_v8, %v1930_v14  ;;  %v92_v43 = vmul.f32 %v91_v1, %v90_v10  ;;  %v121_v44 = vperm.slane %v50_v58, 3 }
  0x41   :  { %v69_v61 = vadd.f32 %v68_v45, %v63_v52  ;;  %v2084_v45 = vpop.eup %1779  ;;  %v2088_v46 = vmul.f32 %v2001_v8, %v1934_v17  ;;  %v127_v52 = vperm.slane %v50_v58, 4  ;;  %v139_v54 = vperm.slane %v50_v58, 6  ;;  %v1489_v8 = vld [vmem:[%s2987_s1 + $0x48] sm:$0xff]  }
  0x42   :  { %v2090_v56 = vpop.eup %1781  ;;  %v98_v14 = vmul.f32 %v97_v23, %v96_v40  ;;  %v150_v60 = vunpack.c.l.bf16 %v1487_v29  ;;  %v104_v10 = vmul.f32 %v103_v25, %v102_v15  ;;  %v116_v17 = vmul.f32 %v115_v28, %v114_v20 }
  0x43   :  { %v75_v12 = vadd.f32 %v74_v53, %v69_v61  ;;  %v133_v53 = vperm.slane %v50_v58, 5  ;;  %v298_v61 = vunpack.c.l.bf16 %v2076_v30  ;;  %v122_v38 = vmul.f32 %v121_v44, %v120_v34 }
  0x44   :  { %v145_v40 = vperm.slane %v50_v58, 7  ;;  %v2107_v23 = vmul.f32 %v139_v54, %v138_v2  ;;  %v253_v0 = vmul.f32 %v2090_v56, %v1936_v18  ;;  %v156_v20 = vunpack.c.h.bf16 %v1487_v29 }
  0x45   :  { %v81_v35 = vadd.f32 %v80_v39, %v75_v12  ;;  %v110_v39 = vmul.f32 %v109_v9, %v108_v19  ;;  %v151_v12 = vperm.slane %v2080_v6, 0  ;;  %v134_v15 = vmul.f32 %v133_v53, %v132_v55 }
  0x46   :  { %v157_v25 = vperm.slane %v2080_v6, 1  ;;  %v162_v9 = vunpack.c.l.bf16 %v1489_v8  ;;  %v163_v28 = vperm.slane %v2080_v6, 2  ;;  %v168_v36 = vunpack.c.h.bf16 %v1489_v8 }
  0x47   :  { %v87_v42 = vadd.f32 %v86_v13, %v81_v35  ;;  %v128_v13 = vmul.f32 %v127_v52, %v126_v48  ;;  %v259_v34 = vperm.slane %v253_v0, 0  ;;  %v264_v48 = vperm.slane %v253_v0, 1  ;;  %v2119_v35 = vpop.eup %1783 }
  0x48   :  { %v146_v58 = vmul.f32 %v145_v40, %v144_v3  ;;  %v2116_v2 = vmul.f32 %v151_v12, %v150_v60  ;;  %v169_v18 = vperm.slane %v2080_v6, 3  ;;  %v269_v44 = vperm.slane %v253_v0, 2  ;;  %v1493_v3 = vld [vmem:[%s2987_s1 + $0x58] sm:$0xff]  }
  0x49   :  { %v93_v1 = vadd.f32 %v92_v43, %v87_v42  ;;  %v260_v29 = vmul.f32 %v1983_v62, %v259_v34  ;;  %v265_v43 = vmul.f32 %v1985_v63, %v264_v48  ;;  %v274_v52 = vperm.slane %v253_v0, 3 }
  0x4a   :  { %v2123_v54 = vmul.f32 %v157_v25, %v156_v20  ;;  %v174_v42 = vunpack.c.l.bf16 %v1491_v7  ;;  %v175_v12 = vperm.slane %v2080_v6, 4  ;;  %v2136_v20 = vmul.f32 %v2090_v56, %v1941_v21 }
  0x4b   :  { %v99_v19 = vadd.f32 %v98_v14, %v93_v1  ;;  %v279_v14 = vperm.slane %v253_v0, 4  ;;  %v266_v60 = vadd.f32 %v265_v43, %v260_v29  ;;  %v275_v8 = vmul.f32 %v274_v52, %v273_v49 }
  0x4c   :  { %v284_v1 = vperm.slane %v253_v0, 5  ;;  %v289_v48 = vperm.slane %v253_v0, 6  ;;  %v186_v16 = vunpack.c.l.bf16 %v1493_v3  ;;  %v187_v49 = vperm.slane %v2080_v6, 6 }
  0x4d   :  { %v105_v55 = vadd.f32 %v104_v10, %v99_v19  ;;  %v270_v10 = vmul.f32 %v269_v44, %v268_v37  ;;  %v181_v19 = vperm.slane %v2080_v6, 5  ;;  %v280_v34 = vmul.f32 %v279_v14, %v278_v50 }
  0x4e   :  { %v285_v21 = vmul.f32 %v284_v1, %v283_v59  ;;  %v294_v43 = vperm.slane %v253_v0, 7  ;;  %v2150_v50 = vmul.f32 %v175_v12, %v174_v42  ;;  %v299_v52 = vperm.slane %v2136_v20, 0 }
  0x4f   :  { %v111_v53 = vadd.f32 %v110_v39, %v105_v55  ;;  %v180_v39 = vunpack.c.h.bf16 %v1491_v7  ;;  %v271_v25 = vadd.f32 %v270_v10, %v266_v60  ;;  %v164_v55 = vmul.f32 %v163_v28, %v162_v9  ;;  %v2146_v7 = vld [vmem:[%s2987_s1 + $0x60] sm:$0xff]  }
  0x50   :  { %v193_v9 = vperm.slane %v2080_v6, 7  ;;  %v2161_v0 = vmul.f32 %v187_v49, %v186_v16  ;;  %v295_v42 = vmul.f32 %v294_v43, %v293_v24  ;;  %v303_v14 = vunpack.c.h.bf16 %v2076_v30 }
  0x51   :  { %v117_v40 = vadd.f32 %v116_v17, %v111_v53  ;;  %v2141_v17 = vmul.f32 %v169_v18, %v168_v36  ;;  %v276_v29 = vadd.f32 %v275_v8, %v271_v25  ;;  %v2153_v28 = vmul.f32 %v181_v19, %v180_v39 }
  0x52   :  { %v290_v18 = vmul.f32 %v289_v48, %v288_v4  ;;  %v199_v53 = vperm.slane %v2088_v46, 0  ;;  %v304_v4 = vperm.slane %v2136_v20, 1  ;;  %v308_v10 = vunpack.c.l.bf16 %v1511_v33 }
  0x53   :  { %v123_v37 = vadd.f32 %v122_v38, %v117_v40  ;;  %v192_v38 = vunpack.c.h.bf16 %v1493_v3  ;;  %v281_v36 = vadd.f32 %v280_v34, %v276_v29  ;;  %v309_v8 = vperm.slane %v2136_v20, 2 }
  0x54   :  { %v300_v57 = vmul.f32 %v299_v52, %v298_v61  ;;  %v313_v24 = vunpack.c.h.bf16 %v1511_v33  ;;  %v314_v40 = vperm.slane %v2136_v20, 3  ;;  %v204_v19 = vunpack.c.h.bf16 %v2146_v7 }
  0x55   :  { %v129_v44 = vadd.f32 %v128_v13, %v123_v37  ;;  %v198_v13 = vunpack.c.l.bf16 %v2146_v7  ;;  %v286_v6 = vadd.f32 %v285_v21, %v281_v36  ;;  %v2170_v60 = vmul.f32 %v193_v9, %v192_v38  ;;  %v1515_v37 = vld [vmem:[%s2987_s1 + $0x38] sm:$0xff]   ;;  %v1517_v7 = vld [vmem:[%s2987_s1 + $0x40] sm:$0xff]  }
  0x56   :  { %v205_v25 = vperm.slane %v2088_v46, 1  ;;  %v2188_v48 = vmul.f32 %v2090_v56, %v1943_v22  ;;  %v305_v61 = vmul.f32 %v304_v4, %v303_v14  ;;  %v310_v49 = vmul.f32 %v309_v8, %v308_v10 }
  0x57   :  { %v135_v59 = vadd.f32 %v134_v15, %v129_v44  ;;  %v1497_v15 = vld [vmem:[%s2987_s1 + $0x68] sm:$0xf]  ;;  %v291_v1 = vadd.f32 %v290_v18, %v286_v6  ;;  %v2182_v39 = vmul.f32 %v199_v53, %v198_v13  ;;  %v315_v43 = vmul.f32 %v314_v40, %v313_v24 }
  0x58   :  { %v210_v34 = vunpack.c.l.bf16 %v1497_v15  ;;  %v319_v22 = vperm.slane %v2136_v20, 4  ;;  %v324_v9 = vperm.slane %v2136_v20, 5  ;;  %v328_v36 = vunpack.c.l.bf16 %v1515_v37  ;;  %v1534_v40 = vld [vmem:[%s2987_s1 + $0x8] sm:$0xff]  }
  0x59   :  { %v141_v3 = vadd.f32 %v2107_v23, %v135_v59  ;;  %v1513_v23 = vld [vmem:[%s2987_s1 + $0x30] sm:$0xff]   ;;  %v296_v30 = vadd.f32 %v295_v42, %v291_v1  ;;  %v333_v52 = vunpack.c.h.bf16 %v1515_v37  ;;  %v334_v33 = vperm.slane %v2136_v20, 7 }
  0x5a   :  { %v318_v29 = vunpack.c.l.bf16 %v1513_v23  ;;  %v323_v44 = vunpack.c.h.bf16 %v1513_v23  ;;  %v338_v59 = vunpack.c.l.bf16 %v1517_v7  ;;  %v339_v53 = vperm.slane %v2188_v48, 0 }
  0x5b   :  { %v147_v12 = vadd.f32 %v146_v58, %v141_v3  ;;  %v211_v58 = vperm.slane %v2088_v46, 2  ;;  %v301_v21 = vadd.f32 %v300_v57, %v296_v30  ;;  %v2205_v46 = vld [vmem:[%s2987_s1 + $0x48] sm:$0xff]   ;;  %v343_v6 = vunpack.c.h.bf16 %v1517_v7 }
  0x5c   :  { %v320_v14 = vmul.f32 %v319_v22, %v318_v29  ;;  %v348_v4 = vunpack.c.l.bf16 %v2205_v46  ;;  %v349_v3 = vperm.slane %v2188_v48, 2  ;;  %v206_v10 = vmul.f32 %v205_v25, %v204_v19 }
  0x5d   :  { %v153_v16 = vadd.f32 %v2116_v2, %v147_v12  ;;  %v329_v2 = vperm.slane %v2136_v20, 6  ;;  %v306_v18 = vadd.f32 %v305_v61, %v301_v21  ;;  %v212_v8 = vmul.f32 %v211_v58, %v210_v34  ;;  %v1536_v34 = vld [vmem:[%s2987_s1 + $0x10] sm:$0xff]  }
  0x5e   :  { %v2215_v20 = vmul.f32 %v2090_v56, %v1947_v26  ;;  %v325_v1 = vmul.f32 %v324_v9, %v323_v44  ;;  %v335_v24 = vmul.f32 %v334_v33, %v333_v52  ;;  %v340_v12 = vmul.f32 %v339_v53, %v338_v59  ;;  %v1521_v21 = vld [vmem:[%s2987_s1 + $0x50] sm:$0xff]   ;;  %v1538_v44 = vld [vmem:[%s2987_s1 + $0x18] sm:$0xff]  }
  0x5f   :  { %v159_v38 = vadd.f32 %v2123_v54, %v153_v16  ;;  %v344_v54 = vperm.slane %v2188_v48, 1  ;;  %v311_v42 = vadd.f32 %v310_v49, %v306_v18  ;;  %v330_v57 = vmul.f32 %v329_v2, %v328_v36 }
  0x60   :  { %v350_v25 = vmul.f32 %v349_v3, %v348_v4  ;;  %v353_v26 = vunpack.c.h.bf16 %v2205_v46  ;;  %v354_v56 = vperm.slane %v2188_v48, 3  ;;  %v447_v16 = vunpack.c.l.bf16 %v1534_v40  ;;  %v1540_v3 = vld [vmem:[%s2987_s1 + $0x20] sm:$0xff]  }
  0x61   :  { %v165_v13 = vadd.f32 %v164_v55, %v159_v38  ;;  %v316_v55 = vadd.f32 %v315_v43, %v311_v42  ;;  %v345_v30 = vmul.f32 %v344_v54, %v343_v6  ;;  %v452_v49 = vunpack.c.h.bf16 %v1534_v40 }
  0x62   :  { %v457_v22 = vunpack.c.l.bf16 %v1536_v34  ;;  %v462_v18 = vunpack.c.h.bf16 %v1536_v34  ;;  %v467_v59 = vunpack.c.l.bf16 %v1538_v44  ;;  %v2251_v53 = vmul.f32 %v2119_v35, %v1954_v31 }
  0x63   :  { %v171_v15 = vadd.f32 %v2141_v17, %v165_v13  ;;  %v2223_v17 = vmul.f32 %v2119_v35, %v1949_v27  ;;  %v321_v19 = vadd.f32 %v320_v14, %v316_v55  ;;  %v355_v14 = vmul.f32 %v354_v56, %v353_v26 }
  0x64   :  { %v364_v40 = vperm.slane %v2188_v48, 5  ;;  %v477_v26 = vunpack.c.l.bf16 %v1540_v3  ;;  %v478_v56 = vperm.slane %v2251_v53, 0 }
  0x65   :  { %v177_v23 = vadd.f32 %v2150_v50, %v171_v15  ;;  %v438_v50 = vperm.slane %v2223_v17, 0  ;;  %v443_v37 = vperm.slane %v2223_v17, 1  ;;  %v326_v58 = vadd.f32 %v325_v1, %v321_v19 }
  0x66   :  { %v448_v27 = vperm.slane %v2223_v17, 2  ;;  %v453_v29 = vperm.slane %v2223_v17, 3  ;;  %v458_v2 = vperm.slane %v2223_v17, 4  ;;  %v463_v52 = vperm.slane %v2223_v17, 5 }
  0x67   :  { %v183_v61 = vadd.f32 %v2153_v28, %v177_v23  ;;  %v439_v43 = vmul.f32 %v1983_v62, %v438_v50  ;;  %v444_v28 = vmul.f32 %v1985_v63, %v443_v37  ;;  %v331_v38 = vadd.f32 %v330_v57, %v326_v58  ;;  %v1542_v37 = vld [vmem:[%s2987_s1 + $0x28] sm:$0xff]  }
  0x68   :  { %v449_v9 = vmul.f32 %v448_v27, %v447_v16  ;;  %v454_v36 = vmul.f32 %v453_v29, %v452_v49  ;;  %v358_v62 = vunpack.c.l.bf16 %v1521_v21  ;;  %v468_v63 = vperm.slane %v2223_v17, 6 }
  0x69   :  { %v189_v7 = vadd.f32 %v2161_v0, %v183_v61  ;;  %v445_v46 = vadd.f32 %v444_v28, %v439_v43  ;;  %v336_v33 = vadd.f32 %v335_v24, %v331_v38  ;;  %v459_v54 = vmul.f32 %v458_v2, %v457_v22  ;;  %v1527_v2 = vld [vmem:[%s2987_s1 + $0x68] sm:$0xf] }
  0x6a   :  { %v464_v4 = vmul.f32 %v463_v52, %v462_v18  ;;  %v472_v1 = vunpack.c.h.bf16 %v1538_v44  ;;  %v473_v31 = vperm.slane %v2223_v17, 7  ;;  %v363_v24 = vunpack.c.h.bf16 %v1521_v21 }
  0x6b   :  { %v195_v0 = vadd.f32 %v2170_v60, %v189_v7  ;;  %v450_v6 = vadd.f32 %v449_v9, %v445_v46  ;;  %v341_v42 = vadd.f32 %v340_v12, %v336_v33  ;;  %v359_v60 = vperm.slane %v2188_v48, 4 }
  0x6c   :  { %v469_v23 = vmul.f32 %v468_v63, %v467_v59  ;;  %v369_v50 = vperm.slane %v2188_v48, 6  ;;  %v474_v17 = vmul.f32 %v473_v31, %v472_v1  ;;  %v482_v16 = vunpack.c.h.bf16 %v1540_v3  ;;  %v1546_v3 = vld [vmem:[%s2987_s1 + $0x38] sm:$0xff]  }
  0x6d   :  { %v201_v13 = vadd.f32 %v2182_v39, %v195_v0  ;;  %v1523_v39 = vld [vmem:[%s2987_s1 + $0x58] sm:$0xff]   ;;  %v455_v55 = vadd.f32 %v454_v36, %v450_v6  ;;  %v346_v57 = vadd.f32 %v345_v30, %v341_v42  ;;  %v365_v27 = vmul.f32 %v364_v40, %v363_v24  ;;  %v1544_v36 = vld [vmem:[%s2987_s1 + $0x30] sm:$0xff]  }
  0x6e   :  { %v368_v61 = vunpack.c.l.bf16 %v1523_v39  ;;  %v373_v49 = vunpack.c.h.bf16 %v1523_v39  ;;  %v374_v29 = vperm.slane %v2188_v48, 7  ;;  %v479_v21 = vmul.f32 %v478_v56, %v477_v26  ;;  %v1548_v56 = vld [vmem:[%s2987_s1 + $0x40] sm:$0xff]  }
  0x6f   :  { %v207_v15 = vadd.f32 %v206_v10, %v201_v13  ;;  %v460_v19 = vadd.f32 %v459_v54, %v455_v55  ;;  %v351_v34 = vadd.f32 %v350_v25, %v346_v57  ;;  %v360_v10 = vmul.f32 %v359_v60, %v358_v62 }
  0x70   :  { %v483_v25 = vperm.slane %v2251_v53, 1  ;;  %v487_v43 = vunpack.c.l.bf16 %v1542_v37  ;;  %v488_v28 = vperm.slane %v2251_v53, 2  ;;  %v370_v44 = vmul.f32 %v369_v50, %v368_v61 }
  0x71   :  { %v213_v12 = vadd.f32 %v212_v8, %v207_v15  ;;  %v1525_v8 = vld [vmem:[%s2987_s1 + $0x60] sm:$0xff]   ;;  %v465_v30 = vadd.f32 %v464_v4, %v460_v19  ;;  %v356_v58 = vadd.f32 %v355_v14, %v351_v34  ;;  %v379_v9 = vperm.slane %v2215_v20, 0 }
  0x72   :  { %v378_v38 = vunpack.c.l.bf16 %v1525_v8  ;;  %v484_v48 = vmul.f32 %v483_v25, %v482_v16  ;;  %v492_v46 = vunpack.c.h.bf16 %v1542_v37  ;;  %v493_v18 = vperm.slane %v2251_v53, 3 }
  0x73   :  { %214 = vst [vmem:[%s2988_s2] sm:$0xff] %v213_v12  ;;  %v470_v7 = vadd.f32 %v469_v23, %v465_v30  ;;  %v361_v22 = vadd.f32 %v360_v10, %v356_v58  ;;  %v375_v33 = vmul.f32 %v374_v29, %v373_v49  ;;  %v383_v62 = vunpack.c.h.bf16 %v1525_v8  ;;  %v1550_v58 = vld [vmem:[%s2987_s1 + $0x48] sm:$0xff]   ;;  %v2311_v49 = vld [vmem:[%s2986_s0 + $0x98] sm:$0x7] }
  0x74   :  { %v384_v59 = vperm.slane %v2215_v20, 1  ;;  %v489_v13 = vmul.f32 %v488_v28, %v487_v43  ;;  %v497_v6 = vunpack.c.l.bf16 %v1544_v36  ;;  %v498_v54 = vperm.slane %v2251_v53, 4  ;;  %v2317_v43 = vld [vmem:[%s2986_s0 + $0x80] sm:$0xff]  ;;  %v2322_v28 = vld [vmem:[%s2986_s0 + $0x88] sm:$0xff] }
  0x75   :  { %v475_v0 = vadd.f32 %v474_v17, %v470_v7  ;;  %v366_v52 = vadd.f32 %v365_v27, %v361_v22  ;;  %v380_v14 = vmul.f32 %v379_v9, %v378_v38  ;;  %v388_v60 = vunpack.c.l.bf16 %v1527_v2  ;;  %v2327_v22 = vld [vmem:[%s2986_s0 + $0x90] sm:$0xff] }
  0x76   :  { %v389_v4 = vperm.slane %v2215_v20, 2  ;;  %v494_v39 = vmul.f32 %v493_v18, %v492_v46  ;;  %v502_v55 = vunpack.c.h.bf16 %v1544_v36  ;;  %v503_v1 = vperm.slane %v2251_v53, 5  ;;  %v1552_v18 = vld [vmem:[%s2987_s1 + $0x50] sm:$0xff]  }
  0x77   :  { %v480_v63 = vadd.f32 %v479_v21, %v475_v0  ;;  %v371_v42 = vadd.f32 %v370_v44, %v366_v52  ;;  %v385_v57 = vmul.f32 %v384_v59, %v383_v62  ;;  %v2293_v24 = vmul.f32 %v2119_v35, %v1956_v32  ;;  %v2345_v59 = vld [vmem:[%s2986_s0 + $0xb8] sm:$0x7] }
  0x78   :  { %v499_v23 = vmul.f32 %v498_v54, %v497_v6  ;;  %v507_v12 = vunpack.c.l.bf16 %v1546_v3  ;;  %v508_v20 = vperm.slane %v2251_v53, 6  ;;  %v390_v26 = vmul.f32 %v389_v4, %v388_v60  ;;  %v1554_v54 = vld [vmem:[%s2987_s1 + $0x58] sm:$0xff]  }
  0x79   :  { %v485_v15 = vadd.f32 %v484_v48, %v480_v63  ;;  %v376_v31 = vadd.f32 %v375_v33, %v371_v42  ;;  %v601_v34 = vadd.f32 %v2068_v5, %v2064_v11  ;;  %v602_v10 = vsel %vm15_vm0, %v2084_v45, 0.0 }
  0x7a   :  { %v504_v32 = vmul.f32 %v503_v1, %v502_v55  ;;  %v512_v50 = vunpack.c.h.bf16 %v1546_v3  ;;  %v513_v37 = vperm.slane %v2251_v53, 7  ;;  %v509_v17 = vmul.f32 %v508_v20, %v507_v12  ;;  %v2364_v55 = vld [vmem:[%s2986_s0 + $0xb0] sm:$0xff] }
  0x7b   :  { %v490_v40 = vadd.f32 %v489_v13, %v485_v15  ;;  %v381_v19 = vadd.f32 %v380_v14, %v376_v31  ;;  %v517_v16 = vunpack.c.l.bf16 %v1548_v56  ;;  %v518_v25 = vperm.slane %v2293_v24, 0  ;;  %v2354_v15 = vld [vmem:[%s2986_s0 + $0xa0] sm:$0xff] }
  0x7c   :  { %v603_v11 = vadd.f32 %v602_v10, %v601_v34  ;;  %v514_v7 = vmul.f32 %v513_v37, %v512_v50  ;;  %v522_v53 = vunpack.c.h.bf16 %v1548_v56  ;;  %v523_v21 = vperm.slane %v2293_v24, 1  ;;  %v1556_v37 = vld [vmem:[%s2987_s1 + $0x60] sm:$0xff]  }
  0x7d   :  { %v495_v61 = vadd.f32 %v494_v39, %v490_v40  ;;  %v386_v8 = vadd.f32 %v385_v57, %v381_v19  ;;  %v527_v44 = vunpack.c.l.bf16 %v1550_v58  ;;  %v528_v38 = vperm.slane %v2293_v24, 2  ;;  %v2359_v39 = vld [vmem:[%s2986_s0 + $0xa8] sm:$0xff] }
  0x7e   :  { %v604_v9 = vrot.slane %v603_v11, 4  ;;  %v519_v2 = vmul.f32 %v518_v25, %v517_v16  ;;  %v532_v0 = vunpack.c.h.bf16 %v1550_v58  ;;  %v757_v48 = vsel %vm15_vm0, %v2311_v49, -inf }
  0x7f   :  { %v500_v30 = vadd.f32 %v499_v23, %v495_v61  ;;  %v391_v27 = vadd.f32 %v390_v26, %v386_v8  ;;  %v533_v46 = vperm.slane %v2293_v24, 3  ;;  %v758_v33 = vmax.f32 %v2317_v43, %v2322_v28 }
  0x80   :  { %v605_v52 = vadd.f32 %v604_v9, %v603_v11  ;;  %v759_v62 = vmax.f32 %v2327_v22, %v757_v48  ;;  %v524_v13 = vmul.f32 %v523_v21, %v522_v53  ;;  %v529_v6 = vmul.f32 %v528_v38, %v527_v44  ;;  %v1565_v48 = vld [vmem:[%s2987_s1 + $0x8] sm:$0xff]  }
  0x81   :  { %v505_v29 = vadd.f32 %v504_v32, %v500_v30  ;;  %1528 = vst [vmem:[%s2988_s2 + $0x8] sm:$0xff] %v391_v27  ;;  %v537_v4 = vunpack.c.l.bf16 %v1552_v18  ;;  %v538_v3 = vperm.slane %v2293_v24, 4  ;;  %v936_v1 = vsel %vm15_vm0, %v2345_v59, -inf  ;;  %v1558_v27 = vld [vmem:[%s2987_s1 + $0x68] sm:$0xf] }
  0x82   :  { %v606_v42 = vrot.slane %v605_v52, 2  ;;  %v760_v14 = vmax.f32 %v758_v33, %v759_v62  ;;  %v534_v31 = vmul.f32 %v533_v46, %v532_v0  ;;  %v542_v12 = vunpack.c.h.bf16 %v1552_v18  ;;  %v1728_v0 = vld [vmem:[%s2987_s1] sm:$0xff]   ;;  %v2401_v62 = vld [vmem:[%s2986_s0 + $0xc8] sm:$0xff] }
  0x83   :  { %v510_v36 = vadd.f32 %v509_v17, %v505_v29  ;;  %v543_v20 = vperm.slane %v2293_v24, 5  ;;  %v547_v19 = vunpack.c.l.bf16 %v1554_v54  ;;  %v548_v26 = vperm.slane %v2293_v24, 6  ;;  %v2396_v33 = vld [vmem:[%s2986_s0 + $0xc0] sm:$0xff] }
  0x84   :  { %v607_v57 = vadd.f32 %v606_v42, %v605_v52  ;;  %v761_v40 = vrot.slane %v760_v14, 4  ;;  %v937_v34 = vmax.f32 %v2354_v15, %v2359_v39  ;;  %v938_v10 = vmax.f32 %v2364_v55, %v936_v1 }
  0x85   :  { %v515_v63 = vadd.f32 %v514_v7, %v510_v36  ;;  %v435_v61 = vmul.f32 %v2119_v35, %v1960_v41  ;;  %v539_v50 = vmul.f32 %v538_v3, %v537_v4  ;;  %v544_v16 = vmul.f32 %v543_v20, %v542_v12  ;;  %v2385_v36 = vld [vmem:[%s2986_s0 + $0xd8] sm:$0x7] }
  0x86   :  { %v608_v56 = vrot.slane %v607_v57, 1  ;;  %v762_v30 = vmax.f32 %v760_v14, %v761_v40  ;;  %v552_v25 = vunpack.c.h.bf16 %v1554_v54  ;;  %v553_v58 = vperm.slane %v2293_v24, 7 }
  0x87   :  { %v520_v60 = vadd.f32 %v519_v2, %v515_v63  ;;  %v549_v11 = vmul.f32 %v548_v26, %v547_v19  ;;  %v939_v41 = vmax.f32 %v937_v34, %v938_v10  ;;  %v557_v29 = vunpack.c.l.bf16 %v1556_v37  ;;  %v2406_v63 = vld [vmem:[%s2986_s0 + $0xd0] sm:$0xff] }
  0x88   :  { %v609_v8 = vadd.f32 %v608_v56, %v607_v57  ;;  %v558_v7 = vperm.slane %v435_v61, 0  ;;  %v562_v53 = vunpack.c.h.bf16 %v1556_v37  ;;  %v563_v21 = vperm.slane %v435_v61, 1  ;;  %v1567_v57 = vld [vmem:[%s2987_s1 + $0x10] sm:$0xff]  }
  0x89   :  { %v525_v23 = vadd.f32 %v524_v13, %v520_v60  ;;  %v567_v44 = vunpack.c.l.bf16 %v1558_v27  ;;  %v568_v38 = vperm.slane %v435_v61, 2  ;;  %v763_v9 = vrot.slane %v762_v30, 2 }
  0x8a   :  { %1785 = vrcp.f32 %v609_v8  ;;  %v554_v2 = vmul.f32 %v553_v58, %v552_v25  ;;  %v940_v46 = vrot.slane %v939_v41, 4  ;;  %v559_v52 = vmul.f32 %v558_v7, %v557_v29  ;;  %v1571_v7 = vld [vmem:[%s2987_s1 + $0x20] sm:$0xff]  }
  0x8b   :  { %v530_v32 = vadd.f32 %v529_v6, %v525_v23  ;;  %v1115_v13 = vsel %vm15_vm0, %v2385_v36, -inf  ;;  %v564_v54 = vmul.f32 %v563_v21, %v562_v53  ;;  %v569_v42 = vmul.f32 %v568_v38, %v567_v44 }
  0x8c   :  { %v2412_v14 = vunpack.c.l.bf16 %v1728_v0  ;;  %v764_v60 = vmax.f32 %v762_v30, %v763_v9  ;;  %v2416_v1 = vunpack.c.h.bf16 %v1728_v0  ;;  %v631_v40 = vunpack.c.h.bf16 %v1565_v48  ;;  %v1575_v0 = vld [vmem:[%s2987_s1 + $0x30] sm:$0xff]  }
  0x8d   :  { %v535_v17 = vadd.f32 %v534_v31, %v530_v32  ;;  %v626_v31 = vunpack.c.l.bf16 %v1565_v48  ;;  %v941_v23 = vmax.f32 %v939_v41, %v940_v46  ;;  %v1116_v12 = vmax.f32 %v2396_v33, %v2401_v62 }
  0x8e   :  { %v1117_v20 = vmax.f32 %v2406_v63, %v1115_v13  ;;  %v765_v32 = vrot.slane %v764_v60, 1 }
  0x8f   :  { %v540_v35 = vadd.f32 %v539_v50, %v535_v17  ;;  %v1569_v17 = vld [vmem:[%s2987_s1 + $0x18] sm:$0xff]   ;;  %v942_v25 = vrot.slane %v941_v23, 2 }
  0x90   :  { %v2410_v6 = vpop.eup %1785  ;;  %v1118_v58 = vmax.f32 %v1116_v12, %v1117_v20  ;;  %v646_v29 = vunpack.c.l.bf16 %v1569_v17  ;;  %v766_v53 = vmax.f32 %v764_v60, %v765_v32  ;;  %v681_v20 = vunpack.c.h.bf16 %v1575_v0 }
  0x91   :  { %v545_v24 = vadd.f32 %v544_v16, %v540_v35  ;;  %v611_v3 = vmul.f32 %v2410_v6, %v2036_v47  ;;  %v636_v47 = vunpack.c.l.bf16 %v1567_v57  ;;  %v641_v16 = vunpack.c.h.bf16 %v1567_v57 }
  0x92   :  { %v2437_v21 = vmul.f32 %v2410_v6, %v2041_v51  ;;  %v943_v48 = vmax.f32 %v941_v23, %v942_v25  ;;  %v1119_v46 = vrot.slane %v1118_v58, 4  ;;  %v661_v51 = vunpack.c.h.bf16 %v1571_v7 }
  0x93   :  { %v550_v18 = vadd.f32 %v549_v11, %v545_v24  ;;  %v617_v26 = vperm.slane %v611_v3, 0  ;;  %v622_v56 = vperm.slane %v611_v3, 1  ;;  %v627_v34 = vperm.slane %v611_v3, 2  ;;  %v1573_v24 = vld [vmem:[%s2987_s1 + $0x28] sm:$0xff]  }
  0x94   :  { %v632_v10 = vperm.slane %v611_v3, 3  ;;  %v637_v61 = vperm.slane %v611_v3, 4  ;;  %v642_v35 = vperm.slane %v611_v3, 5  ;;  %v647_v9 = vperm.slane %v611_v3, 6 }
  0x95   :  { %v555_v4 = vadd.f32 %v554_v2, %v550_v18  ;;  %v618_v37 = vmul.f32 %v2412_v14, %v617_v26  ;;  %v623_v8 = vmul.f32 %v2416_v1, %v622_v56  ;;  %v628_v30 = vmul.f32 %v627_v34, %v626_v31 }
  0x96   :  { %v633_v41 = vmul.f32 %v632_v10, %v631_v40  ;;  %v638_v38 = vmul.f32 %v637_v61, %v636_v47  ;;  %v651_v2 = vunpack.c.h.bf16 %v1569_v17  ;;  %v652_v13 = vperm.slane %v611_v3, 7  ;;  %v2463_v17 = vld [vmem:[%s2987_s1 + $0x40] sm:$0xff]  }
  0x97   :  { %v560_v19 = vadd.f32 %v559_v52, %v555_v4  ;;  %v624_v11 = vadd.f32 %v623_v8, %v618_v37  ;;  %v643_v52 = vmul.f32 %v642_v35, %v641_v16  ;;  %v671_v60 = vunpack.c.h.bf16 %v1573_v24  ;;  %v2448_v4 = vld [vmem:[%s2987_s1 + $0x38] sm:$0xff]  }
  0x98   :  { %v767_v31 = vsub.f32 %v2317_v43, %v766_v53  ;;  %v648_v40 = vmul.f32 %v647_v9, %v646_v29  ;;  %v657_v12 = vperm.slane %v2437_v21, 0  ;;  %v676_v23 = vunpack.c.l.bf16 %v1575_v0 }
  0x99   :  { %v565_v50 = vadd.f32 %v564_v54, %v560_v19  ;;  %v629_v44 = vadd.f32 %v628_v30, %v624_v11  ;;  %v656_v54 = vunpack.c.l.bf16 %v1571_v7  ;;  %v768_v19 = vsub.f32 %v2322_v28, %v766_v53 }
  0x9a   :  { %v944_v3 = vrot.slane %v943_v48, 1  ;;  %v1120_v26 = vmax.f32 %v1118_v58, %v1119_v46  ;;  %v653_v34 = vmul.f32 %v652_v13, %v651_v2  ;;  %v662_v10 = vperm.slane %v2437_v21, 1 }
  0x9b   :  { %v570_v27 = vadd.f32 %v569_v42, %v565_v50  ;;  %v634_v18 = vadd.f32 %v633_v41, %v629_v44  ;;  %v666_v42 = vunpack.c.l.bf16 %v1573_v24  ;;  %v686_v47 = vunpack.c.l.bf16 %v2448_v4 }
  0x9c   :  { %v667_v61 = vperm.slane %v2437_v21, 2  ;;  %v672_v43 = vperm.slane %v2437_v21, 3  ;;  %v769_v32 = vsub.f32 %v2327_v22, %v766_v53  ;;  %v771_v50 = vmul.f32 1.442695, %v767_v31 }
  0x9d   :  { %1559 = vst [vmem:[%s2988_s2 + $0x10] sm:$0xff] %v570_v27  ;;  %v639_v57 = vadd.f32 %v638_v38, %v634_v18  ;;  %v658_v8 = vmul.f32 %v657_v12, %v656_v54  ;;  %v677_v30 = vperm.slane %v2437_v21, 4  ;;  %v682_v28 = vperm.slane %v2437_v21, 5  ;;  %v2480_v54 = vld [vmem:[%s2986_s0 + $0xf8] sm:$0x7]  ;;  %v2498_v12 = vld [vmem:[%s2986_s0 + $0xe8] sm:$0xff] }
  0x9e   :  { %v770_v16 = vsub.f32 %v2311_v49, %v766_v53  ;;  %v773_v25 = vmul.f32 1.442695, %v768_v19  ;;  %v945_v58 = vmax.f32 %v943_v48, %v944_v3  ;;  %v1121_v27 = vrot.slane %v1120_v26, 2 }
  0x9f   :  { %v644_v56 = vadd.f32 %v643_v52, %v639_v57  ;;  %v2468_v22 = vmul.f32 %v2410_v6, %v2068_v5  ;;  %v663_v41 = vmul.f32 %v662_v10, %v661_v51  ;;  %v691_v35 = vunpack.c.h.bf16 %v2448_v4 }
  0xa0   :  { %v668_v29 = vmul.f32 %v667_v61, %v666_v42  ;;  %v696_v7 = vunpack.c.l.bf16 %v2463_v17  ;;  %1787 = vpow2.f32 %v771_v50  ;;  %v775_v44 = vmul.f32 1.442695, %v769_v32 }
  0xa1   :  { %v649_v37 = vadd.f32 %v648_v40, %v644_v56  ;;  %v673_v9 = vmul.f32 %v672_v43, %v671_v60  ;;  %v678_v24 = vmul.f32 %v677_v30, %v676_v23  ;;  %v683_v49 = vmul.f32 %v682_v28, %v681_v20  ;;  %v2503_v23 = vld [vmem:[%s2986_s0 + $0xf0] sm:$0xff] }
  0xa2   :  { %1789 = vpow2.f32 %v773_v25  ;;  %v777_v53 = vmul.f32 1.442695, %v770_v16  ;;  %v946_v2 = vsub.f32 %v2354_v15, %v945_v58  ;;  %v947_v5 = vsub.f32 %v2359_v39, %v945_v58  ;;  %v1581_v39 = vld [vmem:[%s2987_s1 + $0x48] sm:$0xff]   ;;  %v1583_v28 = vld [vmem:[%s2987_s1 + $0x50] sm:$0xff]  }
  0xa3   :  { %v654_v11 = vadd.f32 %v653_v34, %v649_v37  ;;  %v687_v48 = vperm.slane %v2437_v21, 6  ;;  %1791 = vpow2.f32 %v775_v44  ;;  %v948_v46 = vsub.f32 %v2364_v55, %v945_v58 }
  0xa4   :  { %1793 = vpow2.f32 %v777_v53  ;;  %v949_v18 = vsub.f32 %v2345_v59, %v945_v58  ;;  %v950_v52 = vmul.f32 1.442695, %v946_v2  ;;  %v952_v13 = vmul.f32 1.442695, %v947_v5 }
  0xa5   :  { %v659_v38 = vadd.f32 %v658_v8, %v654_v11  ;;  %v692_v15 = vperm.slane %v2437_v21, 7  ;;  %v954_v42 = vmul.f32 1.442695, %v948_v46  ;;  %v1122_v60 = vmax.f32 %v1120_v26, %v1121_v27  ;;  %v2493_v21 = vld [vmem:[%s2986_s0 + $0xe0] sm:$0xff] }
  0xa6   :  { %v2486_v55 = vpop.eup %1787  ;;  %v697_v59 = vperm.slane %v2468_v22, 0  ;;  %v701_v4 = vunpack.c.h.bf16 %v2463_v17  ;;  %1795 = vpow2.f32 %v950_v52  ;;  %v956_v31 = vmul.f32 1.442695, %v949_v18 }
  0xa7   :  { %v664_v0 = vadd.f32 %v663_v41, %v659_v38  ;;  %1797 = vpow2.f32 %v952_v13  ;;  %v1123_v40 = vrot.slane %v1122_v60, 1  ;;  %v1294_v20 = vsel %vm15_vm0, %v2480_v54, -inf }
  0xa8   :  { %v2507_v19 = vpop.eup %1789  ;;  %v688_v3 = vmul.f32 %v687_v48, %v686_v47  ;;  %v702_v26 = vperm.slane %v2468_v22, 1  ;;  %v706_v56 = vunpack.c.l.bf16 %v1581_v39  ;;  %1799 = vpow2.f32 %v954_v42 }
  0xa9   :  { %v669_v51 = vadd.f32 %v668_v29, %v664_v0  ;;  %v2510_v34 = vpop.eup %1791  ;;  %v779_v61 = vadd.f32 %v2507_v19, %v2486_v55  ;;  %1801 = vpow2.f32 %v956_v31  ;;  %v1124_v43 = vmax.f32 %v1122_v60, %v1123_v40 }
  0xaa   :  { %v2514_v32 = vpop.eup %1793  ;;  %v693_v50 = vmul.f32 %v692_v15, %v691_v35  ;;  %v707_v37 = vperm.slane %v2468_v22, 2  ;;  %v1295_v47 = vmax.f32 %v2493_v21, %v2498_v12  ;;  %v1296_v8 = vmax.f32 %v2503_v23, %v1294_v20 }
  0xab   :  { %v674_v57 = vadd.f32 %v673_v9, %v669_v51  ;;  %v780_v17 = vadd.f32 %v2510_v34, %v779_v61  ;;  %v781_v16 = vsel %vm15_vm0, %v2514_v32, 0.0  ;;  %v1125_v25 = vsub.f32 %v2396_v33, %v1124_v43 }
  0xac   :  { %v2527_v58 = vpop.eup %1795  ;;  %v2531_v27 = vmul.f32 %v2410_v6, %v2084_v45  ;;  %v698_v11 = vmul.f32 %v697_v59, %v696_v7  ;;  %v703_v41 = vmul.f32 %v702_v26, %v701_v4  ;;  %v1126_v35 = vsub.f32 %v2401_v62, %v1124_v43  ;;  %v1585_v62 = vld [vmem:[%s2987_s1 + $0x58] sm:$0xff]  }
  0xad   :  { %v679_v10 = vadd.f32 %v678_v24, %v674_v57  ;;  %v2534_v29 = vpop.eup %1797  ;;  %v711_v38 = vunpack.c.h.bf16 %v1581_v39  ;;  %v712_v9 = vperm.slane %v2468_v22, 3  ;;  %v782_v24 = vadd.f32 %v781_v16, %v780_v17 }
  0xae   :  { %v708_v33 = vmul.f32 %v707_v37, %v706_v56  ;;  %v716_v53 = vunpack.c.l.bf16 %v1583_v28  ;;  %v717_v2 = vperm.slane %v2468_v22, 4  ;;  %v958_v45 = vadd.f32 %v2534_v29, %v2527_v58 }
  0xaf   :  { %v684_v30 = vadd.f32 %v683_v49, %v679_v10  ;;  %v2537_v49 = vpop.eup %1799  ;;  %v783_v5 = vrot.slane %v782_v24, 4  ;;  %v1129_v0 = vmul.f32 1.442695, %v1125_v25  ;;  %v1297_v48 = vmax.f32 %v1295_v47, %v1296_v8 }
  0xb0   :  { %v2542_v6 = vpop.eup %1801  ;;  %v959_v46 = vadd.f32 %v2537_v49, %v958_v45  ;;  %v1127_v52 = vsub.f32 %v2406_v63, %v1124_v43  ;;  %v1131_v13 = vmul.f32 1.442695, %v1126_v35  ;;  %v713_v15 = vmul.f32 %v712_v9, %v711_v38 }
  0xb1   :  { %v689_v44 = vadd.f32 %v688_v3, %v684_v30  ;;  %v960_v18 = vsel %vm15_vm0, %v2542_v6, 0.0  ;;  %v784_v39 = vadd.f32 %v783_v5, %v782_v24  ;;  %v1128_v42 = vsub.f32 %v2385_v36, %v1124_v43  ;;  %v1587_v36 = vld [vmem:[%s2987_s1 + $0x60] sm:$0xff]  }
  0xb2   :  { %v721_v60 = vunpack.c.h.bf16 %v1583_v28  ;;  %v722_v59 = vperm.slane %v2468_v22, 5  ;;  %v726_v4 = vunpack.c.l.bf16 %v1585_v62  ;;  %v961_v31 = vadd.f32 %v960_v18, %v959_v46 }
  0xb3   :  { %v694_v7 = vadd.f32 %v693_v50, %v689_v44  ;;  %v785_v40 = vrot.slane %v784_v39, 2  ;;  %1803 = vpow2.f32 %v1129_v0  ;;  %v1298_v20 = vrot.slane %v1297_v48, 4  ;;  %v1589_v44 = vld [vmem:[%s2987_s1 + $0x68] sm:$0xf] }
  0xb4   :  { %v727_v3 = vperm.slane %v2468_v22, 6  ;;  %v962_v26 = vrot.slane %v961_v31, 4  ;;  %1805 = vpow2.f32 %v1131_v13  ;;  %v1133_v63 = vmul.f32 1.442695, %v1127_v52 }
  0xb5   :  { %v699_v51 = vadd.f32 %v698_v11, %v694_v7  ;;  %v718_v10 = vmul.f32 %v717_v2, %v716_v53  ;;  %v786_v61 = vadd.f32 %v785_v40, %v784_v39  ;;  %v1135_v43 = vmul.f32 1.442695, %v1128_v42  ;;  %v1598_v40 = vld [vmem:[%s2987_s1 + $0x10] sm:$0xff]  }
  0xb6   :  { %v723_v50 = vmul.f32 %v722_v59, %v721_v60  ;;  %v731_v37 = vunpack.c.h.bf16 %v1585_v62  ;;  %v963_v47 = vadd.f32 %v962_v26, %v961_v31  ;;  %v732_v30 = vperm.slane %v2468_v22, 7 }
  0xb7   :  { %v704_v57 = vadd.f32 %v703_v41, %v699_v51  ;;  %v787_v28 = vrot.slane %v786_v61, 1  ;;  %v1299_v17 = vmax.f32 %v1297_v48, %v1298_v20  ;;  %v728_v16 = vmul.f32 %v727_v3, %v726_v4 }
  0xb8   :  { %v736_v25 = vunpack.c.l.bf16 %v1587_v36  ;;  %v737_v11 = vperm.slane %v2531_v27, 0  ;;  %1807 = vpow2.f32 %v1133_v63  ;;  %v964_v9 = vrot.slane %v963_v47, 2 }
  0xb9   :  { %v709_v56 = vadd.f32 %v708_v33, %v704_v57  ;;  %v2559_v41 = vpop.eup %1803  ;;  %v788_v38 = vadd.f32 %v787_v28, %v786_v61  ;;  %1809 = vpow2.f32 %v1135_v43  ;;  %v741_v22 = vunpack.c.h.bf16 %v1587_v36  ;;  %v1600_v61 = vld [vmem:[%s2987_s1 + $0x18] sm:$0xff]  }
  0xba   :  { %v2564_v24 = vpop.eup %1805  ;;  %v742_v33 = vperm.slane %v2531_v27, 1  ;;  %v733_v2 = vmul.f32 %v732_v30, %v731_v37  ;;  %v1300_v45 = vrot.slane %v1299_v17, 2  ;;  %v738_v7 = vmul.f32 %v737_v11, %v736_v25 }
  0xbb   :  { %v714_v8 = vadd.f32 %v713_v15, %v709_v56  ;;  %1811 = vrcp.f32 %v788_v38  ;;  %v746_v62 = vunpack.c.l.bf16 %v1589_v44  ;;  %v747_v0 = vperm.slane %v2531_v27, 2  ;;  %v1596_v15 = vld [vmem:[%s2987_s1 + $0x8] sm:$0xff]  }
  0xbc   :  { %v965_v48 = vadd.f32 %v964_v9, %v963_v47  ;;  %v1137_v46 = vadd.f32 %v2564_v24, %v2559_v41  ;;  %v743_v51 = vmul.f32 %v742_v33, %v741_v22  ;;  %v1301_v39 = vmax.f32 %v1299_v17, %v1300_v45  ;;  %v2611_v9 = vld [vmem:[%s2987_s1 + $0x28] sm:$0xff]  }
  0xbd   :  { %v719_v35 = vadd.f32 %v718_v10, %v714_v8  ;;  %v748_v59 = vmul.f32 %v747_v0, %v746_v62  ;;  %v805_v57 = vunpack.c.l.bf16 %v1596_v15  ;;  %v810_v26 = vunpack.c.h.bf16 %v1596_v15  ;;  %v2616_v22 = vld [vmem:[%s2987_s1 + $0x8] sm:$0xff]  }
  0xbe   :  { %v2570_v18 = vpop.eup %1807  ;;  %v966_v27 = vrot.slane %v965_v48, 1  ;;  %v1302_v63 = vrot.slane %v1301_v39, 1  ;;  %v820_v25 = vunpack.c.h.bf16 %v1598_v40  ;;  %v825_v11 = vunpack.c.l.bf16 %v1600_v61 }
  0xbf   :  { %v724_v53 = vadd.f32 %v723_v50, %v719_v35  ;;  %v2572_v52 = vpop.eup %1809  ;;  %v1138_v4 = vadd.f32 %v2570_v18, %v1137_v46  ;;  %v815_v50 = vunpack.c.l.bf16 %v1598_v40  ;;  %v984_v15 = vunpack.c.l.bf16 %v2616_v22 }
  0xc0   :  { %v1139_v20 = vsel %vm15_vm0, %v2572_v52, 0.0  ;;  %v967_v37 = vadd.f32 %v966_v27, %v965_v48  ;;  %v2618_v33 = vmax.f32 %v1301_v39, %v1302_v63  ;;  %v2629_v48 = vld [vmem:[%s2987_s1 + $0x30] sm:$0xff]   ;;  %v989_v40 = vunpack.c.h.bf16 %v2616_v22 }
  0xc1   :  { %v729_v5 = vadd.f32 %v728_v16, %v724_v53  ;;  %v2577_v42 = vpop.eup %1811  ;;  %v1140_v47 = vadd.f32 %v1139_v20, %v1138_v4  ;;  %v2602_v16 = vld [vmem:[%s2987_s1 + $0x20] sm:$0xff]   ;;  %v830_v53 = vunpack.c.h.bf16 %v1600_v61  ;;  %v2644_v27 = vld [vmem:[%s2987_s1 + $0x10] sm:$0xff]  }
  0xc2   :  { %v2582_v31 = vmul.f32 %v2577_v42, %v2486_v55  ;;  %1813 = vrcp.f32 %v967_v37  ;;  %v840_v46 = vunpack.c.h.bf16 %v2602_v16  ;;  %v1304_v4 = vsub.f32 %v2493_v21, %v2618_v33  ;;  %v2666_v37 = vld [vmem:[%s2987_s1 + $0x18] sm:$0xff]  }
  0xc3   :  { %v734_v13 = vadd.f32 %v733_v2, %v729_v5  ;;  %v835_v2 = vunpack.c.l.bf16 %v2602_v16  ;;  %v1141_v45 = vrot.slane %v1140_v47, 4  ;;  %v994_v21 = vunpack.c.l.bf16 %v2644_v27 }
  0xc4   :  { %v796_v56 = vperm.slane %v2582_v31, 0  ;;  %v801_v10 = vperm.slane %v2582_v31, 1  ;;  %v806_v36 = vperm.slane %v2582_v31, 2  ;;  %v811_v55 = vperm.slane %v2582_v31, 3 }
  0xc5   :  { %v739_v60 = vadd.f32 %v738_v7, %v734_v13  ;;  %v816_v17 = vperm.slane %v2582_v31, 4  ;;  %v821_v38 = vperm.slane %v2582_v31, 5  ;;  %v2623_v7 = vmul.f32 %v2577_v42, %v2507_v19 }
  0xc6   :  { %v797_v8 = vmul.f32 %v2412_v14, %v796_v56  ;;  %v802_v30 = vmul.f32 %v2416_v1, %v801_v10  ;;  %v807_v28 = vmul.f32 %v806_v36, %v805_v57  ;;  %v812_v44 = vmul.f32 %v811_v55, %v810_v26 }
  0xc7   :  { %v744_v3 = vadd.f32 %v743_v51, %v739_v60  ;;  %v817_v5 = vmul.f32 %v816_v17, %v815_v50  ;;  %v826_v0 = vperm.slane %v2582_v31, 6  ;;  %v845_v13 = vunpack.c.l.bf16 %v2611_v9 }
  0xc8   :  { %v803_v35 = vadd.f32 %v802_v30, %v797_v8  ;;  %v850_v51 = vunpack.c.h.bf16 %v2611_v9  ;;  %v822_v19 = vmul.f32 %v821_v38, %v820_v25  ;;  %v831_v60 = vperm.slane %v2582_v31, 7  ;;  %v2654_v10 = vpop.eup %1813  ;;  %v1610_v30 = vld [vmem:[%s2987_s1 + $0x40] sm:$0xff]  }
  0xc9   :  { %v749_v43 = vadd.f32 %v748_v59, %v744_v3  ;;  %v2639_v59 = vld [vmem:[%s2987_s1 + $0x38] sm:$0xff]   ;;  %v855_v57 = vunpack.c.l.bf16 %v2629_v48  ;;  %v1142_v20 = vadd.f32 %v1141_v45, %v1140_v47  ;;  %v1305_v31 = vsub.f32 %v2498_v12, %v2618_v33 }
  0xca   :  { %v808_v62 = vadd.f32 %v807_v28, %v803_v35  ;;  %v827_v26 = vmul.f32 %v826_v0, %v825_v11  ;;  %v836_v63 = vperm.slane %v2623_v7, 0  ;;  %v860_v56 = vunpack.c.h.bf16 %v2629_v48 }
  0xcb   :  { %1590 = vst [vmem:[%s2988_s2 + $0x18] sm:$0xff] %v749_v43  ;;  %v865_v36 = vunpack.c.l.bf16 %v2639_v59  ;;  %v1306_v55 = vsub.f32 %v2503_v23, %v2618_v33  ;;  %v1307_v61 = vsub.f32 %v2480_v54, %v2618_v33  ;;  %v832_v12 = vmul.f32 %v831_v60, %v830_v53 }
  0xcc   :  { %v813_v39 = vadd.f32 %v812_v44, %v808_v62  ;;  %v841_v50 = vperm.slane %v2623_v7, 1  ;;  %v2668_v47 = vmul.f32 1.442695, %v1304_v4  ;;  %v846_v8 = vperm.slane %v2623_v7, 2 }
  0xcd   :  { %v999_v28 = vunpack.c.h.bf16 %v2644_v27  ;;  %v1143_v17 = vrot.slane %v1142_v20, 2  ;;  %v2675_v16 = vmul.f32 1.442695, %v1305_v31  ;;  %v837_v11 = vmul.f32 %v836_v63, %v835_v2 }
  0xce   :  { %v818_v3 = vadd.f32 %v817_v5, %v813_v39  ;;  %v851_v35 = vperm.slane %v2623_v7, 3  ;;  %v856_v44 = vperm.slane %v2623_v7, 4  ;;  %v2681_v38 = vmul.f32 %v2577_v42, %v2510_v34 }
  0xcf   :  { %v870_v9 = vunpack.c.h.bf16 %v2639_v59  ;;  %v2686_v22 = vmul.f32 %v2654_v10, %v2527_v58  ;;  %v1004_v53 = vunpack.c.l.bf16 %v2666_v37  ;;  %v2691_v45 = vmul.f32 %v2577_v42, %v2514_v32  ;;  %v1612_v32 = vld [vmem:[%s2987_s1 + $0x48] sm:$0xff]  }
  0xd0   :  { %v823_v43 = vadd.f32 %v822_v19, %v818_v3  ;;  %v842_v62 = vmul.f32 %v841_v50, %v840_v46  ;;  %v875_v5 = vunpack.c.l.bf16 %v1610_v30  ;;  %v861_v0 = vperm.slane %v2623_v7, 5 }
  0xd1   :  { %v975_v34 = vperm.slane %v2686_v22, 0  ;;  %v1009_v48 = vunpack.c.h.bf16 %v2666_v37  ;;  %v2696_v39 = vadd.f32 %v1143_v17, %v1142_v20  ;;  %v847_v58 = vmul.f32 %v846_v8, %v845_v13 }
  0xd2   :  { %v828_v25 = vadd.f32 %v827_v26, %v823_v43  ;;  %v852_v60 = vmul.f32 %v851_v35, %v850_v51  ;;  %v857_v59 = vmul.f32 %v856_v44, %v855_v57  ;;  %v980_v46 = vperm.slane %v2686_v22, 1 }
  0xd3   :  { %v976_v42 = vmul.f32 %v2412_v14, %v975_v34  ;;  %v985_v27 = vperm.slane %v2686_v22, 2  ;;  %v990_v4 = vperm.slane %v2686_v22, 3  ;;  %v866_v20 = vperm.slane %v2623_v7, 6 }
  0xd4   :  { %v833_v2 = vadd.f32 %v832_v12, %v828_v25  ;;  %v871_v3 = vperm.slane %v2623_v7, 7  ;;  %v876_v13 = vperm.slane %v2681_v38, 0  ;;  %v880_v51 = vunpack.c.h.bf16 %v1610_v30 }
  0xd5   :  { %v981_v57 = vmul.f32 %v2416_v1, %v980_v46  ;;  %v986_v26 = vmul.f32 %v985_v27, %v984_v15  ;;  %v995_v63 = vperm.slane %v2686_v22, 4  ;;  %v881_v43 = vperm.slane %v2681_v38, 1  ;;  %v1614_v1 = vld [vmem:[%s2987_s1 + $0x50] sm:$0xff]  }
  0xd6   :  { %v838_v19 = vadd.f32 %v837_v11, %v833_v2  ;;  %v885_v12 = vunpack.c.l.bf16 %v1612_v32  ;;  %v886_v50 = vperm.slane %v2681_v38, 2  ;;  %v862_v37 = vmul.f32 %v861_v0, %v860_v56 }
  0xd7   :  { %v982_v8 = vadd.f32 %v981_v57, %v976_v42  ;;  %v991_v17 = vmul.f32 %v990_v4, %v989_v40  ;;  %v1000_v25 = vperm.slane %v2686_v22, 5  ;;  %v867_v11 = vmul.f32 %v866_v20, %v865_v36  ;;  %v1633_v36 = vld [vmem:[%s2987_s1 + $0x20] sm:$0xff]  }
  0xd8   :  { %v843_v31 = vadd.f32 %v842_v62, %v838_v19  ;;  %v872_v35 = vmul.f32 %v871_v3, %v870_v9  ;;  %v877_v30 = vmul.f32 %v876_v13, %v875_v5  ;;  %v2718_v15 = vmul.f32 %v2654_v10, %v2534_v29  ;;  %v1616_v5 = vld [vmem:[%s2987_s1 + $0x58] sm:$0xff]  }
  0xd9   :  { %v987_v44 = vadd.f32 %v986_v26, %v982_v8  ;;  %v996_v2 = vmul.f32 %v995_v63, %v994_v21  ;;  %v1005_v56 = vperm.slane %v2686_v22, 6  ;;  %v882_v40 = vmul.f32 %v881_v43, %v880_v51 }
  0xda   :  { %v848_v14 = vadd.f32 %v847_v58, %v843_v31  ;;  %v887_v0 = vmul.f32 %v886_v50, %v885_v12  ;;  %v890_v34 = vunpack.c.h.bf16 %v1612_v32  ;;  %v891_v9 = vperm.slane %v2681_v38, 3  ;;  %v2741_v12 = vld [vmem:[%s2987_s1 + $0x60] sm:$0xff]  }
  0xdb   :  { %v992_v29 = vadd.f32 %v991_v17, %v987_v44  ;;  %v1001_v19 = vmul.f32 %v1000_v25, %v999_v28  ;;  %v1010_v21 = vperm.slane %v2686_v22, 7  ;;  %v900_v42 = vunpack.c.h.bf16 %v1614_v1  ;;  %v1635_v28 = vld [vmem:[%s2987_s1 + $0x28] sm:$0xff]  }
  0xdc   :  { %v853_v7 = vadd.f32 %v852_v60, %v848_v14  ;;  %v895_v60 = vunpack.c.l.bf16 %v1614_v1  ;;  %v1006_v46 = vmul.f32 %v1005_v56, %v1004_v53  ;;  %v1014_v27 = vunpack.c.l.bf16 %v1633_v36 }
  0xdd   :  { %v997_v32 = vadd.f32 %v996_v2, %v992_v29  ;;  %v1015_v4 = vperm.slane %v2718_v15, 0  ;;  %v901_v20 = vperm.slane %v2681_v38, 5  ;;  %v905_v3 = vunpack.c.l.bf16 %v1616_v5 }
  0xde   :  { %v858_v62 = vadd.f32 %v857_v59, %v853_v7  ;;  %v896_v59 = vperm.slane %v2681_v38, 4  ;;  %v906_v13 = vperm.slane %v2681_v38, 6  ;;  %v1011_v51 = vmul.f32 %v1010_v21, %v1009_v48 }
  0xdf   :  { %v1002_v22 = vadd.f32 %v1001_v19, %v997_v32  ;;  %v1019_v57 = vunpack.c.h.bf16 %v1633_v36  ;;  %v1020_v26 = vperm.slane %v2718_v15, 1  ;;  %v892_v53 = vmul.f32 %v891_v9, %v890_v34  ;;  %v1639_v19 = vld [vmem:[%s2987_s1 + $0x38] sm:$0xff]  }
  0xe0   :  { %v863_v58 = vadd.f32 %v862_v37, %v858_v62  ;;  %v910_v14 = vunpack.c.h.bf16 %v1616_v5  ;;  %v911_v43 = vperm.slane %v2681_v38, 7  ;;  %v1016_v37 = vmul.f32 %v1015_v4, %v1014_v27 }
  0xe1   :  { %v1007_v50 = vadd.f32 %v1006_v46, %v1002_v22  ;;  %v1024_v8 = vunpack.c.l.bf16 %v1635_v28  ;;  %v1025_v17 = vperm.slane %v2718_v15, 2  ;;  %v897_v48 = vmul.f32 %v896_v59, %v895_v60 }
  0xe2   :  { %v868_v31 = vadd.f32 %v867_v11, %v863_v58  ;;  %v902_v7 = vmul.f32 %v901_v20, %v900_v42  ;;  %v907_v11 = vmul.f32 %v906_v13, %v905_v3  ;;  %v1021_v38 = vmul.f32 %v1020_v26, %v1019_v57  ;;  %v1641_v3 = vld [vmem:[%s2987_s1 + $0x40] sm:$0xff]  }
  0xe3   :  { %v1012_v1 = vadd.f32 %v1011_v51, %v1007_v50  ;;  %v1029_v44 = vunpack.c.h.bf16 %v1635_v28  ;;  %v1030_v2 = vperm.slane %v2718_v15, 3  ;;  %v912_v62 = vmul.f32 %v911_v43, %v910_v14 }
  0xe4   :  { %v873_v63 = vadd.f32 %v872_v35, %v868_v31  ;;  %v1637_v35 = vld [vmem:[%s2987_s1 + $0x30] sm:$0xff]   ;;  %v915_v34 = vunpack.c.l.bf16 %v2741_v12  ;;  %v916_v36 = vperm.slane %v2691_v45, 0  ;;  %v1035_v29 = vperm.slane %v2718_v15, 4 }
  0xe5   :  { %v1017_v9 = vadd.f32 %v1016_v37, %v1012_v1  ;;  %v1034_v5 = vunpack.c.l.bf16 %v1637_v35  ;;  %v920_v58 = vunpack.c.h.bf16 %v2741_v12  ;;  %v921_v60 = vperm.slane %v2691_v45, 1 }
  0xe6   :  { %v878_v25 = vadd.f32 %v877_v30, %v873_v63  ;;  %v1026_v30 = vmul.f32 %v1025_v17, %v1024_v8  ;;  %v2761_v59 = vmul.f32 %v2654_v10, %v2537_v49  ;;  %v1031_v32 = vmul.f32 %v1030_v2, %v1029_v44  ;;  %v1643_v63 = vld [vmem:[%s2987_s1 + $0x48] sm:$0xff]   ;;  %v2778_v17 = vld [vmem:[%s2987_s1 + $0x50] sm:$0xff]  }
  0xe7   :  { %v1022_v42 = vadd.f32 %v1021_v38, %v1017_v9  ;;  %v1039_v46 = vunpack.c.h.bf16 %v1637_v35  ;;  %v1040_v27 = vperm.slane %v2718_v15, 5  ;;  %v917_v31 = vmul.f32 %v916_v36, %v915_v34 }
  0xe8   :  { %v883_v56 = vadd.f32 %v882_v40, %v878_v25  ;;  %v1620_v40 = vld [vmem:[%s2987_s1 + $0x68] sm:$0xf]  ;;  %v1045_v20 = vperm.slane %v2718_v15, 6  ;;  %v926_v28 = vperm.slane %v2691_v45, 2  ;;  %v1036_v49 = vmul.f32 %v1035_v29, %v1034_v5  ;;  %v1647_v5 = vld [vmem:[%s2987_s1 + $0x58] sm:$0xff]  }
  0xe9   :  { %v925_v13 = vunpack.c.l.bf16 %v1620_v40  ;;  %v1027_v22 = vadd.f32 %v1026_v30, %v1022_v42  ;;  %v1049_v57 = vunpack.c.h.bf16 %v1639_v19  ;;  %v1050_v26 = vperm.slane %v2718_v15, 7  ;;  %v2797_v40 = vld [vmem:[%s2987_s1] sm:$0xff]  }
  0xea   :  { %v888_v21 = vadd.f32 %v887_v0, %v883_v56  ;;  %v1044_v0 = vunpack.c.l.bf16 %v1639_v19  ;;  %v1041_v43 = vmul.f32 %v1040_v27, %v1039_v46  ;;  %v1054_v12 = vunpack.c.l.bf16 %v1641_v3  ;;  %v2807_v27 = vld [vmem:[%s2987_s1 + $0x60] sm:$0xff]  }
  0xeb   :  { %v1032_v14 = vadd.f32 %v1031_v32, %v1027_v22  ;;  %v1055_v50 = vperm.slane %v2761_v59, 0  ;;  %v1059_v45 = vunpack.c.h.bf16 %v1641_v3  ;;  %v1064_v35 = vunpack.c.l.bf16 %v1643_v63 }
  0xec   :  { %v893_v4 = vadd.f32 %v892_v53, %v888_v21  ;;  %v1145_v53 = vrot.slane %v2696_v39, 1  ;;  %v1046_v8 = vmul.f32 %v1045_v20, %v1044_v0  ;;  %v1065_v1 = vperm.slane %v2761_v59, 2 }
  0xed   :  { %v1037_v25 = vadd.f32 %v1036_v49, %v1032_v14  ;;  %v1069_v44 = vunpack.c.h.bf16 %v1643_v63  ;;  %v1070_v2 = vperm.slane %v2761_v59, 3  ;;  %v1051_v56 = vmul.f32 %v1050_v26, %v1049_v57 }
  0xee   :  { %v898_v51 = vadd.f32 %v897_v48, %v893_v4  ;;  %v1146_v15 = vadd.f32 %v1145_v53, %v2696_v39  ;;  %v1060_v48 = vperm.slane %v2761_v59, 1  ;;  %v1074_v34 = vunpack.c.l.bf16 %v2778_v17 }
  0xef   :  { %v1075_v36 = vperm.slane %v2761_v59, 4  ;;  %v922_v30 = vmul.f32 %v921_v60, %v920_v58  ;;  %v927_v39 = vmul.f32 %v926_v28, %v925_v13  ;;  %v1056_v19 = vmul.f32 %v1055_v50, %v1054_v12 }
  0xf0   :  { %v903_v37 = vadd.f32 %v902_v7, %v898_v51  ;;  %1815 = vrcp.f32 %v1146_v15  ;;  %v1042_v7 = vadd.f32 %v1041_v43, %v1037_v25  ;;  %v1061_v21 = vmul.f32 %v1060_v48, %v1059_v45  ;;  %v1660_v51 = vld [vmem:[%s2987_s1 + $0x10] sm:$0xff]  }
  0xf1   :  { %1817 = vpow2.f32 %v2668_v47  ;;  %v1066_v58 = vmul.f32 %v1065_v1, %v1064_v35  ;;  %v1071_v60 = vmul.f32 %v1070_v2, %v1069_v44  ;;  %v1079_v42 = vunpack.c.h.bf16 %v2778_v17  ;;  %v1658_v47 = vld [vmem:[%s2987_s1 + $0x8] sm:$0xff]   ;;  %v1662_v35 = vld [vmem:[%s2987_s1 + $0x18] sm:$0xff]  }
  0xf2   :  { %v908_v38 = vadd.f32 %v907_v11, %v903_v37  ;;  %v2792_v11 = vmul.f32 %v2654_v10, %v2542_v6  ;;  %v1047_v29 = vadd.f32 %v1046_v8, %v1042_v7  ;;  %v1076_v6 = vmul.f32 %v1075_v36, %v1074_v34 }
  0xf3   :  { %v1080_v10 = vperm.slane %v2761_v59, 5  ;;  %v1084_v46 = vunpack.c.l.bf16 %v1647_v5  ;;  %v1085_v0 = vperm.slane %v2761_v59, 6  ;;  %v1089_v20 = vunpack.c.h.bf16 %v1647_v5 }
  0xf4   :  { %v913_v9 = vadd.f32 %v912_v62, %v908_v38  ;;  %v1052_v32 = vadd.f32 %v1051_v56, %v1047_v29  ;;  %v1741_v3 = vunpack.c.l.bf16 %v2797_v40  ;;  %v1742_v22 = vunpack.c.h.bf16 %v2797_v40  ;;  %v1651_v56 = vld [vmem:[%s2987_s1 + $0x68] sm:$0xf] }
  0xf5   :  { %v1163_v49 = vunpack.c.l.bf16 %v1658_v47  ;;  %v1090_v63 = vperm.slane %v2761_v59, 7  ;;  %v1094_v53 = vunpack.c.l.bf16 %v2807_v27  ;;  %v1168_v14 = vunpack.c.h.bf16 %v1658_v47 }
  0xf6   :  { %v918_v62 = vadd.f32 %v917_v31, %v913_v9  ;;  %v2809_v4 = vpop.eup %1815  ;;  %v1057_v13 = vadd.f32 %v1056_v19, %v1052_v32  ;;  %v1095_v37 = vperm.slane %v2792_v11, 0  ;;  %v1173_v45 = vunpack.c.l.bf16 %v1660_v51 }
  0xf7   :  { %v2815_v28 = vmul.f32 %v2809_v4, %v2559_v41  ;;  %v2821_v57 = vpop.eup %1817  ;;  %v1081_v1 = vmul.f32 %v1080_v10, %v1079_v42  ;;  %v1086_v38 = vmul.f32 %v1085_v0, %v1084_v46  ;;  %v1091_v44 = vmul.f32 %v1090_v63, %v1089_v20 }
  0xf8   :  { %v923_v31 = vadd.f32 %v922_v30, %v918_v62  ;;  %v1062_v43 = vadd.f32 %v1061_v21, %v1057_v13  ;;  %v1178_v2 = vunpack.c.h.bf16 %v1660_v51  ;;  %v1096_v30 = vmul.f32 %v1095_v37, %v1094_v53 }
  0xf9   :  { %v1154_v12 = vperm.slane %v2815_v28, 0  ;;  %v1159_v41 = vperm.slane %v2815_v28, 1  ;;  %v1164_v50 = vperm.slane %v2815_v28, 2  ;;  %v1169_v8 = vperm.slane %v2815_v28, 3 }
  0xfa   :  { %v928_v26 = vadd.f32 %v927_v39, %v923_v31  ;;  %v1174_v59 = vperm.slane %v2815_v28, 4  ;;  %v1067_v17 = vadd.f32 %v1066_v58, %v1062_v43  ;;  %v1179_v9 = vperm.slane %v2815_v28, 5 }
  0xfb   :  { %v1155_v15 = vmul.f32 %v1741_v3, %v1154_v12  ;;  %v1160_v25 = vmul.f32 %v1742_v22, %v1159_v41  ;;  %v1165_v48 = vmul.f32 %v1164_v50, %v1163_v49  ;;  %v1170_v36 = vmul.f32 %v1169_v8, %v1168_v14  ;;  %v1668_v41 = vld [vmem:[%s2987_s1 + $0x30] sm:$0xff]  }
  0xfc   :  { %1621 = vst [vmem:[%s2988_s2 + $0x20] sm:$0xff] %v928_v26  ;;  %v1072_v7 = vadd.f32 %v1071_v60, %v1067_v17  ;;  %v1099_v39 = vunpack.c.h.bf16 %v2807_v27  ;;  %v2848_v5 = vmul.f32 %v2809_v4, %v2564_v24  ;;  %v1183_v29 = vunpack.c.l.bf16 %v1662_v35  ;;  %v1664_v60 = vld [vmem:[%s2987_s1 + $0x20] sm:$0xff]  }
  0xfd   :  { %v1161_v34 = vadd.f32 %v1160_v25, %v1155_v15  ;;  %v1175_v62 = vmul.f32 %v1174_v59, %v1173_v45  ;;  %v1184_v58 = vperm.slane %v2815_v28, 6  ;;  %v1100_v42 = vperm.slane %v2792_v11, 1 }
  0xfe   :  { %v1077_v19 = vadd.f32 %v1076_v6, %v1072_v7  ;;  %v1104_v47 = vunpack.c.l.bf16 %v1651_v56  ;;  %v1188_v32 = vunpack.c.h.bf16 %v1662_v35  ;;  %v1314_v10 = vmul.f32 1.442695, %v1307_v61  ;;  %v1666_v61 = vld [vmem:[%s2987_s1 + $0x28] sm:$0xff]  }
  0xff   :  { %v1166_v21 = vadd.f32 %v1165_v48, %v1161_v34  ;;  %v1180_v27 = vmul.f32 %v1179_v9, %v1178_v2  ;;  %v1189_v6 = vperm.slane %v2815_v28, 7  ;;  %v1105_v31 = vperm.slane %v2792_v11, 2 }
 0x100   :  { %v1082_v24 = vadd.f32 %v1081_v1, %v1077_v19  ;;  %v1193_v0 = vunpack.c.l.bf16 %v1664_v60  ;;  %1819 = vpow2.f32 %v2675_v16  ;;  %v1312_v20 = vmul.f32 1.442695, %v1306_v55 }
 0x101   :  { %v1171_v46 = vadd.f32 %v1170_v36, %v1166_v21  ;;  %v1185_v51 = vmul.f32 %v1184_v58, %v1183_v29  ;;  %v1194_v54 = vperm.slane %v2848_v5, 0  ;;  %v1101_v26 = vmul.f32 %v1100_v42, %v1099_v39  ;;  %v1672_v58 = vld [vmem:[%s2987_s1 + $0x40] sm:$0xff]  }
 0x102   :  { %v1087_v13 = vadd.f32 %v1086_v38, %v1082_v24  ;;  %v1198_v28 = vunpack.c.h.bf16 %v1664_v60  ;;  %1821 = vpow2.f32 %v1314_v10  ;;  %v1190_v53 = vmul.f32 %v1189_v6, %v1188_v32 }
 0x103   :  { %v1176_v49 = vadd.f32 %v1175_v62, %v1171_v46  ;;  %v1199_v16 = vperm.slane %v2848_v5, 1  ;;  %v1106_v14 = vmul.f32 %v1105_v31, %v1104_v47  ;;  %v1203_v23 = vunpack.c.l.bf16 %v1666_v61 }
 0x104   :  { %v1092_v11 = vadd.f32 %v1091_v44, %v1087_v13  ;;  %1823 = vpow2.f32 %v1312_v20  ;;  %v1195_v43 = vmul.f32 %v1194_v54, %v1193_v0  ;;  %v1204_v12 = vperm.slane %v2848_v5, 2  ;;  %v1670_v44 = vld [vmem:[%s2987_s1 + $0x38] sm:$0xff]   ;;  %v1674_v13 = vld [vmem:[%s2987_s1 + $0x48] sm:$0xff]  }
 0x105   :  { %v1181_v63 = vadd.f32 %v1180_v27, %v1176_v49  ;;  %v1208_v37 = vunpack.c.h.bf16 %v1666_v61  ;;  %v1200_v59 = vmul.f32 %v1199_v16, %v1198_v28  ;;  %v1209_v17 = vperm.slane %v2848_v5, 3 }
 0x106   :  { %v1097_v33 = vadd.f32 %v1096_v30, %v1092_v11  ;;  %v2873_v50 = vpop.eup %1819  ;;  %v1213_v25 = vunpack.c.l.bf16 %v1668_v41  ;;  %v1205_v1 = vmul.f32 %v1204_v12, %v1203_v23  ;;  %v1214_v38 = vperm.slane %v2848_v5, 4  ;;  %v1676_v11 = vld [vmem:[%s2987_s1 + $0x50] sm:$0xff]  }
 0x107   :  { %v1186_v55 = vadd.f32 %v1185_v51, %v1181_v63  ;;  %v1218_v7 = vunpack.c.h.bf16 %v1668_v41  ;;  %v1210_v34 = vmul.f32 %v1209_v17, %v1208_v37  ;;  %v1219_v36 = vperm.slane %v2848_v5, 5 }
 0x108   :  { %v1102_v8 = vadd.f32 %v1101_v26, %v1097_v33  ;;  %v2876_v15 = vpop.eup %1821  ;;  %v1316_v9 = vadd.f32 %v2873_v50, %v2821_v57  ;;  %v2892_v30 = vmul.f32 %v2809_v4, %v2570_v18  ;;  %v1223_v39 = vunpack.c.l.bf16 %v1670_v44 }
 0x109   :  { %v1191_v45 = vadd.f32 %v1190_v53, %v1186_v55  ;;  %v1318_v29 = vsel %vm15_vm0, %v2876_v15, 0.0  ;;  %v1215_v21 = vmul.f32 %v1214_v38, %v1213_v25  ;;  %v1224_v62 = vperm.slane %v2848_v5, 6 }
 0x10a   :  { %v1107_v48 = vadd.f32 %v1106_v14, %v1102_v8  ;;  %v2882_v2 = vpop.eup %1823  ;;  %v1228_v42 = vunpack.c.h.bf16 %v1670_v44  ;;  %v1220_v32 = vmul.f32 %v1219_v36, %v1218_v7  ;;  %v1229_v18 = vperm.slane %v2848_v5, 7 }
 0x10b   :  { %v1196_v35 = vadd.f32 %v1195_v43, %v1191_v45  ;;  %v1317_v60 = vadd.f32 %v2882_v2, %v1316_v9  ;;  %v1233_v24 = vunpack.c.l.bf16 %v1672_v58  ;;  %v1234_v46 = vperm.slane %v2892_v30, 0  ;;  %v1678_v45 = vld [vmem:[%s2987_s1 + $0x58] sm:$0xff]  }
 0x10c   :  { %1652 = vst [vmem:[%s2988_s2 + $0x28] sm:$0xff] %v1107_v48  ;;  %v1225_v6 = vmul.f32 %v1224_v62, %v1223_v39  ;;  %v1238_v0 = vunpack.c.h.bf16 %v1672_v58  ;;  %v1239_v20 = vperm.slane %v2892_v30, 1  ;;  %v1230_v51 = vmul.f32 %v1229_v18, %v1228_v42 }
 0x10d   :  { %v1201_v56 = vadd.f32 %v1200_v59, %v1196_v35  ;;  %v1319_v10 = vadd.f32 %v1318_v29, %v1317_v60  ;;  %v1235_v61 = vmul.f32 %v1234_v46, %v1233_v24  ;;  %v1243_v5 = vunpack.c.l.bf16 %v1674_v13  ;;  %v1691_v24 = vld [vmem:[%s2987_s1 + $0x10] sm:$0xff]  }
 0x10e   :  { %v1244_v28 = vperm.slane %v2892_v30, 2  ;;  %v1240_v53 = vmul.f32 %v1239_v20, %v1238_v0  ;;  %v1248_v14 = vunpack.c.h.bf16 %v1674_v13  ;;  %v1249_v23 = vperm.slane %v2892_v30, 3 }
 0x10f   :  { %v1206_v19 = vadd.f32 %v1205_v1, %v1201_v56  ;;  %v1320_v31 = vrot.slane %v1319_v10, 4  ;;  %v1253_v55 = vunpack.c.l.bf16 %v1676_v11  ;;  %v1254_v43 = vperm.slane %v2892_v30, 4  ;;  %v1680_v56 = vld [vmem:[%s2987_s1 + $0x60] sm:$0xff]  }
 0x110   :  { %v1245_v41 = vmul.f32 %v1244_v28, %v1243_v5  ;;  %v1258_v8 = vunpack.c.h.bf16 %v1676_v11  ;;  %v1250_v17 = vmul.f32 %v1249_v23, %v1248_v14  ;;  %v1259_v25 = vperm.slane %v2892_v30, 5  ;;  %v1693_v11 = vld [vmem:[%s2987_s1 + $0x18] sm:$0xff]  }
 0x111   :  { %v1211_v47 = vadd.f32 %v1210_v34, %v1206_v19  ;;  %v1321_v54 = vadd.f32 %v1320_v31, %v1319_v10  ;;  %v1151_v35 = vmul.f32 %v2809_v4, %v2572_v52  ;;  %v1255_v1 = vmul.f32 %v1254_v43, %v1253_v55  ;;  %v1689_v52 = vld [vmem:[%s2987_s1 + $0x8] sm:$0xff]  }
 0x112   :  { %v1263_v44 = vunpack.c.l.bf16 %v1678_v45  ;;  %v1264_v7 = vperm.slane %v2892_v30, 6  ;;  %v1260_v36 = vmul.f32 %v1259_v25, %v1258_v8  ;;  %v1268_v9 = vunpack.c.h.bf16 %v1678_v45  ;;  %v1682_v4 = vld [vmem:[%s2987_s1 + $0x68] sm:$0xf] }
 0x113   :  { %v1216_v27 = vadd.f32 %v1215_v21, %v1211_v47  ;;  %v1322_v63 = vrot.slane %v1321_v54, 2  ;;  %v1269_v39 = vperm.slane %v2892_v30, 7  ;;  %v1273_v29 = vunpack.c.l.bf16 %v1680_v56 }
 0x114   :  { %v1274_v19 = vperm.slane %v1151_v35, 0  ;;  %v1265_v62 = vmul.f32 %v1264_v7, %v1263_v44  ;;  %v1278_v47 = vunpack.c.h.bf16 %v1680_v56  ;;  %v1342_v10 = vunpack.c.l.bf16 %v1689_v52 }
 0x115   :  { %v1221_v49 = vadd.f32 %v1220_v32, %v1216_v27  ;;  %v1323_v33 = vadd.f32 %v1322_v63, %v1321_v54  ;;  %v1270_v42 = vmul.f32 %v1269_v39, %v1268_v9  ;;  %v1279_v32 = vperm.slane %v1151_v35, 1 }
 0x116   :  { %v1275_v18 = vmul.f32 %v1274_v19, %v1273_v29  ;;  %v1283_v27 = vunpack.c.l.bf16 %v1682_v4  ;;  %v1347_v31 = vunpack.c.h.bf16 %v1689_v52  ;;  %v1357_v23 = vunpack.c.h.bf16 %v1691_v24  ;;  %v1699_v29 = vld [vmem:[%s2987_s1 + $0x30] sm:$0xff]  }
 0x117   :  { %v1226_v26 = vadd.f32 %v1225_v6, %v1221_v49  ;;  %v1324_v37 = vrot.slane %v1323_v33, 1  ;;  %v1284_v6 = vperm.slane %v1151_v35, 2  ;;  %v1280_v54 = vmul.f32 %v1279_v32, %v1278_v47  ;;  %v1701_v32 = vld [vmem:[%s2987_s1 + $0x38] sm:$0xff]  }
 0x118   :  { %v1362_v43 = vunpack.c.l.bf16 %v1693_v11 }
 0x119   :  { %v1231_v16 = vadd.f32 %v1230_v51, %v1226_v26  ;;  %v1325_v48 = vadd.f32 %v1324_v37, %v1323_v33  ;;  %v1695_v37 = vld [vmem:[%s2987_s1 + $0x20] sm:$0xff]  }
 0x11a   :  { %v1372_v35 = vunpack.c.l.bf16 %v1695_v37  ;;  %v1377_v7 = vunpack.c.h.bf16 %v1695_v37 }
 0x11b   :  { %v1236_v12 = vadd.f32 %v1235_v61, %v1231_v16  ;;  %1825 = vrcp.f32 %v1325_v48  ;;  %v1352_v61 = vunpack.c.l.bf16 %v1691_v24 }
 0x11d   :  { %v1241_v59 = vadd.f32 %v1240_v53, %v1236_v12  ;;  %v1285_v53 = vmul.f32 %v1284_v6, %v1283_v27 }
 0x11f   :  { %v1246_v38 = vadd.f32 %v1245_v41, %v1241_v59  ;;  %v1367_v59 = vunpack.c.h.bf16 %v1693_v11 }
 0x121   :  { %v1251_v34 = vadd.f32 %v1250_v17, %v1246_v38  ;;  %v2930_v58 = vpop.eup %1825 }
 0x122   :  { %v1327_v30 = vmul.f32 %v2930_v58, %v2821_v57  ;;  %v1329_v27 = vmul.f32 %v2930_v58, %v2882_v2 }
 0x123   :  { %v1256_v21 = vadd.f32 %v1255_v1, %v1251_v34  ;;  %v1697_v1 = vld [vmem:[%s2987_s1 + $0x28] sm:$0xff]  }
 0x124   :  { %v1333_v0 = vperm.slane %v1327_v30, 0  ;;  %v1338_v20 = vperm.slane %v1327_v30, 1  ;;  %v1343_v13 = vperm.slane %v1327_v30, 2  ;;  %v1348_v49 = vperm.slane %v1327_v30, 3 }
 0x125   :  { %v1261_v60 = vadd.f32 %v1260_v36, %v1256_v21  ;;  %v1353_v28 = vperm.slane %v1327_v30, 4  ;;  %v1358_v33 = vperm.slane %v1327_v30, 5  ;;  %v1368_v17 = vperm.slane %v1327_v30, 7 }
 0x126   :  { %v1334_v26 = vmul.f32 %v1741_v3, %v1333_v0  ;;  %v1339_v57 = vmul.f32 %v1742_v22, %v1338_v20  ;;  %v1344_v5 = vmul.f32 %v1343_v13, %v1342_v10  ;;  %v1349_v14 = vmul.f32 %v1348_v49, %v1347_v31  ;;  %v1703_v20 = vld [vmem:[%s2987_s1 + $0x40] sm:$0xff]  }
 0x127   :  { %v1266_v46 = vadd.f32 %v1265_v62, %v1261_v60  ;;  %v1328_v3 = vmul.f32 %v2930_v58, %v2873_v50  ;;  %v1354_v40 = vmul.f32 %v1353_v28, %v1352_v61  ;;  %v1363_v22 = vperm.slane %v1327_v30, 6  ;;  %v1705_v28 = vld [vmem:[%s2987_s1 + $0x48] sm:$0xff]  }
 0x128   :  { %v1340_v16 = vadd.f32 %v1339_v57, %v1334_v26  ;;  %v1359_v45 = vmul.f32 %v1358_v33, %v1357_v23  ;;  %v1369_v44 = vmul.f32 %v1368_v17, %v1367_v59  ;;  %v1382_v9 = vunpack.c.l.bf16 %v1697_v1 }
 0x129   :  { %v1271_v51 = vadd.f32 %v1270_v42, %v1266_v46  ;;  %v1364_v48 = vmul.f32 %v1363_v22, %v1362_v43  ;;  %v1373_v50 = vperm.slane %v1328_v3, 0  ;;  %v1378_v56 = vperm.slane %v1328_v3, 1 }
 0x12a   :  { %v1345_v12 = vadd.f32 %v1344_v5, %v1340_v16  ;;  %v1383_v39 = vperm.slane %v1328_v3, 2  ;;  %v1387_v62 = vunpack.c.h.bf16 %v1697_v1  ;;  %v1388_v52 = vperm.slane %v1328_v3, 3 }
 0x12b   :  { %v1276_v63 = vadd.f32 %v1275_v18, %v1271_v51  ;;  %v1374_v36 = vmul.f32 %v1373_v50, %v1372_v35  ;;  %v1379_v21 = vmul.f32 %v1378_v56, %v1377_v7  ;;  %v1392_v42 = vunpack.c.l.bf16 %v1699_v29  ;;  %v1711_v7 = vld [vmem:[%s2987_s1 + $0x60] sm:$0xff]  }
 0x12c   :  { %v1350_v8 = vadd.f32 %v1349_v14, %v1345_v12  ;;  %v1384_v60 = vmul.f32 %v1383_v39, %v1382_v9  ;;  %v1393_v47 = vperm.slane %v1328_v3, 4  ;;  %v1389_v30 = vmul.f32 %v1388_v52, %v1387_v62 }
 0x12d   :  { %v1281_v55 = vadd.f32 %v1280_v54, %v1276_v63  ;;  %v1397_v10 = vunpack.c.h.bf16 %v1699_v29  ;;  %v1398_v24 = vperm.slane %v1328_v3, 5  ;;  %v1402_v46 = vunpack.c.l.bf16 %v1701_v32 }
 0x12e   :  { %v1355_v25 = vadd.f32 %v1354_v40, %v1350_v8  ;;  %v1394_v31 = vmul.f32 %v1393_v47, %v1392_v42  ;;  %v1403_v0 = vperm.slane %v1328_v3, 6  ;;  %v1407_v51 = vunpack.c.h.bf16 %v1701_v32 }
 0x12f   :  { %v1286_v41 = vadd.f32 %v1285_v53, %v1281_v55  ;;  %v1399_v49 = vmul.f32 %v1398_v24, %v1397_v10  ;;  %v1408_v54 = vperm.slane %v1328_v3, 7  ;;  %v1412_v57 = vunpack.c.l.bf16 %v1703_v20  ;;  %v1707_v55 = vld [vmem:[%s2987_s1 + $0x50] sm:$0xff]  }
 0x130   :  { %v1360_v38 = vadd.f32 %v1359_v45, %v1355_v25  ;;  %v1404_v26 = vmul.f32 %v1403_v0, %v1402_v46  ;;  %v1413_v5 = vperm.slane %v1329_v27, 0  ;;  %v1417_v63 = vunpack.c.h.bf16 %v1703_v20  ;;  %v1709_v45 = vld [vmem:[%s2987_s1 + $0x58] sm:$0xff]  }
 0x131   :  { %1683 = vst [vmem:[%s2988_s2 + $0x30] sm:$0xff] %v1286_v41  ;;  %v1409_v11 = vmul.f32 %v1408_v54, %v1407_v51  ;;  %v1418_v53 = vperm.slane %v1329_v27, 1  ;;  %v1422_v23 = vunpack.c.l.bf16 %v1705_v28  ;;  %v1423_v33 = vperm.slane %v1329_v27, 2 }
 0x132   :  { %v1365_v34 = vadd.f32 %v1364_v48, %v1360_v38  ;;  %v1414_v14 = vmul.f32 %v1413_v5, %v1412_v57  ;;  %v1427_v12 = vunpack.c.h.bf16 %v1705_v28  ;;  %v1428_v40 = vperm.slane %v1329_v27, 3 }
 0x133   :  { %v1419_v3 = vmul.f32 %v1418_v53, %v1417_v63  ;;  %v1424_v41 = vmul.f32 %v1423_v33, %v1422_v23  ;;  %v1432_v37 = vunpack.c.l.bf16 %v1707_v55  ;;  %v1433_v8 = vperm.slane %v1329_v27, 4 }
 0x134   :  { %v1370_v19 = vadd.f32 %v1369_v44, %v1365_v34  ;;  %v1429_v17 = vmul.f32 %v1428_v40, %v1427_v12  ;;  %v1437_v25 = vunpack.c.h.bf16 %v1707_v55  ;;  %v1438_v48 = vperm.slane %v1329_v27, 5 }
 0x135   :  { %v1330_v35 = vmul.f32 %v2930_v58, %v2876_v15  ;;  %v1434_v1 = vmul.f32 %v1433_v8, %v1432_v37  ;;  %v1442_v38 = vunpack.c.l.bf16 %v1709_v45  ;;  %v1443_v44 = vperm.slane %v1329_v27, 6  ;;  %v1713_v15 = vld [vmem:[%s2987_s1 + $0x68] sm:$0xf] }
 0x136   :  { %v1375_v4 = vadd.f32 %v1374_v36, %v1370_v19  ;;  %v1439_v34 = vmul.f32 %v1438_v48, %v1437_v25  ;;  %v1447_v36 = vunpack.c.h.bf16 %v1709_v45  ;;  %v1448_v9 = vperm.slane %v1329_v27, 7 }
 0x137   :  { %v1444_v29 = vmul.f32 %v1443_v44, %v1442_v38  ;;  %v1452_v19 = vunpack.c.l.bf16 %v1711_v7  ;;  %v1457_v52 = vunpack.c.h.bf16 %v1711_v7  ;;  %v1462_v47 = vunpack.c.l.bf16 %v1713_v15 }
 0x138   :  { %v1380_v18 = vadd.f32 %v1379_v21, %v1375_v4  ;;  %v1453_v21 = vperm.slane %v1330_v35, 0  ;;  %v1449_v62 = vmul.f32 %v1448_v9, %v1447_v36  ;;  %v1458_v4 = vperm.slane %v1330_v35, 1 }
 0x139   :  { %v1463_v32 = vperm.slane %v1330_v35, 2 }
 0x13a   :  { %v1385_v6 = vadd.f32 %v1384_v60, %v1380_v18  ;;  %v1454_v42 = vmul.f32 %v1453_v21, %v1452_v19 }
 0x13b   :  { %v1464_v24 = vmul.f32 %v1463_v32, %v1462_v47 }
 0x13c   :  { %v1390_v13 = vadd.f32 %v1389_v30, %v1385_v6  ;;  %v1459_v30 = vmul.f32 %v1458_v4, %v1457_v52 }
 0x13e   :  { %v1395_v61 = vadd.f32 %v1394_v31, %v1390_v13 }
 0x140   :  { %v1400_v2 = vadd.f32 %v1399_v49, %v1395_v61 }
 0x142   :  { %v1405_v16 = vadd.f32 %v1404_v26, %v1400_v2 }
 0x144   :  { %v1410_v43 = vadd.f32 %v1409_v11, %v1405_v16 }
 0x146   :  { %v1415_v22 = vadd.f32 %v1414_v14, %v1410_v43 }
 0x148   :  { %v1420_v59 = vadd.f32 %v1419_v3, %v1415_v22 }
 0x14a   :  { %v1425_v50 = vadd.f32 %v1424_v41, %v1420_v59 }
 0x14c   :  { %v1430_v56 = vadd.f32 %v1429_v17, %v1425_v50 }
 0x14e   :  { %v1435_v39 = vadd.f32 %v1434_v1, %v1430_v56 }
 0x150   :  { %v1440_v58 = vadd.f32 %v1439_v34, %v1435_v39 }
 0x152   :  { %v1445_v60 = vadd.f32 %v1444_v29, %v1440_v58 }
 0x154   :  { %v1450_v18 = vadd.f32 %v1449_v62, %v1445_v60 }
 0x156   :  { %v1455_v10 = vadd.f32 %v1454_v42, %v1450_v18 }
 0x158   :  { %v1460_v46 = vadd.f32 %v1459_v30, %v1455_v10 }
 0x15a   :  { %v1465_v27 = vadd.f32 %v1464_v24, %v1460_v46 }
 0x15c   :  { %1714 = vst [vmem:[%s2988_s2 + $0x38] sm:$0xff] %v1465_v27 }

</bundles_post_ra>
